<compile_context>
chip_gen: v5e
topology: v5e:2x2
jax: 0.10.0
libtpu: 0.0.40
codegen_flags: <defaults>
</compile_context>

<pallas_src>
import numpy as np

import jax
import jax.numpy as jnp
from jax.experimental import pallas as pl
from jax.experimental.pallas import tpu as pltpu

# ---------------- model config (small, consistent with the module) ----------
V = 32            # shared src/trg vocab (weight sharing enabled)
PAD = 0
D_MODEL = 32      # = d_word_vec
D_INNER = 64
N_LAYERS = 2
N_HEAD = 2
D_K = 16
D_V = 16          # also the LSTM hidden size in the encoder janossy layer
B = 2
L = 8             # src len == trg len
N_POSITION = 16
EPS = 1e-6
NEG = -1.0e9
X_LOGIT_SCALE = D_MODEL ** -0.5   # trg_emb_prj_weight_sharing=True


# ---------------- in-kernel helpers ------------------------------------------
def _layernorm(x, g, b):
    mu = jnp.mean(x, axis=-1, keepdims=True)
    var = jnp.mean((x - mu) ** 2, axis=-1, keepdims=True)
    return (x - mu) * jax.lax.rsqrt(var + EPS) * g + b


def _softmax_lastdim(a):
    e = jnp.exp(a - jnp.max(a, axis=-1, keepdims=True))
    return e * pl.reciprocal(jnp.sum(e, axis=-1, keepdims=True), approx=True)


def _dot(a, b):
    # bf16 operands, f32 accumulation on the MXU
    return jnp.dot(a.astype(jnp.bfloat16), b.astype(jnp.bfloat16),
                   preferred_element_type=jnp.float32)


def _bmm(eq, a, b):
    # batched (over B) contraction, bf16 operands, f32 accumulation
    return jnp.einsum(eq, a.astype(jnp.bfloat16), b.astype(jnp.bfloat16),
                      preferred_element_type=jnp.float32)


def _mha_block(x_q, x_kv, bias, wq, wk, wv, wfc, g, b):
    """MultiHeadAttention: pre-LN on q only (matches the reference), k/v from
    the raw kv input, additive mask bias, residual add.  No per-head
    concatenate / transpose: each head's context is projected by its slice of
    fc and summed."""
    res = x_q                                              # (B*L, D)
    qn = _layernorm(x_q, g, b)
    qp = _dot(qn, wq).reshape(B, L, N_HEAD * D_K)
    kp = _dot(x_kv, wk).reshape(B, L, N_HEAD * D_K)
    vp = _dot(x_kv, wv).reshape(B, L, N_HEAD * D_V)
    scale = 1.0 / (D_K ** 0.5)
    out = res
    for h in range(N_HEAD):
        qh = qp[:, :, h * D_K:(h + 1) * D_K] * scale       # (B, L, dk)
        kh = kp[:, :, h * D_K:(h + 1) * D_K]
        vh = vp[:, :, h * D_V:(h + 1) * D_V]
        s = _bmm('bqd,bkd->bqk', qh, kh) + bias            # (B, L, L)
        a = _softmax_lastdim(s)
        ctx = _bmm('bqk,bkd->bqd', a, vh)                  # (B, L, dv)
        out = out + _dot(ctx.reshape(B * L, D_V),
                         wfc[h * D_V:(h + 1) * D_V, :])
    return out


def _ffn_block(x, g, b, w1, b1, w2, b2):
    res = x
    xn = _layernorm(x, g, b)
    hid = jnp.maximum(_dot(xn, w1) + b1, 0.0)
    return _dot(hid, w2) + b2 + res


def _janossy_block(x, row_mask, g, b, wih, whh, wfc, xw_scratch):
    """janossyLastOnlyLSTM: for output position i the LSTM consumes the
    permutation that ends at element i; all B*L instances run in lockstep on
    the sublane axis and we keep each instance's last hidden state.
    The input projection is hoisted out of the recurrence; per-step permuted
    inputs are contiguous 8-row windows of a doubled VMEM scratch buffer."""
    # TODO(synk): the reference picks a fresh np.random.shuffle per position
    # (only guaranteeing position i is last); we use the deterministic cyclic
    # permutation [i+1, ..., L-1, 0, ..., i] instead.
    H = D_V
    res = x
    xn = _layernorm(x, g, b)
    seq = xn * row_mask                                    # zero padded rows
    xw = _dot(seq, wih).reshape(B, L, 4 * H)               # hoisted x @ W_ih
    xw_scratch[:, 0:L, :] = xw                             # doubled copy so every
    xw_scratch[:, L:2 * L, :] = xw                         # rotation is one window
    h = jnp.zeros((B * L, H), jnp.float32)
    c = jnp.zeros((B * L, H), jnp.float32)
    for t in range(L):
        # instance i reads element (i + t + 1) mod L at step t
        x_t = xw_scratch[:, t + 1:t + 1 + L, :].reshape(B * L, 4 * H)
        gates = x_t + _dot(h, whh)
        i_g = jax.nn.sigmoid(gates[:, 0 * H:1 * H])
        f_g = jax.nn.sigmoid(gates[:, 1 * H:2 * H])
        g_g = jnp.tanh(gates[:, 2 * H:3 * H])
        o_g = jax.nn.sigmoid(gates[:, 3 * H:4 * H])
        c = f_g * c + i_g * g_g
        h = o_g * jnp.tanh(c)
    return _dot(h, wfc) + res


# ---------------- the single fused kernel ------------------------------------
def fused_transformer_kernel(
        # activations / masks
        enc_in_ref, dec_in_ref, row_mask_ref, trg_bias_ref, src_bias_ref,
        # encoder layer weights (stacked over N_LAYERS)
        e_ln1_g, e_ln1_b, e_wih, e_whh, e_wfc,
        e_ln2_g, e_ln2_b, e_w1, e_b1, e_w2, e_b2,
        # decoder layer weights (stacked over N_LAYERS)
        d_sg, d_sb, d_swq, d_swk, d_swv, d_swfc,
        d_eg, d_eb, d_ewq, d_ewk, d_ewv, d_ewfc,
        d_fg, d_fb, d_w1, d_b1, d_w2, d_b2,
        # final layer norms + shared projection
        enc_ln_g, enc_ln_b, dec_ln_g, dec_ln_b, proj_w,
        # output / scratch
        out_ref, xw_scratch):
    row_mask = row_mask_ref[...]
    trg_bias = trg_bias_ref[...]
    src_bias = src_bias_ref[...]

    # ----- encoder -----
    enc = enc_in_ref[...]
    for l in range(N_LAYERS):
        enc = _janossy_block(enc, row_mask,
                             e_ln1_g[l], e_ln1_b[l],
                             e_wih[l], e_whh[l], e_wfc[l], xw_scratch)
        enc = _ffn_block(enc, e_ln2_g[l], e_ln2_b[l],
                         e_w1[l], e_b1[l], e_w2[l], e_b2[l])
    enc = _layernorm(enc, enc_ln_g[...], enc_ln_b[...])

    # ----- decoder -----
    dec = dec_in_ref[...]
    for l in range(N_LAYERS):
        dec = _mha_block(dec, dec, trg_bias,
                         d_swq[l], d_swk[l], d_swv[l], d_swfc[l],
                         d_sg[l], d_sb[l])
        dec = _mha_block(dec, enc, src_bias,
                         d_ewq[l], d_ewk[l], d_ewv[l], d_ewfc[l],
                         d_eg[l], d_eb[l])
        dec = _ffn_block(dec, d_fg[l], d_fb[l],
                         d_w1[l], d_b1[l], d_w2[l], d_b2[l])
    dec = _layernorm(dec, dec_ln_g[...], dec_ln_b[...])

    # shared-weight output projection (trg_word_prj * x_logit_scale)
    out_ref[...] = _dot(dec, proj_w[...]) * X_LOGIT_SCALE


# ---------------- wrapper ------------------------------------------------------
_PARAM_ORDER = (
    "e_ln1_g", "e_ln1_b", "e_wih", "e_whh", "e_wfc",
    "e_ln2_g", "e_ln2_b", "e_w1", "e_b1", "e_w2", "e_b2",
    "d_sg", "d_sb", "d_swq", "d_swk", "d_swv", "d_swfc",
    "d_eg", "d_eb", "d_ewq", "d_ewk", "d_ewv", "d_ewfc",
    "d_fg", "d_fb", "d_w1", "d_b1", "d_w2", "d_b2",
    "enc_ln_g", "enc_ln_b", "dec_ln_g", "dec_ln_b",
)


def _fs(shape):
    nd = len(shape)
    return pl.BlockSpec(shape, lambda i, _nd=nd: (0,) * _nd)


def transformer_forward(params, src_seq, trg_seq, pos_table):
    emb = params["emb"]

    # embedding + positional encoding (tiny XLA gather outside the kernel)
    enc_in = (emb[src_seq] + pos_table[None, :L]).reshape(B * L, D_MODEL)
    dec_in = (emb[trg_seq] + pos_table[None, :L]).reshape(B * L, D_MODEL)

    # masks as additive biases (get_pad_mask / get_subsequent_mask semantics)
    src_pad = src_seq != PAD
    trg_pad = trg_seq != PAD
    causal = jnp.tril(jnp.ones((L, L), jnp.float32)) > 0
    src_bias = jnp.where(jnp.broadcast_to(src_pad[:, None, :], (B, L, L)),
                         0.0, NEG).astype(jnp.float32)
    trg_bias = jnp.where(trg_pad[:, None, :] & causal[None],
                         0.0, NEG).astype(jnp.float32)
    row_mask = src_pad.astype(jnp.float32).reshape(B * L, 1)

    operands = [enc_in, dec_in, row_mask, trg_bias, src_bias]
    operands += [params[k] for k in _PARAM_ORDER]
    operands.append(emb.T)                               # shared projection weight

    return pl.pallas_call(
        fused_transformer_kernel,
        out_shape=jax.ShapeDtypeStruct((B * L, V), jnp.float32),
        grid=(1,),
        in_specs=[_fs(op.shape) for op in operands],
        out_specs=_fs((B * L, V)),
        scratch_shapes=[pltpu.VMEM((B, 2 * L, 4 * D_V), jnp.float32)],
        compiler_params=pltpu.CompilerParams(
            dimension_semantics=("arbitrary",)),
    )(*operands)


# ---------------- parameter construction (deterministic) ---------------------
def xavier(key, shape):
    bound = (6.0 / (shape[-2] + shape[-1])) ** 0.5
    return jax.random.uniform(key, shape, jnp.float32, -bound, bound)


def make_params(key):
    keys = iter(jax.random.split(key, 64))

    def xa(shape):
        return xavier(next(keys), shape)

    def stack(shape):
        return jnp.stack([xa(shape) for _ in range(N_LAYERS)])

    ln_g = jnp.ones((N_LAYERS, 1, D_MODEL), jnp.float32)
    ln_b = jnp.zeros((N_LAYERS, 1, D_MODEL), jnp.float32)

    emb = xa((V, D_MODEL)).at[PAD].set(0.0)              # padding_idx row

    return {
        "emb": emb,
        # encoder layers (janossy LSTM + FFN)  -- PyTorch weights transposed
        "e_ln1_g": ln_g, "e_ln1_b": ln_b,
        "e_wih": stack((D_MODEL, 4 * D_V)),              # W_ih^T
        "e_whh": stack((D_V, 4 * D_V)),                  # W_hh^T
        "e_wfc": stack((D_V, D_MODEL)),                  # fc^T
        "e_ln2_g": ln_g, "e_ln2_b": ln_b,
        "e_w1": stack((D_MODEL, D_INNER)),
        "e_b1": jnp.zeros((N_LAYERS, 1, D_INNER), jnp.float32),
        "e_w2": stack((D_INNER, D_MODEL)),
        "e_b2": jnp.zeros((N_LAYERS, 1, D_MODEL), jnp.float32),
        # decoder layers (self-attn, enc-dec attn, FFN)
        "d_sg": ln_g, "d_sb": ln_b,
        "d_swq": stack((D_MODEL, N_HEAD * D_K)),
        "d_swk": stack((D_MODEL, N_HEAD * D_K)),
        "d_swv": stack((D_MODEL, N_HEAD * D_V)),
        "d_swfc": stack((N_HEAD * D_V, D_MODEL)),
        "d_eg": ln_g, "d_eb": ln_b,
        "d_ewq": stack((D_MODEL, N_HEAD * D_K)),
        "d_ewk": stack((D_MODEL, N_HEAD * D_K)),
        "d_ewv": stack((D_MODEL, N_HEAD * D_V)),
        "d_ewfc": stack((N_HEAD * D_V, D_MODEL)),
        "d_fg": ln_g, "d_fb": ln_b,
        "d_w1": stack((D_MODEL, D_INNER)),
        "d_b1": jnp.zeros((N_LAYERS, 1, D_INNER), jnp.float32),
        "d_w2": stack((D_INNER, D_MODEL)),
        "d_b2": jnp.zeros((N_LAYERS, 1, D_MODEL), jnp.float32),
        # final layer norms
        "enc_ln_g": jnp.ones((1, D_MODEL), jnp.float32),
        "enc_ln_b": jnp.zeros((1, D_MODEL), jnp.float32),
        "dec_ln_g": jnp.ones((1, D_MODEL), jnp.float32),
        "dec_ln_b": jnp.zeros((1, D_MODEL), jnp.float32),
    }


def sinusoid_table(n_position, d_hid):
    pos = np.arange(n_position)[:, None].astype(np.float64)
    i = np.arange(d_hid)[None, :]
    angle = pos / np.power(10000, 2 * (i // 2) / d_hid)
    tab = np.zeros((n_position, d_hid))
    tab[:, 0::2] = np.sin(angle[:, 0::2])
    tab[:, 1::2] = np.cos(angle[:, 1::2])
    return jnp.asarray(tab, jnp.float32)


# ---------------- main --------------------------------------------------------
if __name__ == "__main__":
    key = jax.random.PRNGKey(0)
    k_param, k_src, k_trg = jax.random.split(key, 3)

    params = make_params(k_param)
    pos_table = sinusoid_table(N_POSITION, D_MODEL)

    src_seq = jax.random.randint(k_src, (B, L), 1, V, dtype=jnp.int32)
    trg_seq = jax.random.randint(k_trg, (B, L), 1, V, dtype=jnp.int32)
    # padding at the tails to exercise the masks
    src_seq = src_seq.at[:, 6:].set(PAD)
    trg_seq = trg_seq.at[:, 7:].set(PAD)

    fwd = jax.jit(transformer_forward)
    logits = fwd(params, src_seq, trg_seq, pos_table)
    jax.block_until_ready(logits)

    assert logits.shape == (B * L, V), logits.shape
    assert bool(jnp.all(jnp.isfinite(logits)))
    print("KERNEL_OK")
</pallas_src>

<mosaic_0001>
module attributes {stable_mosaic.version = 11 : i64} {
  func.func @fused_transformer_kernel(%arg0: i32, %arg1: memref<16x32xf32, #tpu.memory_space<vmem>>, %arg2: memref<16x32xf32, #tpu.memory_space<vmem>>, %arg3: memref<16x1xf32, #tpu.memory_space<vmem>>, %arg4: memref<2x8x8xf32, #tpu.memory_space<vmem>>, %arg5: memref<2x8x8xf32, #tpu.memory_space<vmem>>, %arg6: memref<2x1x32xf32, #tpu.memory_space<vmem>>, %arg7: memref<2x1x32xf32, #tpu.memory_space<vmem>>, %arg8: memref<2x32x64xf32, #tpu.memory_space<vmem>>, %arg9: memref<2x16x64xf32, #tpu.memory_space<vmem>>, %arg10: memref<2x16x32xf32, #tpu.memory_space<vmem>>, %arg11: memref<2x1x32xf32, #tpu.memory_space<vmem>>, %arg12: memref<2x1x32xf32, #tpu.memory_space<vmem>>, %arg13: memref<2x32x64xf32, #tpu.memory_space<vmem>>, %arg14: memref<2x1x64xf32, #tpu.memory_space<vmem>>, %arg15: memref<2x64x32xf32, #tpu.memory_space<vmem>>, %arg16: memref<2x1x32xf32, #tpu.memory_space<vmem>>, %arg17: memref<2x1x32xf32, #tpu.memory_space<vmem>>, %arg18: memref<2x1x32xf32, #tpu.memory_space<vmem>>, %arg19: memref<2x32x32xf32, #tpu.memory_space<vmem>>, %arg20: memref<2x32x32xf32, #tpu.memory_space<vmem>>, %arg21: memref<2x32x32xf32, #tpu.memory_space<vmem>>, %arg22: memref<2x32x32xf32, #tpu.memory_space<vmem>>, %arg23: memref<2x1x32xf32, #tpu.memory_space<vmem>>, %arg24: memref<2x1x32xf32, #tpu.memory_space<vmem>>, %arg25: memref<2x32x32xf32, #tpu.memory_space<vmem>>, %arg26: memref<2x32x32xf32, #tpu.memory_space<vmem>>, %arg27: memref<2x32x32xf32, #tpu.memory_space<vmem>>, %arg28: memref<2x32x32xf32, #tpu.memory_space<vmem>>, %arg29: memref<2x1x32xf32, #tpu.memory_space<vmem>>, %arg30: memref<2x1x32xf32, #tpu.memory_space<vmem>>, %arg31: memref<2x32x64xf32, #tpu.memory_space<vmem>>, %arg32: memref<2x1x64xf32, #tpu.memory_space<vmem>>, %arg33: memref<2x64x32xf32, #tpu.memory_space<vmem>>, %arg34: memref<2x1x32xf32, #tpu.memory_space<vmem>>, %arg35: memref<1x32xf32, #tpu.memory_space<vmem>>, %arg36: memref<1x32xf32, #tpu.memory_space<vmem>>, %arg37: memref<1x32xf32, #tpu.memory_space<vmem>>, %arg38: memref<1x32xf32, #tpu.memory_space<vmem>>, %arg39: memref<32x32xf32, #tpu.memory_space<vmem>>, %arg40: memref<16x32xf32, #tpu.memory_space<vmem>>, %arg41: memref<2x16x64xf32, #tpu.memory_space<vmem>>) attributes {dimension_semantics = [#tpu.dimension_semantics<arbitrary>], iteration_bounds = array<i64: 1>, scalar_prefetch = 0 : i64, scratch_operands = 1 : i64, tpu.core_type = #tpu.core_type<tc>, window_params = [{pipeline_mode = #tpu.pipeline_mode<synchronous>, transform_indices = @transform_0, window_bounds = array<i64: 16, 32>}, {pipeline_mode = #tpu.pipeline_mode<synchronous>, transform_indices = @transform_1, window_bounds = array<i64: 16, 32>}, {pipeline_mode = #tpu.pipeline_mode<synchronous>, transform_indices = @transform_2, window_bounds = array<i64: 16, 1>}, {pipeline_mode = #tpu.pipeline_mode<synchronous>, transform_indices = @transform_3, window_bounds = array<i64: 2, 8, 8>}, {pipeline_mode = #tpu.pipeline_mode<synchronous>, transform_indices = @transform_4, window_bounds = array<i64: 2, 8, 8>}, {pipeline_mode = #tpu.pipeline_mode<synchronous>, transform_indices = @transform_5, window_bounds = array<i64: 2, 1, 32>}, {pipeline_mode = #tpu.pipeline_mode<synchronous>, transform_indices = @transform_6, window_bounds = array<i64: 2, 1, 32>}, {pipeline_mode = #tpu.pipeline_mode<synchronous>, transform_indices = @transform_7, window_bounds = array<i64: 2, 32, 64>}, {pipeline_mode = #tpu.pipeline_mode<synchronous>, transform_indices = @transform_8, window_bounds = array<i64: 2, 16, 64>}, {pipeline_mode = #tpu.pipeline_mode<synchronous>, transform_indices = @transform_9, window_bounds = array<i64: 2, 16, 32>}, {pipeline_mode = #tpu.pipeline_mode<synchronous>, transform_indices = @transform_10, window_bounds = array<i64: 2, 1, 32>}, {pipeline_mode = #tpu.pipeline_mode<synchronous>, transform_indices = @transform_11, window_bounds = array<i64: 2, 1, 32>}, {pipeline_mode = #tpu.pipeline_mode<synchronous>, transform_indices = @transform_12, window_bounds = array<i64: 2, 32, 64>}, {pipeline_mode = #tpu.pipeline_mode<synchronous>, transform_indices = @transform_13, window_bounds = array<i64: 2, 1, 64>}, {pipeline_mode = #tpu.pipeline_mode<synchronous>, transform_indices = @transform_14, window_bounds = array<i64: 2, 64, 32>}, {pipeline_mode = #tpu.pipeline_mode<synchronous>, transform_indices = @transform_15, window_bounds = array<i64: 2, 1, 32>}, {pipeline_mode = #tpu.pipeline_mode<synchronous>, transform_indices = @transform_16, window_bounds = array<i64: 2, 1, 32>}, {pipeline_mode = #tpu.pipeline_mode<synchronous>, transform_indices = @transform_17, window_bounds = array<i64: 2, 1, 32>}, {pipeline_mode = #tpu.pipeline_mode<synchronous>, transform_indices = @transform_18, window_bounds = array<i64: 2, 32, 32>}, {pipeline_mode = #tpu.pipeline_mode<synchronous>, transform_indices = @transform_19, window_bounds = array<i64: 2, 32, 32>}, {pipeline_mode = #tpu.pipeline_mode<synchronous>, transform_indices = @transform_20, window_bounds = array<i64: 2, 32, 32>}, {pipeline_mode = #tpu.pipeline_mode<synchronous>, transform_indices = @transform_21, window_bounds = array<i64: 2, 32, 32>}, {pipeline_mode = #tpu.pipeline_mode<synchronous>, transform_indices = @transform_22, window_bounds = array<i64: 2, 1, 32>}, {pipeline_mode = #tpu.pipeline_mode<synchronous>, transform_indices = @transform_23, window_bounds = array<i64: 2, 1, 32>}, {pipeline_mode = #tpu.pipeline_mode<synchronous>, transform_indices = @transform_24, window_bounds = array<i64: 2, 32, 32>}, {pipeline_mode = #tpu.pipeline_mode<synchronous>, transform_indices = @transform_25, window_bounds = array<i64: 2, 32, 32>}, {pipeline_mode = #tpu.pipeline_mode<synchronous>, transform_indices = @transform_26, window_bounds = array<i64: 2, 32, 32>}, {pipeline_mode = #tpu.pipeline_mode<synchronous>, transform_indices = @transform_27, window_bounds = array<i64: 2, 32, 32>}, {pipeline_mode = #tpu.pipeline_mode<synchronous>, transform_indices = @transform_28, window_bounds = array<i64: 2, 1, 32>}, {pipeline_mode = #tpu.pipeline_mode<synchronous>, transform_indices = @transform_29, window_bounds = array<i64: 2, 1, 32>}, {pipeline_mode = #tpu.pipeline_mode<synchronous>, transform_indices = @transform_30, window_bounds = array<i64: 2, 32, 64>}, {pipeline_mode = #tpu.pipeline_mode<synchronous>, transform_indices = @transform_31, window_bounds = array<i64: 2, 1, 64>}, {pipeline_mode = #tpu.pipeline_mode<synchronous>, transform_indices = @transform_32, window_bounds = array<i64: 2, 64, 32>}, {pipeline_mode = #tpu.pipeline_mode<synchronous>, transform_indices = @transform_33, window_bounds = array<i64: 2, 1, 32>}, {pipeline_mode = #tpu.pipeline_mode<synchronous>, transform_indices = @transform_34, window_bounds = array<i64: 1, 32>}, {pipeline_mode = #tpu.pipeline_mode<synchronous>, transform_indices = @transform_35, window_bounds = array<i64: 1, 32>}, {pipeline_mode = #tpu.pipeline_mode<synchronous>, transform_indices = @transform_36, window_bounds = array<i64: 1, 32>}, {pipeline_mode = #tpu.pipeline_mode<synchronous>, transform_indices = @transform_37, window_bounds = array<i64: 1, 32>}, {pipeline_mode = #tpu.pipeline_mode<synchronous>, transform_indices = @transform_38, window_bounds = array<i64: 32, 32>}, {pipeline_mode = #tpu.pipeline_mode<synchronous>, transform_indices = @transform_39, window_bounds = array<i64: 16, 32>}]} {
    %c0 = arith.constant 0 : index
    %c0_0 = arith.constant 0 : index
    %0 = vector.load %arg3[%c0, %c0_0] : memref<16x1xf32, #tpu.memory_space<vmem>>, vector<16x1xf32>
    %c0_1 = arith.constant 0 : index
    %c0_2 = arith.constant 0 : index
    %c0_3 = arith.constant 0 : index
    %1 = vector.load %arg4[%c0_1, %c0_2, %c0_3] : memref<2x8x8xf32, #tpu.memory_space<vmem>>, vector<2x8x8xf32>
    %c0_4 = arith.constant 0 : index
    %c0_5 = arith.constant 0 : index
    %c0_6 = arith.constant 0 : index
    %2 = vector.load %arg5[%c0_4, %c0_5, %c0_6] : memref<2x8x8xf32, #tpu.memory_space<vmem>>, vector<2x8x8xf32>
    %c0_7 = arith.constant 0 : index
    %c0_8 = arith.constant 0 : index
    %3 = vector.load %arg1[%c0_7, %c0_8] : memref<16x32xf32, #tpu.memory_space<vmem>>, vector<16x32xf32>
    %c0_9 = arith.constant 0 : index
    %c0_10 = arith.constant 0 : index
    %c0_11 = arith.constant 0 : index
    %4 = vector.load %arg6[%c0_9, %c0_10, %c0_11] : memref<2x1x32xf32, #tpu.memory_space<vmem>>, vector<1x1x32xf32>
    %5 = vector.shape_cast %4 : vector<1x1x32xf32> to vector<1x32xf32>
    %c0_12 = arith.constant 0 : index
    %c0_13 = arith.constant 0 : index
    %c0_14 = arith.constant 0 : index
    %6 = vector.load %arg7[%c0_12, %c0_13, %c0_14] : memref<2x1x32xf32, #tpu.memory_space<vmem>>, vector<1x1x32xf32>
    %7 = vector.shape_cast %6 : vector<1x1x32xf32> to vector<1x32xf32>
    %c0_15 = arith.constant 0 : index
    %c0_16 = arith.constant 0 : index
    %c0_17 = arith.constant 0 : index
    %8 = vector.load %arg8[%c0_15, %c0_16, %c0_17] : memref<2x32x64xf32, #tpu.memory_space<vmem>>, vector<1x32x64xf32>
    %9 = vector.shape_cast %8 : vector<1x32x64xf32> to vector<32x64xf32>
    %c0_18 = arith.constant 0 : index
    %c0_19 = arith.constant 0 : index
    %c0_20 = arith.constant 0 : index
    %10 = vector.load %arg9[%c0_18, %c0_19, %c0_20] : memref<2x16x64xf32, #tpu.memory_space<vmem>>, vector<1x16x64xf32>
    %11 = vector.shape_cast %10 : vector<1x16x64xf32> to vector<16x64xf32>
    %c0_21 = arith.constant 0 : index
    %c0_22 = arith.constant 0 : index
    %c0_23 = arith.constant 0 : index
    %12 = vector.load %arg10[%c0_21, %c0_22, %c0_23] : memref<2x16x32xf32, #tpu.memory_space<vmem>>, vector<1x16x32xf32>
    %13 = vector.shape_cast %12 : vector<1x16x32xf32> to vector<16x32xf32>
    %cst = arith.constant dense<0.000000e+00> : vector<16xf32>
    %14 = vector.multi_reduction <add>, %3, %cst [1] : vector<16x32xf32> to vector<16xf32>
    %15 = vector.shape_cast %14 : vector<16xf32> to vector<16x1xf32>
    %cst_24 = arith.constant 3.200000e+01 : f32
    %16 = vector.broadcast %cst_24 : f32 to vector<16x1xf32>
    %17 = arith.divf %15, %16 : vector<16x1xf32>
    %18 = vector.broadcast %17 : vector<16x1xf32> to vector<16x32xf32>
    %19 = arith.subf %3, %18 : vector<16x32xf32>
    %20 = arith.mulf %19, %19 : vector<16x32xf32>
    %cst_25 = arith.constant dense<0.000000e+00> : vector<16xf32>
    %21 = vector.multi_reduction <add>, %20, %cst_25 [1] : vector<16x32xf32> to vector<16xf32>
    %22 = vector.shape_cast %21 : vector<16xf32> to vector<16x1xf32>
    %cst_26 = arith.constant 3.200000e+01 : f32
    %23 = vector.broadcast %cst_26 : f32 to vector<16x1xf32>
    %24 = arith.divf %22, %23 : vector<16x1xf32>
    %25 = vector.broadcast %17 : vector<16x1xf32> to vector<16x32xf32>
    %26 = arith.subf %3, %25 : vector<16x32xf32>
    %cst_27 = arith.constant 9.99999997E-7 : f32
    %27 = vector.broadcast %cst_27 : f32 to vector<16x1xf32>
    %28 = arith.addf %24, %27 : vector<16x1xf32>
    %29 = math.rsqrt %28 : vector<16x1xf32>
    %30 = vector.broadcast %29 : vector<16x1xf32> to vector<16x32xf32>
    %31 = arith.mulf %26, %30 : vector<16x32xf32>
    %32 = vector.broadcast %5 : vector<1x32xf32> to vector<16x32xf32>
    %33 = arith.mulf %31, %32 : vector<16x32xf32>
    %34 = vector.broadcast %7 : vector<1x32xf32> to vector<16x32xf32>
    %35 = arith.addf %33, %34 : vector<16x32xf32>
    %36 = vector.broadcast %0 : vector<16x1xf32> to vector<16x32xf32>
    %37 = arith.mulf %35, %36 : vector<16x32xf32>
    %38 = arith.truncf %37 : vector<16x32xf32> to vector<16x32xbf16>
    %39 = arith.truncf %9 : vector<32x64xf32> to vector<32x64xbf16>
    %cst_28 = arith.constant dense<0.000000e+00> : vector<16x64xf32>
    %40 = tpu.matmul %38, %39, %cst_28 {dimension_numbers = #tpu.dot_dimension_numbers<[1], [0], [0], [1], [0, 0, 1, 1], [], []>} : vector<16x32xbf16>, vector<32x64xbf16>, vector<16x64xf32> -> vector<16x64xf32>
    %41 = vector.shape_cast %40 : vector<16x64xf32> to vector<2x8x64xf32>
    %c0_29 = arith.constant 0 : index
    %c0_30 = arith.constant 0 : index
    %c0_31 = arith.constant 0 : index
    %42 = vector.load %arg41[%c0_29, %c0_30, %c0_31] : memref<2x16x64xf32, #tpu.memory_space<vmem>>, vector<2x8x64xf32>
    tpu.vector_store %arg41[%c0_29, %c0_30, %c0_31], %41 {strides = array<i32>} : memref<2x16x64xf32, #tpu.memory_space<vmem>>, vector<2x8x64xf32>,
    %c0_32 = arith.constant 0 : index
    %c8 = arith.constant 8 : index
    %c0_33 = arith.constant 0 : index
    %43 = vector.load %arg41[%c0_32, %c8, %c0_33] : memref<2x16x64xf32, #tpu.memory_space<vmem>>, vector<2x8x64xf32>
    tpu.vector_store %arg41[%c0_32, %c8, %c0_33], %41 {strides = array<i32>} : memref<2x16x64xf32, #tpu.memory_space<vmem>>, vector<2x8x64xf32>,
    %cst_34 = arith.constant 0.000000e+00 : f32
    %44 = vector.broadcast %cst_34 : f32 to vector<16x16xf32>
    %cst_35 = arith.constant 0.000000e+00 : f32
    %45 = vector.broadcast %cst_35 : f32 to vector<16x16xf32>
    %c0_36 = arith.constant 0 : index
    %c1 = arith.constant 1 : index
    %c0_37 = arith.constant 0 : index
    %46 = vector.load %arg41[%c0_36, %c1, %c0_37] : memref<2x16x64xf32, #tpu.memory_space<vmem>>, vector<2x8x64xf32>
    %47 = vector.shape_cast %46 : vector<2x8x64xf32> to vector<16x64xf32>
    %48 = arith.truncf %44 : vector<16x16xf32> to vector<16x16xbf16>
    %49 = arith.truncf %11 : vector<16x64xf32> to vector<16x64xbf16>
    %cst_38 = arith.constant dense<0.000000e+00> : vector<16x64xf32>
    %50 = tpu.matmul %48, %49, %cst_38 {dimension_numbers = #tpu.dot_dimension_numbers<[1], [0], [0], [1], [0, 0, 1, 1], [], []>} : vector<16x16xbf16>, vector<16x64xbf16>, vector<16x64xf32> -> vector<16x64xf32>
    %51 = arith.addf %47, %50 : vector<16x64xf32>
    %52 = vector.extract_strided_slice %51 {offsets = [0, 0], sizes = [16, 16], strides = [1, 1]} : vector<16x64xf32> to vector<16x16xf32>
    %53 = arith.negf %52 : vector<16x16xf32>
    %54 = math.exp %53 : vector<16x16xf32>
    %cst_39 = arith.constant 1.000000e+00 : f32
    %55 = vector.broadcast %cst_39 : f32 to vector<16x16xf32>
    %56 = arith.addf %55, %54 : vector<16x16xf32>
    %57 = arith.divf %55, %56 : vector<16x16xf32>
    %58 = vector.extract_strided_slice %51 {offsets = [0, 16], sizes = [16, 16], strides = [1, 1]} : vector<16x64xf32> to vector<16x16xf32>
    %59 = arith.negf %58 : vector<16x16xf32>
    %60 = math.exp %59 : vector<16x16xf32>
    %cst_40 = arith.constant 1.000000e+00 : f32
    %61 = vector.broadcast %cst_40 : f32 to vector<16x16xf32>
    %62 = arith.addf %61, %60 : vector<16x16xf32>
    %63 = arith.divf %61, %62 : vector<16x16xf32>
    %64 = vector.extract_strided_slice %51 {offsets = [0, 32], sizes = [16, 16], strides = [1, 1]} : vector<16x64xf32> to vector<16x16xf32>
    %65 = math.tanh %64 : vector<16x16xf32>
    %66 = vector.extract_strided_slice %51 {offsets = [0, 48], sizes = [16, 16], strides = [1, 1]} : vector<16x64xf32> to vector<16x16xf32>
    %67 = arith.negf %66 : vector<16x16xf32>
    %68 = math.exp %67 : vector<16x16xf32>
    %cst_41 = arith.constant 1.000000e+00 : f32
    %69 = vector.broadcast %cst_41 : f32 to vector<16x16xf32>
    %70 = arith.addf %69, %68 : vector<16x16xf32>
    %71 = arith.divf %69, %70 : vector<16x16xf32>
    %72 = arith.mulf %63, %45 : vector<16x16xf32>
    %73 = arith.mulf %57, %65 : vector<16x16xf32>
    %74 = arith.addf %72, %73 : vector<16x16xf32>
    %75 = math.tanh %74 : vector<16x16xf32>
    %76 = arith.mulf %71, %75 : vector<16x16xf32>
    %c0_42 = arith.constant 0 : index
    %c2 = arith.constant 2 : index
    %c0_43 = arith.constant 0 : index
    %77 = vector.load %arg41[%c0_42, %c2, %c0_43] : memref<2x16x64xf32, #tpu.memory_space<vmem>>, vector<2x8x64xf32>
    %78 = vector.shape_cast %77 : vector<2x8x64xf32> to vector<16x64xf32>
    %79 = arith.truncf %76 : vector<16x16xf32> to vector<16x16xbf16>
    %80 = arith.truncf %11 : vector<16x64xf32> to vector<16x64xbf16>
    %cst_44 = arith.constant dense<0.000000e+00> : vector<16x64xf32>
    %81 = tpu.matmul %79, %80, %cst_44 {dimension_numbers = #tpu.dot_dimension_numbers<[1], [0], [0], [1], [0, 0, 1, 1], [], []>} : vector<16x16xbf16>, vector<16x64xbf16>, vector<16x64xf32> -> vector<16x64xf32>
    %82 = arith.addf %78, %81 : vector<16x64xf32>
    %83 = vector.extract_strided_slice %82 {offsets = [0, 0], sizes = [16, 16], strides = [1, 1]} : vector<16x64xf32> to vector<16x16xf32>
    %84 = arith.negf %83 : vector<16x16xf32>
    %85 = math.exp %84 : vector<16x16xf32>
    %cst_45 = arith.constant 1.000000e+00 : f32
    %86 = vector.broadcast %cst_45 : f32 to vector<16x16xf32>
    %87 = arith.addf %86, %85 : vector<16x16xf32>
    %88 = arith.divf %86, %87 : vector<16x16xf32>
    %89 = vector.extract_strided_slice %82 {offsets = [0, 16], sizes = [16, 16], strides = [1, 1]} : vector<16x64xf32> to vector<16x16xf32>
    %90 = arith.negf %89 : vector<16x16xf32>
    %91 = math.exp %90 : vector<16x16xf32>
    %cst_46 = arith.constant 1.000000e+00 : f32
    %92 = vector.broadcast %cst_46 : f32 to vector<16x16xf32>
    %93 = arith.addf %92, %91 : vector<16x16xf32>
    %94 = arith.divf %92, %93 : vector<16x16xf32>
    %95 = vector.extract_strided_slice %82 {offsets = [0, 32], sizes = [16, 16], strides = [1, 1]} : vector<16x64xf32> to vector<16x16xf32>
    %96 = math.tanh %95 : vector<16x16xf32>
    %97 = vector.extract_strided_slice %82 {offsets = [0, 48], sizes = [16, 16], strides = [1, 1]} : vector<16x64xf32> to vector<16x16xf32>
    %98 = arith.negf %97 : vector<16x16xf32>
    %99 = math.exp %98 : vector<16x16xf32>
    %cst_47 = arith.constant 1.000000e+00 : f32
    %100 = vector.broadcast %cst_47 : f32 to vector<16x16xf32>
    %101 = arith.addf %100, %99 : vector<16x16xf32>
    %102 = arith.divf %100, %101 : vector<16x16xf32>
    %103 = arith.mulf %94, %74 : vector<16x16xf32>
    %104 = arith.mulf %88, %96 : vector<16x16xf32>
    %105 = arith.addf %103, %104 : vector<16x16xf32>
    %106 = math.tanh %105 : vector<16x16xf32>
    %107 = arith.mulf %102, %106 : vector<16x16xf32>
    %c0_48 = arith.constant 0 : index
    %c3 = arith.constant 3 : index
    %c0_49 = arith.constant 0 : index
    %108 = vector.load %arg41[%c0_48, %c3, %c0_49] : memref<2x16x64xf32, #tpu.memory_space<vmem>>, vector<2x8x64xf32>
    %109 = vector.shape_cast %108 : vector<2x8x64xf32> to vector<16x64xf32>
    %110 = arith.truncf %107 : vector<16x16xf32> to vector<16x16xbf16>
    %111 = arith.truncf %11 : vector<16x64xf32> to vector<16x64xbf16>
    %cst_50 = arith.constant dense<0.000000e+00> : vector<16x64xf32>
    %112 = tpu.matmul %110, %111, %cst_50 {dimension_numbers = #tpu.dot_dimension_numbers<[1], [0], [0], [1], [0, 0, 1, 1], [], []>} : vector<16x16xbf16>, vector<16x64xbf16>, vector<16x64xf32> -> vector<16x64xf32>
    %113 = arith.addf %109, %112 : vector<16x64xf32>
    %114 = vector.extract_strided_slice %113 {offsets = [0, 0], sizes = [16, 16], strides = [1, 1]} : vector<16x64xf32> to vector<16x16xf32>
    %115 = arith.negf %114 : vector<16x16xf32>
    %116 = math.exp %115 : vector<16x16xf32>
    %cst_51 = arith.constant 1.000000e+00 : f32
    %117 = vector.broadcast %cst_51 : f32 to vector<16x16xf32>
    %118 = arith.addf %117, %116 : vector<16x16xf32>
    %119 = arith.divf %117, %118 : vector<16x16xf32>
    %120 = vector.extract_strided_slice %113 {offsets = [0, 16], sizes = [16, 16], strides = [1, 1]} : vector<16x64xf32> to vector<16x16xf32>
    %121 = arith.negf %120 : vector<16x16xf32>
    %122 = math.exp %121 : vector<16x16xf32>
    %cst_52 = arith.constant 1.000000e+00 : f32
    %123 = vector.broadcast %cst_52 : f32 to vector<16x16xf32>
    %124 = arith.addf %123, %122 : vector<16x16xf32>
    %125 = arith.divf %123, %124 : vector<16x16xf32>
    %126 = vector.extract_strided_slice %113 {offsets = [0, 32], sizes = [16, 16], strides = [1, 1]} : vector<16x64xf32> to vector<16x16xf32>
    %127 = math.tanh %126 : vector<16x16xf32>
    %128 = vector.extract_strided_slice %113 {offsets = [0, 48], sizes = [16, 16], strides = [1, 1]} : vector<16x64xf32> to vector<16x16xf32>
    %129 = arith.negf %128 : vector<16x16xf32>
    %130 = math.exp %129 : vector<16x16xf32>
    %cst_53 = arith.constant 1.000000e+00 : f32
    %131 = vector.broadcast %cst_53 : f32 to vector<16x16xf32>
    %132 = arith.addf %131, %130 : vector<16x16xf32>
    %133 = arith.divf %131, %132 : vector<16x16xf32>
    %134 = arith.mulf %125, %105 : vector<16x16xf32>
    %135 = arith.mulf %119, %127 : vector<16x16xf32>
    %136 = arith.addf %134, %135 : vector<16x16xf32>
    %137 = math.tanh %136 : vector<16x16xf32>
    %138 = arith.mulf %133, %137 : vector<16x16xf32>
    %c0_54 = arith.constant 0 : index
    %c4 = arith.constant 4 : index
    %c0_55 = arith.constant 0 : index
    %139 = vector.load %arg41[%c0_54, %c4, %c0_55] : memref<2x16x64xf32, #tpu.memory_space<vmem>>, vector<2x8x64xf32>
    %140 = vector.shape_cast %139 : vector<2x8x64xf32> to vector<16x64xf32>
    %141 = arith.truncf %138 : vector<16x16xf32> to vector<16x16xbf16>
    %142 = arith.truncf %11 : vector<16x64xf32> to vector<16x64xbf16>
    %cst_56 = arith.constant dense<0.000000e+00> : vector<16x64xf32>
    %143 = tpu.matmul %141, %142, %cst_56 {dimension_numbers = #tpu.dot_dimension_numbers<[1], [0], [0], [1], [0, 0, 1, 1], [], []>} : vector<16x16xbf16>, vector<16x64xbf16>, vector<16x64xf32> -> vector<16x64xf32>
    %144 = arith.addf %140, %143 : vector<16x64xf32>
    %145 = vector.extract_strided_slice %144 {offsets = [0, 0], sizes = [16, 16], strides = [1, 1]} : vector<16x64xf32> to vector<16x16xf32>
    %146 = arith.negf %145 : vector<16x16xf32>
    %147 = math.exp %146 : vector<16x16xf32>
    %cst_57 = arith.constant 1.000000e+00 : f32
    %148 = vector.broadcast %cst_57 : f32 to vector<16x16xf32>
    %149 = arith.addf %148, %147 : vector<16x16xf32>
    %150 = arith.divf %148, %149 : vector<16x16xf32>
    %151 = vector.extract_strided_slice %144 {offsets = [0, 16], sizes = [16, 16], strides = [1, 1]} : vector<16x64xf32> to vector<16x16xf32>
    %152 = arith.negf %151 : vector<16x16xf32>
    %153 = math.exp %152 : vector<16x16xf32>
    %cst_58 = arith.constant 1.000000e+00 : f32
    %154 = vector.broadcast %cst_58 : f32 to vector<16x16xf32>
    %155 = arith.addf %154, %153 : vector<16x16xf32>
    %156 = arith.divf %154, %155 : vector<16x16xf32>
    %157 = vector.extract_strided_slice %144 {offsets = [0, 32], sizes = [16, 16], strides = [1, 1]} : vector<16x64xf32> to vector<16x16xf32>
    %158 = math.tanh %157 : vector<16x16xf32>
    %159 = vector.extract_strided_slice %144 {offsets = [0, 48], sizes = [16, 16], strides = [1, 1]} : vector<16x64xf32> to vector<16x16xf32>
    %160 = arith.negf %159 : vector<16x16xf32>
    %161 = math.exp %160 : vector<16x16xf32>
    %cst_59 = arith.constant 1.000000e+00 : f32
    %162 = vector.broadcast %cst_59 : f32 to vector<16x16xf32>
    %163 = arith.addf %162, %161 : vector<16x16xf32>
    %164 = arith.divf %162, %163 : vector<16x16xf32>
    %165 = arith.mulf %156, %136 : vector<16x16xf32>
    %166 = arith.mulf %150, %158 : vector<16x16xf32>
    %167 = arith.addf %165, %166 : vector<16x16xf32>
    %168 = math.tanh %167 : vector<16x16xf32>
    %169 = arith.mulf %164, %168 : vector<16x16xf32>
    %c0_60 = arith.constant 0 : index
    %c5 = arith.constant 5 : index
    %c0_61 = arith.constant 0 : index
    %170 = vector.load %arg41[%c0_60, %c5, %c0_61] : memref<2x16x64xf32, #tpu.memory_space<vmem>>, vector<2x8x64xf32>
    %171 = vector.shape_cast %170 : vector<2x8x64xf32> to vector<16x64xf32>
    %172 = arith.truncf %169 : vector<16x16xf32> to vector<16x16xbf16>
    %173 = arith.truncf %11 : vector<16x64xf32> to vector<16x64xbf16>
    %cst_62 = arith.constant dense<0.000000e+00> : vector<16x64xf32>
    %174 = tpu.matmul %172, %173, %cst_62 {dimension_numbers = #tpu.dot_dimension_numbers<[1], [0], [0], [1], [0, 0, 1, 1], [], []>} : vector<16x16xbf16>, vector<16x64xbf16>, vector<16x64xf32> -> vector<16x64xf32>
    %175 = arith.addf %171, %174 : vector<16x64xf32>
    %176 = vector.extract_strided_slice %175 {offsets = [0, 0], sizes = [16, 16], strides = [1, 1]} : vector<16x64xf32> to vector<16x16xf32>
    %177 = arith.negf %176 : vector<16x16xf32>
    %178 = math.exp %177 : vector<16x16xf32>
    %cst_63 = arith.constant 1.000000e+00 : f32
    %179 = vector.broadcast %cst_63 : f32 to vector<16x16xf32>
    %180 = arith.addf %179, %178 : vector<16x16xf32>
    %181 = arith.divf %179, %180 : vector<16x16xf32>
    %182 = vector.extract_strided_slice %175 {offsets = [0, 16], sizes = [16, 16], strides = [1, 1]} : vector<16x64xf32> to vector<16x16xf32>
    %183 = arith.negf %182 : vector<16x16xf32>
    %184 = math.exp %183 : vector<16x16xf32>
    %cst_64 = arith.constant 1.000000e+00 : f32
    %185 = vector.broadcast %cst_64 : f32 to vector<16x16xf32>
    %186 = arith.addf %185, %184 : vector<16x16xf32>
    %187 = arith.divf %185, %186 : vector<16x16xf32>
    %188 = vector.extract_strided_slice %175 {offsets = [0, 32], sizes = [16, 16], strides = [1, 1]} : vector<16x64xf32> to vector<16x16xf32>
    %189 = math.tanh %188 : vector<16x16xf32>
    %190 = vector.extract_strided_slice %175 {offsets = [0, 48], sizes = [16, 16], strides = [1, 1]} : vector<16x64xf32> to vector<16x16xf32>
    %191 = arith.negf %190 : vector<16x16xf32>
    %192 = math.exp %191 : vector<16x16xf32>
    %cst_65 = arith.constant 1.000000e+00 : f32
    %193 = vector.broadcast %cst_65 : f32 to vector<16x16xf32>
    %194 = arith.addf %193, %192 : vector<16x16xf32>
    %195 = arith.divf %193, %194 : vector<16x16xf32>
    %196 = arith.mulf %187, %167 : vector<16x16xf32>
    %197 = arith.mulf %181, %189 : vector<16x16xf32>
    %198 = arith.addf %196, %197 : vector<16x16xf32>
    %199 = math.tanh %198 : vector<16x16xf32>
    %200 = arith.mulf %195, %199 : vector<16x16xf32>
    %c0_66 = arith.constant 0 : index
    %c6 = arith.constant 6 : index
    %c0_67 = arith.constant 0 : index
    %201 = vector.load %arg41[%c0_66, %c6, %c0_67] : memref<2x16x64xf32, #tpu.memory_space<vmem>>, vector<2x8x64xf32>
    %202 = vector.shape_cast %201 : vector<2x8x64xf32> to vector<16x64xf32>
    %203 = arith.truncf %200 : vector<16x16xf32> to vector<16x16xbf16>
    %204 = arith.truncf %11 : vector<16x64xf32> to vector<16x64xbf16>
    %cst_68 = arith.constant dense<0.000000e+00> : vector<16x64xf32>
    %205 = tpu.matmul %203, %204, %cst_68 {dimension_numbers = #tpu.dot_dimension_numbers<[1], [0], [0], [1], [0, 0, 1, 1], [], []>} : vector<16x16xbf16>, vector<16x64xbf16>, vector<16x64xf32> -> vector<16x64xf32>
    %206 = arith.addf %202, %205 : vector<16x64xf32>
    %207 = vector.extract_strided_slice %206 {offsets = [0, 0], sizes = [16, 16], strides = [1, 1]} : vector<16x64xf32> to vector<16x16xf32>
    %208 = arith.negf %207 : vector<16x16xf32>
    %209 = math.exp %208 : vector<16x16xf32>
    %cst_69 = arith.constant 1.000000e+00 : f32
    %210 = vector.broadcast %cst_69 : f32 to vector<16x16xf32>
    %211 = arith.addf %210, %209 : vector<16x16xf32>
    %212 = arith.divf %210, %211 : vector<16x16xf32>
    %213 = vector.extract_strided_slice %206 {offsets = [0, 16], sizes = [16, 16], strides = [1, 1]} : vector<16x64xf32> to vector<16x16xf32>
    %214 = arith.negf %213 : vector<16x16xf32>
    %215 = math.exp %214 : vector<16x16xf32>
    %cst_70 = arith.constant 1.000000e+00 : f32
    %216 = vector.broadcast %cst_70 : f32 to vector<16x16xf32>
    %217 = arith.addf %216, %215 : vector<16x16xf32>
    %218 = arith.divf %216, %217 : vector<16x16xf32>
    %219 = vector.extract_strided_slice %206 {offsets = [0, 32], sizes = [16, 16], strides = [1, 1]} : vector<16x64xf32> to vector<16x16xf32>
    %220 = math.tanh %219 : vector<16x16xf32>
    %221 = vector.extract_strided_slice %206 {offsets = [0, 48], sizes = [16, 16], strides = [1, 1]} : vector<16x64xf32> to vector<16x16xf32>
    %222 = arith.negf %221 : vector<16x16xf32>
    %223 = math.exp %222 : vector<16x16xf32>
    %cst_71 = arith.constant 1.000000e+00 : f32
    %224 = vector.broadcast %cst_71 : f32 to vector<16x16xf32>
    %225 = arith.addf %224, %223 : vector<16x16xf32>
    %226 = arith.divf %224, %225 : vector<16x16xf32>
    %227 = arith.mulf %218, %198 : vector<16x16xf32>
    %228 = arith.mulf %212, %220 : vector<16x16xf32>
    %229 = arith.addf %227, %228 : vector<16x16xf32>
    %230 = math.tanh %229 : vector<16x16xf32>
    %231 = arith.mulf %226, %230 : vector<16x16xf32>
    %c0_72 = arith.constant 0 : index
    %c7 = arith.constant 7 : index
    %c0_73 = arith.constant 0 : index
    %232 = vector.load %arg41[%c0_72, %c7, %c0_73] : memref<2x16x64xf32, #tpu.memory_space<vmem>>, vector<2x8x64xf32>
    %233 = vector.shape_cast %232 : vector<2x8x64xf32> to vector<16x64xf32>
    %234 = arith.truncf %231 : vector<16x16xf32> to vector<16x16xbf16>
    %235 = arith.truncf %11 : vector<16x64xf32> to vector<16x64xbf16>
    %cst_74 = arith.constant dense<0.000000e+00> : vector<16x64xf32>
    %236 = tpu.matmul %234, %235, %cst_74 {dimension_numbers = #tpu.dot_dimension_numbers<[1], [0], [0], [1], [0, 0, 1, 1], [], []>} : vector<16x16xbf16>, vector<16x64xbf16>, vector<16x64xf32> -> vector<16x64xf32>
    %237 = arith.addf %233, %236 : vector<16x64xf32>
    %238 = vector.extract_strided_slice %237 {offsets = [0, 0], sizes = [16, 16], strides = [1, 1]} : vector<16x64xf32> to vector<16x16xf32>
    %239 = arith.negf %238 : vector<16x16xf32>
    %240 = math.exp %239 : vector<16x16xf32>
    %cst_75 = arith.constant 1.000000e+00 : f32
    %241 = vector.broadcast %cst_75 : f32 to vector<16x16xf32>
    %242 = arith.addf %241, %240 : vector<16x16xf32>
    %243 = arith.divf %241, %242 : vector<16x16xf32>
    %244 = vector.extract_strided_slice %237 {offsets = [0, 16], sizes = [16, 16], strides = [1, 1]} : vector<16x64xf32> to vector<16x16xf32>
    %245 = arith.negf %244 : vector<16x16xf32>
    %246 = math.exp %245 : vector<16x16xf32>
    %cst_76 = arith.constant 1.000000e+00 : f32
    %247 = vector.broadcast %cst_76 : f32 to vector<16x16xf32>
    %248 = arith.addf %247, %246 : vector<16x16xf32>
    %249 = arith.divf %247, %248 : vector<16x16xf32>
    %250 = vector.extract_strided_slice %237 {offsets = [0, 32], sizes = [16, 16], strides = [1, 1]} : vector<16x64xf32> to vector<16x16xf32>
    %251 = math.tanh %250 : vector<16x16xf32>
    %252 = vector.extract_strided_slice %237 {offsets = [0, 48], sizes = [16, 16], strides = [1, 1]} : vector<16x64xf32> to vector<16x16xf32>
    %253 = arith.negf %252 : vector<16x16xf32>
    %254 = math.exp %253 : vector<16x16xf32>
    %cst_77 = arith.constant 1.000000e+00 : f32
    %255 = vector.broadcast %cst_77 : f32 to vector<16x16xf32>
    %256 = arith.addf %255, %254 : vector<16x16xf32>
    %257 = arith.divf %255, %256 : vector<16x16xf32>
    %258 = arith.mulf %249, %229 : vector<16x16xf32>
    %259 = arith.mulf %243, %251 : vector<16x16xf32>
    %260 = arith.addf %258, %259 : vector<16x16xf32>
    %261 = math.tanh %260 : vector<16x16xf32>
    %262 = arith.mulf %257, %261 : vector<16x16xf32>
    %c0_78 = arith.constant 0 : index
    %c8_79 = arith.constant 8 : index
    %c0_80 = arith.constant 0 : index
    %263 = vector.load %arg41[%c0_78, %c8_79, %c0_80] : memref<2x16x64xf32, #tpu.memory_space<vmem>>, vector<2x8x64xf32>
    %264 = vector.shape_cast %263 : vector<2x8x64xf32> to vector<16x64xf32>
    %265 = arith.truncf %262 : vector<16x16xf32> to vector<16x16xbf16>
    %266 = arith.truncf %11 : vector<16x64xf32> to vector<16x64xbf16>
    %cst_81 = arith.constant dense<0.000000e+00> : vector<16x64xf32>
    %267 = tpu.matmul %265, %266, %cst_81 {dimension_numbers = #tpu.dot_dimension_numbers<[1], [0], [0], [1], [0, 0, 1, 1], [], []>} : vector<16x16xbf16>, vector<16x64xbf16>, vector<16x64xf32> -> vector<16x64xf32>
    %268 = arith.addf %264, %267 : vector<16x64xf32>
    %269 = vector.extract_strided_slice %268 {offsets = [0, 0], sizes = [16, 16], strides = [1, 1]} : vector<16x64xf32> to vector<16x16xf32>
    %270 = arith.negf %269 : vector<16x16xf32>
    %271 = math.exp %270 : vector<16x16xf32>
    %cst_82 = arith.constant 1.000000e+00 : f32
    %272 = vector.broadcast %cst_82 : f32 to vector<16x16xf32>
    %273 = arith.addf %272, %271 : vector<16x16xf32>
    %274 = arith.divf %272, %273 : vector<16x16xf32>
    %275 = vector.extract_strided_slice %268 {offsets = [0, 16], sizes = [16, 16], strides = [1, 1]} : vector<16x64xf32> to vector<16x16xf32>
    %276 = arith.negf %275 : vector<16x16xf32>
    %277 = math.exp %276 : vector<16x16xf32>
    %cst_83 = arith.constant 1.000000e+00 : f32
    %278 = vector.broadcast %cst_83 : f32 to vector<16x16xf32>
    %279 = arith.addf %278, %277 : vector<16x16xf32>
    %280 = arith.divf %278, %279 : vector<16x16xf32>
    %281 = vector.extract_strided_slice %268 {offsets = [0, 32], sizes = [16, 16], strides = [1, 1]} : vector<16x64xf32> to vector<16x16xf32>
    %282 = math.tanh %281 : vector<16x16xf32>
    %283 = vector.extract_strided_slice %268 {offsets = [0, 48], sizes = [16, 16], strides = [1, 1]} : vector<16x64xf32> to vector<16x16xf32>
    %284 = arith.negf %283 : vector<16x16xf32>
    %285 = math.exp %284 : vector<16x16xf32>
    %cst_84 = arith.constant 1.000000e+00 : f32
    %286 = vector.broadcast %cst_84 : f32 to vector<16x16xf32>
    %287 = arith.addf %286, %285 : vector<16x16xf32>
    %288 = arith.divf %286, %287 : vector<16x16xf32>
    %289 = arith.mulf %280, %260 : vector<16x16xf32>
    %290 = arith.mulf %274, %282 : vector<16x16xf32>
    %291 = arith.addf %289, %290 : vector<16x16xf32>
    %292 = math.tanh %291 : vector<16x16xf32>
    %293 = arith.mulf %288, %292 : vector<16x16xf32>
    %294 = arith.truncf %293 : vector<16x16xf32> to vector<16x16xbf16>
    %295 = arith.truncf %13 : vector<16x32xf32> to vector<16x32xbf16>
    %cst_85 = arith.constant dense<0.000000e+00> : vector<16x32xf32>
    %296 = tpu.matmul %294, %295, %cst_85 {dimension_numbers = #tpu.dot_dimension_numbers<[1], [0], [0], [1], [0, 0, 1, 1], [], []>} : vector<16x16xbf16>, vector<16x32xbf16>, vector<16x32xf32> -> vector<16x32xf32>
    %297 = arith.addf %296, %3 : vector<16x32xf32>
    %c0_86 = arith.constant 0 : index
    %c0_87 = arith.constant 0 : index
    %c0_88 = arith.constant 0 : index
    %298 = vector.load %arg11[%c0_86, %c0_87, %c0_88] : memref<2x1x32xf32, #tpu.memory_space<vmem>>, vector<1x1x32xf32>
    %299 = vector.shape_cast %298 : vector<1x1x32xf32> to vector<1x32xf32>
    %c0_89 = arith.constant 0 : index
    %c0_90 = arith.constant 0 : index
    %c0_91 = arith.constant 0 : index
    %300 = vector.load %arg12[%c0_89, %c0_90, %c0_91] : memref<2x1x32xf32, #tpu.memory_space<vmem>>, vector<1x1x32xf32>
    %301 = vector.shape_cast %300 : vector<1x1x32xf32> to vector<1x32xf32>
    %c0_92 = arith.constant 0 : index
    %c0_93 = arith.constant 0 : index
    %c0_94 = arith.constant 0 : index
    %302 = vector.load %arg13[%c0_92, %c0_93, %c0_94] : memref<2x32x64xf32, #tpu.memory_space<vmem>>, vector<1x32x64xf32>
    %303 = vector.shape_cast %302 : vector<1x32x64xf32> to vector<32x64xf32>
    %c0_95 = arith.constant 0 : index
    %c0_96 = arith.constant 0 : index
    %c0_97 = arith.constant 0 : index
    %304 = vector.load %arg14[%c0_95, %c0_96, %c0_97] : memref<2x1x64xf32, #tpu.memory_space<vmem>>, vector<1x1x64xf32>
    %305 = vector.shape_cast %304 : vector<1x1x64xf32> to vector<1x64xf32>
    %c0_98 = arith.constant 0 : index
    %c0_99 = arith.constant 0 : index
    %c0_100 = arith.constant 0 : index
    %306 = vector.load %arg15[%c0_98, %c0_99, %c0_100] : memref<2x64x32xf32, #tpu.memory_space<vmem>>, vector<1x64x32xf32>
    %307 = vector.shape_cast %306 : vector<1x64x32xf32> to vector<64x32xf32>
    %c0_101 = arith.constant 0 : index
    %c0_102 = arith.constant 0 : index
    %c0_103 = arith.constant 0 : index
    %308 = vector.load %arg16[%c0_101, %c0_102, %c0_103] : memref<2x1x32xf32, #tpu.memory_space<vmem>>, vector<1x1x32xf32>
    %309 = vector.shape_cast %308 : vector<1x1x32xf32> to vector<1x32xf32>
    %cst_104 = arith.constant dense<0.000000e+00> : vector<16xf32>
    %310 = vector.multi_reduction <add>, %297, %cst_104 [1] : vector<16x32xf32> to vector<16xf32>
    %311 = vector.shape_cast %310 : vector<16xf32> to vector<16x1xf32>
    %cst_105 = arith.constant 3.200000e+01 : f32
    %312 = vector.broadcast %cst_105 : f32 to vector<16x1xf32>
    %313 = arith.divf %311, %312 : vector<16x1xf32>
    %314 = vector.broadcast %313 : vector<16x1xf32> to vector<16x32xf32>
    %315 = arith.subf %297, %314 : vector<16x32xf32>
    %316 = arith.mulf %315, %315 : vector<16x32xf32>
    %cst_106 = arith.constant dense<0.000000e+00> : vector<16xf32>
    %317 = vector.multi_reduction <add>, %316, %cst_106 [1] : vector<16x32xf32> to vector<16xf32>
    %318 = vector.shape_cast %317 : vector<16xf32> to vector<16x1xf32>
    %cst_107 = arith.constant 3.200000e+01 : f32
    %319 = vector.broadcast %cst_107 : f32 to vector<16x1xf32>
    %320 = arith.divf %318, %319 : vector<16x1xf32>
    %321 = vector.broadcast %313 : vector<16x1xf32> to vector<16x32xf32>
    %322 = arith.subf %297, %321 : vector<16x32xf32>
    %cst_108 = arith.constant 9.99999997E-7 : f32
    %323 = vector.broadcast %cst_108 : f32 to vector<16x1xf32>
    %324 = arith.addf %320, %323 : vector<16x1xf32>
    %325 = math.rsqrt %324 : vector<16x1xf32>
    %326 = vector.broadcast %325 : vector<16x1xf32> to vector<16x32xf32>
    %327 = arith.mulf %322, %326 : vector<16x32xf32>
    %328 = vector.broadcast %299 : vector<1x32xf32> to vector<16x32xf32>
    %329 = arith.mulf %327, %328 : vector<16x32xf32>
    %330 = vector.broadcast %301 : vector<1x32xf32> to vector<16x32xf32>
    %331 = arith.addf %329, %330 : vector<16x32xf32>
    %332 = arith.truncf %331 : vector<16x32xf32> to vector<16x32xbf16>
    %333 = arith.truncf %303 : vector<32x64xf32> to vector<32x64xbf16>
    %cst_109 = arith.constant dense<0.000000e+00> : vector<16x64xf32>
    %334 = tpu.matmul %332, %333, %cst_109 {dimension_numbers = #tpu.dot_dimension_numbers<[1], [0], [0], [1], [0, 0, 1, 1], [], []>} : vector<16x32xbf16>, vector<32x64xbf16>, vector<16x64xf32> -> vector<16x64xf32>
    %335 = vector.broadcast %305 : vector<1x64xf32> to vector<16x64xf32>
    %336 = arith.addf %334, %335 : vector<16x64xf32>
    %cst_110 = arith.constant 0.000000e+00 : f32
    %337 = vector.broadcast %cst_110 : f32 to vector<16x64xf32>
    %338 = arith.maximumf %336, %337 : vector<16x64xf32>
    %339 = arith.truncf %338 : vector<16x64xf32> to vector<16x64xbf16>
    %340 = arith.truncf %307 : vector<64x32xf32> to vector<64x32xbf16>
    %cst_111 = arith.constant dense<0.000000e+00> : vector<16x32xf32>
    %341 = tpu.matmul %339, %340, %cst_111 {dimension_numbers = #tpu.dot_dimension_numbers<[1], [0], [0], [1], [0, 0, 1, 1], [], []>} : vector<16x64xbf16>, vector<64x32xbf16>, vector<16x32xf32> -> vector<16x32xf32>
    %342 = vector.broadcast %309 : vector<1x32xf32> to vector<16x32xf32>
    %343 = arith.addf %341, %342 : vector<16x32xf32>
    %344 = arith.addf %343, %297 : vector<16x32xf32>
    %c1_112 = arith.constant 1 : index
    %c0_113 = arith.constant 0 : index
    %c0_114 = arith.constant 0 : index
    %345 = vector.load %arg6[%c1_112, %c0_113, %c0_114] : memref<2x1x32xf32, #tpu.memory_space<vmem>>, vector<1x1x32xf32>
    %346 = vector.shape_cast %345 : vector<1x1x32xf32> to vector<1x32xf32>
    %c1_115 = arith.constant 1 : index
    %c0_116 = arith.constant 0 : index
    %c0_117 = arith.constant 0 : index
    %347 = vector.load %arg7[%c1_115, %c0_116, %c0_117] : memref<2x1x32xf32, #tpu.memory_space<vmem>>, vector<1x1x32xf32>
    %348 = vector.shape_cast %347 : vector<1x1x32xf32> to vector<1x32xf32>
    %c1_118 = arith.constant 1 : index
    %c0_119 = arith.constant 0 : index
    %c0_120 = arith.constant 0 : index
    %349 = vector.load %arg8[%c1_118, %c0_119, %c0_120] : memref<2x32x64xf32, #tpu.memory_space<vmem>>, vector<1x32x64xf32>
    %350 = vector.shape_cast %349 : vector<1x32x64xf32> to vector<32x64xf32>
    %c1_121 = arith.constant 1 : index
    %c0_122 = arith.constant 0 : index
    %c0_123 = arith.constant 0 : index
    %351 = vector.load %arg9[%c1_121, %c0_122, %c0_123] : memref<2x16x64xf32, #tpu.memory_space<vmem>>, vector<1x16x64xf32>
    %352 = vector.shape_cast %351 : vector<1x16x64xf32> to vector<16x64xf32>
    %c1_124 = arith.constant 1 : index
    %c0_125 = arith.constant 0 : index
    %c0_126 = arith.constant 0 : index
    %353 = vector.load %arg10[%c1_124, %c0_125, %c0_126] : memref<2x16x32xf32, #tpu.memory_space<vmem>>, vector<1x16x32xf32>
    %354 = vector.shape_cast %353 : vector<1x16x32xf32> to vector<16x32xf32>
    %cst_127 = arith.constant dense<0.000000e+00> : vector<16xf32>
    %355 = vector.multi_reduction <add>, %344, %cst_127 [1] : vector<16x32xf32> to vector<16xf32>
    %356 = vector.shape_cast %355 : vector<16xf32> to vector<16x1xf32>
    %cst_128 = arith.constant 3.200000e+01 : f32
    %357 = vector.broadcast %cst_128 : f32 to vector<16x1xf32>
    %358 = arith.divf %356, %357 : vector<16x1xf32>
    %359 = vector.broadcast %358 : vector<16x1xf32> to vector<16x32xf32>
    %360 = arith.subf %344, %359 : vector<16x32xf32>
    %361 = arith.mulf %360, %360 : vector<16x32xf32>
    %cst_129 = arith.constant dense<0.000000e+00> : vector<16xf32>
    %362 = vector.multi_reduction <add>, %361, %cst_129 [1] : vector<16x32xf32> to vector<16xf32>
    %363 = vector.shape_cast %362 : vector<16xf32> to vector<16x1xf32>
    %cst_130 = arith.constant 3.200000e+01 : f32
    %364 = vector.broadcast %cst_130 : f32 to vector<16x1xf32>
    %365 = arith.divf %363, %364 : vector<16x1xf32>
    %366 = vector.broadcast %358 : vector<16x1xf32> to vector<16x32xf32>
    %367 = arith.subf %344, %366 : vector<16x32xf32>
    %cst_131 = arith.constant 9.99999997E-7 : f32
    %368 = vector.broadcast %cst_131 : f32 to vector<16x1xf32>
    %369 = arith.addf %365, %368 : vector<16x1xf32>
    %370 = math.rsqrt %369 : vector<16x1xf32>
    %371 = vector.broadcast %370 : vector<16x1xf32> to vector<16x32xf32>
    %372 = arith.mulf %367, %371 : vector<16x32xf32>
    %373 = vector.broadcast %346 : vector<1x32xf32> to vector<16x32xf32>
    %374 = arith.mulf %372, %373 : vector<16x32xf32>
    %375 = vector.broadcast %348 : vector<1x32xf32> to vector<16x32xf32>
    %376 = arith.addf %374, %375 : vector<16x32xf32>
    %377 = vector.broadcast %0 : vector<16x1xf32> to vector<16x32xf32>
    %378 = arith.mulf %376, %377 : vector<16x32xf32>
    %379 = arith.truncf %378 : vector<16x32xf32> to vector<16x32xbf16>
    %380 = arith.truncf %350 : vector<32x64xf32> to vector<32x64xbf16>
    %cst_132 = arith.constant dense<0.000000e+00> : vector<16x64xf32>
    %381 = tpu.matmul %379, %380, %cst_132 {dimension_numbers = #tpu.dot_dimension_numbers<[1], [0], [0], [1], [0, 0, 1, 1], [], []>} : vector<16x32xbf16>, vector<32x64xbf16>, vector<16x64xf32> -> vector<16x64xf32>
    %382 = vector.shape_cast %381 : vector<16x64xf32> to vector<2x8x64xf32>
    %c0_133 = arith.constant 0 : index
    %c0_134 = arith.constant 0 : index
    %c0_135 = arith.constant 0 : index
    %383 = vector.load %arg41[%c0_133, %c0_134, %c0_135] : memref<2x16x64xf32, #tpu.memory_space<vmem>>, vector<2x8x64xf32>
    tpu.vector_store %arg41[%c0_133, %c0_134, %c0_135], %382 {strides = array<i32>} : memref<2x16x64xf32, #tpu.memory_space<vmem>>, vector<2x8x64xf32>,
    %c0_136 = arith.constant 0 : index
    %c8_137 = arith.constant 8 : index
    %c0_138 = arith.constant 0 : index
    %384 = vector.load %arg41[%c0_136, %c8_137, %c0_138] : memref<2x16x64xf32, #tpu.memory_space<vmem>>, vector<2x8x64xf32>
    tpu.vector_store %arg41[%c0_136, %c8_137, %c0_138], %382 {strides = array<i32>} : memref<2x16x64xf32, #tpu.memory_space<vmem>>, vector<2x8x64xf32>,
    %cst_139 = arith.constant 0.000000e+00 : f32
    %385 = vector.broadcast %cst_139 : f32 to vector<16x16xf32>
    %cst_140 = arith.constant 0.000000e+00 : f32
    %386 = vector.broadcast %cst_140 : f32 to vector<16x16xf32>
    %c0_141 = arith.constant 0 : index
    %c1_142 = arith.constant 1 : index
    %c0_143 = arith.constant 0 : index
    %387 = vector.load %arg41[%c0_141, %c1_142, %c0_143] : memref<2x16x64xf32, #tpu.memory_space<vmem>>, vector<2x8x64xf32>
    %388 = vector.shape_cast %387 : vector<2x8x64xf32> to vector<16x64xf32>
    %389 = arith.truncf %385 : vector<16x16xf32> to vector<16x16xbf16>
    %390 = arith.truncf %352 : vector<16x64xf32> to vector<16x64xbf16>
    %cst_144 = arith.constant dense<0.000000e+00> : vector<16x64xf32>
    %391 = tpu.matmul %389, %390, %cst_144 {dimension_numbers = #tpu.dot_dimension_numbers<[1], [0], [0], [1], [0, 0, 1, 1], [], []>} : vector<16x16xbf16>, vector<16x64xbf16>, vector<16x64xf32> -> vector<16x64xf32>
    %392 = arith.addf %388, %391 : vector<16x64xf32>
    %393 = vector.extract_strided_slice %392 {offsets = [0, 0], sizes = [16, 16], strides = [1, 1]} : vector<16x64xf32> to vector<16x16xf32>
    %394 = arith.negf %393 : vector<16x16xf32>
    %395 = math.exp %394 : vector<16x16xf32>
    %cst_145 = arith.constant 1.000000e+00 : f32
    %396 = vector.broadcast %cst_145 : f32 to vector<16x16xf32>
    %397 = arith.addf %396, %395 : vector<16x16xf32>
    %398 = arith.divf %396, %397 : vector<16x16xf32>
    %399 = vector.extract_strided_slice %392 {offsets = [0, 16], sizes = [16, 16], strides = [1, 1]} : vector<16x64xf32> to vector<16x16xf32>
    %400 = arith.negf %399 : vector<16x16xf32>
    %401 = math.exp %400 : vector<16x16xf32>
    %cst_146 = arith.constant 1.000000e+00 : f32
    %402 = vector.broadcast %cst_146 : f32 to vector<16x16xf32>
    %403 = arith.addf %402, %401 : vector<16x16xf32>
    %404 = arith.divf %402, %403 : vector<16x16xf32>
    %405 = vector.extract_strided_slice %392 {offsets = [0, 32], sizes = [16, 16], strides = [1, 1]} : vector<16x64xf32> to vector<16x16xf32>
    %406 = math.tanh %405 : vector<16x16xf32>
    %407 = vector.extract_strided_slice %392 {offsets = [0, 48], sizes = [16, 16], strides = [1, 1]} : vector<16x64xf32> to vector<16x16xf32>
    %408 = arith.negf %407 : vector<16x16xf32>
    %409 = math.exp %408 : vector<16x16xf32>
    %cst_147 = arith.constant 1.000000e+00 : f32
    %410 = vector.broadcast %cst_147 : f32 to vector<16x16xf32>
    %411 = arith.addf %410, %409 : vector<16x16xf32>
    %412 = arith.divf %410, %411 : vector<16x16xf32>
    %413 = arith.mulf %404, %386 : vector<16x16xf32>
    %414 = arith.mulf %398, %406 : vector<16x16xf32>
    %415 = arith.addf %413, %414 : vector<16x16xf32>
    %416 = math.tanh %415 : vector<16x16xf32>
    %417 = arith.mulf %412, %416 : vector<16x16xf32>
    %c0_148 = arith.constant 0 : index
    %c2_149 = arith.constant 2 : index
    %c0_150 = arith.constant 0 : index
    %418 = vector.load %arg41[%c0_148, %c2_149, %c0_150] : memref<2x16x64xf32, #tpu.memory_space<vmem>>, vector<2x8x64xf32>
    %419 = vector.shape_cast %418 : vector<2x8x64xf32> to vector<16x64xf32>
    %420 = arith.truncf %417 : vector<16x16xf32> to vector<16x16xbf16>
    %421 = arith.truncf %352 : vector<16x64xf32> to vector<16x64xbf16>
    %cst_151 = arith.constant dense<0.000000e+00> : vector<16x64xf32>
    %422 = tpu.matmul %420, %421, %cst_151 {dimension_numbers = #tpu.dot_dimension_numbers<[1], [0], [0], [1], [0, 0, 1, 1], [], []>} : vector<16x16xbf16>, vector<16x64xbf16>, vector<16x64xf32> -> vector<16x64xf32>
    %423 = arith.addf %419, %422 : vector<16x64xf32>
    %424 = vector.extract_strided_slice %423 {offsets = [0, 0], sizes = [16, 16], strides = [1, 1]} : vector<16x64xf32> to vector<16x16xf32>
    %425 = arith.negf %424 : vector<16x16xf32>
    %426 = math.exp %425 : vector<16x16xf32>
    %cst_152 = arith.constant 1.000000e+00 : f32
    %427 = vector.broadcast %cst_152 : f32 to vector<16x16xf32>
    %428 = arith.addf %427, %426 : vector<16x16xf32>
    %429 = arith.divf %427, %428 : vector<16x16xf32>
    %430 = vector.extract_strided_slice %423 {offsets = [0, 16], sizes = [16, 16], strides = [1, 1]} : vector<16x64xf32> to vector<16x16xf32>
    %431 = arith.negf %430 : vector<16x16xf32>
    %432 = math.exp %431 : vector<16x16xf32>
    %cst_153 = arith.constant 1.000000e+00 : f32
    %433 = vector.broadcast %cst_153 : f32 to vector<16x16xf32>
    %434 = arith.addf %433, %432 : vector<16x16xf32>
    %435 = arith.divf %433, %434 : vector<16x16xf32>
    %436 = vector.extract_strided_slice %423 {offsets = [0, 32], sizes = [16, 16], strides = [1, 1]} : vector<16x64xf32> to vector<16x16xf32>
    %437 = math.tanh %436 : vector<16x16xf32>
    %438 = vector.extract_strided_slice %423 {offsets = [0, 48], sizes = [16, 16], strides = [1, 1]} : vector<16x64xf32> to vector<16x16xf32>
    %439 = arith.negf %438 : vector<16x16xf32>
    %440 = math.exp %439 : vector<16x16xf32>
    %cst_154 = arith.constant 1.000000e+00 : f32
    %441 = vector.broadcast %cst_154 : f32 to vector<16x16xf32>
    %442 = arith.addf %441, %440 : vector<16x16xf32>
    %443 = arith.divf %441, %442 : vector<16x16xf32>
    %444 = arith.mulf %435, %415 : vector<16x16xf32>
    %445 = arith.mulf %429, %437 : vector<16x16xf32>
    %446 = arith.addf %444, %445 : vector<16x16xf32>
    %447 = math.tanh %446 : vector<16x16xf32>
    %448 = arith.mulf %443, %447 : vector<16x16xf32>
    %c0_155 = arith.constant 0 : index
    %c3_156 = arith.constant 3 : index
    %c0_157 = arith.constant 0 : index
    %449 = vector.load %arg41[%c0_155, %c3_156, %c0_157] : memref<2x16x64xf32, #tpu.memory_space<vmem>>, vector<2x8x64xf32>
    %450 = vector.shape_cast %449 : vector<2x8x64xf32> to vector<16x64xf32>
    %451 = arith.truncf %448 : vector<16x16xf32> to vector<16x16xbf16>
    %452 = arith.truncf %352 : vector<16x64xf32> to vector<16x64xbf16>
    %cst_158 = arith.constant dense<0.000000e+00> : vector<16x64xf32>
    %453 = tpu.matmul %451, %452, %cst_158 {dimension_numbers = #tpu.dot_dimension_numbers<[1], [0], [0], [1], [0, 0, 1, 1], [], []>} : vector<16x16xbf16>, vector<16x64xbf16>, vector<16x64xf32> -> vector<16x64xf32>
    %454 = arith.addf %450, %453 : vector<16x64xf32>
    %455 = vector.extract_strided_slice %454 {offsets = [0, 0], sizes = [16, 16], strides = [1, 1]} : vector<16x64xf32> to vector<16x16xf32>
    %456 = arith.negf %455 : vector<16x16xf32>
    %457 = math.exp %456 : vector<16x16xf32>
    %cst_159 = arith.constant 1.000000e+00 : f32
    %458 = vector.broadcast %cst_159 : f32 to vector<16x16xf32>
    %459 = arith.addf %458, %457 : vector<16x16xf32>
    %460 = arith.divf %458, %459 : vector<16x16xf32>
    %461 = vector.extract_strided_slice %454 {offsets = [0, 16], sizes = [16, 16], strides = [1, 1]} : vector<16x64xf32> to vector<16x16xf32>
    %462 = arith.negf %461 : vector<16x16xf32>
    %463 = math.exp %462 : vector<16x16xf32>
    %cst_160 = arith.constant 1.000000e+00 : f32
    %464 = vector.broadcast %cst_160 : f32 to vector<16x16xf32>
    %465 = arith.addf %464, %463 : vector<16x16xf32>
    %466 = arith.divf %464, %465 : vector<16x16xf32>
    %467 = vector.extract_strided_slice %454 {offsets = [0, 32], sizes = [16, 16], strides = [1, 1]} : vector<16x64xf32> to vector<16x16xf32>
    %468 = math.tanh %467 : vector<16x16xf32>
    %469 = vector.extract_strided_slice %454 {offsets = [0, 48], sizes = [16, 16], strides = [1, 1]} : vector<16x64xf32> to vector<16x16xf32>
    %470 = arith.negf %469 : vector<16x16xf32>
    %471 = math.exp %470 : vector<16x16xf32>
    %cst_161 = arith.constant 1.000000e+00 : f32
    %472 = vector.broadcast %cst_161 : f32 to vector<16x16xf32>
    %473 = arith.addf %472, %471 : vector<16x16xf32>
    %474 = arith.divf %472, %473 : vector<16x16xf32>
    %475 = arith.mulf %466, %446 : vector<16x16xf32>
    %476 = arith.mulf %460, %468 : vector<16x16xf32>
    %477 = arith.addf %475, %476 : vector<16x16xf32>
    %478 = math.tanh %477 : vector<16x16xf32>
    %479 = arith.mulf %474, %478 : vector<16x16xf32>
    %c0_162 = arith.constant 0 : index
    %c4_163 = arith.constant 4 : index
    %c0_164 = arith.constant 0 : index
    %480 = vector.load %arg41[%c0_162, %c4_163, %c0_164] : memref<2x16x64xf32, #tpu.memory_space<vmem>>, vector<2x8x64xf32>
    %481 = vector.shape_cast %480 : vector<2x8x64xf32> to vector<16x64xf32>
    %482 = arith.truncf %479 : vector<16x16xf32> to vector<16x16xbf16>
    %483 = arith.truncf %352 : vector<16x64xf32> to vector<16x64xbf16>
    %cst_165 = arith.constant dense<0.000000e+00> : vector<16x64xf32>
    %484 = tpu.matmul %482, %483, %cst_165 {dimension_numbers = #tpu.dot_dimension_numbers<[1], [0], [0], [1], [0, 0, 1, 1], [], []>} : vector<16x16xbf16>, vector<16x64xbf16>, vector<16x64xf32> -> vector<16x64xf32>
    %485 = arith.addf %481, %484 : vector<16x64xf32>
    %486 = vector.extract_strided_slice %485 {offsets = [0, 0], sizes = [16, 16], strides = [1, 1]} : vector<16x64xf32> to vector<16x16xf32>
    %487 = arith.negf %486 : vector<16x16xf32>
    %488 = math.exp %487 : vector<16x16xf32>
    %cst_166 = arith.constant 1.000000e+00 : f32
    %489 = vector.broadcast %cst_166 : f32 to vector<16x16xf32>
    %490 = arith.addf %489, %488 : vector<16x16xf32>
    %491 = arith.divf %489, %490 : vector<16x16xf32>
    %492 = vector.extract_strided_slice %485 {offsets = [0, 16], sizes = [16, 16], strides = [1, 1]} : vector<16x64xf32> to vector<16x16xf32>
    %493 = arith.negf %492 : vector<16x16xf32>
    %494 = math.exp %493 : vector<16x16xf32>
    %cst_167 = arith.constant 1.000000e+00 : f32
    %495 = vector.broadcast %cst_167 : f32 to vector<16x16xf32>
    %496 = arith.addf %495, %494 : vector<16x16xf32>
    %497 = arith.divf %495, %496 : vector<16x16xf32>
    %498 = vector.extract_strided_slice %485 {offsets = [0, 32], sizes = [16, 16], strides = [1, 1]} : vector<16x64xf32> to vector<16x16xf32>
    %499 = math.tanh %498 : vector<16x16xf32>
    %500 = vector.extract_strided_slice %485 {offsets = [0, 48], sizes = [16, 16], strides = [1, 1]} : vector<16x64xf32> to vector<16x16xf32>
    %501 = arith.negf %500 : vector<16x16xf32>
    %502 = math.exp %501 : vector<16x16xf32>
    %cst_168 = arith.constant 1.000000e+00 : f32
    %503 = vector.broadcast %cst_168 : f32 to vector<16x16xf32>
    %504 = arith.addf %503, %502 : vector<16x16xf32>
    %505 = arith.divf %503, %504 : vector<16x16xf32>
    %506 = arith.mulf %497, %477 : vector<16x16xf32>
    %507 = arith.mulf %491, %499 : vector<16x16xf32>
    %508 = arith.addf %506, %507 : vector<16x16xf32>
    %509 = math.tanh %508 : vector<16x16xf32>
    %510 = arith.mulf %505, %509 : vector<16x16xf32>
    %c0_169 = arith.constant 0 : index
    %c5_170 = arith.constant 5 : index
    %c0_171 = arith.constant 0 : index
    %511 = vector.load %arg41[%c0_169, %c5_170, %c0_171] : memref<2x16x64xf32, #tpu.memory_space<vmem>>, vector<2x8x64xf32>
    %512 = vector.shape_cast %511 : vector<2x8x64xf32> to vector<16x64xf32>
    %513 = arith.truncf %510 : vector<16x16xf32> to vector<16x16xbf16>
    %514 = arith.truncf %352 : vector<16x64xf32> to vector<16x64xbf16>
    %cst_172 = arith.constant dense<0.000000e+00> : vector<16x64xf32>
    %515 = tpu.matmul %513, %514, %cst_172 {dimension_numbers = #tpu.dot_dimension_numbers<[1], [0], [0], [1], [0, 0, 1, 1], [], []>} : vector<16x16xbf16>, vector<16x64xbf16>, vector<16x64xf32> -> vector<16x64xf32>
    %516 = arith.addf %512, %515 : vector<16x64xf32>
    %517 = vector.extract_strided_slice %516 {offsets = [0, 0], sizes = [16, 16], strides = [1, 1]} : vector<16x64xf32> to vector<16x16xf32>
    %518 = arith.negf %517 : vector<16x16xf32>
    %519 = math.exp %518 : vector<16x16xf32>
    %cst_173 = arith.constant 1.000000e+00 : f32
    %520 = vector.broadcast %cst_173 : f32 to vector<16x16xf32>
    %521 = arith.addf %520, %519 : vector<16x16xf32>
    %522 = arith.divf %520, %521 : vector<16x16xf32>
    %523 = vector.extract_strided_slice %516 {offsets = [0, 16], sizes = [16, 16], strides = [1, 1]} : vector<16x64xf32> to vector<16x16xf32>
    %524 = arith.negf %523 : vector<16x16xf32>
    %525 = math.exp %524 : vector<16x16xf32>
    %cst_174 = arith.constant 1.000000e+00 : f32
    %526 = vector.broadcast %cst_174 : f32 to vector<16x16xf32>
    %527 = arith.addf %526, %525 : vector<16x16xf32>
    %528 = arith.divf %526, %527 : vector<16x16xf32>
    %529 = vector.extract_strided_slice %516 {offsets = [0, 32], sizes = [16, 16], strides = [1, 1]} : vector<16x64xf32> to vector<16x16xf32>
    %530 = math.tanh %529 : vector<16x16xf32>
    %531 = vector.extract_strided_slice %516 {offsets = [0, 48], sizes = [16, 16], strides = [1, 1]} : vector<16x64xf32> to vector<16x16xf32>
    %532 = arith.negf %531 : vector<16x16xf32>
    %533 = math.exp %532 : vector<16x16xf32>
    %cst_175 = arith.constant 1.000000e+00 : f32
    %534 = vector.broadcast %cst_175 : f32 to vector<16x16xf32>
    %535 = arith.addf %534, %533 : vector<16x16xf32>
    %536 = arith.divf %534, %535 : vector<16x16xf32>
    %537 = arith.mulf %528, %508 : vector<16x16xf32>
    %538 = arith.mulf %522, %530 : vector<16x16xf32>
    %539 = arith.addf %537, %538 : vector<16x16xf32>
    %540 = math.tanh %539 : vector<16x16xf32>
    %541 = arith.mulf %536, %540 : vector<16x16xf32>
    %c0_176 = arith.constant 0 : index
    %c6_177 = arith.constant 6 : index
    %c0_178 = arith.constant 0 : index
    %542 = vector.load %arg41[%c0_176, %c6_177, %c0_178] : memref<2x16x64xf32, #tpu.memory_space<vmem>>, vector<2x8x64xf32>
    %543 = vector.shape_cast %542 : vector<2x8x64xf32> to vector<16x64xf32>
    %544 = arith.truncf %541 : vector<16x16xf32> to vector<16x16xbf16>
    %545 = arith.truncf %352 : vector<16x64xf32> to vector<16x64xbf16>
    %cst_179 = arith.constant dense<0.000000e+00> : vector<16x64xf32>
    %546 = tpu.matmul %544, %545, %cst_179 {dimension_numbers = #tpu.dot_dimension_numbers<[1], [0], [0], [1], [0, 0, 1, 1], [], []>} : vector<16x16xbf16>, vector<16x64xbf16>, vector<16x64xf32> -> vector<16x64xf32>
    %547 = arith.addf %543, %546 : vector<16x64xf32>
    %548 = vector.extract_strided_slice %547 {offsets = [0, 0], sizes = [16, 16], strides = [1, 1]} : vector<16x64xf32> to vector<16x16xf32>
    %549 = arith.negf %548 : vector<16x16xf32>
    %550 = math.exp %549 : vector<16x16xf32>
    %cst_180 = arith.constant 1.000000e+00 : f32
    %551 = vector.broadcast %cst_180 : f32 to vector<16x16xf32>
    %552 = arith.addf %551, %550 : vector<16x16xf32>
    %553 = arith.divf %551, %552 : vector<16x16xf32>
    %554 = vector.extract_strided_slice %547 {offsets = [0, 16], sizes = [16, 16], strides = [1, 1]} : vector<16x64xf32> to vector<16x16xf32>
    %555 = arith.negf %554 : vector<16x16xf32>
    %556 = math.exp %555 : vector<16x16xf32>
    %cst_181 = arith.constant 1.000000e+00 : f32
    %557 = vector.broadcast %cst_181 : f32 to vector<16x16xf32>
    %558 = arith.addf %557, %556 : vector<16x16xf32>
    %559 = arith.divf %557, %558 : vector<16x16xf32>
    %560 = vector.extract_strided_slice %547 {offsets = [0, 32], sizes = [16, 16], strides = [1, 1]} : vector<16x64xf32> to vector<16x16xf32>
    %561 = math.tanh %560 : vector<16x16xf32>
    %562 = vector.extract_strided_slice %547 {offsets = [0, 48], sizes = [16, 16], strides = [1, 1]} : vector<16x64xf32> to vector<16x16xf32>
    %563 = arith.negf %562 : vector<16x16xf32>
    %564 = math.exp %563 : vector<16x16xf32>
    %cst_182 = arith.constant 1.000000e+00 : f32
    %565 = vector.broadcast %cst_182 : f32 to vector<16x16xf32>
    %566 = arith.addf %565, %564 : vector<16x16xf32>
    %567 = arith.divf %565, %566 : vector<16x16xf32>
    %568 = arith.mulf %559, %539 : vector<16x16xf32>
    %569 = arith.mulf %553, %561 : vector<16x16xf32>
    %570 = arith.addf %568, %569 : vector<16x16xf32>
    %571 = math.tanh %570 : vector<16x16xf32>
    %572 = arith.mulf %567, %571 : vector<16x16xf32>
    %c0_183 = arith.constant 0 : index
    %c7_184 = arith.constant 7 : index
    %c0_185 = arith.constant 0 : index
    %573 = vector.load %arg41[%c0_183, %c7_184, %c0_185] : memref<2x16x64xf32, #tpu.memory_space<vmem>>, vector<2x8x64xf32>
    %574 = vector.shape_cast %573 : vector<2x8x64xf32> to vector<16x64xf32>
    %575 = arith.truncf %572 : vector<16x16xf32> to vector<16x16xbf16>
    %576 = arith.truncf %352 : vector<16x64xf32> to vector<16x64xbf16>
    %cst_186 = arith.constant dense<0.000000e+00> : vector<16x64xf32>
    %577 = tpu.matmul %575, %576, %cst_186 {dimension_numbers = #tpu.dot_dimension_numbers<[1], [0], [0], [1], [0, 0, 1, 1], [], []>} : vector<16x16xbf16>, vector<16x64xbf16>, vector<16x64xf32> -> vector<16x64xf32>
    %578 = arith.addf %574, %577 : vector<16x64xf32>
    %579 = vector.extract_strided_slice %578 {offsets = [0, 0], sizes = [16, 16], strides = [1, 1]} : vector<16x64xf32> to vector<16x16xf32>
    %580 = arith.negf %579 : vector<16x16xf32>
    %581 = math.exp %580 : vector<16x16xf32>
    %cst_187 = arith.constant 1.000000e+00 : f32
    %582 = vector.broadcast %cst_187 : f32 to vector<16x16xf32>
    %583 = arith.addf %582, %581 : vector<16x16xf32>
    %584 = arith.divf %582, %583 : vector<16x16xf32>
    %585 = vector.extract_strided_slice %578 {offsets = [0, 16], sizes = [16, 16], strides = [1, 1]} : vector<16x64xf32> to vector<16x16xf32>
    %586 = arith.negf %585 : vector<16x16xf32>
    %587 = math.exp %586 : vector<16x16xf32>
    %cst_188 = arith.constant 1.000000e+00 : f32
    %588 = vector.broadcast %cst_188 : f32 to vector<16x16xf32>
    %589 = arith.addf %588, %587 : vector<16x16xf32>
    %590 = arith.divf %588, %589 : vector<16x16xf32>
    %591 = vector.extract_strided_slice %578 {offsets = [0, 32], sizes = [16, 16], strides = [1, 1]} : vector<16x64xf32> to vector<16x16xf32>
    %592 = math.tanh %591 : vector<16x16xf32>
    %593 = vector.extract_strided_slice %578 {offsets = [0, 48], sizes = [16, 16], strides = [1, 1]} : vector<16x64xf32> to vector<16x16xf32>
    %594 = arith.negf %593 : vector<16x16xf32>
    %595 = math.exp %594 : vector<16x16xf32>
    %cst_189 = arith.constant 1.000000e+00 : f32
    %596 = vector.broadcast %cst_189 : f32 to vector<16x16xf32>
    %597 = arith.addf %596, %595 : vector<16x16xf32>
    %598 = arith.divf %596, %597 : vector<16x16xf32>
    %599 = arith.mulf %590, %570 : vector<16x16xf32>
    %600 = arith.mulf %584, %592 : vector<16x16xf32>
    %601 = arith.addf %599, %600 : vector<16x16xf32>
    %602 = math.tanh %601 : vector<16x16xf32>
    %603 = arith.mulf %598, %602 : vector<16x16xf32>
    %c0_190 = arith.constant 0 : index
    %c8_191 = arith.constant 8 : index
    %c0_192 = arith.constant 0 : index
    %604 = vector.load %arg41[%c0_190, %c8_191, %c0_192] : memref<2x16x64xf32, #tpu.memory_space<vmem>>, vector<2x8x64xf32>
    %605 = vector.shape_cast %604 : vector<2x8x64xf32> to vector<16x64xf32>
    %606 = arith.truncf %603 : vector<16x16xf32> to vector<16x16xbf16>
    %607 = arith.truncf %352 : vector<16x64xf32> to vector<16x64xbf16>
    %cst_193 = arith.constant dense<0.000000e+00> : vector<16x64xf32>
    %608 = tpu.matmul %606, %607, %cst_193 {dimension_numbers = #tpu.dot_dimension_numbers<[1], [0], [0], [1], [0, 0, 1, 1], [], []>} : vector<16x16xbf16>, vector<16x64xbf16>, vector<16x64xf32> -> vector<16x64xf32>
    %609 = arith.addf %605, %608 : vector<16x64xf32>
    %610 = vector.extract_strided_slice %609 {offsets = [0, 0], sizes = [16, 16], strides = [1, 1]} : vector<16x64xf32> to vector<16x16xf32>
    %611 = arith.negf %610 : vector<16x16xf32>
    %612 = math.exp %611 : vector<16x16xf32>
    %cst_194 = arith.constant 1.000000e+00 : f32
    %613 = vector.broadcast %cst_194 : f32 to vector<16x16xf32>
    %614 = arith.addf %613, %612 : vector<16x16xf32>
    %615 = arith.divf %613, %614 : vector<16x16xf32>
    %616 = vector.extract_strided_slice %609 {offsets = [0, 16], sizes = [16, 16], strides = [1, 1]} : vector<16x64xf32> to vector<16x16xf32>
    %617 = arith.negf %616 : vector<16x16xf32>
    %618 = math.exp %617 : vector<16x16xf32>
    %cst_195 = arith.constant 1.000000e+00 : f32
    %619 = vector.broadcast %cst_195 : f32 to vector<16x16xf32>
    %620 = arith.addf %619, %618 : vector<16x16xf32>
    %621 = arith.divf %619, %620 : vector<16x16xf32>
    %622 = vector.extract_strided_slice %609 {offsets = [0, 32], sizes = [16, 16], strides = [1, 1]} : vector<16x64xf32> to vector<16x16xf32>
    %623 = math.tanh %622 : vector<16x16xf32>
    %624 = vector.extract_strided_slice %609 {offsets = [0, 48], sizes = [16, 16], strides = [1, 1]} : vector<16x64xf32> to vector<16x16xf32>
    %625 = arith.negf %624 : vector<16x16xf32>
    %626 = math.exp %625 : vector<16x16xf32>
    %cst_196 = arith.constant 1.000000e+00 : f32
    %627 = vector.broadcast %cst_196 : f32 to vector<16x16xf32>
    %628 = arith.addf %627, %626 : vector<16x16xf32>
    %629 = arith.divf %627, %628 : vector<16x16xf32>
    %630 = arith.mulf %621, %601 : vector<16x16xf32>
    %631 = arith.mulf %615, %623 : vector<16x16xf32>
    %632 = arith.addf %630, %631 : vector<16x16xf32>
    %633 = math.tanh %632 : vector<16x16xf32>
    %634 = arith.mulf %629, %633 : vector<16x16xf32>
    %635 = arith.truncf %634 : vector<16x16xf32> to vector<16x16xbf16>
    %636 = arith.truncf %354 : vector<16x32xf32> to vector<16x32xbf16>
    %cst_197 = arith.constant dense<0.000000e+00> : vector<16x32xf32>
    %637 = tpu.matmul %635, %636, %cst_197 {dimension_numbers = #tpu.dot_dimension_numbers<[1], [0], [0], [1], [0, 0, 1, 1], [], []>} : vector<16x16xbf16>, vector<16x32xbf16>, vector<16x32xf32> -> vector<16x32xf32>
    %638 = arith.addf %637, %344 : vector<16x32xf32>
    %c1_198 = arith.constant 1 : index
    %c0_199 = arith.constant 0 : index
    %c0_200 = arith.constant 0 : index
    %639 = vector.load %arg11[%c1_198, %c0_199, %c0_200] : memref<2x1x32xf32, #tpu.memory_space<vmem>>, vector<1x1x32xf32>
    %640 = vector.shape_cast %639 : vector<1x1x32xf32> to vector<1x32xf32>
    %c1_201 = arith.constant 1 : index
    %c0_202 = arith.constant 0 : index
    %c0_203 = arith.constant 0 : index
    %641 = vector.load %arg12[%c1_201, %c0_202, %c0_203] : memref<2x1x32xf32, #tpu.memory_space<vmem>>, vector<1x1x32xf32>
    %642 = vector.shape_cast %641 : vector<1x1x32xf32> to vector<1x32xf32>
    %c1_204 = arith.constant 1 : index
    %c0_205 = arith.constant 0 : index
    %c0_206 = arith.constant 0 : index
    %643 = vector.load %arg13[%c1_204, %c0_205, %c0_206] : memref<2x32x64xf32, #tpu.memory_space<vmem>>, vector<1x32x64xf32>
    %644 = vector.shape_cast %643 : vector<1x32x64xf32> to vector<32x64xf32>
    %c1_207 = arith.constant 1 : index
    %c0_208 = arith.constant 0 : index
    %c0_209 = arith.constant 0 : index
    %645 = vector.load %arg14[%c1_207, %c0_208, %c0_209] : memref<2x1x64xf32, #tpu.memory_space<vmem>>, vector<1x1x64xf32>
    %646 = vector.shape_cast %645 : vector<1x1x64xf32> to vector<1x64xf32>
    %c1_210 = arith.constant 1 : index
    %c0_211 = arith.constant 0 : index
    %c0_212 = arith.constant 0 : index
    %647 = vector.load %arg15[%c1_210, %c0_211, %c0_212] : memref<2x64x32xf32, #tpu.memory_space<vmem>>, vector<1x64x32xf32>
    %648 = vector.shape_cast %647 : vector<1x64x32xf32> to vector<64x32xf32>
    %c1_213 = arith.constant 1 : index
    %c0_214 = arith.constant 0 : index
    %c0_215 = arith.constant 0 : index
    %649 = vector.load %arg16[%c1_213, %c0_214, %c0_215] : memref<2x1x32xf32, #tpu.memory_space<vmem>>, vector<1x1x32xf32>
    %650 = vector.shape_cast %649 : vector<1x1x32xf32> to vector<1x32xf32>
    %cst_216 = arith.constant dense<0.000000e+00> : vector<16xf32>
    %651 = vector.multi_reduction <add>, %638, %cst_216 [1] : vector<16x32xf32> to vector<16xf32>
    %652 = vector.shape_cast %651 : vector<16xf32> to vector<16x1xf32>
    %cst_217 = arith.constant 3.200000e+01 : f32
    %653 = vector.broadcast %cst_217 : f32 to vector<16x1xf32>
    %654 = arith.divf %652, %653 : vector<16x1xf32>
    %655 = vector.broadcast %654 : vector<16x1xf32> to vector<16x32xf32>
    %656 = arith.subf %638, %655 : vector<16x32xf32>
    %657 = arith.mulf %656, %656 : vector<16x32xf32>
    %cst_218 = arith.constant dense<0.000000e+00> : vector<16xf32>
    %658 = vector.multi_reduction <add>, %657, %cst_218 [1] : vector<16x32xf32> to vector<16xf32>
    %659 = vector.shape_cast %658 : vector<16xf32> to vector<16x1xf32>
    %cst_219 = arith.constant 3.200000e+01 : f32
    %660 = vector.broadcast %cst_219 : f32 to vector<16x1xf32>
    %661 = arith.divf %659, %660 : vector<16x1xf32>
    %662 = vector.broadcast %654 : vector<16x1xf32> to vector<16x32xf32>
    %663 = arith.subf %638, %662 : vector<16x32xf32>
    %cst_220 = arith.constant 9.99999997E-7 : f32
    %664 = vector.broadcast %cst_220 : f32 to vector<16x1xf32>
    %665 = arith.addf %661, %664 : vector<16x1xf32>
    %666 = math.rsqrt %665 : vector<16x1xf32>
    %667 = vector.broadcast %666 : vector<16x1xf32> to vector<16x32xf32>
    %668 = arith.mulf %663, %667 : vector<16x32xf32>
    %669 = vector.broadcast %640 : vector<1x32xf32> to vector<16x32xf32>
    %670 = arith.mulf %668, %669 : vector<16x32xf32>
    %671 = vector.broadcast %642 : vector<1x32xf32> to vector<16x32xf32>
    %672 = arith.addf %670, %671 : vector<16x32xf32>
    %673 = arith.truncf %672 : vector<16x32xf32> to vector<16x32xbf16>
    %674 = arith.truncf %644 : vector<32x64xf32> to vector<32x64xbf16>
    %cst_221 = arith.constant dense<0.000000e+00> : vector<16x64xf32>
    %675 = tpu.matmul %673, %674, %cst_221 {dimension_numbers = #tpu.dot_dimension_numbers<[1], [0], [0], [1], [0, 0, 1, 1], [], []>} : vector<16x32xbf16>, vector<32x64xbf16>, vector<16x64xf32> -> vector<16x64xf32>
    %676 = vector.broadcast %646 : vector<1x64xf32> to vector<16x64xf32>
    %677 = arith.addf %675, %676 : vector<16x64xf32>
    %cst_222 = arith.constant 0.000000e+00 : f32
    %678 = vector.broadcast %cst_222 : f32 to vector<16x64xf32>
    %679 = arith.maximumf %677, %678 : vector<16x64xf32>
    %680 = arith.truncf %679 : vector<16x64xf32> to vector<16x64xbf16>
    %681 = arith.truncf %648 : vector<64x32xf32> to vector<64x32xbf16>
    %cst_223 = arith.constant dense<0.000000e+00> : vector<16x32xf32>
    %682 = tpu.matmul %680, %681, %cst_223 {dimension_numbers = #tpu.dot_dimension_numbers<[1], [0], [0], [1], [0, 0, 1, 1], [], []>} : vector<16x64xbf16>, vector<64x32xbf16>, vector<16x32xf32> -> vector<16x32xf32>
    %683 = vector.broadcast %650 : vector<1x32xf32> to vector<16x32xf32>
    %684 = arith.addf %682, %683 : vector<16x32xf32>
    %685 = arith.addf %684, %638 : vector<16x32xf32>
    %c0_224 = arith.constant 0 : index
    %c0_225 = arith.constant 0 : index
    %686 = vector.load %arg35[%c0_224, %c0_225] : memref<1x32xf32, #tpu.memory_space<vmem>>, vector<1x32xf32>
    %c0_226 = arith.constant 0 : index
    %c0_227 = arith.constant 0 : index
    %687 = vector.load %arg36[%c0_226, %c0_227] : memref<1x32xf32, #tpu.memory_space<vmem>>, vector<1x32xf32>
    %cst_228 = arith.constant dense<0.000000e+00> : vector<16xf32>
    %688 = vector.multi_reduction <add>, %685, %cst_228 [1] : vector<16x32xf32> to vector<16xf32>
    %689 = vector.shape_cast %688 : vector<16xf32> to vector<16x1xf32>
    %cst_229 = arith.constant 3.200000e+01 : f32
    %690 = vector.broadcast %cst_229 : f32 to vector<16x1xf32>
    %691 = arith.divf %689, %690 : vector<16x1xf32>
    %692 = vector.broadcast %691 : vector<16x1xf32> to vector<16x32xf32>
    %693 = arith.subf %685, %692 : vector<16x32xf32>
    %694 = arith.mulf %693, %693 : vector<16x32xf32>
    %cst_230 = arith.constant dense<0.000000e+00> : vector<16xf32>
    %695 = vector.multi_reduction <add>, %694, %cst_230 [1] : vector<16x32xf32> to vector<16xf32>
    %696 = vector.shape_cast %695 : vector<16xf32> to vector<16x1xf32>
    %cst_231 = arith.constant 3.200000e+01 : f32
    %697 = vector.broadcast %cst_231 : f32 to vector<16x1xf32>
    %698 = arith.divf %696, %697 : vector<16x1xf32>
    %699 = vector.broadcast %691 : vector<16x1xf32> to vector<16x32xf32>
    %700 = arith.subf %685, %699 : vector<16x32xf32>
    %cst_232 = arith.constant 9.99999997E-7 : f32
    %701 = vector.broadcast %cst_232 : f32 to vector<16x1xf32>
    %702 = arith.addf %698, %701 : vector<16x1xf32>
    %703 = math.rsqrt %702 : vector<16x1xf32>
    %704 = vector.broadcast %703 : vector<16x1xf32> to vector<16x32xf32>
    %705 = arith.mulf %700, %704 : vector<16x32xf32>
    %706 = vector.broadcast %686 : vector<1x32xf32> to vector<16x32xf32>
    %707 = arith.mulf %705, %706 : vector<16x32xf32>
    %708 = vector.broadcast %687 : vector<1x32xf32> to vector<16x32xf32>
    %709 = arith.addf %707, %708 : vector<16x32xf32>
    %c0_233 = arith.constant 0 : index
    %c0_234 = arith.constant 0 : index
    %710 = vector.load %arg2[%c0_233, %c0_234] : memref<16x32xf32, #tpu.memory_space<vmem>>, vector<16x32xf32>
    %c0_235 = arith.constant 0 : index
    %c0_236 = arith.constant 0 : index
    %c0_237 = arith.constant 0 : index
    %711 = vector.load %arg19[%c0_235, %c0_236, %c0_237] : memref<2x32x32xf32, #tpu.memory_space<vmem>>, vector<1x32x32xf32>
    %712 = vector.shape_cast %711 : vector<1x32x32xf32> to vector<32x32xf32>
    %c0_238 = arith.constant 0 : index
    %c0_239 = arith.constant 0 : index
    %c0_240 = arith.constant 0 : index
    %713 = vector.load %arg20[%c0_238, %c0_239, %c0_240] : memref<2x32x32xf32, #tpu.memory_space<vmem>>, vector<1x32x32xf32>
    %714 = vector.shape_cast %713 : vector<1x32x32xf32> to vector<32x32xf32>
    %c0_241 = arith.constant 0 : index
    %c0_242 = arith.constant 0 : index
    %c0_243 = arith.constant 0 : index
    %715 = vector.load %arg21[%c0_241, %c0_242, %c0_243] : memref<2x32x32xf32, #tpu.memory_space<vmem>>, vector<1x32x32xf32>
    %716 = vector.shape_cast %715 : vector<1x32x32xf32> to vector<32x32xf32>
    %c0_244 = arith.constant 0 : index
    %c0_245 = arith.constant 0 : index
    %c0_246 = arith.constant 0 : index
    %717 = vector.load %arg22[%c0_244, %c0_245, %c0_246] : memref<2x32x32xf32, #tpu.memory_space<vmem>>, vector<1x32x32xf32>
    %718 = vector.shape_cast %717 : vector<1x32x32xf32> to vector<32x32xf32>
    %c0_247 = arith.constant 0 : index
    %c0_248 = arith.constant 0 : index
    %c0_249 = arith.constant 0 : index
    %719 = vector.load %arg17[%c0_247, %c0_248, %c0_249] : memref<2x1x32xf32, #tpu.memory_space<vmem>>, vector<1x1x32xf32>
    %720 = vector.shape_cast %719 : vector<1x1x32xf32> to vector<1x32xf32>
    %c0_250 = arith.constant 0 : index
    %c0_251 = arith.constant 0 : index
    %c0_252 = arith.constant 0 : index
    %721 = vector.load %arg18[%c0_250, %c0_251, %c0_252] : memref<2x1x32xf32, #tpu.memory_space<vmem>>, vector<1x1x32xf32>
    %722 = vector.shape_cast %721 : vector<1x1x32xf32> to vector<1x32xf32>
    %cst_253 = arith.constant dense<0.000000e+00> : vector<16xf32>
    %723 = vector.multi_reduction <add>, %710, %cst_253 [1] : vector<16x32xf32> to vector<16xf32>
    %724 = vector.shape_cast %723 : vector<16xf32> to vector<16x1xf32>
    %cst_254 = arith.constant 3.200000e+01 : f32
    %725 = vector.broadcast %cst_254 : f32 to vector<16x1xf32>
    %726 = arith.divf %724, %725 : vector<16x1xf32>
    %727 = vector.broadcast %726 : vector<16x1xf32> to vector<16x32xf32>
    %728 = arith.subf %710, %727 : vector<16x32xf32>
    %729 = arith.mulf %728, %728 : vector<16x32xf32>
    %cst_255 = arith.constant dense<0.000000e+00> : vector<16xf32>
    %730 = vector.multi_reduction <add>, %729, %cst_255 [1] : vector<16x32xf32> to vector<16xf32>
    %731 = vector.shape_cast %730 : vector<16xf32> to vector<16x1xf32>
    %cst_256 = arith.constant 3.200000e+01 : f32
    %732 = vector.broadcast %cst_256 : f32 to vector<16x1xf32>
    %733 = arith.divf %731, %732 : vector<16x1xf32>
    %734 = vector.broadcast %726 : vector<16x1xf32> to vector<16x32xf32>
    %735 = arith.subf %710, %734 : vector<16x32xf32>
    %cst_257 = arith.constant 9.99999997E-7 : f32
    %736 = vector.broadcast %cst_257 : f32 to vector<16x1xf32>
    %737 = arith.addf %733, %736 : vector<16x1xf32>
    %738 = math.rsqrt %737 : vector<16x1xf32>
    %739 = vector.broadcast %738 : vector<16x1xf32> to vector<16x32xf32>
    %740 = arith.mulf %735, %739 : vector<16x32xf32>
    %741 = vector.broadcast %720 : vector<1x32xf32> to vector<16x32xf32>
    %742 = arith.mulf %740, %741 : vector<16x32xf32>
    %743 = vector.broadcast %722 : vector<1x32xf32> to vector<16x32xf32>
    %744 = arith.addf %742, %743 : vector<16x32xf32>
    %745 = arith.truncf %744 : vector<16x32xf32> to vector<16x32xbf16>
    %746 = arith.truncf %712 : vector<32x32xf32> to vector<32x32xbf16>
    %cst_258 = arith.constant dense<0.000000e+00> : vector<16x32xf32>
    %747 = tpu.matmul %745, %746, %cst_258 {dimension_numbers = #tpu.dot_dimension_numbers<[1], [0], [0], [1], [0, 0, 1, 1], [], []>} : vector<16x32xbf16>, vector<32x32xbf16>, vector<16x32xf32> -> vector<16x32xf32>
    %748 = vector.shape_cast %747 : vector<16x32xf32> to vector<2x8x32xf32>
    %749 = arith.truncf %710 : vector<16x32xf32> to vector<16x32xbf16>
    %750 = arith.truncf %714 : vector<32x32xf32> to vector<32x32xbf16>
    %cst_259 = arith.constant dense<0.000000e+00> : vector<16x32xf32>
    %751 = tpu.matmul %749, %750, %cst_259 {dimension_numbers = #tpu.dot_dimension_numbers<[1], [0], [0], [1], [0, 0, 1, 1], [], []>} : vector<16x32xbf16>, vector<32x32xbf16>, vector<16x32xf32> -> vector<16x32xf32>
    %752 = vector.shape_cast %751 : vector<16x32xf32> to vector<2x8x32xf32>
    %753 = arith.truncf %710 : vector<16x32xf32> to vector<16x32xbf16>
    %754 = arith.truncf %716 : vector<32x32xf32> to vector<32x32xbf16>
    %cst_260 = arith.constant dense<0.000000e+00> : vector<16x32xf32>
    %755 = tpu.matmul %753, %754, %cst_260 {dimension_numbers = #tpu.dot_dimension_numbers<[1], [0], [0], [1], [0, 0, 1, 1], [], []>} : vector<16x32xbf16>, vector<32x32xbf16>, vector<16x32xf32> -> vector<16x32xf32>
    %756 = vector.shape_cast %755 : vector<16x32xf32> to vector<2x8x32xf32>
    %757 = vector.extract_strided_slice %748 {offsets = [0, 0, 0], sizes = [2, 8, 16], strides = [1, 1, 1]} : vector<2x8x32xf32> to vector<2x8x16xf32>
    %cst_261 = arith.constant 2.500000e-01 : f32
    %758 = vector.broadcast %cst_261 : f32 to vector<2x8x16xf32>
    %759 = arith.mulf %757, %758 : vector<2x8x16xf32>
    %760 = vector.extract_strided_slice %752 {offsets = [0, 0, 0], sizes = [2, 8, 16], strides = [1, 1, 1]} : vector<2x8x32xf32> to vector<2x8x16xf32>
    %761 = vector.extract_strided_slice %756 {offsets = [0, 0, 0], sizes = [2, 8, 16], strides = [1, 1, 1]} : vector<2x8x32xf32> to vector<2x8x16xf32>
    %762 = arith.truncf %759 : vector<2x8x16xf32> to vector<2x8x16xbf16>
    %763 = arith.truncf %760 : vector<2x8x16xf32> to vector<2x8x16xbf16>
    "tpu.trace_start"() <{level = 10 : i32, message = "bqd,bkd->bqk"}> : () -> ()
    %cst_262 = arith.constant dense<0.000000e+00> : vector<2x8x8xf32>
    %764 = tpu.matmul %762, %763, %cst_262 {dimension_numbers = #tpu.dot_dimension_numbers<[2], [2], [1], [1], [0, 0, 0, 1, 1, 1], [0], [0]>} : vector<2x8x16xbf16>, vector<2x8x16xbf16>, vector<2x8x8xf32> -> vector<2x8x8xf32>
    "tpu.trace_stop"() : () -> ()
    %765 = arith.addf %764, %1 : vector<2x8x8xf32>
    %cst_263 = arith.constant dense<0xFF800000> : vector<2x8xf32>
    %766 = vector.multi_reduction <maximumf>, %765, %cst_263 [2] : vector<2x8x8xf32> to vector<2x8xf32>
    %767 = vector.shape_cast %766 : vector<2x8xf32> to vector<2x8x1xf32>
    %768 = vector.broadcast %767 : vector<2x8x1xf32> to vector<2x8x8xf32>
    %769 = arith.subf %765, %768 : vector<2x8x8xf32>
    %770 = math.exp %769 : vector<2x8x8xf32>
    %cst_264 = arith.constant dense<0.000000e+00> : vector<2x8xf32>
    %771 = vector.multi_reduction <add>, %770, %cst_264 [2] : vector<2x8x8xf32> to vector<2x8xf32>
    %772 = vector.shape_cast %771 : vector<2x8xf32> to vector<2x8x1xf32>
    %773 = tpu.reciprocal %772 {approx = true} : vector<2x8x1xf32> -> vector<2x8x1xf32>
    %774 = vector.broadcast %773 : vector<2x8x1xf32> to vector<2x8x8xf32>
    %775 = arith.mulf %770, %774 : vector<2x8x8xf32>
    %776 = arith.truncf %775 : vector<2x8x8xf32> to vector<2x8x8xbf16>
    %777 = arith.truncf %761 : vector<2x8x16xf32> to vector<2x8x16xbf16>
    "tpu.trace_start"() <{level = 10 : i32, message = "bqk,bkd->bqd"}> : () -> ()
    %cst_265 = arith.constant dense<0.000000e+00> : vector<2x8x16xf32>
    %778 = tpu.matmul %776, %777, %cst_265 {dimension_numbers = #tpu.dot_dimension_numbers<[2], [1], [1], [2], [0, 0, 0, 1, 1, 2], [0], [0]>} : vector<2x8x8xbf16>, vector<2x8x16xbf16>, vector<2x8x16xf32> -> vector<2x8x16xf32>
    "tpu.trace_stop"() : () -> ()
    %779 = vector.shape_cast %778 : vector<2x8x16xf32> to vector<16x16xf32>
    %780 = vector.extract_strided_slice %718 {offsets = [0, 0], sizes = [16, 32], strides = [1, 1]} : vector<32x32xf32> to vector<16x32xf32>
    %781 = arith.truncf %779 : vector<16x16xf32> to vector<16x16xbf16>
    %782 = arith.truncf %780 : vector<16x32xf32> to vector<16x32xbf16>
    %cst_266 = arith.constant dense<0.000000e+00> : vector<16x32xf32>
    %783 = tpu.matmul %781, %782, %cst_266 {dimension_numbers = #tpu.dot_dimension_numbers<[1], [0], [0], [1], [0, 0, 1, 1], [], []>} : vector<16x16xbf16>, vector<16x32xbf16>, vector<16x32xf32> -> vector<16x32xf32>
    %784 = arith.addf %710, %783 : vector<16x32xf32>
    %785 = vector.extract_strided_slice %748 {offsets = [0, 0, 16], sizes = [2, 8, 16], strides = [1, 1, 1]} : vector<2x8x32xf32> to vector<2x8x16xf32>
    %cst_267 = arith.constant 2.500000e-01 : f32
    %786 = vector.broadcast %cst_267 : f32 to vector<2x8x16xf32>
    %787 = arith.mulf %785, %786 : vector<2x8x16xf32>
    %788 = vector.extract_strided_slice %752 {offsets = [0, 0, 16], sizes = [2, 8, 16], strides = [1, 1, 1]} : vector<2x8x32xf32> to vector<2x8x16xf32>
    %789 = vector.extract_strided_slice %756 {offsets = [0, 0, 16], sizes = [2, 8, 16], strides = [1, 1, 1]} : vector<2x8x32xf32> to vector<2x8x16xf32>
    %790 = arith.truncf %787 : vector<2x8x16xf32> to vector<2x8x16xbf16>
    %791 = arith.truncf %788 : vector<2x8x16xf32> to vector<2x8x16xbf16>
    "tpu.trace_start"() <{level = 10 : i32, message = "bqd,bkd->bqk"}> : () -> ()
    %cst_268 = arith.constant dense<0.000000e+00> : vector<2x8x8xf32>
    %792 = tpu.matmul %790, %791, %cst_268 {dimension_numbers = #tpu.dot_dimension_numbers<[2], [2], [1], [1], [0, 0, 0, 1, 1, 1], [0], [0]>} : vector<2x8x16xbf16>, vector<2x8x16xbf16>, vector<2x8x8xf32> -> vector<2x8x8xf32>
    "tpu.trace_stop"() : () -> ()
    %793 = arith.addf %792, %1 : vector<2x8x8xf32>
    %cst_269 = arith.constant dense<0xFF800000> : vector<2x8xf32>
    %794 = vector.multi_reduction <maximumf>, %793, %cst_269 [2] : vector<2x8x8xf32> to vector<2x8xf32>
    %795 = vector.shape_cast %794 : vector<2x8xf32> to vector<2x8x1xf32>
    %796 = vector.broadcast %795 : vector<2x8x1xf32> to vector<2x8x8xf32>
    %797 = arith.subf %793, %796 : vector<2x8x8xf32>
    %798 = math.exp %797 : vector<2x8x8xf32>
    %cst_270 = arith.constant dense<0.000000e+00> : vector<2x8xf32>
    %799 = vector.multi_reduction <add>, %798, %cst_270 [2] : vector<2x8x8xf32> to vector<2x8xf32>
    %800 = vector.shape_cast %799 : vector<2x8xf32> to vector<2x8x1xf32>
    %801 = tpu.reciprocal %800 {approx = true} : vector<2x8x1xf32> -> vector<2x8x1xf32>
    %802 = vector.broadcast %801 : vector<2x8x1xf32> to vector<2x8x8xf32>
    %803 = arith.mulf %798, %802 : vector<2x8x8xf32>
    %804 = arith.truncf %803 : vector<2x8x8xf32> to vector<2x8x8xbf16>
    %805 = arith.truncf %789 : vector<2x8x16xf32> to vector<2x8x16xbf16>
    "tpu.trace_start"() <{level = 10 : i32, message = "bqk,bkd->bqd"}> : () -> ()
    %cst_271 = arith.constant dense<0.000000e+00> : vector<2x8x16xf32>
    %806 = tpu.matmul %804, %805, %cst_271 {dimension_numbers = #tpu.dot_dimension_numbers<[2], [1], [1], [2], [0, 0, 0, 1, 1, 2], [0], [0]>} : vector<2x8x8xbf16>, vector<2x8x16xbf16>, vector<2x8x16xf32> -> vector<2x8x16xf32>
    "tpu.trace_stop"() : () -> ()
    %807 = vector.shape_cast %806 : vector<2x8x16xf32> to vector<16x16xf32>
    %808 = vector.extract_strided_slice %718 {offsets = [16, 0], sizes = [16, 32], strides = [1, 1]} : vector<32x32xf32> to vector<16x32xf32>
    %809 = arith.truncf %807 : vector<16x16xf32> to vector<16x16xbf16>
    %810 = arith.truncf %808 : vector<16x32xf32> to vector<16x32xbf16>
    %cst_272 = arith.constant dense<0.000000e+00> : vector<16x32xf32>
    %811 = tpu.matmul %809, %810, %cst_272 {dimension_numbers = #tpu.dot_dimension_numbers<[1], [0], [0], [1], [0, 0, 1, 1], [], []>} : vector<16x16xbf16>, vector<16x32xbf16>, vector<16x32xf32> -> vector<16x32xf32>
    %812 = arith.addf %784, %811 : vector<16x32xf32>
    %c0_273 = arith.constant 0 : index
    %c0_274 = arith.constant 0 : index
    %c0_275 = arith.constant 0 : index
    %813 = vector.load %arg25[%c0_273, %c0_274, %c0_275] : memref<2x32x32xf32, #tpu.memory_space<vmem>>, vector<1x32x32xf32>
    %814 = vector.shape_cast %813 : vector<1x32x32xf32> to vector<32x32xf32>
    %c0_276 = arith.constant 0 : index
    %c0_277 = arith.constant 0 : index
    %c0_278 = arith.constant 0 : index
    %815 = vector.load %arg26[%c0_276, %c0_277, %c0_278] : memref<2x32x32xf32, #tpu.memory_space<vmem>>, vector<1x32x32xf32>
    %816 = vector.shape_cast %815 : vector<1x32x32xf32> to vector<32x32xf32>
    %c0_279 = arith.constant 0 : index
    %c0_280 = arith.constant 0 : index
    %c0_281 = arith.constant 0 : index
    %817 = vector.load %arg27[%c0_279, %c0_280, %c0_281] : memref<2x32x32xf32, #tpu.memory_space<vmem>>, vector<1x32x32xf32>
    %818 = vector.shape_cast %817 : vector<1x32x32xf32> to vector<32x32xf32>
    %c0_282 = arith.constant 0 : index
    %c0_283 = arith.constant 0 : index
    %c0_284 = arith.constant 0 : index
    %819 = vector.load %arg28[%c0_282, %c0_283, %c0_284] : memref<2x32x32xf32, #tpu.memory_space<vmem>>, vector<1x32x32xf32>
    %820 = vector.shape_cast %819 : vector<1x32x32xf32> to vector<32x32xf32>
    %c0_285 = arith.constant 0 : index
    %c0_286 = arith.constant 0 : index
    %c0_287 = arith.constant 0 : index
    %821 = vector.load %arg23[%c0_285, %c0_286, %c0_287] : memref<2x1x32xf32, #tpu.memory_space<vmem>>, vector<1x1x32xf32>
    %822 = vector.shape_cast %821 : vector<1x1x32xf32> to vector<1x32xf32>
    %c0_288 = arith.constant 0 : index
    %c0_289 = arith.constant 0 : index
    %c0_290 = arith.constant 0 : index
    %823 = vector.load %arg24[%c0_288, %c0_289, %c0_290] : memref<2x1x32xf32, #tpu.memory_space<vmem>>, vector<1x1x32xf32>
    %824 = vector.shape_cast %823 : vector<1x1x32xf32> to vector<1x32xf32>
    %cst_291 = arith.constant dense<0.000000e+00> : vector<16xf32>
    %825 = vector.multi_reduction <add>, %812, %cst_291 [1] : vector<16x32xf32> to vector<16xf32>
    %826 = vector.shape_cast %825 : vector<16xf32> to vector<16x1xf32>
    %cst_292 = arith.constant 3.200000e+01 : f32
    %827 = vector.broadcast %cst_292 : f32 to vector<16x1xf32>
    %828 = arith.divf %826, %827 : vector<16x1xf32>
    %829 = vector.broadcast %828 : vector<16x1xf32> to vector<16x32xf32>
    %830 = arith.subf %812, %829 : vector<16x32xf32>
    %831 = arith.mulf %830, %830 : vector<16x32xf32>
    %cst_293 = arith.constant dense<0.000000e+00> : vector<16xf32>
    %832 = vector.multi_reduction <add>, %831, %cst_293 [1] : vector<16x32xf32> to vector<16xf32>
    %833 = vector.shape_cast %832 : vector<16xf32> to vector<16x1xf32>
    %cst_294 = arith.constant 3.200000e+01 : f32
    %834 = vector.broadcast %cst_294 : f32 to vector<16x1xf32>
    %835 = arith.divf %833, %834 : vector<16x1xf32>
    %836 = vector.broadcast %828 : vector<16x1xf32> to vector<16x32xf32>
    %837 = arith.subf %812, %836 : vector<16x32xf32>
    %cst_295 = arith.constant 9.99999997E-7 : f32
    %838 = vector.broadcast %cst_295 : f32 to vector<16x1xf32>
    %839 = arith.addf %835, %838 : vector<16x1xf32>
    %840 = math.rsqrt %839 : vector<16x1xf32>
    %841 = vector.broadcast %840 : vector<16x1xf32> to vector<16x32xf32>
    %842 = arith.mulf %837, %841 : vector<16x32xf32>
    %843 = vector.broadcast %822 : vector<1x32xf32> to vector<16x32xf32>
    %844 = arith.mulf %842, %843 : vector<16x32xf32>
    %845 = vector.broadcast %824 : vector<1x32xf32> to vector<16x32xf32>
    %846 = arith.addf %844, %845 : vector<16x32xf32>
    %847 = arith.truncf %846 : vector<16x32xf32> to vector<16x32xbf16>
    %848 = arith.truncf %814 : vector<32x32xf32> to vector<32x32xbf16>
    %cst_296 = arith.constant dense<0.000000e+00> : vector<16x32xf32>
    %849 = tpu.matmul %847, %848, %cst_296 {dimension_numbers = #tpu.dot_dimension_numbers<[1], [0], [0], [1], [0, 0, 1, 1], [], []>} : vector<16x32xbf16>, vector<32x32xbf16>, vector<16x32xf32> -> vector<16x32xf32>
    %850 = vector.shape_cast %849 : vector<16x32xf32> to vector<2x8x32xf32>
    %851 = arith.truncf %709 : vector<16x32xf32> to vector<16x32xbf16>
    %852 = arith.truncf %816 : vector<32x32xf32> to vector<32x32xbf16>
    %cst_297 = arith.constant dense<0.000000e+00> : vector<16x32xf32>
    %853 = tpu.matmul %851, %852, %cst_297 {dimension_numbers = #tpu.dot_dimension_numbers<[1], [0], [0], [1], [0, 0, 1, 1], [], []>} : vector<16x32xbf16>, vector<32x32xbf16>, vector<16x32xf32> -> vector<16x32xf32>
    %854 = vector.shape_cast %853 : vector<16x32xf32> to vector<2x8x32xf32>
    %855 = arith.truncf %709 : vector<16x32xf32> to vector<16x32xbf16>
    %856 = arith.truncf %818 : vector<32x32xf32> to vector<32x32xbf16>
    %cst_298 = arith.constant dense<0.000000e+00> : vector<16x32xf32>
    %857 = tpu.matmul %855, %856, %cst_298 {dimension_numbers = #tpu.dot_dimension_numbers<[1], [0], [0], [1], [0, 0, 1, 1], [], []>} : vector<16x32xbf16>, vector<32x32xbf16>, vector<16x32xf32> -> vector<16x32xf32>
    %858 = vector.shape_cast %857 : vector<16x32xf32> to vector<2x8x32xf32>
    %859 = vector.extract_strided_slice %850 {offsets = [0, 0, 0], sizes = [2, 8, 16], strides = [1, 1, 1]} : vector<2x8x32xf32> to vector<2x8x16xf32>
    %cst_299 = arith.constant 2.500000e-01 : f32
    %860 = vector.broadcast %cst_299 : f32 to vector<2x8x16xf32>
    %861 = arith.mulf %859, %860 : vector<2x8x16xf32>
    %862 = vector.extract_strided_slice %854 {offsets = [0, 0, 0], sizes = [2, 8, 16], strides = [1, 1, 1]} : vector<2x8x32xf32> to vector<2x8x16xf32>
    %863 = vector.extract_strided_slice %858 {offsets = [0, 0, 0], sizes = [2, 8, 16], strides = [1, 1, 1]} : vector<2x8x32xf32> to vector<2x8x16xf32>
    %864 = arith.truncf %861 : vector<2x8x16xf32> to vector<2x8x16xbf16>
    %865 = arith.truncf %862 : vector<2x8x16xf32> to vector<2x8x16xbf16>
    "tpu.trace_start"() <{level = 10 : i32, message = "bqd,bkd->bqk"}> : () -> ()
    %cst_300 = arith.constant dense<0.000000e+00> : vector<2x8x8xf32>
    %866 = tpu.matmul %864, %865, %cst_300 {dimension_numbers = #tpu.dot_dimension_numbers<[2], [2], [1], [1], [0, 0, 0, 1, 1, 1], [0], [0]>} : vector<2x8x16xbf16>, vector<2x8x16xbf16>, vector<2x8x8xf32> -> vector<2x8x8xf32>
    "tpu.trace_stop"() : () -> ()
    %867 = arith.addf %866, %2 : vector<2x8x8xf32>
    %cst_301 = arith.constant dense<0xFF800000> : vector<2x8xf32>
    %868 = vector.multi_reduction <maximumf>, %867, %cst_301 [2] : vector<2x8x8xf32> to vector<2x8xf32>
    %869 = vector.shape_cast %868 : vector<2x8xf32> to vector<2x8x1xf32>
    %870 = vector.broadcast %869 : vector<2x8x1xf32> to vector<2x8x8xf32>
    %871 = arith.subf %867, %870 : vector<2x8x8xf32>
    %872 = math.exp %871 : vector<2x8x8xf32>
    %cst_302 = arith.constant dense<0.000000e+00> : vector<2x8xf32>
    %873 = vector.multi_reduction <add>, %872, %cst_302 [2] : vector<2x8x8xf32> to vector<2x8xf32>
    %874 = vector.shape_cast %873 : vector<2x8xf32> to vector<2x8x1xf32>
    %875 = tpu.reciprocal %874 {approx = true} : vector<2x8x1xf32> -> vector<2x8x1xf32>
    %876 = vector.broadcast %875 : vector<2x8x1xf32> to vector<2x8x8xf32>
    %877 = arith.mulf %872, %876 : vector<2x8x8xf32>
    %878 = arith.truncf %877 : vector<2x8x8xf32> to vector<2x8x8xbf16>
    %879 = arith.truncf %863 : vector<2x8x16xf32> to vector<2x8x16xbf16>
    "tpu.trace_start"() <{level = 10 : i32, message = "bqk,bkd->bqd"}> : () -> ()
    %cst_303 = arith.constant dense<0.000000e+00> : vector<2x8x16xf32>
    %880 = tpu.matmul %878, %879, %cst_303 {dimension_numbers = #tpu.dot_dimension_numbers<[2], [1], [1], [2], [0, 0, 0, 1, 1, 2], [0], [0]>} : vector<2x8x8xbf16>, vector<2x8x16xbf16>, vector<2x8x16xf32> -> vector<2x8x16xf32>
    "tpu.trace_stop"() : () -> ()
    %881 = vector.shape_cast %880 : vector<2x8x16xf32> to vector<16x16xf32>
    %882 = vector.extract_strided_slice %820 {offsets = [0, 0], sizes = [16, 32], strides = [1, 1]} : vector<32x32xf32> to vector<16x32xf32>
    %883 = arith.truncf %881 : vector<16x16xf32> to vector<16x16xbf16>
    %884 = arith.truncf %882 : vector<16x32xf32> to vector<16x32xbf16>
    %cst_304 = arith.constant dense<0.000000e+00> : vector<16x32xf32>
    %885 = tpu.matmul %883, %884, %cst_304 {dimension_numbers = #tpu.dot_dimension_numbers<[1], [0], [0], [1], [0, 0, 1, 1], [], []>} : vector<16x16xbf16>, vector<16x32xbf16>, vector<16x32xf32> -> vector<16x32xf32>
    %886 = arith.addf %812, %885 : vector<16x32xf32>
    %887 = vector.extract_strided_slice %850 {offsets = [0, 0, 16], sizes = [2, 8, 16], strides = [1, 1, 1]} : vector<2x8x32xf32> to vector<2x8x16xf32>
    %cst_305 = arith.constant 2.500000e-01 : f32
    %888 = vector.broadcast %cst_305 : f32 to vector<2x8x16xf32>
    %889 = arith.mulf %887, %888 : vector<2x8x16xf32>
    %890 = vector.extract_strided_slice %854 {offsets = [0, 0, 16], sizes = [2, 8, 16], strides = [1, 1, 1]} : vector<2x8x32xf32> to vector<2x8x16xf32>
    %891 = vector.extract_strided_slice %858 {offsets = [0, 0, 16], sizes = [2, 8, 16], strides = [1, 1, 1]} : vector<2x8x32xf32> to vector<2x8x16xf32>
    %892 = arith.truncf %889 : vector<2x8x16xf32> to vector<2x8x16xbf16>
    %893 = arith.truncf %890 : vector<2x8x16xf32> to vector<2x8x16xbf16>
    "tpu.trace_start"() <{level = 10 : i32, message = "bqd,bkd->bqk"}> : () -> ()
    %cst_306 = arith.constant dense<0.000000e+00> : vector<2x8x8xf32>
    %894 = tpu.matmul %892, %893, %cst_306 {dimension_numbers = #tpu.dot_dimension_numbers<[2], [2], [1], [1], [0, 0, 0, 1, 1, 1], [0], [0]>} : vector<2x8x16xbf16>, vector<2x8x16xbf16>, vector<2x8x8xf32> -> vector<2x8x8xf32>
    "tpu.trace_stop"() : () -> ()
    %895 = arith.addf %894, %2 : vector<2x8x8xf32>
    %cst_307 = arith.constant dense<0xFF800000> : vector<2x8xf32>
    %896 = vector.multi_reduction <maximumf>, %895, %cst_307 [2] : vector<2x8x8xf32> to vector<2x8xf32>
    %897 = vector.shape_cast %896 : vector<2x8xf32> to vector<2x8x1xf32>
    %898 = vector.broadcast %897 : vector<2x8x1xf32> to vector<2x8x8xf32>
    %899 = arith.subf %895, %898 : vector<2x8x8xf32>
    %900 = math.exp %899 : vector<2x8x8xf32>
    %cst_308 = arith.constant dense<0.000000e+00> : vector<2x8xf32>
    %901 = vector.multi_reduction <add>, %900, %cst_308 [2] : vector<2x8x8xf32> to vector<2x8xf32>
    %902 = vector.shape_cast %901 : vector<2x8xf32> to vector<2x8x1xf32>
    %903 = tpu.reciprocal %902 {approx = true} : vector<2x8x1xf32> -> vector<2x8x1xf32>
    %904 = vector.broadcast %903 : vector<2x8x1xf32> to vector<2x8x8xf32>
    %905 = arith.mulf %900, %904 : vector<2x8x8xf32>
    %906 = arith.truncf %905 : vector<2x8x8xf32> to vector<2x8x8xbf16>
    %907 = arith.truncf %891 : vector<2x8x16xf32> to vector<2x8x16xbf16>
    "tpu.trace_start"() <{level = 10 : i32, message = "bqk,bkd->bqd"}> : () -> ()
    %cst_309 = arith.constant dense<0.000000e+00> : vector<2x8x16xf32>
    %908 = tpu.matmul %906, %907, %cst_309 {dimension_numbers = #tpu.dot_dimension_numbers<[2], [1], [1], [2], [0, 0, 0, 1, 1, 2], [0], [0]>} : vector<2x8x8xbf16>, vector<2x8x16xbf16>, vector<2x8x16xf32> -> vector<2x8x16xf32>
    "tpu.trace_stop"() : () -> ()
    %909 = vector.shape_cast %908 : vector<2x8x16xf32> to vector<16x16xf32>
    %910 = vector.extract_strided_slice %820 {offsets = [16, 0], sizes = [16, 32], strides = [1, 1]} : vector<32x32xf32> to vector<16x32xf32>
    %911 = arith.truncf %909 : vector<16x16xf32> to vector<16x16xbf16>
    %912 = arith.truncf %910 : vector<16x32xf32> to vector<16x32xbf16>
    %cst_310 = arith.constant dense<0.000000e+00> : vector<16x32xf32>
    %913 = tpu.matmul %911, %912, %cst_310 {dimension_numbers = #tpu.dot_dimension_numbers<[1], [0], [0], [1], [0, 0, 1, 1], [], []>} : vector<16x16xbf16>, vector<16x32xbf16>, vector<16x32xf32> -> vector<16x32xf32>
    %914 = arith.addf %886, %913 : vector<16x32xf32>
    %c0_311 = arith.constant 0 : index
    %c0_312 = arith.constant 0 : index
    %c0_313 = arith.constant 0 : index
    %915 = vector.load %arg29[%c0_311, %c0_312, %c0_313] : memref<2x1x32xf32, #tpu.memory_space<vmem>>, vector<1x1x32xf32>
    %916 = vector.shape_cast %915 : vector<1x1x32xf32> to vector<1x32xf32>
    %c0_314 = arith.constant 0 : index
    %c0_315 = arith.constant 0 : index
    %c0_316 = arith.constant 0 : index
    %917 = vector.load %arg30[%c0_314, %c0_315, %c0_316] : memref<2x1x32xf32, #tpu.memory_space<vmem>>, vector<1x1x32xf32>
    %918 = vector.shape_cast %917 : vector<1x1x32xf32> to vector<1x32xf32>
    %c0_317 = arith.constant 0 : index
    %c0_318 = arith.constant 0 : index
    %c0_319 = arith.constant 0 : index
    %919 = vector.load %arg31[%c0_317, %c0_318, %c0_319] : memref<2x32x64xf32, #tpu.memory_space<vmem>>, vector<1x32x64xf32>
    %920 = vector.shape_cast %919 : vector<1x32x64xf32> to vector<32x64xf32>
    %c0_320 = arith.constant 0 : index
    %c0_321 = arith.constant 0 : index
    %c0_322 = arith.constant 0 : index
    %921 = vector.load %arg32[%c0_320, %c0_321, %c0_322] : memref<2x1x64xf32, #tpu.memory_space<vmem>>, vector<1x1x64xf32>
    %922 = vector.shape_cast %921 : vector<1x1x64xf32> to vector<1x64xf32>
    %c0_323 = arith.constant 0 : index
    %c0_324 = arith.constant 0 : index
    %c0_325 = arith.constant 0 : index
    %923 = vector.load %arg33[%c0_323, %c0_324, %c0_325] : memref<2x64x32xf32, #tpu.memory_space<vmem>>, vector<1x64x32xf32>
    %924 = vector.shape_cast %923 : vector<1x64x32xf32> to vector<64x32xf32>
    %c0_326 = arith.constant 0 : index
    %c0_327 = arith.constant 0 : index
    %c0_328 = arith.constant 0 : index
    %925 = vector.load %arg34[%c0_326, %c0_327, %c0_328] : memref<2x1x32xf32, #tpu.memory_space<vmem>>, vector<1x1x32xf32>
    %926 = vector.shape_cast %925 : vector<1x1x32xf32> to vector<1x32xf32>
    %cst_329 = arith.constant dense<0.000000e+00> : vector<16xf32>
    %927 = vector.multi_reduction <add>, %914, %cst_329 [1] : vector<16x32xf32> to vector<16xf32>
    %928 = vector.shape_cast %927 : vector<16xf32> to vector<16x1xf32>
    %cst_330 = arith.constant 3.200000e+01 : f32
    %929 = vector.broadcast %cst_330 : f32 to vector<16x1xf32>
    %930 = arith.divf %928, %929 : vector<16x1xf32>
    %931 = vector.broadcast %930 : vector<16x1xf32> to vector<16x32xf32>
    %932 = arith.subf %914, %931 : vector<16x32xf32>
    %933 = arith.mulf %932, %932 : vector<16x32xf32>
    %cst_331 = arith.constant dense<0.000000e+00> : vector<16xf32>
    %934 = vector.multi_reduction <add>, %933, %cst_331 [1] : vector<16x32xf32> to vector<16xf32>
    %935 = vector.shape_cast %934 : vector<16xf32> to vector<16x1xf32>
    %cst_332 = arith.constant 3.200000e+01 : f32
    %936 = vector.broadcast %cst_332 : f32 to vector<16x1xf32>
    %937 = arith.divf %935, %936 : vector<16x1xf32>
    %938 = vector.broadcast %930 : vector<16x1xf32> to vector<16x32xf32>
    %939 = arith.subf %914, %938 : vector<16x32xf32>
    %cst_333 = arith.constant 9.99999997E-7 : f32
    %940 = vector.broadcast %cst_333 : f32 to vector<16x1xf32>
    %941 = arith.addf %937, %940 : vector<16x1xf32>
    %942 = math.rsqrt %941 : vector<16x1xf32>
    %943 = vector.broadcast %942 : vector<16x1xf32> to vector<16x32xf32>
    %944 = arith.mulf %939, %943 : vector<16x32xf32>
    %945 = vector.broadcast %916 : vector<1x32xf32> to vector<16x32xf32>
    %946 = arith.mulf %944, %945 : vector<16x32xf32>
    %947 = vector.broadcast %918 : vector<1x32xf32> to vector<16x32xf32>
    %948 = arith.addf %946, %947 : vector<16x32xf32>
    %949 = arith.truncf %948 : vector<16x32xf32> to vector<16x32xbf16>
    %950 = arith.truncf %920 : vector<32x64xf32> to vector<32x64xbf16>
    %cst_334 = arith.constant dense<0.000000e+00> : vector<16x64xf32>
    %951 = tpu.matmul %949, %950, %cst_334 {dimension_numbers = #tpu.dot_dimension_numbers<[1], [0], [0], [1], [0, 0, 1, 1], [], []>} : vector<16x32xbf16>, vector<32x64xbf16>, vector<16x64xf32> -> vector<16x64xf32>
    %952 = vector.broadcast %922 : vector<1x64xf32> to vector<16x64xf32>
    %953 = arith.addf %951, %952 : vector<16x64xf32>
    %cst_335 = arith.constant 0.000000e+00 : f32
    %954 = vector.broadcast %cst_335 : f32 to vector<16x64xf32>
    %955 = arith.maximumf %953, %954 : vector<16x64xf32>
    %956 = arith.truncf %955 : vector<16x64xf32> to vector<16x64xbf16>
    %957 = arith.truncf %924 : vector<64x32xf32> to vector<64x32xbf16>
    %cst_336 = arith.constant dense<0.000000e+00> : vector<16x32xf32>
    %958 = tpu.matmul %956, %957, %cst_336 {dimension_numbers = #tpu.dot_dimension_numbers<[1], [0], [0], [1], [0, 0, 1, 1], [], []>} : vector<16x64xbf16>, vector<64x32xbf16>, vector<16x32xf32> -> vector<16x32xf32>
    %959 = vector.broadcast %926 : vector<1x32xf32> to vector<16x32xf32>
    %960 = arith.addf %958, %959 : vector<16x32xf32>
    %961 = arith.addf %960, %914 : vector<16x32xf32>
    %c1_337 = arith.constant 1 : index
    %c0_338 = arith.constant 0 : index
    %c0_339 = arith.constant 0 : index
    %962 = vector.load %arg19[%c1_337, %c0_338, %c0_339] : memref<2x32x32xf32, #tpu.memory_space<vmem>>, vector<1x32x32xf32>
    %963 = vector.shape_cast %962 : vector<1x32x32xf32> to vector<32x32xf32>
    %c1_340 = arith.constant 1 : index
    %c0_341 = arith.constant 0 : index
    %c0_342 = arith.constant 0 : index
    %964 = vector.load %arg20[%c1_340, %c0_341, %c0_342] : memref<2x32x32xf32, #tpu.memory_space<vmem>>, vector<1x32x32xf32>
    %965 = vector.shape_cast %964 : vector<1x32x32xf32> to vector<32x32xf32>
    %c1_343 = arith.constant 1 : index
    %c0_344 = arith.constant 0 : index
    %c0_345 = arith.constant 0 : index
    %966 = vector.load %arg21[%c1_343, %c0_344, %c0_345] : memref<2x32x32xf32, #tpu.memory_space<vmem>>, vector<1x32x32xf32>
    %967 = vector.shape_cast %966 : vector<1x32x32xf32> to vector<32x32xf32>
    %c1_346 = arith.constant 1 : index
    %c0_347 = arith.constant 0 : index
    %c0_348 = arith.constant 0 : index
    %968 = vector.load %arg22[%c1_346, %c0_347, %c0_348] : memref<2x32x32xf32, #tpu.memory_space<vmem>>, vector<1x32x32xf32>
    %969 = vector.shape_cast %968 : vector<1x32x32xf32> to vector<32x32xf32>
    %c1_349 = arith.constant 1 : index
    %c0_350 = arith.constant 0 : index
    %c0_351 = arith.constant 0 : index
    %970 = vector.load %arg17[%c1_349, %c0_350, %c0_351] : memref<2x1x32xf32, #tpu.memory_space<vmem>>, vector<1x1x32xf32>
    %971 = vector.shape_cast %970 : vector<1x1x32xf32> to vector<1x32xf32>
    %c1_352 = arith.constant 1 : index
    %c0_353 = arith.constant 0 : index
    %c0_354 = arith.constant 0 : index
    %972 = vector.load %arg18[%c1_352, %c0_353, %c0_354] : memref<2x1x32xf32, #tpu.memory_space<vmem>>, vector<1x1x32xf32>
    %973 = vector.shape_cast %972 : vector<1x1x32xf32> to vector<1x32xf32>
    %cst_355 = arith.constant dense<0.000000e+00> : vector<16xf32>
    %974 = vector.multi_reduction <add>, %961, %cst_355 [1] : vector<16x32xf32> to vector<16xf32>
    %975 = vector.shape_cast %974 : vector<16xf32> to vector<16x1xf32>
    %cst_356 = arith.constant 3.200000e+01 : f32
    %976 = vector.broadcast %cst_356 : f32 to vector<16x1xf32>
    %977 = arith.divf %975, %976 : vector<16x1xf32>
    %978 = vector.broadcast %977 : vector<16x1xf32> to vector<16x32xf32>
    %979 = arith.subf %961, %978 : vector<16x32xf32>
    %980 = arith.mulf %979, %979 : vector<16x32xf32>
    %cst_357 = arith.constant dense<0.000000e+00> : vector<16xf32>
    %981 = vector.multi_reduction <add>, %980, %cst_357 [1] : vector<16x32xf32> to vector<16xf32>
    %982 = vector.shape_cast %981 : vector<16xf32> to vector<16x1xf32>
    %cst_358 = arith.constant 3.200000e+01 : f32
    %983 = vector.broadcast %cst_358 : f32 to vector<16x1xf32>
    %984 = arith.divf %982, %983 : vector<16x1xf32>
    %985 = vector.broadcast %977 : vector<16x1xf32> to vector<16x32xf32>
    %986 = arith.subf %961, %985 : vector<16x32xf32>
    %cst_359 = arith.constant 9.99999997E-7 : f32
    %987 = vector.broadcast %cst_359 : f32 to vector<16x1xf32>
    %988 = arith.addf %984, %987 : vector<16x1xf32>
    %989 = math.rsqrt %988 : vector<16x1xf32>
    %990 = vector.broadcast %989 : vector<16x1xf32> to vector<16x32xf32>
    %991 = arith.mulf %986, %990 : vector<16x32xf32>
    %992 = vector.broadcast %971 : vector<1x32xf32> to vector<16x32xf32>
    %993 = arith.mulf %991, %992 : vector<16x32xf32>
    %994 = vector.broadcast %973 : vector<1x32xf32> to vector<16x32xf32>
    %995 = arith.addf %993, %994 : vector<16x32xf32>
    %996 = arith.truncf %995 : vector<16x32xf32> to vector<16x32xbf16>
    %997 = arith.truncf %963 : vector<32x32xf32> to vector<32x32xbf16>
    %cst_360 = arith.constant dense<0.000000e+00> : vector<16x32xf32>
    %998 = tpu.matmul %996, %997, %cst_360 {dimension_numbers = #tpu.dot_dimension_numbers<[1], [0], [0], [1], [0, 0, 1, 1], [], []>} : vector<16x32xbf16>, vector<32x32xbf16>, vector<16x32xf32> -> vector<16x32xf32>
    %999 = vector.shape_cast %998 : vector<16x32xf32> to vector<2x8x32xf32>
    %1000 = arith.truncf %961 : vector<16x32xf32> to vector<16x32xbf16>
    %1001 = arith.truncf %965 : vector<32x32xf32> to vector<32x32xbf16>
    %cst_361 = arith.constant dense<0.000000e+00> : vector<16x32xf32>
    %1002 = tpu.matmul %1000, %1001, %cst_361 {dimension_numbers = #tpu.dot_dimension_numbers<[1], [0], [0], [1], [0, 0, 1, 1], [], []>} : vector<16x32xbf16>, vector<32x32xbf16>, vector<16x32xf32> -> vector<16x32xf32>
    %1003 = vector.shape_cast %1002 : vector<16x32xf32> to vector<2x8x32xf32>
    %1004 = arith.truncf %961 : vector<16x32xf32> to vector<16x32xbf16>
    %1005 = arith.truncf %967 : vector<32x32xf32> to vector<32x32xbf16>
    %cst_362 = arith.constant dense<0.000000e+00> : vector<16x32xf32>
    %1006 = tpu.matmul %1004, %1005, %cst_362 {dimension_numbers = #tpu.dot_dimension_numbers<[1], [0], [0], [1], [0, 0, 1, 1], [], []>} : vector<16x32xbf16>, vector<32x32xbf16>, vector<16x32xf32> -> vector<16x32xf32>
    %1007 = vector.shape_cast %1006 : vector<16x32xf32> to vector<2x8x32xf32>
    %1008 = vector.extract_strided_slice %999 {offsets = [0, 0, 0], sizes = [2, 8, 16], strides = [1, 1, 1]} : vector<2x8x32xf32> to vector<2x8x16xf32>
    %cst_363 = arith.constant 2.500000e-01 : f32
    %1009 = vector.broadcast %cst_363 : f32 to vector<2x8x16xf32>
    %1010 = arith.mulf %1008, %1009 : vector<2x8x16xf32>
    %1011 = vector.extract_strided_slice %1003 {offsets = [0, 0, 0], sizes = [2, 8, 16], strides = [1, 1, 1]} : vector<2x8x32xf32> to vector<2x8x16xf32>
    %1012 = vector.extract_strided_slice %1007 {offsets = [0, 0, 0], sizes = [2, 8, 16], strides = [1, 1, 1]} : vector<2x8x32xf32> to vector<2x8x16xf32>
    %1013 = arith.truncf %1010 : vector<2x8x16xf32> to vector<2x8x16xbf16>
    %1014 = arith.truncf %1011 : vector<2x8x16xf32> to vector<2x8x16xbf16>
    "tpu.trace_start"() <{level = 10 : i32, message = "bqd,bkd->bqk"}> : () -> ()
    %cst_364 = arith.constant dense<0.000000e+00> : vector<2x8x8xf32>
    %1015 = tpu.matmul %1013, %1014, %cst_364 {dimension_numbers = #tpu.dot_dimension_numbers<[2], [2], [1], [1], [0, 0, 0, 1, 1, 1], [0], [0]>} : vector<2x8x16xbf16>, vector<2x8x16xbf16>, vector<2x8x8xf32> -> vector<2x8x8xf32>
    "tpu.trace_stop"() : () -> ()
    %1016 = arith.addf %1015, %1 : vector<2x8x8xf32>
    %cst_365 = arith.constant dense<0xFF800000> : vector<2x8xf32>
    %1017 = vector.multi_reduction <maximumf>, %1016, %cst_365 [2] : vector<2x8x8xf32> to vector<2x8xf32>
    %1018 = vector.shape_cast %1017 : vector<2x8xf32> to vector<2x8x1xf32>
    %1019 = vector.broadcast %1018 : vector<2x8x1xf32> to vector<2x8x8xf32>
    %1020 = arith.subf %1016, %1019 : vector<2x8x8xf32>
    %1021 = math.exp %1020 : vector<2x8x8xf32>
    %cst_366 = arith.constant dense<0.000000e+00> : vector<2x8xf32>
    %1022 = vector.multi_reduction <add>, %1021, %cst_366 [2] : vector<2x8x8xf32> to vector<2x8xf32>
    %1023 = vector.shape_cast %1022 : vector<2x8xf32> to vector<2x8x1xf32>
    %1024 = tpu.reciprocal %1023 {approx = true} : vector<2x8x1xf32> -> vector<2x8x1xf32>
    %1025 = vector.broadcast %1024 : vector<2x8x1xf32> to vector<2x8x8xf32>
    %1026 = arith.mulf %1021, %1025 : vector<2x8x8xf32>
    %1027 = arith.truncf %1026 : vector<2x8x8xf32> to vector<2x8x8xbf16>
    %1028 = arith.truncf %1012 : vector<2x8x16xf32> to vector<2x8x16xbf16>
    "tpu.trace_start"() <{level = 10 : i32, message = "bqk,bkd->bqd"}> : () -> ()
    %cst_367 = arith.constant dense<0.000000e+00> : vector<2x8x16xf32>
    %1029 = tpu.matmul %1027, %1028, %cst_367 {dimension_numbers = #tpu.dot_dimension_numbers<[2], [1], [1], [2], [0, 0, 0, 1, 1, 2], [0], [0]>} : vector<2x8x8xbf16>, vector<2x8x16xbf16>, vector<2x8x16xf32> -> vector<2x8x16xf32>
    "tpu.trace_stop"() : () -> ()
    %1030 = vector.shape_cast %1029 : vector<2x8x16xf32> to vector<16x16xf32>
    %1031 = vector.extract_strided_slice %969 {offsets = [0, 0], sizes = [16, 32], strides = [1, 1]} : vector<32x32xf32> to vector<16x32xf32>
    %1032 = arith.truncf %1030 : vector<16x16xf32> to vector<16x16xbf16>
    %1033 = arith.truncf %1031 : vector<16x32xf32> to vector<16x32xbf16>
    %cst_368 = arith.constant dense<0.000000e+00> : vector<16x32xf32>
    %1034 = tpu.matmul %1032, %1033, %cst_368 {dimension_numbers = #tpu.dot_dimension_numbers<[1], [0], [0], [1], [0, 0, 1, 1], [], []>} : vector<16x16xbf16>, vector<16x32xbf16>, vector<16x32xf32> -> vector<16x32xf32>
    %1035 = arith.addf %961, %1034 : vector<16x32xf32>
    %1036 = vector.extract_strided_slice %999 {offsets = [0, 0, 16], sizes = [2, 8, 16], strides = [1, 1, 1]} : vector<2x8x32xf32> to vector<2x8x16xf32>
    %cst_369 = arith.constant 2.500000e-01 : f32
    %1037 = vector.broadcast %cst_369 : f32 to vector<2x8x16xf32>
    %1038 = arith.mulf %1036, %1037 : vector<2x8x16xf32>
    %1039 = vector.extract_strided_slice %1003 {offsets = [0, 0, 16], sizes = [2, 8, 16], strides = [1, 1, 1]} : vector<2x8x32xf32> to vector<2x8x16xf32>
    %1040 = vector.extract_strided_slice %1007 {offsets = [0, 0, 16], sizes = [2, 8, 16], strides = [1, 1, 1]} : vector<2x8x32xf32> to vector<2x8x16xf32>
    %1041 = arith.truncf %1038 : vector<2x8x16xf32> to vector<2x8x16xbf16>
    %1042 = arith.truncf %1039 : vector<2x8x16xf32> to vector<2x8x16xbf16>
    "tpu.trace_start"() <{level = 10 : i32, message = "bqd,bkd->bqk"}> : () -> ()
    %cst_370 = arith.constant dense<0.000000e+00> : vector<2x8x8xf32>
    %1043 = tpu.matmul %1041, %1042, %cst_370 {dimension_numbers = #tpu.dot_dimension_numbers<[2], [2], [1], [1], [0, 0, 0, 1, 1, 1], [0], [0]>} : vector<2x8x16xbf16>, vector<2x8x16xbf16>, vector<2x8x8xf32> -> vector<2x8x8xf32>
    "tpu.trace_stop"() : () -> ()
    %1044 = arith.addf %1043, %1 : vector<2x8x8xf32>
    %cst_371 = arith.constant dense<0xFF800000> : vector<2x8xf32>
    %1045 = vector.multi_reduction <maximumf>, %1044, %cst_371 [2] : vector<2x8x8xf32> to vector<2x8xf32>
    %1046 = vector.shape_cast %1045 : vector<2x8xf32> to vector<2x8x1xf32>
    %1047 = vector.broadcast %1046 : vector<2x8x1xf32> to vector<2x8x8xf32>
    %1048 = arith.subf %1044, %1047 : vector<2x8x8xf32>
    %1049 = math.exp %1048 : vector<2x8x8xf32>
    %cst_372 = arith.constant dense<0.000000e+00> : vector<2x8xf32>
    %1050 = vector.multi_reduction <add>, %1049, %cst_372 [2] : vector<2x8x8xf32> to vector<2x8xf32>
    %1051 = vector.shape_cast %1050 : vector<2x8xf32> to vector<2x8x1xf32>
    %1052 = tpu.reciprocal %1051 {approx = true} : vector<2x8x1xf32> -> vector<2x8x1xf32>
    %1053 = vector.broadcast %1052 : vector<2x8x1xf32> to vector<2x8x8xf32>
    %1054 = arith.mulf %1049, %1053 : vector<2x8x8xf32>
    %1055 = arith.truncf %1054 : vector<2x8x8xf32> to vector<2x8x8xbf16>
    %1056 = arith.truncf %1040 : vector<2x8x16xf32> to vector<2x8x16xbf16>
    "tpu.trace_start"() <{level = 10 : i32, message = "bqk,bkd->bqd"}> : () -> ()
    %cst_373 = arith.constant dense<0.000000e+00> : vector<2x8x16xf32>
    %1057 = tpu.matmul %1055, %1056, %cst_373 {dimension_numbers = #tpu.dot_dimension_numbers<[2], [1], [1], [2], [0, 0, 0, 1, 1, 2], [0], [0]>} : vector<2x8x8xbf16>, vector<2x8x16xbf16>, vector<2x8x16xf32> -> vector<2x8x16xf32>
    "tpu.trace_stop"() : () -> ()
    %1058 = vector.shape_cast %1057 : vector<2x8x16xf32> to vector<16x16xf32>
    %1059 = vector.extract_strided_slice %969 {offsets = [16, 0], sizes = [16, 32], strides = [1, 1]} : vector<32x32xf32> to vector<16x32xf32>
    %1060 = arith.truncf %1058 : vector<16x16xf32> to vector<16x16xbf16>
    %1061 = arith.truncf %1059 : vector<16x32xf32> to vector<16x32xbf16>
    %cst_374 = arith.constant dense<0.000000e+00> : vector<16x32xf32>
    %1062 = tpu.matmul %1060, %1061, %cst_374 {dimension_numbers = #tpu.dot_dimension_numbers<[1], [0], [0], [1], [0, 0, 1, 1], [], []>} : vector<16x16xbf16>, vector<16x32xbf16>, vector<16x32xf32> -> vector<16x32xf32>
    %1063 = arith.addf %1035, %1062 : vector<16x32xf32>
    %c1_375 = arith.constant 1 : index
    %c0_376 = arith.constant 0 : index
    %c0_377 = arith.constant 0 : index
    %1064 = vector.load %arg25[%c1_375, %c0_376, %c0_377] : memref<2x32x32xf32, #tpu.memory_space<vmem>>, vector<1x32x32xf32>
    %1065 = vector.shape_cast %1064 : vector<1x32x32xf32> to vector<32x32xf32>
    %c1_378 = arith.constant 1 : index
    %c0_379 = arith.constant 0 : index
    %c0_380 = arith.constant 0 : index
    %1066 = vector.load %arg26[%c1_378, %c0_379, %c0_380] : memref<2x32x32xf32, #tpu.memory_space<vmem>>, vector<1x32x32xf32>
    %1067 = vector.shape_cast %1066 : vector<1x32x32xf32> to vector<32x32xf32>
    %c1_381 = arith.constant 1 : index
    %c0_382 = arith.constant 0 : index
    %c0_383 = arith.constant 0 : index
    %1068 = vector.load %arg27[%c1_381, %c0_382, %c0_383] : memref<2x32x32xf32, #tpu.memory_space<vmem>>, vector<1x32x32xf32>
    %1069 = vector.shape_cast %1068 : vector<1x32x32xf32> to vector<32x32xf32>
    %c1_384 = arith.constant 1 : index
    %c0_385 = arith.constant 0 : index
    %c0_386 = arith.constant 0 : index
    %1070 = vector.load %arg28[%c1_384, %c0_385, %c0_386] : memref<2x32x32xf32, #tpu.memory_space<vmem>>, vector<1x32x32xf32>
    %1071 = vector.shape_cast %1070 : vector<1x32x32xf32> to vector<32x32xf32>
    %c1_387 = arith.constant 1 : index
    %c0_388 = arith.constant 0 : index
    %c0_389 = arith.constant 0 : index
    %1072 = vector.load %arg23[%c1_387, %c0_388, %c0_389] : memref<2x1x32xf32, #tpu.memory_space<vmem>>, vector<1x1x32xf32>
    %1073 = vector.shape_cast %1072 : vector<1x1x32xf32> to vector<1x32xf32>
    %c1_390 = arith.constant 1 : index
    %c0_391 = arith.constant 0 : index
    %c0_392 = arith.constant 0 : index
    %1074 = vector.load %arg24[%c1_390, %c0_391, %c0_392] : memref<2x1x32xf32, #tpu.memory_space<vmem>>, vector<1x1x32xf32>
    %1075 = vector.shape_cast %1074 : vector<1x1x32xf32> to vector<1x32xf32>
    %cst_393 = arith.constant dense<0.000000e+00> : vector<16xf32>
    %1076 = vector.multi_reduction <add>, %1063, %cst_393 [1] : vector<16x32xf32> to vector<16xf32>
    %1077 = vector.shape_cast %1076 : vector<16xf32> to vector<16x1xf32>
    %cst_394 = arith.constant 3.200000e+01 : f32
    %1078 = vector.broadcast %cst_394 : f32 to vector<16x1xf32>
    %1079 = arith.divf %1077, %1078 : vector<16x1xf32>
    %1080 = vector.broadcast %1079 : vector<16x1xf32> to vector<16x32xf32>
    %1081 = arith.subf %1063, %1080 : vector<16x32xf32>
    %1082 = arith.mulf %1081, %1081 : vector<16x32xf32>
    %cst_395 = arith.constant dense<0.000000e+00> : vector<16xf32>
    %1083 = vector.multi_reduction <add>, %1082, %cst_395 [1] : vector<16x32xf32> to vector<16xf32>
    %1084 = vector.shape_cast %1083 : vector<16xf32> to vector<16x1xf32>
    %cst_396 = arith.constant 3.200000e+01 : f32
    %1085 = vector.broadcast %cst_396 : f32 to vector<16x1xf32>
    %1086 = arith.divf %1084, %1085 : vector<16x1xf32>
    %1087 = vector.broadcast %1079 : vector<16x1xf32> to vector<16x32xf32>
    %1088 = arith.subf %1063, %1087 : vector<16x32xf32>
    %cst_397 = arith.constant 9.99999997E-7 : f32
    %1089 = vector.broadcast %cst_397 : f32 to vector<16x1xf32>
    %1090 = arith.addf %1086, %1089 : vector<16x1xf32>
    %1091 = math.rsqrt %1090 : vector<16x1xf32>
    %1092 = vector.broadcast %1091 : vector<16x1xf32> to vector<16x32xf32>
    %1093 = arith.mulf %1088, %1092 : vector<16x32xf32>
    %1094 = vector.broadcast %1073 : vector<1x32xf32> to vector<16x32xf32>
    %1095 = arith.mulf %1093, %1094 : vector<16x32xf32>
    %1096 = vector.broadcast %1075 : vector<1x32xf32> to vector<16x32xf32>
    %1097 = arith.addf %1095, %1096 : vector<16x32xf32>
    %1098 = arith.truncf %1097 : vector<16x32xf32> to vector<16x32xbf16>
    %1099 = arith.truncf %1065 : vector<32x32xf32> to vector<32x32xbf16>
    %cst_398 = arith.constant dense<0.000000e+00> : vector<16x32xf32>
    %1100 = tpu.matmul %1098, %1099, %cst_398 {dimension_numbers = #tpu.dot_dimension_numbers<[1], [0], [0], [1], [0, 0, 1, 1], [], []>} : vector<16x32xbf16>, vector<32x32xbf16>, vector<16x32xf32> -> vector<16x32xf32>
    %1101 = vector.shape_cast %1100 : vector<16x32xf32> to vector<2x8x32xf32>
    %1102 = arith.truncf %709 : vector<16x32xf32> to vector<16x32xbf16>
    %1103 = arith.truncf %1067 : vector<32x32xf32> to vector<32x32xbf16>
    %cst_399 = arith.constant dense<0.000000e+00> : vector<16x32xf32>
    %1104 = tpu.matmul %1102, %1103, %cst_399 {dimension_numbers = #tpu.dot_dimension_numbers<[1], [0], [0], [1], [0, 0, 1, 1], [], []>} : vector<16x32xbf16>, vector<32x32xbf16>, vector<16x32xf32> -> vector<16x32xf32>
    %1105 = vector.shape_cast %1104 : vector<16x32xf32> to vector<2x8x32xf32>
    %1106 = arith.truncf %709 : vector<16x32xf32> to vector<16x32xbf16>
    %1107 = arith.truncf %1069 : vector<32x32xf32> to vector<32x32xbf16>
    %cst_400 = arith.constant dense<0.000000e+00> : vector<16x32xf32>
    %1108 = tpu.matmul %1106, %1107, %cst_400 {dimension_numbers = #tpu.dot_dimension_numbers<[1], [0], [0], [1], [0, 0, 1, 1], [], []>} : vector<16x32xbf16>, vector<32x32xbf16>, vector<16x32xf32> -> vector<16x32xf32>
    %1109 = vector.shape_cast %1108 : vector<16x32xf32> to vector<2x8x32xf32>
    %1110 = vector.extract_strided_slice %1101 {offsets = [0, 0, 0], sizes = [2, 8, 16], strides = [1, 1, 1]} : vector<2x8x32xf32> to vector<2x8x16xf32>
    %cst_401 = arith.constant 2.500000e-01 : f32
    %1111 = vector.broadcast %cst_401 : f32 to vector<2x8x16xf32>
    %1112 = arith.mulf %1110, %1111 : vector<2x8x16xf32>
    %1113 = vector.extract_strided_slice %1105 {offsets = [0, 0, 0], sizes = [2, 8, 16], strides = [1, 1, 1]} : vector<2x8x32xf32> to vector<2x8x16xf32>
    %1114 = vector.extract_strided_slice %1109 {offsets = [0, 0, 0], sizes = [2, 8, 16], strides = [1, 1, 1]} : vector<2x8x32xf32> to vector<2x8x16xf32>
    %1115 = arith.truncf %1112 : vector<2x8x16xf32> to vector<2x8x16xbf16>
    %1116 = arith.truncf %1113 : vector<2x8x16xf32> to vector<2x8x16xbf16>
    "tpu.trace_start"() <{level = 10 : i32, message = "bqd,bkd->bqk"}> : () -> ()
    %cst_402 = arith.constant dense<0.000000e+00> : vector<2x8x8xf32>
    %1117 = tpu.matmul %1115, %1116, %cst_402 {dimension_numbers = #tpu.dot_dimension_numbers<[2], [2], [1], [1], [0, 0, 0, 1, 1, 1], [0], [0]>} : vector<2x8x16xbf16>, vector<2x8x16xbf16>, vector<2x8x8xf32> -> vector<2x8x8xf32>
    "tpu.trace_stop"() : () -> ()
    %1118 = arith.addf %1117, %2 : vector<2x8x8xf32>
    %cst_403 = arith.constant dense<0xFF800000> : vector<2x8xf32>
    %1119 = vector.multi_reduction <maximumf>, %1118, %cst_403 [2] : vector<2x8x8xf32> to vector<2x8xf32>
    %1120 = vector.shape_cast %1119 : vector<2x8xf32> to vector<2x8x1xf32>
    %1121 = vector.broadcast %1120 : vector<2x8x1xf32> to vector<2x8x8xf32>
    %1122 = arith.subf %1118, %1121 : vector<2x8x8xf32>
    %1123 = math.exp %1122 : vector<2x8x8xf32>
    %cst_404 = arith.constant dense<0.000000e+00> : vector<2x8xf32>
    %1124 = vector.multi_reduction <add>, %1123, %cst_404 [2] : vector<2x8x8xf32> to vector<2x8xf32>
    %1125 = vector.shape_cast %1124 : vector<2x8xf32> to vector<2x8x1xf32>
    %1126 = tpu.reciprocal %1125 {approx = true} : vector<2x8x1xf32> -> vector<2x8x1xf32>
    %1127 = vector.broadcast %1126 : vector<2x8x1xf32> to vector<2x8x8xf32>
    %1128 = arith.mulf %1123, %1127 : vector<2x8x8xf32>
    %1129 = arith.truncf %1128 : vector<2x8x8xf32> to vector<2x8x8xbf16>
    %1130 = arith.truncf %1114 : vector<2x8x16xf32> to vector<2x8x16xbf16>
    "tpu.trace_start"() <{level = 10 : i32, message = "bqk,bkd->bqd"}> : () -> ()
    %cst_405 = arith.constant dense<0.000000e+00> : vector<2x8x16xf32>
    %1131 = tpu.matmul %1129, %1130, %cst_405 {dimension_numbers = #tpu.dot_dimension_numbers<[2], [1], [1], [2], [0, 0, 0, 1, 1, 2], [0], [0]>} : vector<2x8x8xbf16>, vector<2x8x16xbf16>, vector<2x8x16xf32> -> vector<2x8x16xf32>
    "tpu.trace_stop"() : () -> ()
    %1132 = vector.shape_cast %1131 : vector<2x8x16xf32> to vector<16x16xf32>
    %1133 = vector.extract_strided_slice %1071 {offsets = [0, 0], sizes = [16, 32], strides = [1, 1]} : vector<32x32xf32> to vector<16x32xf32>
    %1134 = arith.truncf %1132 : vector<16x16xf32> to vector<16x16xbf16>
    %1135 = arith.truncf %1133 : vector<16x32xf32> to vector<16x32xbf16>
    %cst_406 = arith.constant dense<0.000000e+00> : vector<16x32xf32>
    %1136 = tpu.matmul %1134, %1135, %cst_406 {dimension_numbers = #tpu.dot_dimension_numbers<[1], [0], [0], [1], [0, 0, 1, 1], [], []>} : vector<16x16xbf16>, vector<16x32xbf16>, vector<16x32xf32> -> vector<16x32xf32>
    %1137 = arith.addf %1063, %1136 : vector<16x32xf32>
    %1138 = vector.extract_strided_slice %1101 {offsets = [0, 0, 16], sizes = [2, 8, 16], strides = [1, 1, 1]} : vector<2x8x32xf32> to vector<2x8x16xf32>
    %cst_407 = arith.constant 2.500000e-01 : f32
    %1139 = vector.broadcast %cst_407 : f32 to vector<2x8x16xf32>
    %1140 = arith.mulf %1138, %1139 : vector<2x8x16xf32>
    %1141 = vector.extract_strided_slice %1105 {offsets = [0, 0, 16], sizes = [2, 8, 16], strides = [1, 1, 1]} : vector<2x8x32xf32> to vector<2x8x16xf32>
    %1142 = vector.extract_strided_slice %1109 {offsets = [0, 0, 16], sizes = [2, 8, 16], strides = [1, 1, 1]} : vector<2x8x32xf32> to vector<2x8x16xf32>
    %1143 = arith.truncf %1140 : vector<2x8x16xf32> to vector<2x8x16xbf16>
    %1144 = arith.truncf %1141 : vector<2x8x16xf32> to vector<2x8x16xbf16>
    "tpu.trace_start"() <{level = 10 : i32, message = "bqd,bkd->bqk"}> : () -> ()
    %cst_408 = arith.constant dense<0.000000e+00> : vector<2x8x8xf32>
    %1145 = tpu.matmul %1143, %1144, %cst_408 {dimension_numbers = #tpu.dot_dimension_numbers<[2], [2], [1], [1], [0, 0, 0, 1, 1, 1], [0], [0]>} : vector<2x8x16xbf16>, vector<2x8x16xbf16>, vector<2x8x8xf32> -> vector<2x8x8xf32>
    "tpu.trace_stop"() : () -> ()
    %1146 = arith.addf %1145, %2 : vector<2x8x8xf32>
    %cst_409 = arith.constant dense<0xFF800000> : vector<2x8xf32>
    %1147 = vector.multi_reduction <maximumf>, %1146, %cst_409 [2] : vector<2x8x8xf32> to vector<2x8xf32>
    %1148 = vector.shape_cast %1147 : vector<2x8xf32> to vector<2x8x1xf32>
    %1149 = vector.broadcast %1148 : vector<2x8x1xf32> to vector<2x8x8xf32>
    %1150 = arith.subf %1146, %1149 : vector<2x8x8xf32>
    %1151 = math.exp %1150 : vector<2x8x8xf32>
    %cst_410 = arith.constant dense<0.000000e+00> : vector<2x8xf32>
    %1152 = vector.multi_reduction <add>, %1151, %cst_410 [2] : vector<2x8x8xf32> to vector<2x8xf32>
    %1153 = vector.shape_cast %1152 : vector<2x8xf32> to vector<2x8x1xf32>
    %1154 = tpu.reciprocal %1153 {approx = true} : vector<2x8x1xf32> -> vector<2x8x1xf32>
    %1155 = vector.broadcast %1154 : vector<2x8x1xf32> to vector<2x8x8xf32>
    %1156 = arith.mulf %1151, %1155 : vector<2x8x8xf32>
    %1157 = arith.truncf %1156 : vector<2x8x8xf32> to vector<2x8x8xbf16>
    %1158 = arith.truncf %1142 : vector<2x8x16xf32> to vector<2x8x16xbf16>
    "tpu.trace_start"() <{level = 10 : i32, message = "bqk,bkd->bqd"}> : () -> ()
    %cst_411 = arith.constant dense<0.000000e+00> : vector<2x8x16xf32>
    %1159 = tpu.matmul %1157, %1158, %cst_411 {dimension_numbers = #tpu.dot_dimension_numbers<[2], [1], [1], [2], [0, 0, 0, 1, 1, 2], [0], [0]>} : vector<2x8x8xbf16>, vector<2x8x16xbf16>, vector<2x8x16xf32> -> vector<2x8x16xf32>
    "tpu.trace_stop"() : () -> ()
    %1160 = vector.shape_cast %1159 : vector<2x8x16xf32> to vector<16x16xf32>
    %1161 = vector.extract_strided_slice %1071 {offsets = [16, 0], sizes = [16, 32], strides = [1, 1]} : vector<32x32xf32> to vector<16x32xf32>
    %1162 = arith.truncf %1160 : vector<16x16xf32> to vector<16x16xbf16>
    %1163 = arith.truncf %1161 : vector<16x32xf32> to vector<16x32xbf16>
    %cst_412 = arith.constant dense<0.000000e+00> : vector<16x32xf32>
    %1164 = tpu.matmul %1162, %1163, %cst_412 {dimension_numbers = #tpu.dot_dimension_numbers<[1], [0], [0], [1], [0, 0, 1, 1], [], []>} : vector<16x16xbf16>, vector<16x32xbf16>, vector<16x32xf32> -> vector<16x32xf32>
    %1165 = arith.addf %1137, %1164 : vector<16x32xf32>
    %c1_413 = arith.constant 1 : index
    %c0_414 = arith.constant 0 : index
    %c0_415 = arith.constant 0 : index
    %1166 = vector.load %arg29[%c1_413, %c0_414, %c0_415] : memref<2x1x32xf32, #tpu.memory_space<vmem>>, vector<1x1x32xf32>
    %1167 = vector.shape_cast %1166 : vector<1x1x32xf32> to vector<1x32xf32>
    %c1_416 = arith.constant 1 : index
    %c0_417 = arith.constant 0 : index
    %c0_418 = arith.constant 0 : index
    %1168 = vector.load %arg30[%c1_416, %c0_417, %c0_418] : memref<2x1x32xf32, #tpu.memory_space<vmem>>, vector<1x1x32xf32>
    %1169 = vector.shape_cast %1168 : vector<1x1x32xf32> to vector<1x32xf32>
    %c1_419 = arith.constant 1 : index
    %c0_420 = arith.constant 0 : index
    %c0_421 = arith.constant 0 : index
    %1170 = vector.load %arg31[%c1_419, %c0_420, %c0_421] : memref<2x32x64xf32, #tpu.memory_space<vmem>>, vector<1x32x64xf32>
    %1171 = vector.shape_cast %1170 : vector<1x32x64xf32> to vector<32x64xf32>
    %c1_422 = arith.constant 1 : index
    %c0_423 = arith.constant 0 : index
    %c0_424 = arith.constant 0 : index
    %1172 = vector.load %arg32[%c1_422, %c0_423, %c0_424] : memref<2x1x64xf32, #tpu.memory_space<vmem>>, vector<1x1x64xf32>
    %1173 = vector.shape_cast %1172 : vector<1x1x64xf32> to vector<1x64xf32>
    %c1_425 = arith.constant 1 : index
    %c0_426 = arith.constant 0 : index
    %c0_427 = arith.constant 0 : index
    %1174 = vector.load %arg33[%c1_425, %c0_426, %c0_427] : memref<2x64x32xf32, #tpu.memory_space<vmem>>, vector<1x64x32xf32>
    %1175 = vector.shape_cast %1174 : vector<1x64x32xf32> to vector<64x32xf32>
    %c1_428 = arith.constant 1 : index
    %c0_429 = arith.constant 0 : index
    %c0_430 = arith.constant 0 : index
    %1176 = vector.load %arg34[%c1_428, %c0_429, %c0_430] : memref<2x1x32xf32, #tpu.memory_space<vmem>>, vector<1x1x32xf32>
    %1177 = vector.shape_cast %1176 : vector<1x1x32xf32> to vector<1x32xf32>
    %cst_431 = arith.constant dense<0.000000e+00> : vector<16xf32>
    %1178 = vector.multi_reduction <add>, %1165, %cst_431 [1] : vector<16x32xf32> to vector<16xf32>
    %1179 = vector.shape_cast %1178 : vector<16xf32> to vector<16x1xf32>
    %cst_432 = arith.constant 3.200000e+01 : f32
    %1180 = vector.broadcast %cst_432 : f32 to vector<16x1xf32>
    %1181 = arith.divf %1179, %1180 : vector<16x1xf32>
    %1182 = vector.broadcast %1181 : vector<16x1xf32> to vector<16x32xf32>
    %1183 = arith.subf %1165, %1182 : vector<16x32xf32>
    %1184 = arith.mulf %1183, %1183 : vector<16x32xf32>
    %cst_433 = arith.constant dense<0.000000e+00> : vector<16xf32>
    %1185 = vector.multi_reduction <add>, %1184, %cst_433 [1] : vector<16x32xf32> to vector<16xf32>
    %1186 = vector.shape_cast %1185 : vector<16xf32> to vector<16x1xf32>
    %cst_434 = arith.constant 3.200000e+01 : f32
    %1187 = vector.broadcast %cst_434 : f32 to vector<16x1xf32>
    %1188 = arith.divf %1186, %1187 : vector<16x1xf32>
    %1189 = vector.broadcast %1181 : vector<16x1xf32> to vector<16x32xf32>
    %1190 = arith.subf %1165, %1189 : vector<16x32xf32>
    %cst_435 = arith.constant 9.99999997E-7 : f32
    %1191 = vector.broadcast %cst_435 : f32 to vector<16x1xf32>
    %1192 = arith.addf %1188, %1191 : vector<16x1xf32>
    %1193 = math.rsqrt %1192 : vector<16x1xf32>
    %1194 = vector.broadcast %1193 : vector<16x1xf32> to vector<16x32xf32>
    %1195 = arith.mulf %1190, %1194 : vector<16x32xf32>
    %1196 = vector.broadcast %1167 : vector<1x32xf32> to vector<16x32xf32>
    %1197 = arith.mulf %1195, %1196 : vector<16x32xf32>
    %1198 = vector.broadcast %1169 : vector<1x32xf32> to vector<16x32xf32>
    %1199 = arith.addf %1197, %1198 : vector<16x32xf32>
    %1200 = arith.truncf %1199 : vector<16x32xf32> to vector<16x32xbf16>
    %1201 = arith.truncf %1171 : vector<32x64xf32> to vector<32x64xbf16>
    %cst_436 = arith.constant dense<0.000000e+00> : vector<16x64xf32>
    %1202 = tpu.matmul %1200, %1201, %cst_436 {dimension_numbers = #tpu.dot_dimension_numbers<[1], [0], [0], [1], [0, 0, 1, 1], [], []>} : vector<16x32xbf16>, vector<32x64xbf16>, vector<16x64xf32> -> vector<16x64xf32>
    %1203 = vector.broadcast %1173 : vector<1x64xf32> to vector<16x64xf32>
    %1204 = arith.addf %1202, %1203 : vector<16x64xf32>
    %cst_437 = arith.constant 0.000000e+00 : f32
    %1205 = vector.broadcast %cst_437 : f32 to vector<16x64xf32>
    %1206 = arith.maximumf %1204, %1205 : vector<16x64xf32>
    %1207 = arith.truncf %1206 : vector<16x64xf32> to vector<16x64xbf16>
    %1208 = arith.truncf %1175 : vector<64x32xf32> to vector<64x32xbf16>
    %cst_438 = arith.constant dense<0.000000e+00> : vector<16x32xf32>
    %1209 = tpu.matmul %1207, %1208, %cst_438 {dimension_numbers = #tpu.dot_dimension_numbers<[1], [0], [0], [1], [0, 0, 1, 1], [], []>} : vector<16x64xbf16>, vector<64x32xbf16>, vector<16x32xf32> -> vector<16x32xf32>
    %1210 = vector.broadcast %1177 : vector<1x32xf32> to vector<16x32xf32>
    %1211 = arith.addf %1209, %1210 : vector<16x32xf32>
    %1212 = arith.addf %1211, %1165 : vector<16x32xf32>
    %c0_439 = arith.constant 0 : index
    %c0_440 = arith.constant 0 : index
    %1213 = vector.load %arg37[%c0_439, %c0_440] : memref<1x32xf32, #tpu.memory_space<vmem>>, vector<1x32xf32>
    %c0_441 = arith.constant 0 : index
    %c0_442 = arith.constant 0 : index
    %1214 = vector.load %arg38[%c0_441, %c0_442] : memref<1x32xf32, #tpu.memory_space<vmem>>, vector<1x32xf32>
    %cst_443 = arith.constant dense<0.000000e+00> : vector<16xf32>
    %1215 = vector.multi_reduction <add>, %1212, %cst_443 [1] : vector<16x32xf32> to vector<16xf32>
    %1216 = vector.shape_cast %1215 : vector<16xf32> to vector<16x1xf32>
    %cst_444 = arith.constant 3.200000e+01 : f32
    %1217 = vector.broadcast %cst_444 : f32 to vector<16x1xf32>
    %1218 = arith.divf %1216, %1217 : vector<16x1xf32>
    %1219 = vector.broadcast %1218 : vector<16x1xf32> to vector<16x32xf32>
    %1220 = arith.subf %1212, %1219 : vector<16x32xf32>
    %1221 = arith.mulf %1220, %1220 : vector<16x32xf32>
    %cst_445 = arith.constant dense<0.000000e+00> : vector<16xf32>
    %1222 = vector.multi_reduction <add>, %1221, %cst_445 [1] : vector<16x32xf32> to vector<16xf32>
    %1223 = vector.shape_cast %1222 : vector<16xf32> to vector<16x1xf32>
    %cst_446 = arith.constant 3.200000e+01 : f32
    %1224 = vector.broadcast %cst_446 : f32 to vector<16x1xf32>
    %1225 = arith.divf %1223, %1224 : vector<16x1xf32>
    %1226 = vector.broadcast %1218 : vector<16x1xf32> to vector<16x32xf32>
    %1227 = arith.subf %1212, %1226 : vector<16x32xf32>
    %cst_447 = arith.constant 9.99999997E-7 : f32
    %1228 = vector.broadcast %cst_447 : f32 to vector<16x1xf32>
    %1229 = arith.addf %1225, %1228 : vector<16x1xf32>
    %1230 = math.rsqrt %1229 : vector<16x1xf32>
    %1231 = vector.broadcast %1230 : vector<16x1xf32> to vector<16x32xf32>
    %1232 = arith.mulf %1227, %1231 : vector<16x32xf32>
    %1233 = vector.broadcast %1213 : vector<1x32xf32> to vector<16x32xf32>
    %1234 = arith.mulf %1232, %1233 : vector<16x32xf32>
    %1235 = vector.broadcast %1214 : vector<1x32xf32> to vector<16x32xf32>
    %1236 = arith.addf %1234, %1235 : vector<16x32xf32>
    %c0_448 = arith.constant 0 : index
    %c0_449 = arith.constant 0 : index
    %1237 = vector.load %arg39[%c0_448, %c0_449] : memref<32x32xf32, #tpu.memory_space<vmem>>, vector<32x32xf32>
    %1238 = arith.truncf %1236 : vector<16x32xf32> to vector<16x32xbf16>
    %1239 = arith.truncf %1237 : vector<32x32xf32> to vector<32x32xbf16>
    %cst_450 = arith.constant dense<0.000000e+00> : vector<16x32xf32>
    %1240 = tpu.matmul %1238, %1239, %cst_450 {dimension_numbers = #tpu.dot_dimension_numbers<[1], [0], [0], [1], [0, 0, 1, 1], [], []>} : vector<16x32xbf16>, vector<32x32xbf16>, vector<16x32xf32> -> vector<16x32xf32>
    %cst_451 = arith.constant 0.176776692 : f32
    %1241 = vector.broadcast %cst_451 : f32 to vector<16x32xf32>
    %1242 = arith.mulf %1240, %1241 : vector<16x32xf32>
    %c0_452 = arith.constant 0 : index
    %c0_453 = arith.constant 0 : index
    %1243 = vector.load %arg40[%c0_452, %c0_453] : memref<16x32xf32, #tpu.memory_space<vmem>>, vector<16x32xf32>
    tpu.vector_store %arg40[%c0_452, %c0_453], %1242 {strides = array<i32>} : memref<16x32xf32, #tpu.memory_space<vmem>>, vector<16x32xf32>,
    return
  }
  func.func @transform_0(%arg0: i32) -> (i32, i32) {
    %c0_i32 = arith.constant 0 : i32
    %c0_i32_0 = arith.constant 0 : i32
    %c0_i32_1 = arith.constant 0 : i32
    return %c0_i32, %c0_i32_0 : i32, i32
  }
  func.func @transform_1(%arg0: i32) -> (i32, i32) {
    %c0_i32 = arith.constant 0 : i32
    %c0_i32_0 = arith.constant 0 : i32
    %c0_i32_1 = arith.constant 0 : i32
    return %c0_i32, %c0_i32_0 : i32, i32
  }
  func.func @transform_2(%arg0: i32) -> (i32, i32) {
    %c0_i32 = arith.constant 0 : i32
    %c0_i32_0 = arith.constant 0 : i32
    %c0_i32_1 = arith.constant 0 : i32
    return %c0_i32, %c0_i32_0 : i32, i32
  }
  func.func @transform_3(%arg0: i32) -> (i32, i32, i32) {
    %c0_i32 = arith.constant 0 : i32
    %c0_i32_0 = arith.constant 0 : i32
    %c0_i32_1 = arith.constant 0 : i32
    %c0_i32_2 = arith.constant 0 : i32
    return %c0_i32, %c0_i32_0, %c0_i32_1 : i32, i32, i32
  }
  func.func @transform_4(%arg0: i32) -> (i32, i32, i32) {
    %c0_i32 = arith.constant 0 : i32
    %c0_i32_0 = arith.constant 0 : i32
    %c0_i32_1 = arith.constant 0 : i32
    %c0_i32_2 = arith.constant 0 : i32
    return %c0_i32, %c0_i32_0, %c0_i32_1 : i32, i32, i32
  }
  func.func @transform_5(%arg0: i32) -> (i32, i32, i32) {
    %c0_i32 = arith.constant 0 : i32
    %c0_i32_0 = arith.constant 0 : i32
    %c0_i32_1 = arith.constant 0 : i32
    %c0_i32_2 = arith.constant 0 : i32
    return %c0_i32, %c0_i32_0, %c0_i32_1 : i32, i32, i32
  }
  func.func @transform_6(%arg0: i32) -> (i32, i32, i32) {
    %c0_i32 = arith.constant 0 : i32
    %c0_i32_0 = arith.constant 0 : i32
    %c0_i32_1 = arith.constant 0 : i32
    %c0_i32_2 = arith.constant 0 : i32
    return %c0_i32, %c0_i32_0, %c0_i32_1 : i32, i32, i32
  }
  func.func @transform_7(%arg0: i32) -> (i32, i32, i32) {
    %c0_i32 = arith.constant 0 : i32
    %c0_i32_0 = arith.constant 0 : i32
    %c0_i32_1 = arith.constant 0 : i32
    %c0_i32_2 = arith.constant 0 : i32
    return %c0_i32, %c0_i32_0, %c0_i32_1 : i32, i32, i32
  }
  func.func @transform_8(%arg0: i32) -> (i32, i32, i32) {
    %c0_i32 = arith.constant 0 : i32
    %c0_i32_0 = arith.constant 0 : i32
    %c0_i32_1 = arith.constant 0 : i32
    %c0_i32_2 = arith.constant 0 : i32
    return %c0_i32, %c0_i32_0, %c0_i32_1 : i32, i32, i32
  }
  func.func @transform_9(%arg0: i32) -> (i32, i32, i32) {
    %c0_i32 = arith.constant 0 : i32
    %c0_i32_0 = arith.constant 0 : i32
    %c0_i32_1 = arith.constant 0 : i32
    %c0_i32_2 = arith.constant 0 : i32
    return %c0_i32, %c0_i32_0, %c0_i32_1 : i32, i32, i32
  }
  func.func @transform_10(%arg0: i32) -> (i32, i32, i32) {
    %c0_i32 = arith.constant 0 : i32
    %c0_i32_0 = arith.constant 0 : i32
    %c0_i32_1 = arith.constant 0 : i32
    %c0_i32_2 = arith.constant 0 : i32
    return %c0_i32, %c0_i32_0, %c0_i32_1 : i32, i32, i32
  }
  func.func @transform_11(%arg0: i32) -> (i32, i32, i32) {
    %c0_i32 = arith.constant 0 : i32
    %c0_i32_0 = arith.constant 0 : i32
    %c0_i32_1 = arith.constant 0 : i32
    %c0_i32_2 = arith.constant 0 : i32
    return %c0_i32, %c0_i32_0, %c0_i32_1 : i32, i32, i32
  }
  func.func @transform_12(%arg0: i32) -> (i32, i32, i32) {
    %c0_i32 = arith.constant 0 : i32
    %c0_i32_0 = arith.constant 0 : i32
    %c0_i32_1 = arith.constant 0 : i32
    %c0_i32_2 = arith.constant 0 : i32
    return %c0_i32, %c0_i32_0, %c0_i32_1 : i32, i32, i32
  }
  func.func @transform_13(%arg0: i32) -> (i32, i32, i32) {
    %c0_i32 = arith.constant 0 : i32
    %c0_i32_0 = arith.constant 0 : i32
    %c0_i32_1 = arith.constant 0 : i32
    %c0_i32_2 = arith.constant 0 : i32
    return %c0_i32, %c0_i32_0, %c0_i32_1 : i32, i32, i32
  }
  func.func @transform_14(%arg0: i32) -> (i32, i32, i32) {
    %c0_i32 = arith.constant 0 : i32
    %c0_i32_0 = arith.constant 0 : i32
    %c0_i32_1 = arith.constant 0 : i32
    %c0_i32_2 = arith.constant 0 : i32
    return %c0_i32, %c0_i32_0, %c0_i32_1 : i32, i32, i32
  }
  func.func @transform_15(%arg0: i32) -> (i32, i32, i32) {
    %c0_i32 = arith.constant 0 : i32
    %c0_i32_0 = arith.constant 0 : i32
    %c0_i32_1 = arith.constant 0 : i32
    %c0_i32_2 = arith.constant 0 : i32
    return %c0_i32, %c0_i32_0, %c0_i32_1 : i32, i32, i32
  }
  func.func @transform_16(%arg0: i32) -> (i32, i32, i32) {
    %c0_i32 = arith.constant 0 : i32
    %c0_i32_0 = arith.constant 0 : i32
    %c0_i32_1 = arith.constant 0 : i32
    %c0_i32_2 = arith.constant 0 : i32
    return %c0_i32, %c0_i32_0, %c0_i32_1 : i32, i32, i32
  }
  func.func @transform_17(%arg0: i32) -> (i32, i32, i32) {
    %c0_i32 = arith.constant 0 : i32
    %c0_i32_0 = arith.constant 0 : i32
    %c0_i32_1 = arith.constant 0 : i32
    %c0_i32_2 = arith.constant 0 : i32
    return %c0_i32, %c0_i32_0, %c0_i32_1 : i32, i32, i32
  }
  func.func @transform_18(%arg0: i32) -> (i32, i32, i32) {
    %c0_i32 = arith.constant 0 : i32
    %c0_i32_0 = arith.constant 0 : i32
    %c0_i32_1 = arith.constant 0 : i32
    %c0_i32_2 = arith.constant 0 : i32
    return %c0_i32, %c0_i32_0, %c0_i32_1 : i32, i32, i32
  }
  func.func @transform_19(%arg0: i32) -> (i32, i32, i32) {
    %c0_i32 = arith.constant 0 : i32
    %c0_i32_0 = arith.constant 0 : i32
    %c0_i32_1 = arith.constant 0 : i32
    %c0_i32_2 = arith.constant 0 : i32
    return %c0_i32, %c0_i32_0, %c0_i32_1 : i32, i32, i32
  }
  func.func @transform_20(%arg0: i32) -> (i32, i32, i32) {
    %c0_i32 = arith.constant 0 : i32
    %c0_i32_0 = arith.constant 0 : i32
    %c0_i32_1 = arith.constant 0 : i32
    %c0_i32_2 = arith.constant 0 : i32
    return %c0_i32, %c0_i32_0, %c0_i32_1 : i32, i32, i32
  }
  func.func @transform_21(%arg0: i32) -> (i32, i32, i32) {
    %c0_i32 = arith.constant 0 : i32
    %c0_i32_0 = arith.constant 0 : i32
    %c0_i32_1 = arith.constant 0 : i32
    %c0_i32_2 = arith.constant 0 : i32
    return %c0_i32, %c0_i32_0, %c0_i32_1 : i32, i32, i32
  }
  func.func @transform_22(%arg0: i32) -> (i32, i32, i32) {
    %c0_i32 = arith.constant 0 : i32
    %c0_i32_0 = arith.constant 0 : i32
    %c0_i32_1 = arith.constant 0 : i32
    %c0_i32_2 = arith.constant 0 : i32
    return %c0_i32, %c0_i32_0, %c0_i32_1 : i32, i32, i32
  }
  func.func @transform_23(%arg0: i32) -> (i32, i32, i32) {
    %c0_i32 = arith.constant 0 : i32
    %c0_i32_0 = arith.constant 0 : i32
    %c0_i32_1 = arith.constant 0 : i32
    %c0_i32_2 = arith.constant 0 : i32
    return %c0_i32, %c0_i32_0, %c0_i32_1 : i32, i32, i32
  }
  func.func @transform_24(%arg0: i32) -> (i32, i32, i32) {
    %c0_i32 = arith.constant 0 : i32
    %c0_i32_0 = arith.constant 0 : i32
    %c0_i32_1 = arith.constant 0 : i32
    %c0_i32_2 = arith.constant 0 : i32
    return %c0_i32, %c0_i32_0, %c0_i32_1 : i32, i32, i32
  }
  func.func @transform_25(%arg0: i32) -> (i32, i32, i32) {
    %c0_i32 = arith.constant 0 : i32
    %c0_i32_0 = arith.constant 0 : i32
    %c0_i32_1 = arith.constant 0 : i32
    %c0_i32_2 = arith.constant 0 : i32
    return %c0_i32, %c0_i32_0, %c0_i32_1 : i32, i32, i32
  }
  func.func @transform_26(%arg0: i32) -> (i32, i32, i32) {
    %c0_i32 = arith.constant 0 : i32
    %c0_i32_0 = arith.constant 0 : i32
    %c0_i32_1 = arith.constant 0 : i32
    %c0_i32_2 = arith.constant 0 : i32
    return %c0_i32, %c0_i32_0, %c0_i32_1 : i32, i32, i32
  }
  func.func @transform_27(%arg0: i32) -> (i32, i32, i32) {
    %c0_i32 = arith.constant 0 : i32
    %c0_i32_0 = arith.constant 0 : i32
    %c0_i32_1 = arith.constant 0 : i32
    %c0_i32_2 = arith.constant 0 : i32
    return %c0_i32, %c0_i32_0, %c0_i32_1 : i32, i32, i32
  }
  func.func @transform_28(%arg0: i32) -> (i32, i32, i32) {
    %c0_i32 = arith.constant 0 : i32
    %c0_i32_0 = arith.constant 0 : i32
    %c0_i32_1 = arith.constant 0 : i32
    %c0_i32_2 = arith.constant 0 : i32
    return %c0_i32, %c0_i32_0, %c0_i32_1 : i32, i32, i32
  }
  func.func @transform_29(%arg0: i32) -> (i32, i32, i32) {
    %c0_i32 = arith.constant 0 : i32
    %c0_i32_0 = arith.constant 0 : i32
    %c0_i32_1 = arith.constant 0 : i32
    %c0_i32_2 = arith.constant 0 : i32
    return %c0_i32, %c0_i32_0, %c0_i32_1 : i32, i32, i32
  }
  func.func @transform_30(%arg0: i32) -> (i32, i32, i32) {
    %c0_i32 = arith.constant 0 : i32
    %c0_i32_0 = arith.constant 0 : i32
    %c0_i32_1 = arith.constant 0 : i32
    %c0_i32_2 = arith.constant 0 : i32
    return %c0_i32, %c0_i32_0, %c0_i32_1 : i32, i32, i32
  }
  func.func @transform_31(%arg0: i32) -> (i32, i32, i32) {
    %c0_i32 = arith.constant 0 : i32
    %c0_i32_0 = arith.constant 0 : i32
    %c0_i32_1 = arith.constant 0 : i32
    %c0_i32_2 = arith.constant 0 : i32
    return %c0_i32, %c0_i32_0, %c0_i32_1 : i32, i32, i32
  }
  func.func @transform_32(%arg0: i32) -> (i32, i32, i32) {
    %c0_i32 = arith.constant 0 : i32
    %c0_i32_0 = arith.constant 0 : i32
    %c0_i32_1 = arith.constant 0 : i32
    %c0_i32_2 = arith.constant 0 : i32
    return %c0_i32, %c0_i32_0, %c0_i32_1 : i32, i32, i32
  }
  func.func @transform_33(%arg0: i32) -> (i32, i32, i32) {
    %c0_i32 = arith.constant 0 : i32
    %c0_i32_0 = arith.constant 0 : i32
    %c0_i32_1 = arith.constant 0 : i32
    %c0_i32_2 = arith.constant 0 : i32
    return %c0_i32, %c0_i32_0, %c0_i32_1 : i32, i32, i32
  }
  func.func @transform_34(%arg0: i32) -> (i32, i32) {
    %c0_i32 = arith.constant 0 : i32
    %c0_i32_0 = arith.constant 0 : i32
    %c0_i32_1 = arith.constant 0 : i32
    return %c0_i32, %c0_i32_0 : i32, i32
  }
  func.func @transform_35(%arg0: i32) -> (i32, i32) {
    %c0_i32 = arith.constant 0 : i32
    %c0_i32_0 = arith.constant 0 : i32
    %c0_i32_1 = arith.constant 0 : i32
    return %c0_i32, %c0_i32_0 : i32, i32
  }
  func.func @transform_36(%arg0: i32) -> (i32, i32) {
    %c0_i32 = arith.constant 0 : i32
    %c0_i32_0 = arith.constant 0 : i32
    %c0_i32_1 = arith.constant 0 : i32
    return %c0_i32, %c0_i32_0 : i32, i32
  }
  func.func @transform_37(%arg0: i32) -> (i32, i32) {
    %c0_i32 = arith.constant 0 : i32
    %c0_i32_0 = arith.constant 0 : i32
    %c0_i32_1 = arith.constant 0 : i32
    return %c0_i32, %c0_i32_0 : i32, i32
  }
  func.func @transform_38(%arg0: i32) -> (i32, i32) {
    %c0_i32 = arith.constant 0 : i32
    %c0_i32_0 = arith.constant 0 : i32
    %c0_i32_1 = arith.constant 0 : i32
    return %c0_i32, %c0_i32_0 : i32, i32
  }
  func.func @transform_39(%arg0: i32) -> (i32, i32) {
    %c0_i32 = arith.constant 0 : i32
    %c0_i32_0 = arith.constant 0 : i32
    %c0_i32_1 = arith.constant 0 : i32
    return %c0_i32, %c0_i32_0 : i32, i32
  }
}

</mosaic_0001>

<bundles_post_ra>
// kernel: transformer_forward.1
= control target key start
LH: loop header
LB: loop body
LE: loop exit
PB: predicated region body
PF: predicated region fallthrough
CT: control target
= control target key end

     0   :  { %s5463_s6 = smov 1   ;;  %s5464_s10 = smov 2   ;;  %s6679_s0 = inlined_call_operand.smem [shape: u32[40], index: -1, kind: input, shape index: {}] }
   0x1   :  { %s5532_s5 = sld [smem:[%s6679_s0]]   ;;  %s5465_s14 = smov 3  }
   0x2   :  { %s5537_s9 = sld [smem:[%s6679_s0 + %s5463_s6]]   ;;  %s5466_s18 = smov 4  }
   0x3   :  { %s5542_s13 = sld [smem:[%s6679_s0 + %s5464_s10]]   ;;  %s5467_s22 = smov 5  }
   0x4   :  { %s5547_s17 = sld [smem:[%s6679_s0 + %s5465_s14]]   ;;  %s5468_s26 = smov 6  }
   0x5   :  { %s5552_s21 = sld [smem:[%s6679_s0 + %s5466_s18]]   ;;  %s5469_s30 = smov 7  }
   0x6   :  { %s5557_s25 = sld [smem:[%s6679_s0 + %s5467_s22]]   ;;  %s5470_s4 = smov 8  }
   0x7   :  { %s5562_s29 = sld [smem:[%s6679_s0 + %s5468_s26]]   ;;  %s5471_s10 = smov 9  }
   0x8   :  { %6700 = sst [smem:[#allocation29_spill]] %s5537_s9  ;;  %s5472_s15 = smov 10  }
   0x9   :  { %s5567_s3 = sld [smem:[%s6679_s0 + %s5469_s30]]   ;;  %s5473_s20 = smov 11  }
   0xa   :  { %6701 = sst [smem:[#allocation30_spill]] %s5547_s17  ;;  %s5474_s26 = smov 12  }
   0xb   :  { %6702 = sst [smem:[#allocation31_spill]] %s5552_s21  ;;  %s5475_s1 = smov 13  }
   0xc   :  { %s5572_s8 = sld [smem:[%s6679_s0 + %s5470_s4]]   ;;  %s5476_s7 = smov 14  }
   0xd   :  { %6703 = sst [smem:[#allocation32_spill]] %s5562_s29  ;;  %s5478_s22 = smov 16  }
   0xe   :  { %s5577_s14 = sld [smem:[%s6679_s0 + %s5471_s10]]   ;;  %s5479_s28 = smov 17  }
   0xf   :  { %s5582_s19 = sld [smem:[%s6679_s0 + %s5472_s15]]   ;;  %s5477_s15 = smov 15  }
  0x10   :  { %s5587_s24 = sld [smem:[%s6679_s0 + %s5473_s20]]  }
  0x11   :  { %s5592_s30 = sld [smem:[%s6679_s0 + %s5474_s26]]  }
  0x12   :  { %s5597_s6 = sld [smem:[%s6679_s0 + %s5475_s1]]  }
  0x13   :  { %s5602_s12 = sld [smem:[%s6679_s0 + %s5476_s7]]   ;;  %s5480_s7 = smov 18  }
  0x14   :  { %6704 = sst [smem:[#allocation33_spill]] %s5577_s14 }
  0x15   :  { %6705 = sst [smem:[#allocation34_spill]] %s5582_s19 }
  0x16   :  { %6706 = sst [smem:[#allocation35_spill]] %s5587_s24 }
  0x17   :  { %6707 = sst [smem:[#allocation36_spill]] %s5592_s30 }
  0x18   :  { %6708 = sst [smem:[#allocation37_spill]] %s5597_s6 }
  0x19   :  { %6709 = sst [smem:[#allocation38_spill]] %s5602_s12 }
  0x1a   :  { %s5607_s20 = sld [smem:[%s6679_s0 + %s5477_s15]]   ;;  %s5481_s15 = smov 19  }
  0x1b   :  { %s5612_s27 = sld [smem:[%s6679_s0 + %s5478_s22]]   ;;  %s5482_s22 = smov 20  }
  0x1c   :  { %s5617_s4 = sld [smem:[%s6679_s0 + %s5479_s28]]   ;;  %s5483_s28 = smov 21  }
  0x1d   :  { %s5622_s21 = sld [smem:[%s6679_s0 + %s5480_s7]]   ;;  %s5484_s7 = smov 22  }
  0x1e   :  { %s5627_s17 = sld [smem:[%s6679_s0 + %s5481_s15]]   ;;  %s5485_s15 = smov 23  }
  0x1f   :  { %s5632_s9 = sld [smem:[%s6679_s0 + %s5482_s22]]   ;;  %s5486_s22 = smov 24  }
  0x20   :  { %s5637_s6 = sld [smem:[%s6679_s0 + %s5483_s28]]   ;;  %s5487_s28 = smov 25  }
  0x23   :  { %6710 = sst [smem:[#allocation39_spill]] %s5622_s21 }
  0x24   :  { %6711 = sst [smem:[#allocation40_spill]] %s5627_s17 }
  0x25   :  { %6712 = sst [smem:[#allocation41_spill]] %s5632_s9 }
  0x26   :  { %6713 = sst [smem:[#allocation42_spill]] %s5637_s6 }
  0x27   :  { %s5642_s21 = sld [smem:[%s6679_s0 + %s5484_s7]]   ;;  %s5488_s7 = smov 26  }
  0x28   :  { %s5647_s17 = sld [smem:[%s6679_s0 + %s5485_s15]]   ;;  %s5489_s15 = smov 27  }
  0x29   :  { %s5652_s9 = sld [smem:[%s6679_s0 + %s5486_s22]]   ;;  %s5490_s22 = smov 28  }
  0x2a   :  { %s5657_s6 = sld [smem:[%s6679_s0 + %s5487_s28]]   ;;  %s5491_s28 = smov 29  }
  0x2b   :  { %s5662_s12 = sld [smem:[%s6679_s0 + %s5488_s7]]   ;;  %s5492_s7 = smov 30  }
  0x2c   :  { %s5667_s24 = sld [smem:[%s6679_s0 + %s5489_s15]]   ;;  %s5493_s15 = smov 31  }
  0x2f   :  { %6714 = sst [smem:[#allocation43_spill]] %s5652_s9 }
  0x30   :  { %6715 = sst [smem:[#allocation44_spill]] %s5657_s6 }
  0x31   :  { %6716 = sst [smem:[#allocation45_spill]] %s5662_s12 }
  0x32   :  { %6717 = sst [smem:[#allocation46_spill]] %s5667_s24 }
  0x33   :  { %s5672_s9 = sld [smem:[%s6679_s0 + %s5490_s22]]   ;;  %s5494_s22 = smov 32  }
  0x34   :  { %s5677_s6 = sld [smem:[%s6679_s0 + %s5491_s28]]   ;;  %s5495_s28 = smov 33  }
  0x35   :  { %s5682_s12 = sld [smem:[%s6679_s0 + %s5492_s7]]   ;;  %s5496_s7 = smov 34  }
  0x36   :  { %s5687_s24 = sld [smem:[%s6679_s0 + %s5493_s15]]   ;;  %s5497_s15 = smov 35  }
  0x37   :  { %s5692_s19 = sld [smem:[%s6679_s0 + %s5494_s22]]   ;;  %s5498_s22 = smov 36  }
  0x38   :  { %s5697_s30 = sld [smem:[%s6679_s0 + %s5495_s28]]   ;;  %s5499_s28 = smov 37  }
  0x39   :  { %s5707_s14 = sld [smem:[%s6679_s0 + %s5497_s15]]   ;;  %s5501_s15 = smov 39  }
  0x3a   :  { %s5717_s29 = sld [smem:[%s6679_s0 + %s5499_s28]]  }
  0x3b   :  { %6718 = sst [smem:[#allocation47_spill]] %s5682_s12 }
  0x3c   :  { %s5702_s12 = sld [smem:[%s6679_s0 + %s5496_s7]]   ;;  %s5500_s7 = smov 38  }
  0x3d   :  { %6719 = sst [smem:[#allocation48_spill]] %s5692_s19 }
  0x3e   :  { %s5712_s19 = sld [smem:[%s6679_s0 + %s5498_s22]]  }
  0x3f   :  { %6721 = sst [smem:[#allocation50_spill]] %s5707_s14 }
  0x40   :  { %s5727_s14 = sld [smem:[%s6679_s0 + %s5501_s15]]  }
  0x42   :  { %6720 = sst [smem:[#allocation49_spill]] %s5702_s12 }
  0x43   :  { %s5722_s12 = sld [smem:[%s6679_s0 + %s5500_s7]]  }
  0x44   :  { %84 = vsyncpa [#allocation4], 0 }
  0x45   :  { %85 = vsyncpa [#allocation7], 0 }
  0x46   :  { %86 = vsyncpa [#allocation10], 0 }
  0x47   :  { %87 = vsyncpa [#allocation13], 0 }
  0x48   :  { %88 = vsyncpa [#allocation16], 0 }
  0x49   :  { %89 = vsyncpa [#allocation19], 0 }
  0x4a   :  { %90 = vsyncpa [#allocation5], 0  ;;  %s138_s22 = sshll.u32 %s5612_s27, 4  ;;  %s5502_s23 = smov [#allocation6]   ;;  %s139_s22 = int_to_ptr.hbm [resolvable:$true] %s138_s22 }
  0x4b   :  { %s140_s26 = sshll.u32 %s5502_s23, 4  ;;  %s172_s28 = sshll.u32 %s5642_s21, 4  ;;  %s141_s26 = int_to_ptr.vmem [resolvable:$true] %s140_s26  ;;  %s173_s28 = int_to_ptr.hbm [resolvable:$true] %s172_s28 }
  0x4c   :  { %s5161_s1 = sshra.s32 %s139_s22, 4  ;;  %s5165_s2 = scalar_lea.hbm %s5612_s27, 2  ;;  %s5162_s1 = int_to_ptr.hbm [resolvable:$true] %s5161_s1 }
  0x4d   :  { %s5163_s0 = scalar_lea.hbm %s5162_s1, 2  ;;  %p5166_p1 = scmp.lt.s32.totalorder %s5162_s1, %s5612_s27 }
  0x4e   :  { %p5164_p0 = scmp.ne.s32.totalorder %s5162_s1, %s5163_s0  ;;  %p5167_p2 = scmp.lt.s32.totalorder %s5165_s2, %s5163_s0 }
  0x50   :  { %p5168_p3 = por %p5167_p2, %p5166_p1 }
  0x52   :  { %p5169_p4 = pnand %p5168_p3, %p5164_p0 }
  0x54   :  { %5172 = shalt.err (!%p5169_p4)
}
  0x55   :  { %s5503_s7 = smov 16   ;;  %s5504_s10 = smov 1  }
  0x56   :  { %146 = dma.hbm_to_vmem [thread:$0]  %s139_s22, 32, %s141_s26, [#allocation7], %s5503_s7, %s5503_s7, %s5504_s10  }
  0x57   :  { %s5505_s11 = smov [#allocation9]   ;;  %s206_s16 = sshll.u32 %s5672_s9, 4  ;;  %s5737_s16 = int_to_ptr.hbm [resolvable:$true] %s206_s16 }
  0x58   :  { %s174_s15 = sshll.u32 %s5505_s11, 4  ;;  %s5185_s27 = sshra.s32 %s173_s28, 4  ;;  %s175_s15 = int_to_ptr.vmem [resolvable:$true] %s174_s15  ;;  %s5186_s27 = int_to_ptr.hbm [resolvable:$true] %s5185_s27 }
  0x59   :  { %s5187_s18 = scalar_lea.hbm %s5186_s27, 2  ;;  %s5189_s23 = scalar_lea.hbm %s5642_s21, 2 }
  0x5a   :  { %p5188_p5 = scmp.ne.s32.totalorder %s5186_s27, %s5187_s18  ;;  %p5190_p6 = scmp.lt.s32.totalorder %s5186_s27, %s5642_s21 }
  0x5b   :  { %p5191_p7 = scmp.lt.s32.totalorder %s5189_s23, %s5187_s18 }
  0x5d   :  { %p5192_p8 = por %p5191_p7, %p5190_p6 }
  0x5f   :  { %p5193_p9 = pnand %p5192_p8, %p5188_p5 }
  0x61   :  { %5196 = shalt.err (!%p5193_p9)
}
  0x62   :  { %180 = dma.hbm_to_vmem [thread:$0]  %s173_s28, 32, %s175_s15, [#allocation10], %s5503_s7, %s5503_s7, %s5504_s10  }
  0x63   :  { %s234_s22 = sshll.u32 %s5687_s24, 4  ;;  %s5506_s26 = smov [#allocation12]   ;;  %s5745_s22 = int_to_ptr.hbm [resolvable:$true] %s234_s22 }
  0x64   :  { %s208_s1 = sshll.u32 %s5506_s26, 4  ;;  %s5209_s0 = sshra.s32 %s5737_s16, 4  ;;  %s209_s1 = int_to_ptr.vmem [resolvable:$true] %s208_s1  ;;  %s5210_s0 = int_to_ptr.hbm [resolvable:$true] %s5209_s0 }
  0x65   :  { %s5211_s21 = scalar_lea.hbm %s5210_s0, 2  ;;  %s5213_s2 = scalar_lea.hbm %s5672_s9, 2 }
  0x66   :  { %p5212_p10 = scmp.ne.s32.totalorder %s5210_s0, %s5211_s21  ;;  %p5214_p11 = scmp.lt.s32.totalorder %s5210_s0, %s5672_s9 }
  0x67   :  { %p5215_p12 = scmp.lt.s32.totalorder %s5213_s2, %s5211_s21 }
  0x69   :  { %p5216_p13 = por %p5215_p12, %p5214_p11 }
  0x6b   :  { %p5217_p0 = pnand %p5216_p13, %p5212_p10 }
  0x6d   :  { %5220 = shalt.err (!%p5217_p0)
}
  0x6e   :  { %214 = dma.hbm_to_vmem [thread:$0]  %s5737_s16, 32, %s209_s1, [#allocation13], %s5503_s7, %s5503_s7, %s5504_s10  }
  0x6f   :  { %s5507_s28 = smov [#allocation15]   ;;  %s267_s15 = sshll.u32 %s5712_s19, 4  ;;  %s268_s15 = int_to_ptr.hbm [resolvable:$true] %s267_s15 }
  0x70   :  { %s236_s11 = sshll.u32 %s5507_s28, 4  ;;  %s5233_s27 = sshra.s32 %s5745_s22, 4  ;;  %s237_s11 = int_to_ptr.vmem [resolvable:$true] %s236_s11  ;;  %s5234_s27 = int_to_ptr.hbm [resolvable:$true] %s5233_s27 }
  0x71   :  { %s5235_s9 = scalar_lea.hbm %s5234_s27, 2  ;;  %s5237_s18 = scalar_lea.hbm %s5687_s24, 2 }
  0x72   :  { %p5236_p1 = scmp.ne.s32.totalorder %s5234_s27, %s5235_s9  ;;  %p5238_p2 = scmp.lt.s32.totalorder %s5234_s27, %s5687_s24 }
  0x73   :  { %p5239_p3 = scmp.lt.s32.totalorder %s5237_s18, %s5235_s9 }
  0x75   :  { %p5240_p4 = por %p5239_p3, %p5238_p2 }
  0x77   :  { %p5241_p5 = pnand %p5240_p4, %p5236_p1 }
  0x79   :  { %5244 = shalt.err (!%p5241_p5)
}
  0x7a   :  { %242 = dma.hbm_to_vmem [thread:$0]  %s5745_s22, 32, %s237_s11, [#allocation16], %s5503_s7, %s5503_s7, %s5504_s10  }
  0x7b   :  { %s125_s16 = sshll.u32 %s5607_s20, 4  ;;  %s5508_s23 = smov [#allocation18]   ;;  %s5763_s16 = int_to_ptr.hbm [resolvable:$true] %s125_s16 }
  0x7c   :  { %s269_s26 = sshll.u32 %s5508_s23, 4  ;;  %s5257_s1 = sshra.s32 %s268_s15, 4  ;;  %s270_s26 = int_to_ptr.vmem [resolvable:$true] %s269_s26  ;;  %s5258_s1 = int_to_ptr.hbm [resolvable:$true] %s5257_s1 }
  0x7d   :  { %s5259_s24 = scalar_lea.hbm %s5258_s1, 1  ;;  %s5261_s0 = scalar_lea.hbm %s5712_s19, 1 }
  0x7e   :  { %p5260_p6 = scmp.ne.s32.totalorder %s5258_s1, %s5259_s24  ;;  %p5262_p7 = scmp.lt.s32.totalorder %s5258_s1, %s5712_s19 }
  0x7f   :  { %p5263_p8 = scmp.lt.s32.totalorder %s5261_s0, %s5259_s24 }
  0x81   :  { %p5264_p9 = por %p5263_p8, %p5262_p7 }
  0x83   :  { %p5265_p10 = pnand %p5264_p9, %p5260_p6 }
  0x85   :  { %5268 = shalt.err (!%p5265_p10)
}
  0x86   :  { %272 = dma.hbm_to_vmem [thread:$0]  %s268_s15, 16, %s270_s26, [#allocation19]  }
  0x87   :  { %s5509_s22 = smov [#allocation3]   ;;  %s151_s2 = sshll.u32 %s5617_s4, 4  ;;  %s5768_s2 = int_to_ptr.hbm [resolvable:$true] %s151_s2 }
  0x88   :  { %s127_s21 = sshll.u32 %s5509_s22, 4  ;;  %s5281_s28 = sshra.s32 %s5763_s16, 4  ;;  %s128_s21 = int_to_ptr.vmem [resolvable:$true] %s127_s21  ;;  %s5282_s28 = int_to_ptr.hbm [resolvable:$true] %s5281_s28 }
  0x89   :  { %s5283_s11 = scalar_lea.hbm %s5282_s28, 2  ;;  %s5285_s19 = scalar_lea.hbm %s5607_s20, 2 }
  0x8a   :  { %p5284_p11 = scmp.ne.s32.totalorder %s5282_s28, %s5283_s11  ;;  %p5286_p12 = scmp.lt.s32.totalorder %s5282_s28, %s5607_s20 }
  0x8b   :  { %p5287_p13 = scmp.lt.s32.totalorder %s5285_s19, %s5283_s11 }
  0x8d   :  { %p5288_p0 = por %p5287_p13, %p5286_p12 }
  0x8f   :  { %p5289_p1 = pnand %p5288_p0, %p5284_p11 }
  0x91   :  { %5292 = shalt.err (!%p5289_p1)
}
  0x92   :  { %133 = dma.hbm_to_vmem [thread:$0]  %s5763_s16, 32, %s128_s21, [#allocation4], %s5503_s7, %s5503_s7, %s5504_s10  }
  0x93   :  { %s185_s15 = sshll.u32 %s5647_s17, 4  ;;  %s5510_s27 = smov [#allocation8]   ;;  %s5778_s15 = int_to_ptr.hbm [resolvable:$true] %s185_s15 }
  0x94   :  { %s153_s9 = sshll.u32 %s5510_s27, 4  ;;  %s5305_s20 = sshra.s32 %s5768_s2, 4  ;;  %s154_s9 = int_to_ptr.vmem [resolvable:$true] %s153_s9  ;;  %s5306_s20 = int_to_ptr.hbm [resolvable:$true] %s5305_s20 }
  0x95   :  { %s5307_s18 = scalar_lea.hbm %s5306_s20, 2  ;;  %s5309_s23 = scalar_lea.hbm %s5617_s4, 2 }
  0x96   :  { %p5308_p2 = scmp.ne.s32.totalorder %s5306_s20, %s5307_s18  ;;  %p5310_p3 = scmp.lt.s32.totalorder %s5306_s20, %s5617_s4 }
  0x97   :  { %p5311_p4 = scmp.lt.s32.totalorder %s5309_s23, %s5307_s18 }
  0x99   :  { %p5312_p5 = por %p5311_p4, %p5310_p3 }
  0x9b   :  { %p5313_p6 = pnand %p5312_p5, %p5308_p2 }
  0x9d   :  { %5316 = shalt.err (!%p5313_p6)
}
  0x9e   :  { %159 = dma.hbm_to_vmem [thread:$0]  %s5768_s2, 32, %s154_s9, [#allocation7], %s5503_s7, %s5503_s7, %s5504_s10  }
  0x9f   :  { %s5511_s16 = smov [#allocation11]   ;;  %s219_s1 = sshll.u32 %s5677_s6, 4  ;;  %s5788_s1 = int_to_ptr.hbm [resolvable:$true] %s219_s1 }
  0xa0   :  { %s187_s26 = sshll.u32 %s5511_s16, 4  ;;  %s5329_s4 = sshra.s32 %s5778_s15, 4  ;;  %s188_s26 = int_to_ptr.vmem [resolvable:$true] %s187_s26  ;;  %s5330_s4 = int_to_ptr.hbm [resolvable:$true] %s5329_s4 }
  0xa1   :  { %s5331_s24 = scalar_lea.hbm %s5330_s4, 2  ;;  %s5333_s0 = scalar_lea.hbm %s5647_s17, 2 }
  0xa2   :  { %p5332_p7 = scmp.ne.s32.totalorder %s5330_s4, %s5331_s24  ;;  %p5334_p8 = scmp.lt.s32.totalorder %s5330_s4, %s5647_s17 }
  0xa3   :  { %p5335_p9 = scmp.lt.s32.totalorder %s5333_s0, %s5331_s24 }
  0xa5   :  { %p5336_p10 = por %p5335_p9, %p5334_p8 }
  0xa7   :  { %p5337_p11 = pnand %p5336_p10, %p5332_p7 }
  0xa9   :  { %5340 = shalt.err (!%p5337_p11)
}
  0xaa   :  { %193 = dma.hbm_to_vmem [thread:$0]  %s5778_s15, 32, %s188_s26, [#allocation10], %s5503_s7, %s5503_s7, %s5504_s10  }
  0xab   :  { %s249_s22 = sshll.u32 %s5697_s30, 4  ;;  %s5512_s21 = smov [#allocation14]   ;;  %s5798_s22 = int_to_ptr.hbm [resolvable:$true] %s249_s22 }
  0xac   :  { %s221_s2 = sshll.u32 %s5512_s21, 4  ;;  %s5353_s17 = sshra.s32 %s5788_s1, 4  ;;  %s222_s2 = int_to_ptr.vmem [resolvable:$true] %s221_s2  ;;  %s5354_s17 = int_to_ptr.hbm [resolvable:$true] %s5353_s17 }
  0xad   :  { %s5355_s28 = scalar_lea.hbm %s5354_s17, 2  ;;  %s5357_s11 = scalar_lea.hbm %s5677_s6, 2 }
  0xae   :  { %p5356_p12 = scmp.ne.s32.totalorder %s5354_s17, %s5355_s28  ;;  %p5358_p13 = scmp.lt.s32.totalorder %s5354_s17, %s5677_s6 }
  0xaf   :  { %p5359_p0 = scmp.lt.s32.totalorder %s5357_s11, %s5355_s28 }
  0xb1   :  { %p5360_p1 = por %p5359_p0, %p5358_p13 }
  0xb3   :  { %p5361_p2 = pnand %p5360_p1, %p5356_p12 }
  0xb5   :  { %5364 = shalt.err (!%p5361_p2)
}
  0xb6   :  { %227 = dma.hbm_to_vmem [thread:$0]  %s5788_s1, 32, %s222_s2, [#allocation13], %s5503_s7, %s5503_s7, %s5504_s10  }
  0xb7   :  { %s5513_s19 = smov [#allocation17]   ;;  %s278_s27 = sshll.u32 %s5717_s29, 4  ;;  %s279_s27 = int_to_ptr.hbm [resolvable:$true] %s278_s27 }
  0xb8   :  { %s251_s15 = sshll.u32 %s5513_s19, 4  ;;  %s5377_s9 = sshra.s32 %s5798_s22, 4  ;;  %s252_s15 = int_to_ptr.vmem [resolvable:$true] %s251_s15  ;;  %s5378_s9 = int_to_ptr.hbm [resolvable:$true] %s5377_s9 }
  0xb9   :  { %s5379_s6 = scalar_lea.hbm %s5378_s9, 2  ;;  %s5381_s20 = scalar_lea.hbm %s5697_s30, 2 }
  0xba   :  { %p5380_p3 = scmp.ne.s32.totalorder %s5378_s9, %s5379_s6  ;;  %p5382_p4 = scmp.lt.s32.totalorder %s5378_s9, %s5697_s30 }
  0xbb   :  { %p5383_p5 = scmp.lt.s32.totalorder %s5381_s20, %s5379_s6 }
  0xbd   :  { %p5384_p6 = por %p5383_p5, %p5382_p4 }
  0xbf   :  { %p5385_p7 = pnand %p5384_p6, %p5380_p3 }
  0xc1   :  { %5388 = shalt.err (!%p5385_p7)
}
  0xc2   :  { %257 = dma.hbm_to_vmem [thread:$0]  %s5798_s22, 32, %s252_s15, [#allocation16], %s5503_s7, %s5503_s7, %s5504_s10  }
  0xc3   :  { %s5514_s18 = smov [#allocation20]   ;;  %s5401_s16 = sshra.s32 %s279_s27, 4  ;;  %s5402_s16 = int_to_ptr.hbm [resolvable:$true] %s5401_s16 }
  0xc4   :  { %s280_s23 = sshll.u32 %s5514_s18, 4  ;;  %s5403_s26 = scalar_lea.hbm %s5402_s16, 1  ;;  %s281_s23 = int_to_ptr.vmem [resolvable:$true] %s280_s23 }
  0xc5   :  { %p5404_p8 = scmp.ne.s32.totalorder %s5402_s16, %s5403_s26  ;;  %s5405_s30 = scalar_lea.hbm %s5717_s29, 1 }
  0xc6   :  { %p5406_p9 = scmp.lt.s32.totalorder %s5402_s16, %s5717_s29  ;;  %p5407_p10 = scmp.lt.s32.totalorder %s5405_s30, %s5403_s26 }
  0xc8   :  { %p5408_p11 = por %p5407_p10, %p5406_p9 }
  0xca   :  { %p5409_p12 = pnand %p5408_p11, %p5404_p8 }
  0xcc   :  { %5412 = shalt.err (!%p5409_p12)
}
  0xcd   :  { %283 = dma.hbm_to_vmem [thread:$0]  %s279_s27, 16, %s281_s23, [#allocation19]  }
  0xce   :  { %5449 = dma.done.wait [#allocation4], 32  }
  0xcf   :  { %5450 = vsyncadd [#allocation4], 4294967264 }
  0xd0   :  { %5451 = dma.done.wait [#allocation7], 64  }
  0xd1   :  { %5452 = vsyncadd [#allocation7], 4294967232 }
  0xd2   :  { %5453 = dma.done.wait [#allocation10], 64  }
  0xd3   :  { %5454 = vsyncadd [#allocation10], 4294967232 }
  0xd4   :  { %5455 = dma.done.wait [#allocation13], 64  }
  0xd5   :  { %5456 = vsyncadd [#allocation13], 4294967232 }
  0xd6   :  { %5457 = dma.done.wait [#allocation16], 64  }
  0xd7   :  { %5458 = vsyncadd [#allocation16], 4294967232 }
  0xd8   :  { %5459 = dma.done.wait [#allocation19], 32  }
  0xd9   :  { %5460 = vsyncadd [#allocation19], 4294967264  ;;  %vm349_vm0 = vcmask 261120   ;;  %v337_v0 = vld [vmem:[%s5532_s5] sm:$0xff]  ;;  %v338_v1 = vld [vmem:[%s5532_s5 + $0x8] sm:$0xff]  ;;  %v5515_v4 = vmov 32.0  }
  0xda   :  { %v350_v2 = vsel %vm349_vm0, %v337_v0, 0.0  ;;  %v353_v3 = vsel %vm349_vm0, %v338_v1, 0.0  ;;  %4785 = vrcp.f32 %v5515_v4  ;;  %v331_v7 = vld [vmem:[%s5542_s13] sm:$0xff]  ;;  %v5516_v8 = vmov 0   ;;  %v332_v11 = vld [vmem:[%s5542_s13 + $0x8] sm:$0xff]  ;;  %v343_v24 = vld [vmem:[%s5567_s3 + $0x10] sm:$0xff] }
  0xdb   :  { %351 = vadd.xlane.f32.xlu0 %v350_v2  ;;  %4751 = vset.pattern.permute.xlu2 %v5516_v8  ;;  %v344_v25 = vld [vmem:[%s5567_s3 + $0x18] sm:$0xff]  ;;  %v341_v30 = vld [vmem:[%s5567_s3] sm:$0xff]  ;;  %v342_v31 = vld [vmem:[%s5567_s3 + $0x8] sm:$0xff]  ;;  %s6722_s13 = sld [smem:[#allocation32_spill]]  ;;  %vm443_vm8 = vcmask 523264   ;;  %s5517_s29 = smov 96  }
  0xdc   :  { %4752 = vset.pattern.permute.xlu0 %v5516_v8  ;;  %413 = vperm.xlu2 %4751, %v331_v7   ;;  %v425_v27 = vpack.c.bf16 %v344_v25, %v343_v24  ;;  %v345_v32 = vld [vmem:[%s5572_s8] sm:$0xff]  ;;  %v424_v33 = vpack.c.bf16 %v342_v31, %v341_v30  ;;  %v346_v34 = vld [vmem:[%s5572_s8 + $0x8] sm:$0xff]  ;;  %s5518_s10 = smov 32   ;;  %s5519_s1 = smov 80  }
  0xdd   :  { %v450_v35 = vpack.c.bf16 %v346_v34, %v345_v32  ;;  %v4753_v51 = vld [vmem:[%s5557_s25] ss:$0 sm:$0xff]  ;;  %s6723_s4 = sld [smem:[#allocation33_spill]]  ;;  %s4453_s26 = sshll.u32 %s5727_s14, 4  ;;  %s4454_s26 = int_to_ptr.hbm [resolvable:$true] %s4453_s26 }
  0xde   :  { %435 = vmatpush.bf16.msra.mxu0 %v425_v27  ;;  %s6724_s24 = sld [smem:[#allocation36_spill]]  ;;  %s5437_s30 = sshra.s32 %s4454_s26, 4  ;;  %s5438_s30 = int_to_ptr.hbm [resolvable:$true] %s5437_s30 }
  0xdf   :  { %462 = vmatpush.bf16.msra.mxu1 %v450_v35  ;;  %561 = vmatpush.bf16.msra.mxu2 %v450_v35  ;;  %s6726_s0 = sld [smem:[#allocation35_spill]]  ;;  %p5442_p0 = scmp.lt.s32.totalorder %s5438_s30, %s5727_s14 }
  0xe0   :  { %v4786_v5 = vpop.eup %4785  ;;  %660 = vmatpush.bf16.msra.mxu3 %v450_v35  ;;  %s6727_s22 = sld [smem:[#allocation38_spill]] }
  0xe1   :  { %v357_v6 = vmul.f32 32.0, %v4786_v5  ;;  %vm361_vm1 = vweird.f32 %v4786_v5  ;;  %v4754_v56 = vld [vmem:[%s6722_s13] ss:$0 sm:$0xff]  ;;  %s6728_s21 = sld [smem:[#allocation37_spill]] }
  0xe2   :  { %436 = vmatpush.bf16.msra.mxu0 %v424_v33  ;;  %463 = vmatmul.bf16.vlgmr.msra.gmra.mxu1 %v5516_v8  ;;  %s6734_s2 = sld [smem:[#allocation41_spill]] }
  0xe3   :  { %354 = vadd.xlane.f32.xlu0 %v353_v3  ;;  %v358_v9 = vsub.f32 1.0, %v357_v6  ;;  %759 = vmatpush.bf16.msrb.mxu1 %v450_v35  ;;  %s6735_s17 = sld [smem:[#allocation30_spill]] }
  0xe4   :  { %418 = vperm.xlu2 %4751, %v332_v11   ;;  %858 = vmatpush.bf16.msrb.mxu2 %v450_v35  ;;  %s6736_s28 = sld [smem:[#allocation42_spill]] }
  0xe5   :  { %v359_v10 = vmul.f32 %v4786_v5, %v358_v9  ;;  %957 = vmatpush.bf16.msrb.mxu3 %v450_v35  ;;  %s6737_s11 = sld [smem:[#allocation44_spill]] }
  0xe6   :  { %1056 = vmatpush.bf16.msrb.mxu0 %v450_v35  ;;  %s6738_s19 = sld [smem:[#allocation45_spill]] }
  0xe7   :  { %v360_v12 = vadd.f32 %v4786_v5, %v359_v10  ;;  %1155 = vmatpush.bf16.msra.mxu1 %v450_v35  ;;  %s6739_s15 = sld [smem:[#allocation49_spill]] }
  0xe8   :  { %s6740_s27 = sld [smem:[#allocation50_spill]] }
  0xe9   :  { %v5825_v13 = vsel %vm361_vm1, %v4786_v5, %v360_v12  ;;  %s6741_s9 = sld [smem:[#allocation43_spill]] }
  0xea   :  { %s6742_s6 = sld [smem:[#allocation31_spill]] }
  0xeb   :  { %s6743_s20 = sld [smem:[#allocation46_spill]] }
  0xec   :  { %s6744_s18 = sld [smem:[#allocation47_spill]] }
  0xed   :  { %s6745_s23 = sld [smem:[#allocation48_spill]] }
 0x136   :  { %v5841_v53 = vpop.permute.xlu2 %413 }
 0x13e   :  { %v5844_v62 = vpop.permute.xlu2 %418 }
 0x14e   :  { %v352_v14 = vpop.xlane.xlu0 %351 }
 0x14f   :  { %v363_v15 = vmul.f32 %v5825_v13, %v352_v14 }
 0x151   :  { %v365_v16 = vsub.f32 %v337_v0, %v363_v15 }
 0x153   :  { %v367_v17 = vmul.f32 %v365_v16, %v365_v16 }
 0x155   :  { %v369_v18 = vsel %vm349_vm0, %v367_v17, 0.0 }
 0x156   :  { %370 = vadd.xlane.f32.xlu1 %v369_v18  ;;  %v355_v19 = vpop.xlane.xlu0 %354 }
 0x157   :  { %v364_v20 = vmul.f32 %v5825_v13, %v355_v19 }
 0x159   :  { %v366_v21 = vsub.f32 %v338_v1, %v364_v20 }
 0x15b   :  { %v368_v22 = vmul.f32 %v366_v21, %v366_v21 }
 0x15d   :  { %v372_v23 = vsel %vm349_vm0, %v368_v22, 0.0 }
 0x15e   :  { %373 = vadd.xlane.f32.xlu1 %v372_v23 }
 0x15f   :  { %v464_v3 = vpop.f32.mrf.mxu1 }
 0x167   :  { %v466_v9 = vpop.f32.mrf.mxu1 }
 0x1c9   :  { %v371_v26 = vpop.xlane.xlu1 %370 }
 0x1ca   :  { %v375_v28 = vmul.f32 %v371_v26, %v5825_v13 }
 0x1cc   :  { %v377_v29 = vadd.f32 1e-06, %v375_v28 }
 0x1ce   :  { %4787 = vrsqrt.f32 %v377_v29  ;;  %vm385_vm3 = vweird.f32 %v377_v29 }
 0x1d1   :  { %v374_v36 = vpop.xlane.xlu1 %373 }
 0x1d2   :  { %v376_v37 = vmul.f32 %v374_v36, %v5825_v13 }
 0x1d4   :  { %v4788_v38 = vpop.eup %4787  ;;  %v378_v39 = vadd.f32 1e-06, %v376_v37 }
 0x1d5   :  { %v380_v40 = vmul.f32 %v4788_v38, %v377_v29  ;;  %vm386_vm2 = vweird.f32 %v4788_v38 }
 0x1d6   :  { %4789 = vrsqrt.f32 %v378_v39  ;;  %vm387_vm4 = vmor %vm385_vm3, %vm386_vm2  ;;  %vm395_vm6 = vweird.f32 %v378_v39  ;;  %vm451_vm2 = vcmask 130048  }
 0x1d7   :  { %v381_v41 = vmul.f32 %v4788_v38, %v380_v40 }
 0x1d9   :  { %v382_v42 = vmul.f32 0.5, %v381_v41 }
 0x1db   :  { %v383_v43 = vsub.f32 1.5, %v382_v42 }
 0x1dc   :  { %v4790_v44 = vpop.eup %4789 }
 0x1dd   :  { %v384_v45 = vmul.f32 %v4788_v38, %v383_v43  ;;  %v390_v46 = vmul.f32 %v4790_v44, %v378_v39  ;;  %vm396_vm5 = vweird.f32 %v4790_v44 }
 0x1de   :  { %vm397_vm7 = vmor %vm395_vm6, %vm396_vm5 }
 0x1df   :  { %v388_v47 = vsel %vm387_vm4, %v4788_v38, %v384_v45  ;;  %v391_v48 = vmul.f32 %v4790_v44, %v390_v46 }
 0x1e0   :  { %v399_v50 = vmul.f32 %v388_v47, %v365_v16 }
 0x1e1   :  { %v392_v49 = vmul.f32 0.5, %v391_v48 }
 0x1e2   :  { %v404_v55 = vmul.f32 %v4753_v51, %v399_v50 }
 0x1e3   :  { %v393_v52 = vsub.f32 1.5, %v392_v49 }
 0x1e4   :  { %v409_v59 = vadd.f32 %v4754_v56, %v404_v55 }
 0x1e5   :  { %v394_v54 = vmul.f32 %v4790_v44, %v393_v52 }
 0x1e6   :  { %v421_v63 = vmul.f32 %v5841_v53, %v409_v59 }
 0x1e7   :  { %v398_v57 = vsel %vm397_vm7, %v4790_v44, %v394_v54 }
 0x1e8   :  { %v400_v58 = vmul.f32 %v398_v57, %v366_v21 }
 0x1ea   :  { %v405_v60 = vmul.f32 %v4753_v51, %v400_v58 }
 0x1ec   :  { %v410_v61 = vadd.f32 %v4754_v56, %v405_v60 }
 0x1ee   :  { %v422_v0 = vmul.f32 %v5844_v62, %v410_v61 }
 0x1f0   :  { %v423_v1 = vpack.c.bf16 %v422_v0, %v421_v63 }
 0x1f2   :  { %4510 = vmatmul.msk.bf16.vlgmr.msra.gmra.mxu0 %vm349_vm0, %v423_v1 }
 0x26f   :  { %v438_v2 = vpop.f32.mrf.mxu0 }
 0x270   :  { %444 = vst.msk [vmem:[#allocation2] sm:$0xff] %vm443_vm8, %v438_v2 }
 0x271   :  { %446 = vst.msk [vmem:[#allocation2 + $0x8] sm:$0xff] %vm443_vm8, %v438_v2 }
 0x277   :  { %v440_v4 = vpop.f32.mrf.mxu0 }
 0x278   :  { %v448_v5 = vld [vmem:[#allocation2 + $0x1] sm:$0xff]  ;;  %445 = vst.msk [vmem:[#allocation2 + $0x10] sm:$0xff] %vm443_vm8, %v440_v4 }
 0x279   :  { %v469_v6 = vadd.f32 %v464_v3, %v448_v5  ;;  %447 = vst.msk [vmem:[#allocation2 + $0x18] sm:$0xff] %vm443_vm8, %v440_v4  ;;  %v545_v59 = vld [vmem:[#allocation2 + $0x2] sm:$0xff] }
 0x27b   :  { %4791 = vtanh.f32 %v469_v6  ;;  %v4511_v14 = vmul.f32 -1.442695, %v469_v6 }
 0x280   :  { %v449_v7 = vld [vmem:[#allocation2 + $0x11] sm:$0xff] }
 0x281   :  { %v4792_v10 = vpop.eup %4791  ;;  %v470_v11 = vadd.f32 %v466_v9, %v449_v7  ;;  %v546_v63 = vld [vmem:[#allocation2 + $0x12] sm:$0xff] }
 0x282   :  { %515 = vrot.lane.b32.xlu0 %v4792_v10, %s5517_s29 }
 0x283   :  { %4793 = vtanh.f32 %v470_v11  ;;  %v4512_v15 = vmul.f32 -1.442695, %v470_v11 }
 0x284   :  { %4795 = vpow2.f32 %v4511_v14 }
 0x285   :  { %4797 = vpow2.f32 %v4512_v15 }
 0x289   :  { %v4794_v12 = vpop.eup %4793 }
 0x28a   :  { %517 = vrot.lane.b32.xlu1 %v4794_v12, %s5517_s29  ;;  %v4796_v16 = vpop.eup %4795 }
 0x28b   :  { %v477_v17 = vadd.f32 1.0, %v4796_v16  ;;  %v4798_v18 = vpop.eup %4797 }
 0x28c   :  { %v478_v19 = vadd.f32 1.0, %v4798_v18 }
 0x28d   :  { %4799 = vrcp.f32 %v477_v17  ;;  %v490_v28 = vand.u32 2147483648, %v477_v17  ;;  %vm484_vm10 = vweird.f32 %v477_v17  ;;  %v488_v29 = vand.u32 2147483647, %v477_v17 }
 0x28e   :  { %4801 = vrcp.f32 %v478_v19  ;;  %v505_v37 = vand.u32 2147483648, %v478_v19  ;;  %vm499_vm14 = vweird.f32 %v478_v19  ;;  %v503_v38 = vand.u32 2147483647, %v478_v19 }
 0x28f   :  { %v491_v32 = vor.u32 1.1754944e-38, %v490_v28  ;;  %vm489_vm12 = vcmp.eq.f32.partialorder %v488_v29, 8.507059e+37 }
 0x290   :  { %v506_v40 = vor.u32 1.1754944e-38, %v505_v37  ;;  %vm504_vm1 = vcmp.eq.f32.partialorder %v503_v38, 8.507059e+37 }
 0x293   :  { %v4800_v20 = vpop.eup %4799 }
 0x294   :  { %v480_v21 = vmul.f32 %v4800_v20, %v477_v17  ;;  %v4802_v23 = vpop.eup %4801  ;;  %vm485_vm9 = vweird.f32 %v4800_v20 }
 0x295   :  { %v495_v25 = vmul.f32 %v4802_v23, %v478_v19  ;;  %vm486_vm11 = vmor %vm484_vm10, %vm485_vm9  ;;  %vm500_vm13 = vweird.f32 %v4802_v23 }
 0x296   :  { %v481_v22 = vsub.f32 1.0, %v480_v21  ;;  %vm501_vm15 = vmor %vm499_vm14, %vm500_vm13 }
 0x297   :  { %v496_v27 = vsub.f32 1.0, %v495_v25 }
 0x298   :  { %v482_v24 = vmul.f32 %v4800_v20, %v481_v22 }
 0x299   :  { %v497_v31 = vmul.f32 %v4802_v23, %v496_v27 }
 0x29a   :  { %v483_v26 = vadd.f32 %v4800_v20, %v482_v24 }
 0x29b   :  { %v498_v36 = vadd.f32 %v4802_v23, %v497_v31 }
 0x29c   :  { %v487_v30 = vsel %vm486_vm11, %v4800_v20, %v483_v26 }
 0x29d   :  { %v492_v34 = vsel %vm489_vm12, %v491_v32, %v487_v30  ;;  %v502_v39 = vsel %vm501_vm15, %v4802_v23, %v498_v36 }
 0x29e   :  { %v507_v42 = vsel %vm504_vm1, %v506_v40, %v502_v39  ;;  %v511_v44 = vmul.f32 0.0, %v492_v34 }
 0x29f   :  { %v512_v47 = vmul.f32 0.0, %v507_v42 }
 0x2f4   :  { %v516_v33 = vpop.permute.xlu0 %515 }
 0x2f5   :  { %v521_v35 = vmul.f32 %v516_v33, %v492_v34 }
 0x2f7   :  { %525 = vrot.lane.b32.xlu2 %v521_v35, %s5503_s7 }
 0x2fc   :  { %v518_v41 = vpop.permute.xlu1 %517 }
 0x2fd   :  { %v522_v43 = vmul.f32 %v518_v41, %v507_v42 }
 0x2ff   :  { %527 = vrot.lane.b32.xlu2 %v522_v43, %s5503_s7 }
 0x351   :  { %v526_v45 = vpop.permute.xlu2 %525 }
 0x352   :  { %v5857_v46 = vadd.f32 %v526_v45, %v511_v44 }
 0x354   :  { %4803 = vtanh.f32 %v5857_v46 }
 0x359   :  { %v528_v48 = vpop.permute.xlu2 %527 }
 0x35a   :  { %v4804_v49 = vpop.eup %4803  ;;  %v5860_v50 = vadd.f32 %v528_v48, %v512_v47 }
 0x35b   :  { %537 = vrot.lane.b32.xlu2 %v4804_v49, %s5518_s10 }
 0x35c   :  { %4805 = vtanh.f32 %v5860_v50 }
 0x362   :  { %v4806_v51 = vpop.eup %4805 }
 0x363   :  { %539 = vrot.lane.b32.xlu0 %v4806_v51, %s5518_s10  ;;  %v644_v51 = vld [vmem:[#allocation2 + $0x3] sm:$0xff] }
 0x3b5   :  { %v538_v52 = vpop.permute.xlu2 %537 }
 0x3b6   :  { %v543_v55 = vmul.f32 %v538_v52, %v492_v34 }
 0x3d5   :  { %v540_v54 = vpop.permute.xlu0 %539 }
 0x3d6   :  { %v544_v56 = vmul.f32 %v540_v54, %v507_v42  ;;  %v645_v54 = vld [vmem:[#allocation2 + $0x13] sm:$0xff] }
 0x3d8   :  { %v547_v57 = vpack.c.bf16 %v544_v56, %v543_v55 }
 0x3da   :  { %549 = vrot.lane.b32.xlu2 %v547_v57, %s5519_s1 }
 0x434   :  { %v550_v58 = vpop.permute.xlu2 %549 }
 0x435   :  { %4513 = vmatmul.msk.bf16.vlgmr.msra.gmra.mxu2 %vm451_vm2, %v550_v58 }
 0x4b8   :  { %v563_v60 = vpop.f32.mrf.mxu2 }
 0x4b9   :  { %v568_v61 = vadd.f32 %v563_v60, %v545_v59 }
 0x4bb   :  { %4807 = vtanh.f32 %v568_v61  ;;  %v4514_v4 = vmul.f32 -1.442695, %v568_v61 }
 0x4c0   :  { %v565_v0 = vpop.f32.mrf.mxu2 }
 0x4c1   :  { %v4808_v1 = vpop.eup %4807  ;;  %v569_v2 = vadd.f32 %v565_v0, %v546_v63 }
 0x4c2   :  { %614 = vrot.lane.b32.xlu1 %v4808_v1, %s5517_s29 }
 0x4c3   :  { %4809 = vtanh.f32 %v569_v2  ;;  %v4515_v5 = vmul.f32 -1.442695, %v569_v2 }
 0x4c4   :  { %4811 = vpow2.f32 %v4514_v4 }
 0x4c5   :  { %4813 = vpow2.f32 %v4515_v5 }
 0x4c9   :  { %v4810_v3 = vpop.eup %4809 }
 0x4ca   :  { %616 = vrot.lane.b32.xlu0 %v4810_v3, %s5517_s29  ;;  %v4812_v6 = vpop.eup %4811 }
 0x4cb   :  { %v576_v7 = vadd.f32 1.0, %v4812_v6  ;;  %v4814_v9 = vpop.eup %4813 }
 0x4cc   :  { %v577_v10 = vadd.f32 1.0, %v4814_v9 }
 0x4cd   :  { %4815 = vrcp.f32 %v576_v7  ;;  %v589_v20 = vand.u32 2147483648, %v576_v7  ;;  %vm583_vm4 = vweird.f32 %v576_v7  ;;  %v587_v21 = vand.u32 2147483647, %v576_v7 }
 0x4ce   :  { %4817 = vrcp.f32 %v577_v10  ;;  %v604_v29 = vand.u32 2147483648, %v577_v10  ;;  %vm598_vm9 = vweird.f32 %v577_v10  ;;  %v602_v30 = vand.u32 2147483647, %v577_v10 }
 0x4cf   :  { %v590_v24 = vor.u32 1.1754944e-38, %v589_v20  ;;  %vm588_vm6 = vcmp.eq.f32.partialorder %v587_v21, 8.507059e+37 }
 0x4d0   :  { %v605_v32 = vor.u32 1.1754944e-38, %v604_v29  ;;  %vm603_vm11 = vcmp.eq.f32.partialorder %v602_v30, 8.507059e+37 }
 0x4d3   :  { %v4816_v11 = vpop.eup %4815 }
 0x4d4   :  { %v579_v12 = vmul.f32 %v4816_v11, %v576_v7  ;;  %v4818_v15 = vpop.eup %4817  ;;  %vm584_vm3 = vweird.f32 %v4816_v11 }
 0x4d5   :  { %v594_v17 = vmul.f32 %v4818_v15, %v577_v10  ;;  %vm585_vm5 = vmor %vm583_vm4, %vm584_vm3  ;;  %vm599_vm7 = vweird.f32 %v4818_v15 }
 0x4d6   :  { %v580_v14 = vsub.f32 1.0, %v579_v12  ;;  %vm600_vm10 = vmor %vm598_vm9, %vm599_vm7 }
 0x4d7   :  { %v595_v19 = vsub.f32 1.0, %v594_v17 }
 0x4d8   :  { %v581_v16 = vmul.f32 %v4816_v11, %v580_v14 }
 0x4d9   :  { %v596_v23 = vmul.f32 %v4818_v15, %v595_v19 }
 0x4da   :  { %v582_v18 = vadd.f32 %v4816_v11, %v581_v16 }
 0x4db   :  { %v597_v28 = vadd.f32 %v4818_v15, %v596_v23 }
 0x4dc   :  { %v586_v22 = vsel %vm585_vm5, %v4816_v11, %v582_v18 }
 0x4dd   :  { %v591_v26 = vsel %vm588_vm6, %v590_v24, %v586_v22  ;;  %v601_v31 = vsel %vm600_vm10, %v4818_v15, %v597_v28 }
 0x4de   :  { %v606_v34 = vsel %vm603_vm11, %v605_v32, %v601_v31  ;;  %v610_v36 = vmul.f32 %v591_v26, %v5857_v46 }
 0x4df   :  { %v611_v40 = vmul.f32 %v606_v34, %v5860_v50 }
 0x534   :  { %v615_v25 = vpop.permute.xlu1 %614 }
 0x535   :  { %v620_v27 = vmul.f32 %v615_v25, %v591_v26 }
 0x537   :  { %624 = vrot.lane.b32.xlu2 %v620_v27, %s5503_s7 }
 0x53c   :  { %v617_v33 = vpop.permute.xlu0 %616 }
 0x53d   :  { %v621_v35 = vmul.f32 %v617_v33, %v606_v34 }
 0x53f   :  { %626 = vrot.lane.b32.xlu1 %v621_v35, %s5503_s7 }
 0x591   :  { %v625_v37 = vpop.permute.xlu2 %624 }
 0x592   :  { %v5872_v38 = vadd.f32 %v625_v37, %v610_v36 }
 0x594   :  { %4819 = vtanh.f32 %v5872_v38 }
 0x59a   :  { %v4820_v39 = vpop.eup %4819 }
 0x59b   :  { %636 = vrot.lane.b32.xlu0 %v4820_v39, %s5518_s10 }
 0x5b1   :  { %v627_v41 = vpop.permute.xlu1 %626 }
 0x5b2   :  { %v5877_v42 = vadd.f32 %v627_v41, %v611_v40 }
 0x5b4   :  { %4821 = vtanh.f32 %v5877_v42 }
 0x5ba   :  { %v4822_v43 = vpop.eup %4821 }
 0x5bb   :  { %638 = vrot.lane.b32.xlu2 %v4822_v43, %s5518_s10  ;;  %v743_v43 = vld [vmem:[#allocation2 + $0x4] sm:$0xff] }
 0x60d   :  { %v637_v44 = vpop.permute.xlu0 %636 }
 0x60e   :  { %v642_v46 = vmul.f32 %v637_v44, %v591_v26 }
 0x615   :  { %v639_v45 = vpop.permute.xlu2 %638 }
 0x616   :  { %v643_v47 = vmul.f32 %v639_v45, %v606_v34  ;;  %v744_v45 = vld [vmem:[#allocation2 + $0x14] sm:$0xff] }
 0x618   :  { %v646_v48 = vpack.c.bf16 %v643_v47, %v642_v46 }
 0x61a   :  { %648 = vrot.lane.b32.xlu1 %v646_v48, %s5519_s1 }
 0x68c   :  { %v649_v49 = vpop.permute.xlu1 %648 }
 0x68d   :  { %4516 = vmatmul.msk.bf16.vlgmr.msra.gmra.mxu3 %vm451_vm2, %v649_v49 }
 0x710   :  { %v662_v50 = vpop.f32.mrf.mxu3 }
 0x711   :  { %v667_v52 = vadd.f32 %v662_v50, %v644_v51 }
 0x713   :  { %4823 = vtanh.f32 %v667_v52  ;;  %v4517_v63 = vmul.f32 -1.442695, %v667_v52 }
 0x718   :  { %v664_v55 = vpop.f32.mrf.mxu3 }
 0x719   :  { %v4824_v56 = vpop.eup %4823  ;;  %v668_v57 = vadd.f32 %v664_v55, %v645_v54 }
 0x71a   :  { %713 = vrot.lane.b32.xlu0 %v4824_v56, %s5517_s29 }
 0x71b   :  { %4825 = vtanh.f32 %v668_v57  ;;  %v4518_v59 = vmul.f32 -1.442695, %v668_v57 }
 0x71d   :  { %4827 = vpow2.f32 %v4518_v59 }
 0x721   :  { %v4826_v58 = vpop.eup %4825 }
 0x722   :  { %715 = vrot.lane.b32.xlu2 %v4826_v58, %s5517_s29 }
 0x723   :  { %v4828_v60 = vpop.eup %4827 }
 0x724   :  { %v676_v61 = vadd.f32 1.0, %v4828_v60 }
 0x726   :  { %4829 = vrcp.f32 %v676_v61  ;;  %v703_v9 = vand.u32 2147483648, %v676_v61  ;;  %vm697_vm13 = vweird.f32 %v676_v61  ;;  %v701_v10 = vand.u32 2147483647, %v676_v61 }
 0x727   :  { %4831 = vpow2.f32 %v4517_v63 }
 0x728   :  { %v704_v14 = vor.u32 1.1754944e-38, %v703_v9  ;;  %vm702_vm15 = vcmp.eq.f32.partialorder %v701_v10, 8.507059e+37 }
 0x72c   :  { %v4830_v0 = vpop.eup %4829 }
 0x72d   :  { %v4832_v1 = vpop.eup %4831  ;;  %v693_v2 = vmul.f32 %v4830_v0, %v676_v61  ;;  %vm698_vm12 = vweird.f32 %v4830_v0 }
 0x72e   :  { %v675_v3 = vadd.f32 1.0, %v4832_v1  ;;  %vm699_vm14 = vmor %vm697_vm13, %vm698_vm12 }
 0x72f   :  { %v694_v4 = vsub.f32 1.0, %v693_v2 }
 0x730   :  { %4833 = vrcp.f32 %v675_v3  ;;  %v688_v21 = vand.u32 2147483648, %v675_v3  ;;  %vm682_vm3 = vweird.f32 %v675_v3  ;;  %v686_v22 = vand.u32 2147483647, %v675_v3 }
 0x731   :  { %v695_v5 = vmul.f32 %v4830_v0, %v694_v4 }
 0x732   :  { %v689_v24 = vor.u32 1.1754944e-38, %v688_v21  ;;  %vm687_vm5 = vcmp.eq.f32.partialorder %v686_v22, 8.507059e+37 }
 0x733   :  { %v696_v6 = vadd.f32 %v4830_v0, %v695_v5 }
 0x735   :  { %v700_v11 = vsel %vm699_vm14, %v4830_v0, %v696_v6 }
 0x736   :  { %v4834_v7 = vpop.eup %4833  ;;  %v705_v16 = vsel %vm702_vm15, %v704_v14, %v700_v11 }
 0x737   :  { %v678_v12 = vmul.f32 %v4834_v7, %v675_v3  ;;  %vm683_vm1 = vweird.f32 %v4834_v7  ;;  %v710_v28 = vmul.f32 %v705_v16, %v5877_v42 }
 0x738   :  { %vm684_vm4 = vmor %vm682_vm3, %vm683_vm1 }
 0x739   :  { %v679_v18 = vsub.f32 1.0, %v678_v12 }
 0x73b   :  { %v680_v19 = vmul.f32 %v4834_v7, %v679_v18 }
 0x73d   :  { %v681_v20 = vadd.f32 %v4834_v7, %v680_v19 }
 0x73f   :  { %v685_v23 = vsel %vm684_vm4, %v4834_v7, %v681_v20 }
 0x740   :  { %v690_v26 = vsel %vm687_vm5, %v689_v24, %v685_v23 }
 0x741   :  { %v709_v32 = vmul.f32 %v690_v26, %v5872_v38 }
 0x77c   :  { %v716_v15 = vpop.permute.xlu2 %715 }
 0x77d   :  { %v720_v17 = vmul.f32 %v716_v15, %v705_v16 }
 0x77f   :  { %725 = vrot.lane.b32.xlu0 %v720_v17, %s5503_s7 }
 0x78c   :  { %v714_v25 = vpop.permute.xlu0 %713 }
 0x78d   :  { %v719_v27 = vmul.f32 %v714_v25, %v690_v26 }
 0x78f   :  { %723 = vrot.lane.b32.xlu1 %v719_v27, %s5503_s7 }
 0x7f1   :  { %v726_v29 = vpop.permute.xlu0 %725 }
 0x7f2   :  { %v5888_v30 = vadd.f32 %v726_v29, %v710_v28 }
 0x7f4   :  { %4835 = vtanh.f32 %v5888_v30 }
 0x7fa   :  { %v4836_v31 = vpop.eup %4835 }
 0x7fb   :  { %737 = vrot.lane.b32.xlu1 %v4836_v31, %s5518_s10 }
 0x801   :  { %v724_v33 = vpop.permute.xlu1 %723 }
 0x802   :  { %v5893_v34 = vadd.f32 %v724_v33, %v709_v32 }
 0x804   :  { %4837 = vtanh.f32 %v5893_v34 }
 0x80a   :  { %v4838_v35 = vpop.eup %4837 }
 0x80b   :  { %735 = vrot.lane.b32.xlu2 %v4838_v35, %s5518_s10 }
 0x865   :  { %v736_v36 = vpop.permute.xlu2 %735 }
 0x866   :  { %v741_v39 = vmul.f32 %v736_v36, %v690_v26 }
 0x86d   :  { %v738_v37 = vpop.permute.xlu1 %737 }
 0x86e   :  { %v742_v40 = vmul.f32 %v738_v37, %v705_v16  ;;  %v843_v37 = vld [vmem:[#allocation2 + $0x15] sm:$0xff] }
 0x870   :  { %v745_v41 = vpack.c.bf16 %v742_v40, %v741_v39 }
 0x872   :  { %747 = vrot.lane.b32.xlu0 %v745_v41, %s5519_s1 }
 0x8e4   :  { %v748_v42 = vpop.permute.xlu0 %747 }
 0x8e5   :  { %4519 = vmatmul.msk.bf16.vlgmr.msrb.gmra.mxu1 %vm451_vm2, %v748_v42 }
 0x962   :  { %v761_v38 = vpop.f32.mrf.mxu1 }
 0x963   :  { %v766_v44 = vadd.f32 %v761_v38, %v743_v43 }
 0x965   :  { %4839 = vtanh.f32 %v766_v44  ;;  %v4520_v51 = vmul.f32 -1.442695, %v766_v44 }
 0x96a   :  { %v763_v46 = vpop.f32.mrf.mxu1 }
 0x96b   :  { %v4840_v47 = vpop.eup %4839  ;;  %v767_v48 = vadd.f32 %v763_v46, %v744_v45 }
 0x96c   :  { %812 = vrot.lane.b32.xlu2 %v4840_v47, %s5517_s29 }
 0x96d   :  { %4841 = vtanh.f32 %v767_v48  ;;  %v4521_v57 = vmul.f32 -1.442695, %v767_v48 }
 0x96e   :  { %4843 = vpow2.f32 %v4520_v51 }
 0x973   :  { %v4842_v49 = vpop.eup %4841 }
 0x974   :  { %814 = vrot.lane.b32.xlu1 %v4842_v49, %s5517_s29  ;;  %v4844_v50 = vpop.eup %4843 }
 0x975   :  { %v774_v52 = vadd.f32 1.0, %v4844_v50 }
 0x977   :  { %4845 = vrcp.f32 %v774_v52  ;;  %v787_v60 = vand.u32 2147483648, %v774_v52  ;;  %vm781_vm7 = vweird.f32 %v774_v52  ;;  %v785_v61 = vand.u32 2147483647, %v774_v52 }
 0x978   :  { %4847 = vpow2.f32 %v4521_v57 }
 0x979   :  { %v788_v1 = vor.u32 1.1754944e-38, %v787_v60  ;;  %vm786_vm10 = vcmp.eq.f32.partialorder %v785_v61, 8.507059e+37 }
 0x97d   :  { %v4846_v54 = vpop.eup %4845 }
 0x97e   :  { %v777_v55 = vmul.f32 %v4846_v54, %v774_v52  ;;  %vm782_vm6 = vweird.f32 %v4846_v54  ;;  %v4848_v63 = vpop.eup %4847 }
 0x97f   :  { %vm783_vm9 = vmor %vm781_vm7, %vm782_vm6  ;;  %v775_v2 = vadd.f32 1.0, %v4848_v63 }
 0x980   :  { %v778_v56 = vsub.f32 1.0, %v777_v55 }
 0x981   :  { %4849 = vrcp.f32 %v775_v2  ;;  %v802_v12 = vand.u32 2147483648, %v775_v2  ;;  %vm796_vm12 = vweird.f32 %v775_v2  ;;  %v800_v14 = vand.u32 2147483647, %v775_v2 }
 0x982   :  { %v779_v58 = vmul.f32 %v4846_v54, %v778_v56 }
 0x983   :  { %v803_v16 = vor.u32 1.1754944e-38, %v802_v12  ;;  %vm801_vm14 = vcmp.eq.f32.partialorder %v800_v14, 8.507059e+37 }
 0x984   :  { %v780_v59 = vadd.f32 %v4846_v54, %v779_v58 }
 0x986   :  { %v784_v0 = vsel %vm783_vm9, %v4846_v54, %v780_v59 }
 0x987   :  { %v789_v4 = vsel %vm786_vm10, %v788_v1, %v784_v0  ;;  %v4850_v6 = vpop.eup %4849 }
 0x988   :  { %v792_v7 = vmul.f32 %v4850_v6, %v775_v2  ;;  %vm797_vm11 = vweird.f32 %v4850_v6  ;;  %v808_v20 = vmul.f32 %v789_v4, %v5893_v34 }
 0x989   :  { %vm798_vm13 = vmor %vm796_vm12, %vm797_vm11 }
 0x98a   :  { %v793_v9 = vsub.f32 1.0, %v792_v7 }
 0x98c   :  { %v794_v10 = vmul.f32 %v4850_v6, %v793_v9 }
 0x98e   :  { %v795_v11 = vadd.f32 %v4850_v6, %v794_v10 }
 0x990   :  { %v799_v15 = vsel %vm798_vm13, %v4850_v6, %v795_v11 }
 0x991   :  { %v804_v18 = vsel %vm801_vm14, %v803_v16, %v799_v15 }
 0x992   :  { %v809_v23 = vmul.f32 %v804_v18, %v5888_v30  ;;  %v842_v30 = vld [vmem:[#allocation2 + $0x5] sm:$0xff] }
 0x9c6   :  { %v813_v3 = vpop.permute.xlu2 %812 }
 0x9c7   :  { %v818_v5 = vmul.f32 %v813_v3, %v789_v4 }
 0x9c9   :  { %822 = vrot.lane.b32.xlu0 %v818_v5, %s5503_s7 }
 0x9e6   :  { %v815_v17 = vpop.permute.xlu1 %814 }
 0x9e7   :  { %v819_v19 = vmul.f32 %v815_v17, %v804_v18 }
 0x9e9   :  { %824 = vrot.lane.b32.xlu2 %v819_v19, %s5503_s7 }
 0xa3b   :  { %v823_v21 = vpop.permute.xlu0 %822 }
 0xa3c   :  { %v5904_v22 = vadd.f32 %v823_v21, %v808_v20 }
 0xa3e   :  { %4851 = vtanh.f32 %v5904_v22 }
 0xa43   :  { %v825_v24 = vpop.permute.xlu2 %824 }
 0xa44   :  { %v4852_v25 = vpop.eup %4851  ;;  %v5908_v26 = vadd.f32 %v825_v24, %v809_v23 }
 0xa45   :  { %834 = vrot.lane.b32.xlu1 %v4852_v25, %s5518_s10 }
 0xa46   :  { %4853 = vtanh.f32 %v5908_v26 }
 0xa4c   :  { %v4854_v27 = vpop.eup %4853 }
 0xa4d   :  { %836 = vrot.lane.b32.xlu0 %v4854_v27, %s5518_s10  ;;  %v941_v27 = vld [vmem:[#allocation2 + $0x6] sm:$0xff] }
 0xab7   :  { %v835_v28 = vpop.permute.xlu1 %834 }
 0xab8   :  { %v840_v31 = vmul.f32 %v835_v28, %v789_v4 }
 0xabf   :  { %v837_v29 = vpop.permute.xlu0 %836 }
 0xac0   :  { %v841_v32 = vmul.f32 %v837_v29, %v804_v18  ;;  %v942_v29 = vld [vmem:[#allocation2 + $0x16] sm:$0xff] }
 0xac2   :  { %v844_v33 = vpack.c.bf16 %v841_v32, %v840_v31 }
 0xac4   :  { %846 = vrot.lane.b32.xlu2 %v844_v33, %s5519_s1 }
 0xb1e   :  { %v847_v34 = vpop.permute.xlu2 %846 }
 0xb1f   :  { %4522 = vmatmul.msk.bf16.vlgmr.msrb.gmra.mxu2 %vm451_vm2, %v847_v34 }
 0xba2   :  { %v860_v35 = vpop.f32.mrf.mxu2 }
 0xba3   :  { %v865_v36 = vadd.f32 %v860_v35, %v842_v30 }
 0xba5   :  { %4855 = vtanh.f32 %v865_v36  ;;  %v4523_v43 = vmul.f32 -1.442695, %v865_v36 }
 0xbaa   :  { %v862_v39 = vpop.f32.mrf.mxu2 }
 0xbab   :  { %v4856_v40 = vpop.eup %4855  ;;  %v866_v41 = vadd.f32 %v862_v39, %v843_v37 }
 0xbac   :  { %911 = vrot.lane.b32.xlu1 %v4856_v40, %s5517_s29 }
 0xbad   :  { %4857 = vtanh.f32 %v866_v41  ;;  %v4524_v38 = vmul.f32 -1.442695, %v866_v41 }
 0xbae   :  { %4859 = vpow2.f32 %v4523_v43 }
 0xbaf   :  { %4861 = vpow2.f32 %v4524_v38 }
 0xbb3   :  { %v4858_v42 = vpop.eup %4857 }
 0xbb4   :  { %913 = vrot.lane.b32.xlu0 %v4858_v42, %s5517_s29  ;;  %v4860_v44 = vpop.eup %4859 }
 0xbb5   :  { %v873_v45 = vadd.f32 1.0, %v4860_v44  ;;  %v4862_v46 = vpop.eup %4861 }
 0xbb6   :  { %v874_v47 = vadd.f32 1.0, %v4862_v46 }
 0xbb7   :  { %4863 = vrcp.f32 %v873_v45  ;;  %v886_v57 = vand.u32 2147483648, %v873_v45  ;;  %vm880_vm1 = vweird.f32 %v873_v45  ;;  %v884_v58 = vand.u32 2147483647, %v873_v45 }
 0xbb8   :  { %4865 = vrcp.f32 %v874_v47  ;;  %v901_v3 = vand.u32 2147483648, %v874_v47  ;;  %vm895_vm6 = vweird.f32 %v874_v47  ;;  %v899_v4 = vand.u32 2147483647, %v874_v47 }
 0xbb9   :  { %v887_v61 = vor.u32 1.1754944e-38, %v886_v57  ;;  %vm885_vm4 = vcmp.eq.f32.partialorder %v884_v58, 8.507059e+37 }
 0xbba   :  { %v902_v6 = vor.u32 1.1754944e-38, %v901_v3  ;;  %vm900_vm9 = vcmp.eq.f32.partialorder %v899_v4, 8.507059e+37 }
 0xbbd   :  { %v4864_v48 = vpop.eup %4863 }
 0xbbe   :  { %v876_v49 = vmul.f32 %v4864_v48, %v873_v45  ;;  %v4866_v50 = vpop.eup %4865  ;;  %vm881_vm15 = vweird.f32 %v4864_v48 }
 0xbbf   :  { %v891_v54 = vmul.f32 %v4866_v50, %v874_v47  ;;  %vm882_vm3 = vmor %vm880_vm1, %vm881_vm15  ;;  %vm896_vm5 = vweird.f32 %v4866_v50 }
 0xbc0   :  { %v877_v51 = vsub.f32 1.0, %v876_v49  ;;  %vm897_vm7 = vmor %vm895_vm6, %vm896_vm5 }
 0xbc1   :  { %v892_v56 = vsub.f32 1.0, %v891_v54 }
 0xbc2   :  { %v878_v52 = vmul.f32 %v4864_v48, %v877_v51 }
 0xbc3   :  { %v893_v60 = vmul.f32 %v4866_v50, %v892_v56 }
 0xbc4   :  { %v879_v55 = vadd.f32 %v4864_v48, %v878_v52 }
 0xbc5   :  { %v894_v2 = vadd.f32 %v4866_v50, %v893_v60 }
 0xbc6   :  { %v883_v59 = vsel %vm882_vm3, %v4864_v48, %v879_v55 }
 0xbc7   :  { %v888_v0 = vsel %vm885_vm4, %v887_v61, %v883_v59  ;;  %v898_v5 = vsel %vm897_vm7, %v4866_v50, %v894_v2 }
 0xbc8   :  { %v903_v9 = vsel %vm900_vm9, %v902_v6, %v898_v5  ;;  %v907_v11 = vmul.f32 %v888_v0, %v5904_v22 }
 0xbc9   :  { %v908_v16 = vmul.f32 %v903_v9, %v5908_v26 }
 0xc1e   :  { %v912_v63 = vpop.permute.xlu1 %911 }
 0xc1f   :  { %v917_v1 = vmul.f32 %v912_v63, %v888_v0 }
 0xc21   :  { %921 = vrot.lane.b32.xlu2 %v917_v1, %s5503_s7 }
 0xc26   :  { %v914_v7 = vpop.permute.xlu0 %913 }
 0xc27   :  { %v918_v10 = vmul.f32 %v914_v7, %v903_v9 }
 0xc29   :  { %923 = vrot.lane.b32.xlu1 %v918_v10, %s5503_s7 }
 0xc7b   :  { %v922_v12 = vpop.permute.xlu2 %921 }
 0xc7c   :  { %v5920_v14 = vadd.f32 %v922_v12, %v907_v11 }
 0xc7e   :  { %4867 = vtanh.f32 %v5920_v14 }
 0xc84   :  { %v4868_v15 = vpop.eup %4867 }
 0xc85   :  { %933 = vrot.lane.b32.xlu0 %v4868_v15, %s5518_s10 }
 0xc9b   :  { %v924_v17 = vpop.permute.xlu1 %923 }
 0xc9c   :  { %v5925_v18 = vadd.f32 %v924_v17, %v908_v16 }
 0xc9e   :  { %4869 = vtanh.f32 %v5925_v18 }
 0xca4   :  { %v4870_v19 = vpop.eup %4869 }
 0xca5   :  { %935 = vrot.lane.b32.xlu2 %v4870_v19, %s5518_s10  ;;  %v1040_v19 = vld [vmem:[#allocation2 + $0x7] sm:$0xff] }
 0xcf7   :  { %v934_v20 = vpop.permute.xlu0 %933 }
 0xcf8   :  { %v939_v22 = vmul.f32 %v934_v20, %v888_v0 }
 0xcff   :  { %v936_v21 = vpop.permute.xlu2 %935 }
 0xd00   :  { %v940_v23 = vmul.f32 %v936_v21, %v903_v9  ;;  %v1041_v21 = vld [vmem:[#allocation2 + $0x17] sm:$0xff] }
 0xd02   :  { %v943_v24 = vpack.c.bf16 %v940_v23, %v939_v22 }
 0xd04   :  { %945 = vrot.lane.b32.xlu1 %v943_v24, %s5519_s1 }
 0xd76   :  { %v946_v25 = vpop.permute.xlu1 %945 }
 0xd77   :  { %4525 = vmatmul.msk.bf16.vlgmr.msrb.gmra.mxu3 %vm451_vm2, %v946_v25 }
 0xdfa   :  { %v959_v26 = vpop.f32.mrf.mxu3 }
 0xdfb   :  { %v964_v28 = vadd.f32 %v959_v26, %v941_v27 }
 0xdfd   :  { %4871 = vtanh.f32 %v964_v28  ;;  %v4526_v37 = vmul.f32 -1.442695, %v964_v28 }
 0xe02   :  { %v961_v31 = vpop.f32.mrf.mxu3 }
 0xe03   :  { %v4872_v32 = vpop.eup %4871  ;;  %v965_v33 = vadd.f32 %v961_v31, %v942_v29 }
 0xe04   :  { %1010 = vrot.lane.b32.xlu0 %v4872_v32, %s5517_s29 }
 0xe05   :  { %4873 = vtanh.f32 %v965_v33  ;;  %v4527_v30 = vmul.f32 -1.442695, %v965_v33 }
 0xe07   :  { %4875 = vpow2.f32 %v4527_v30 }
 0xe0b   :  { %v4874_v34 = vpop.eup %4873 }
 0xe0c   :  { %1012 = vrot.lane.b32.xlu2 %v4874_v34, %s5517_s29 }
 0xe0d   :  { %v4876_v35 = vpop.eup %4875 }
 0xe0e   :  { %v973_v36 = vadd.f32 1.0, %v4876_v35 }
 0xe10   :  { %4877 = vrcp.f32 %v973_v36  ;;  %v1000_v46 = vand.u32 2147483648, %v973_v36  ;;  %vm994_vm11 = vweird.f32 %v973_v36  ;;  %v998_v47 = vand.u32 2147483647, %v973_v36 }
 0xe11   :  { %4879 = vpow2.f32 %v4526_v37 }
 0xe12   :  { %v1001_v51 = vor.u32 1.1754944e-38, %v1000_v46  ;;  %vm999_vm13 = vcmp.eq.f32.partialorder %v998_v47, 8.507059e+37 }
 0xe16   :  { %v4878_v39 = vpop.eup %4877 }
 0xe17   :  { %v4880_v40 = vpop.eup %4879  ;;  %v990_v41 = vmul.f32 %v4878_v39, %v973_v36  ;;  %vm995_vm10 = vweird.f32 %v4878_v39 }
 0xe18   :  { %v972_v42 = vadd.f32 1.0, %v4880_v40  ;;  %vm996_vm12 = vmor %vm994_vm11, %vm995_vm10 }
 0xe19   :  { %v991_v43 = vsub.f32 1.0, %v990_v41 }
 0xe1a   :  { %4881 = vrcp.f32 %v972_v42  ;;  %v985_v58 = vand.u32 2147483648, %v972_v42  ;;  %vm979_vm15 = vweird.f32 %v972_v42  ;;  %v983_v59 = vand.u32 2147483647, %v972_v42 }
 0xe1b   :  { %v992_v38 = vmul.f32 %v4878_v39, %v991_v43 }
 0xe1c   :  { %v986_v61 = vor.u32 1.1754944e-38, %v985_v58  ;;  %vm984_vm3 = vcmp.eq.f32.partialorder %v983_v59, 8.507059e+37 }
 0xe1d   :  { %v993_v44 = vadd.f32 %v4878_v39, %v992_v38 }
 0xe1f   :  { %v997_v48 = vsel %vm996_vm12, %v4878_v39, %v993_v44 }
 0xe20   :  { %v4882_v45 = vpop.eup %4881  ;;  %v1002_v52 = vsel %vm999_vm13, %v1001_v51, %v997_v48 }
 0xe21   :  { %v975_v49 = vmul.f32 %v4882_v45, %v972_v42  ;;  %vm980_vm14 = vweird.f32 %v4882_v45  ;;  %v1007_v2 = vmul.f32 %v1002_v52, %v5925_v18 }
 0xe22   :  { %vm981_vm1 = vmor %vm979_vm15, %vm980_vm14 }
 0xe23   :  { %v976_v55 = vsub.f32 1.0, %v975_v49 }
 0xe25   :  { %v977_v56 = vmul.f32 %v4882_v45, %v976_v55 }
 0xe27   :  { %v978_v57 = vadd.f32 %v4882_v45, %v977_v56 }
 0xe29   :  { %v982_v60 = vsel %vm981_vm1, %v4882_v45, %v978_v57 }
 0xe2a   :  { %v987_v0 = vsel %vm984_vm3, %v986_v61, %v982_v60 }
 0xe2b   :  { %v1006_v6 = vmul.f32 %v987_v0, %v5920_v14 }
 0xe66   :  { %v1013_v50 = vpop.permute.xlu2 %1012 }
 0xe67   :  { %v1017_v54 = vmul.f32 %v1013_v50, %v1002_v52 }
 0xe69   :  { %1022 = vrot.lane.b32.xlu0 %v1017_v54, %s5503_s7 }
 0xe76   :  { %v1011_v63 = vpop.permute.xlu0 %1010 }
 0xe77   :  { %v1016_v1 = vmul.f32 %v1011_v63, %v987_v0 }
 0xe79   :  { %1020 = vrot.lane.b32.xlu1 %v1016_v1, %s5503_s7 }
 0xedb   :  { %v1023_v3 = vpop.permute.xlu0 %1022 }
 0xedc   :  { %v5936_v4 = vadd.f32 %v1023_v3, %v1007_v2 }
 0xede   :  { %4883 = vtanh.f32 %v5936_v4 }
 0xee4   :  { %v4884_v5 = vpop.eup %4883 }
 0xee5   :  { %1034 = vrot.lane.b32.xlu1 %v4884_v5, %s5518_s10 }
 0xeeb   :  { %v1021_v7 = vpop.permute.xlu1 %1020 }
 0xeec   :  { %v5941_v9 = vadd.f32 %v1021_v7, %v1006_v6 }
 0xeee   :  { %4885 = vtanh.f32 %v5941_v9 }
 0xef4   :  { %v4886_v10 = vpop.eup %4885 }
 0xef5   :  { %1032 = vrot.lane.b32.xlu2 %v4886_v10, %s5518_s10 }
 0xf4f   :  { %v1033_v11 = vpop.permute.xlu2 %1032 }
 0xf50   :  { %v1038_v15 = vmul.f32 %v1033_v11, %v987_v0 }
 0xf57   :  { %v1035_v12 = vpop.permute.xlu1 %1034 }
 0xf58   :  { %v1039_v16 = vmul.f32 %v1035_v12, %v1002_v52  ;;  %v1140_v12 = vld [vmem:[#allocation2 + $0x18] sm:$0xff] }
 0xf5a   :  { %v1042_v17 = vpack.c.bf16 %v1039_v16, %v1038_v15 }
 0xf5c   :  { %1044 = vrot.lane.b32.xlu0 %v1042_v17, %s5519_s1 }
 0xfce   :  { %v1045_v18 = vpop.permute.xlu0 %1044 }
 0xfcf   :  { %4528 = vmatmul.msk.bf16.vlgmr.msrb.gmra.mxu0 %vm451_vm2, %v1045_v18 }
0x104c   :  { %v1058_v14 = vpop.f32.mrf.mxu0 }
0x104d   :  { %v1063_v20 = vadd.f32 %v1058_v14, %v1040_v19 }
0x104f   :  { %4887 = vtanh.f32 %v1063_v20  ;;  %v4529_v27 = vmul.f32 -1.442695, %v1063_v20 }
0x1054   :  { %v1060_v22 = vpop.f32.mrf.mxu0 }
0x1055   :  { %v4888_v23 = vpop.eup %4887  ;;  %v1064_v24 = vadd.f32 %v1060_v22, %v1041_v21 }
0x1056   :  { %1109 = vrot.lane.b32.xlu2 %v4888_v23, %s5517_s29 }
0x1057   :  { %4889 = vtanh.f32 %v1064_v24  ;;  %v4530_v33 = vmul.f32 -1.442695, %v1064_v24 }
0x1058   :  { %4891 = vpow2.f32 %v4529_v27 }
0x105d   :  { %v4890_v25 = vpop.eup %4889 }
0x105e   :  { %1111 = vrot.lane.b32.xlu1 %v4890_v25, %s5517_s29  ;;  %v4892_v26 = vpop.eup %4891 }
0x105f   :  { %v1071_v28 = vadd.f32 1.0, %v4892_v26 }
0x1061   :  { %4893 = vrcp.f32 %v1071_v28  ;;  %v1084_v35 = vand.u32 2147483648, %v1071_v28  ;;  %vm1078_vm5 = vweird.f32 %v1071_v28  ;;  %v1082_v36 = vand.u32 2147483647, %v1071_v28 }
0x1062   :  { %4895 = vpow2.f32 %v4530_v33 }
0x1063   :  { %v1085_v40 = vor.u32 1.1754944e-38, %v1084_v35  ;;  %vm1083_vm7 = vcmp.eq.f32.partialorder %v1082_v36, 8.507059e+37 }
0x1067   :  { %v4894_v29 = vpop.eup %4893 }
0x1068   :  { %v1074_v31 = vmul.f32 %v4894_v29, %v1071_v28  ;;  %vm1079_vm4 = vweird.f32 %v4894_v29  ;;  %v4896_v37 = vpop.eup %4895 }
0x1069   :  { %vm1080_vm6 = vmor %vm1078_vm5, %vm1079_vm4  ;;  %v1072_v41 = vadd.f32 1.0, %v4896_v37 }
0x106a   :  { %v1075_v32 = vsub.f32 1.0, %v1074_v31 }
0x106b   :  { %4897 = vrcp.f32 %v1072_v41  ;;  %v1099_v49 = vand.u32 2147483648, %v1072_v41  ;;  %vm1093_vm10 = vweird.f32 %v1072_v41  ;;  %v1097_v51 = vand.u32 2147483647, %v1072_v41 }
0x106c   :  { %v1076_v34 = vmul.f32 %v4894_v29, %v1075_v32 }
0x106d   :  { %v1100_v52 = vor.u32 1.1754944e-38, %v1099_v49  ;;  %vm1098_vm12 = vcmp.eq.f32.partialorder %v1097_v51, 8.507059e+37 }
0x106e   :  { %v1077_v30 = vadd.f32 %v4894_v29, %v1076_v34 }
0x1070   :  { %v1081_v39 = vsel %vm1080_vm6, %v4894_v29, %v1077_v30 }
0x1071   :  { %v1086_v43 = vsel %vm1083_vm7, %v1085_v40, %v1081_v39  ;;  %v4898_v44 = vpop.eup %4897 }
0x1072   :  { %v1089_v45 = vmul.f32 %v4898_v44, %v1072_v41  ;;  %vm1094_vm9 = vweird.f32 %v4898_v44  ;;  %v1105_v57 = vmul.f32 %v1086_v43, %v5941_v9 }
0x1073   :  { %vm1095_vm11 = vmor %vm1093_vm10, %vm1094_vm9 }
0x1074   :  { %v1090_v46 = vsub.f32 1.0, %v1089_v45 }
0x1076   :  { %v1091_v47 = vmul.f32 %v4898_v44, %v1090_v46 }
0x1078   :  { %v1092_v48 = vadd.f32 %v4898_v44, %v1091_v47 }
0x107a   :  { %v1096_v50 = vsel %vm1095_vm11, %v4898_v44, %v1092_v48 }
0x107b   :  { %v1101_v55 = vsel %vm1098_vm12, %v1100_v52, %v1096_v50 }
0x107c   :  { %v1106_v60 = vmul.f32 %v1101_v55, %v5936_v4  ;;  %v1139_v4 = vld [vmem:[#allocation2 + $0x8] sm:$0xff] }
0x10b0   :  { %v1110_v42 = vpop.permute.xlu2 %1109 }
0x10b1   :  { %v1115_v38 = vmul.f32 %v1110_v42, %v1086_v43 }
0x10b3   :  { %1119 = vrot.lane.b32.xlu0 %v1115_v38, %s5503_s7 }
0x10d0   :  { %v1112_v54 = vpop.permute.xlu1 %1111 }
0x10d1   :  { %v1116_v56 = vmul.f32 %v1112_v54, %v1101_v55 }
0x10d3   :  { %1121 = vrot.lane.b32.xlu2 %v1116_v56, %s5503_s7 }
0x1125   :  { %v1120_v58 = vpop.permute.xlu0 %1119 }
0x1126   :  { %v5952_v59 = vadd.f32 %v1120_v58, %v1105_v57  ;;  %v347_v57 = vld [vmem:[%s6723_s4] sm:$0xff]  ;;  %v348_v58 = vld [vmem:[%s6723_s4 + $0x8] sm:$0xff] }
0x1128   :  { %4899 = vtanh.f32 %v5952_v59 }
0x112d   :  { %v1122_v61 = vpop.permute.xlu2 %1121 }
0x112e   :  { %v4900_v63 = vpop.eup %4899  ;;  %v5956_v0 = vadd.f32 %v1122_v61, %v1106_v60  ;;  %v1239_v60 = vpack.c.bf16 %v348_v58, %v347_v57 }
0x112f   :  { %1131 = vrot.lane.b32.xlu1 %v4900_v63, %s5518_s10 }
0x1130   :  { %4901 = vtanh.f32 %v5956_v0  ;;  %1253 = vmatpush.bf16.msra.mxu2 %v1239_v60  ;;  %v1273_v60 = vld [vmem:[%s6727_s22 + $0x30] sm:$0xff] }
0x1136   :  { %v4902_v1 = vpop.eup %4901 }
0x1137   :  { %1133 = vrot.lane.b32.xlu0 %v4902_v1, %s5518_s10 }
0x11a1   :  { %v1132_v2 = vpop.permute.xlu1 %1131 }
0x11a2   :  { %v1137_v5 = vmul.f32 %v1132_v2, %v1086_v43 }
0x11a9   :  { %v1134_v3 = vpop.permute.xlu0 %1133 }
0x11aa   :  { %v1138_v6 = vmul.f32 %v1134_v3, %v1101_v55 }
0x11ac   :  { %v1141_v7 = vpack.c.bf16 %v1138_v6, %v1137_v5  ;;  %v5155_v5 = vld [vmem:[%s5532_s5] sm:$0xff] }
0x11ae   :  { %1143 = vrot.lane.b32.xlu2 %v1141_v7, %s5519_s1 }
0x1208   :  { %v1144_v9 = vpop.permute.xlu2 %1143 }
0x1209   :  { %4531 = vmatmul.msk.bf16.vlgmr.msra.gmra.mxu1 %vm451_vm2, %v1144_v9 }
0x1286   :  { %v1157_v10 = vpop.f32.mrf.mxu1 }
0x1287   :  { %v1162_v11 = vadd.f32 %v1157_v10, %v1139_v4  ;;  %v5156_v4 = vld [vmem:[%s5532_s5 + $0x8] sm:$0xff]  ;;  %s6725_s5 = sld [smem:[#allocation34_spill]] }
0x1289   :  { %4903 = vtanh.f32 %v1162_v11  ;;  %v4532_v19 = vmul.f32 -1.442695, %v1162_v11 }
0x128e   :  { %v1159_v15 = vpop.f32.mrf.mxu1 }
0x128f   :  { %v4904_v16 = vpop.eup %4903  ;;  %v1163_v17 = vadd.f32 %v1159_v15, %v1140_v12 }
0x1290   :  { %1208 = vrot.lane.b32.xlu1 %v4904_v16, %s5517_s29 }
0x1291   :  { %4905 = vtanh.f32 %v1163_v17  ;;  %v4533_v14 = vmul.f32 -1.442695, %v1163_v17 }
0x1292   :  { %4907 = vpow2.f32 %v4532_v19 }
0x1293   :  { %4909 = vpow2.f32 %v4533_v14 }
0x1297   :  { %v4906_v18 = vpop.eup %4905 }
0x1298   :  { %1210 = vrot.lane.b32.xlu0 %v4906_v18, %s5517_s29  ;;  %v4908_v20 = vpop.eup %4907 }
0x1299   :  { %v1170_v21 = vadd.f32 1.0, %v4908_v20  ;;  %v4910_v22 = vpop.eup %4909 }
0x129a   :  { %v1171_v23 = vadd.f32 1.0, %v4910_v22 }
0x129b   :  { %4911 = vrcp.f32 %v1170_v21  ;;  %v1183_v33 = vand.u32 2147483648, %v1170_v21  ;;  %vm1177_vm14 = vweird.f32 %v1170_v21  ;;  %v1181_v34 = vand.u32 2147483647, %v1170_v21 }
0x129c   :  { %4913 = vrcp.f32 %v1171_v23  ;;  %v1198_v42 = vand.u32 2147483648, %v1171_v23  ;;  %vm1192_vm4 = vweird.f32 %v1171_v23  ;;  %v1196_v43 = vand.u32 2147483647, %v1171_v23 }
0x129d   :  { %v1184_v36 = vor.u32 1.1754944e-38, %v1183_v33  ;;  %vm1182_vm1 = vcmp.eq.f32.partialorder %v1181_v34, 8.507059e+37 }
0x129e   :  { %v1199_v44 = vor.u32 1.1754944e-38, %v1198_v42  ;;  %vm1197_vm6 = vcmp.eq.f32.partialorder %v1196_v43, 8.507059e+37 }
0x12a1   :  { %v4912_v24 = vpop.eup %4911 }
0x12a2   :  { %v1173_v25 = vmul.f32 %v4912_v24, %v1170_v21  ;;  %v4914_v26 = vpop.eup %4913  ;;  %vm1178_vm13 = vweird.f32 %v4912_v24 }
0x12a3   :  { %v1188_v29 = vmul.f32 %v4914_v26, %v1171_v23  ;;  %vm1179_vm15 = vmor %vm1177_vm14, %vm1178_vm13  ;;  %vm1193_vm3 = vweird.f32 %v4914_v26  ;;  %v1264_v23 = vld [vmem:[%s6724_s24 + $0x10] sm:$0xff] }
0x12a4   :  { %v1174_v27 = vsub.f32 1.0, %v1173_v25  ;;  %vm1194_vm5 = vmor %vm1192_vm4, %vm1193_vm3 }
0x12a5   :  { %v1189_v32 = vsub.f32 1.0, %v1188_v29  ;;  %v1262_v29 = vld [vmem:[%s6724_s24] sm:$0xff] }
0x12a6   :  { %v1175_v28 = vmul.f32 %v4912_v24, %v1174_v27 }
0x12a7   :  { %v1190_v35 = vmul.f32 %v4914_v26, %v1189_v32 }
0x12a8   :  { %v1176_v31 = vadd.f32 %v4912_v24, %v1175_v28 }
0x12a9   :  { %v1191_v41 = vadd.f32 %v4914_v26, %v1190_v35 }
0x12aa   :  { %v1180_v30 = vsel %vm1179_vm15, %v4912_v24, %v1176_v31  ;;  %v1265_v24 = vld [vmem:[%s6724_s24 + $0x18] sm:$0xff]  ;;  %v1263_v31 = vld [vmem:[%s6724_s24 + $0x8] sm:$0xff] }
0x12ab   :  { %v1185_v39 = vsel %vm1182_vm1, %v1184_v36, %v1180_v30  ;;  %v1195_v38 = vsel %vm1194_vm5, %v4914_v26, %v1191_v41  ;;  %v1332_v27 = vpack.c.bf16 %v1265_v24, %v1264_v23  ;;  %v1331_v32 = vpack.c.bf16 %v1263_v31, %v1262_v29 }
0x12ac   :  { %v1200_v46 = vsel %vm1197_vm6, %v1199_v44, %v1195_v38  ;;  %v1204_v48 = vmul.f32 %v1185_v39, %v5952_v59 }
0x12ad   :  { %v1205_v52 = vmul.f32 %v1200_v46, %v5956_v0  ;;  %1345 = vmatpush.bf16.msra.mxu3 %v1332_v27 }
0x12b1   :  { %1346 = vmatpush.bf16.msra.mxu3 %v1331_v32 }
0x1302   :  { %v1209_v37 = vpop.permute.xlu1 %1208 }
0x1303   :  { %v1214_v40 = vmul.f32 %v1209_v37, %v1185_v39 }
0x1305   :  { %1218 = vrot.lane.b32.xlu2 %v1214_v40, %s5503_s7 }
0x130a   :  { %v1211_v45 = vpop.permute.xlu0 %1210 }
0x130b   :  { %v1215_v47 = vmul.f32 %v1211_v45, %v1200_v46 }
0x130d   :  { %1220 = vrot.lane.b32.xlu1 %v1215_v47, %s5503_s7  ;;  %v4755_v47 = vld [vmem:[%s6725_s5] ss:$0 sm:$0xff] }
0x135f   :  { %v1219_v49 = vpop.permute.xlu2 %1218 }
0x1360   :  { %v1224_v51 = vadd.f32 %v1219_v49, %v1204_v48 }
0x1362   :  { %4915 = vtanh.f32 %v1224_v51 }
0x1368   :  { %v4916_v50 = vpop.eup %4915 }
0x1369   :  { %1230 = vrot.lane.b32.xlu0 %v4916_v50, %s5518_s10 }
0x137f   :  { %v1221_v54 = vpop.permute.xlu1 %1220 }
0x1380   :  { %v1225_v55 = vadd.f32 %v1221_v54, %v1205_v52  ;;  %v4756_v52 = vld [vmem:[%s6726_s0] ss:$0 sm:$0xff] }
0x1382   :  { %4917 = vtanh.f32 %v1225_v55 }
0x1388   :  { %v4918_v56 = vpop.eup %4917 }
0x1389   :  { %1232 = vrot.lane.b32.xlu2 %v4918_v56, %s5518_s10 }
0x13db   :  { %v1231_v59 = vpop.permute.xlu0 %1230 }
0x13dc   :  { %v1236_v63 = vmul.f32 %v1231_v59, %v1185_v39  ;;  %v1274_v59 = vld [vmem:[%s6727_s22 + $0x38] sm:$0xff] }
0x13e3   :  { %v1233_v61 = vpop.permute.xlu2 %1232 }
0x13e4   :  { %v1237_v1 = vmul.f32 %v1233_v61, %v1200_v46  ;;  %v1359_v61 = vpack.c.bf16 %v1274_v59, %v1273_v60 }
0x13e6   :  { %v1238_v2 = vpack.c.bf16 %v1237_v1, %v1236_v63  ;;  %1370 = vmatpush.bf16.msra.mxu0 %v1359_v61  ;;  %v1271_v63 = vld [vmem:[%s6727_s22 + $0x20] sm:$0xff]  ;;  %v1272_v1 = vld [vmem:[%s6727_s22 + $0x28] sm:$0xff] }
0x13e8   :  { %1241 = vrot.lane.b32.xlu1 %v1238_v2, %s5519_s1  ;;  %v1358_v2 = vpack.c.bf16 %v1272_v1, %v1271_v63  ;;  %v4759_v1 = vld [vmem:[%s5557_s25 + $0x1] ss:$0 sm:$0xff]  ;;  %s6729_s25 = sld [smem:[#allocation29_spill]] }
0x13ea   :  { %1371 = vmatpush.bf16.msra.mxu0 %v1358_v2 }
0x145a   :  { %v1242_v0 = vpop.permute.xlu1 %1241 }
0x145b   :  { %4534 = vmatmul.msk.bf16.vlgmr.msra.gmra.mxu2 %vm451_vm2, %v1242_v0  ;;  %v1269_v0 = vld [vmem:[%s6727_s22 + $0x10] sm:$0xff] }
0x14de   :  { %v1255_v3 = vpop.f32.mrf.mxu2 }
0x14df   :  { %v5976_v6 = vadd.f32 %v5155_v5, %v1255_v3  ;;  %v1270_v3 = vld [vmem:[%s6727_s22 + $0x18] sm:$0xff] }
0x14e0   :  { %v1357_v5 = vpack.c.bf16 %v1270_v3, %v1269_v0 }
0x14e1   :  { %v1276_v7 = vsel %vm349_vm0, %v5976_v6, 0.0 }
0x14e2   :  { %1277 = vadd.xlane.f32.xlu0 %v1276_v7  ;;  %1372 = vmatpush.bf16.msra.mxu0 %v1357_v5  ;;  %v1267_v7 = vld [vmem:[%s6727_s22] sm:$0xff] }
0x14e3   :  { %v4760_v5 = vld [vmem:[%s6722_s13 + $0x1] ss:$0 sm:$0xff]  ;;  %s5439_s13 = scalar_lea.hbm %s5438_s30, 16 }
0x14e4   :  { %p5440_p13 = scmp.ne.s32.totalorder %s5438_s30, %s5439_s13 }
0x14e6   :  { %v1257_v9 = vpop.f32.mrf.mxu2 }
0x14e7   :  { %v5981_v10 = vadd.f32 %v5156_v4, %v1257_v9  ;;  %v1268_v9 = vld [vmem:[%s6727_s22 + $0x8] sm:$0xff] }
0x14e8   :  { %v1356_v4 = vpack.c.bf16 %v1268_v9, %v1267_v7 }
0x14e9   :  { %v1279_v11 = vsel %vm349_vm0, %v5981_v10, 0.0 }
0x14ea   :  { %1280 = vadd.xlane.f32.xlu2 %v1279_v11  ;;  %1373 = vmatpush.bf16.msra.mxu0 %v1356_v4 }
0x1555   :  { %v1278_v12 = vpop.xlane.xlu0 %1277 }
0x1556   :  { %v1282_v15 = vmul.f32 %v1278_v12, %v5825_v13  ;;  %v4757_v12 = vld [vmem:[%s6728_s21] ss:$0 sm:$0xff] }
0x1558   :  { %v1284_v16 = vsub.f32 %v5976_v6, %v1282_v15 }
0x155a   :  { %v1286_v17 = vmul.f32 %v1284_v16, %v1284_v16 }
0x155c   :  { %v1288_v18 = vsel %vm349_vm0, %v1286_v17, 0.0 }
0x155d   :  { %v1281_v19 = vpop.xlane.xlu2 %1280  ;;  %1289 = vadd.xlane.f32.xlu1 %v1288_v18 }
0x155e   :  { %v1283_v14 = vmul.f32 %v1281_v19, %v5825_v13 }
0x1560   :  { %v1285_v20 = vsub.f32 %v5981_v10, %v1283_v14 }
0x1562   :  { %v1287_v21 = vmul.f32 %v1285_v20, %v1285_v20 }
0x1564   :  { %v1291_v22 = vsel %vm349_vm0, %v1287_v21, 0.0 }
0x1565   :  { %1292 = vadd.xlane.f32.xlu0 %v1291_v22 }
0x15d0   :  { %v1290_v25 = vpop.xlane.xlu1 %1289 }
0x15d1   :  { %v1294_v26 = vmul.f32 %v1290_v25, %v5825_v13 }
0x15d3   :  { %v1296_v28 = vadd.f32 1e-06, %v1294_v26 }
0x15d5   :  { %4919 = vrsqrt.f32 %v1296_v28  ;;  %vm1304_vm9 = vweird.f32 %v1296_v28 }
0x15d8   :  { %v1293_v33 = vpop.xlane.xlu0 %1292 }
0x15d9   :  { %v1295_v34 = vmul.f32 %v1293_v33, %v5825_v13 }
0x15db   :  { %v4920_v30 = vpop.eup %4919  ;;  %v1297_v35 = vadd.f32 1e-06, %v1295_v34 }
0x15dc   :  { %v1299_v36 = vmul.f32 %v4920_v30, %v1296_v28  ;;  %vm1305_vm7 = vweird.f32 %v4920_v30 }
0x15dd   :  { %4921 = vrsqrt.f32 %v1297_v35  ;;  %vm1306_vm10 = vmor %vm1304_vm9, %vm1305_vm7  ;;  %vm1314_vm12 = vweird.f32 %v1297_v35 }
0x15de   :  { %v1300_v37 = vmul.f32 %v4920_v30, %v1299_v36 }
0x15e0   :  { %v1301_v39 = vmul.f32 0.5, %v1300_v37  ;;  %v4543_v37 = vld [vmem:[%s5572_s8 + $0x10] sm:$0xff] }
0x15e2   :  { %v1302_v40 = vsub.f32 1.5, %v1301_v39  ;;  %v4544_v39 = vld [vmem:[%s5572_s8 + $0x18] sm:$0xff]  ;;  %s6731_s8 = sld [smem:[#allocation39_spill]] }
0x15e3   :  { %v4922_v41 = vpop.eup %4921 }
0x15e4   :  { %v1303_v42 = vmul.f32 %v4920_v30, %v1302_v40  ;;  %v1309_v43 = vmul.f32 %v4922_v41, %v1297_v35  ;;  %vm1315_vm11 = vweird.f32 %v4922_v41 }
0x15e5   :  { %vm1316_vm13 = vmor %vm1314_vm12, %vm1315_vm11 }
0x15e6   :  { %v1310_v38 = vmul.f32 %v4922_v41, %v1309_v43  ;;  %v1307_v44 = vsel %vm1306_vm10, %v4920_v30, %v1303_v42  ;;  %v4541_v43 = vld [vmem:[%s5567_s3 + $0x30] sm:$0xff] }
0x15e7   :  { %v1318_v48 = vmul.f32 %v1307_v44, %v1284_v16 }
0x15e8   :  { %v1311_v45 = vmul.f32 0.5, %v1310_v38  ;;  %v4542_v38 = vld [vmem:[%s5567_s3 + $0x38] sm:$0xff] }
0x15e9   :  { %v1323_v50 = vmul.f32 %v4755_v47, %v1318_v48  ;;  %v1455_v44 = vpack.c.bf16 %v4542_v38, %v4541_v43 }
0x15ea   :  { %v1312_v46 = vsub.f32 1.5, %v1311_v45 }
0x15eb   :  { %v1328_v57 = vadd.f32 %v4756_v52, %v1323_v50  ;;  %1465 = vmatpush.bf16.msrb.mxu1 %v1455_v44 }
0x15ec   :  { %v1313_v49 = vmul.f32 %v4922_v41, %v1312_v46  ;;  %v4539_v46 = vld [vmem:[%s5567_s3 + $0x20] sm:$0xff] }
0x15ee   :  { %v1317_v51 = vsel %vm1316_vm13, %v4922_v41, %v1313_v49  ;;  %v1479_v41 = vpack.c.bf16 %v4544_v39, %v4543_v37 }
0x15ef   :  { %v1319_v54 = vmul.f32 %v1317_v51, %v1285_v20  ;;  %v4758_v20 = vld [vmem:[#allocation3] ss:$0 sm:$0xff] }
0x15f0   :  { %1487 = vmatpush.bf16.msrb.mxu2 %v1479_v41  ;;  %1586 = vmatpush.bf16.msrb.mxu3 %v1479_v41 }
0x15f1   :  { %v1324_v55 = vmul.f32 %v4755_v47, %v1319_v54  ;;  %v4540_v47 = vld [vmem:[%s5567_s3 + $0x28] sm:$0xff]  ;;  %1685 = vmatpush.bf16.msrb.mxu0 %v1479_v41  ;;  %s6730_s3 = sld [smem:[#allocation40_spill]] }
0x15f2   :  { %v1454_v48 = vpack.c.bf16 %v4540_v47, %v4539_v46 }
0x15f3   :  { %v1329_v56 = vadd.f32 %v4756_v52, %v1324_v55  ;;  %1488 = vmatmul.bf16.vlgmr.msrb.gmra.mxu2 %v5516_v8 }
0x15f4   :  { %1883 = vmatpush.bf16.msra.mxu2 %v1479_v41  ;;  %1466 = vmatpush.bf16.msrb.mxu1 %v1454_v48 }
0x15f5   :  { %v1330_v58 = vpack.c.bf16 %v1329_v56, %v1328_v57 }
0x15f7   :  { %4535 = vmatmul.msk.bf16.vlgmr.msra.gmra.mxu3 %vm349_vm0, %v1330_v58 }
0x15f8   :  { %1982 = vmatpush.bf16.msra.mxu3 %v1479_v41  ;;  %1784 = vmatpush.bf16.msra.mxu1 %v1479_v41 }
0x167a   :  { %v1348_v11 = vpop.f32.mrf.mxu3 }
0x167b   :  { %v1349_v15 = vadd.f32 %v4757_v12, %v1348_v11 }
0x167d   :  { %v1353_v18 = vmax.f32 %v1349_v15, 0.0 }
0x1682   :  { %v1350_v16 = vpop.f32.mrf.mxu3 }
0x1683   :  { %v1351_v17 = vadd.f32 %v4757_v12, %v1350_v16 }
0x1685   :  { %v1354_v19 = vmax.f32 %v1351_v17, 0.0 }
0x1687   :  { %v1355_v14 = vpack.c.bf16 %v1354_v19, %v1353_v18 }
0x1689   :  { %4536 = vmatmul.msk.bf16.vlgmr.msra.gmra.mxu0 %vm443_vm8, %v1355_v14  ;;  %v1489_v14 = vpop.f32.mrf.mxu2 }
0x168a   :  { %2081 = vmatpush.bf16.msra.mxu0 %v1479_v41 }
0x1706   :  { %v1375_v21 = vpop.f32.mrf.mxu0 }
0x1707   :  { %v1376_v22 = vadd.f32 %v4758_v20, %v1375_v21 }
0x1709   :  { %v6011_v23 = vadd.f32 %v1376_v22, %v5976_v6 }
0x170b   :  { %v1397_v24 = vsel %vm349_vm0, %v6011_v23, 0.0 }
0x170c   :  { %1398 = vadd.xlane.f32.xlu2 %v1397_v24 }
0x170e   :  { %v1377_v25 = vpop.f32.mrf.mxu0 }
0x170f   :  { %v1378_v27 = vadd.f32 %v4758_v20, %v1377_v25 }
0x1711   :  { %v6016_v26 = vadd.f32 %v1378_v27, %v5981_v10 }
0x1713   :  { %v1400_v28 = vsel %vm349_vm0, %v6016_v26, 0.0 }
0x1714   :  { %1401 = vadd.xlane.f32.xlu1 %v1400_v28 }
0x177f   :  { %v1399_v29 = vpop.xlane.xlu2 %1398 }
0x1780   :  { %v1403_v31 = vmul.f32 %v1399_v29, %v5825_v13 }
0x1782   :  { %v1405_v6 = vsub.f32 %v6011_v23, %v1403_v31 }
0x1784   :  { %v1407_v32 = vmul.f32 %v1405_v6, %v1405_v6 }
0x1786   :  { %v1409_v33 = vsel %vm349_vm0, %v1407_v32, 0.0 }
0x1787   :  { %v1402_v34 = vpop.xlane.xlu1 %1401  ;;  %1410 = vadd.xlane.f32.xlu0 %v1409_v33 }
0x1788   :  { %v1404_v10 = vmul.f32 %v1402_v34, %v5825_v13 }
0x178a   :  { %v1406_v30 = vsub.f32 %v6016_v26, %v1404_v10 }
0x178c   :  { %v1408_v35 = vmul.f32 %v1406_v30, %v1406_v30 }
0x178e   :  { %v1412_v36 = vsel %vm349_vm0, %v1408_v35, 0.0 }
0x178f   :  { %1413 = vadd.xlane.f32.xlu2 %v1412_v36 }
0x17fa   :  { %v1411_v40 = vpop.xlane.xlu0 %1410 }
0x17fb   :  { %v1415_v42 = vmul.f32 %v1411_v40, %v5825_v13 }
0x17fd   :  { %v1417_v45 = vadd.f32 1e-06, %v1415_v42 }
0x17ff   :  { %4923 = vrsqrt.f32 %v1417_v45  ;;  %vm1425_vm15 = vweird.f32 %v1417_v45 }
0x1802   :  { %v1414_v49 = vpop.xlane.xlu2 %1413 }
0x1803   :  { %v1416_v51 = vmul.f32 %v1414_v49, %v5825_v13 }
0x1805   :  { %v4924_v50 = vpop.eup %4923  ;;  %v1418_v52 = vadd.f32 1e-06, %v1416_v51 }
0x1806   :  { %v1420_v54 = vmul.f32 %v4924_v50, %v1417_v45  ;;  %vm1426_vm14 = vweird.f32 %v4924_v50 }
0x1807   :  { %4925 = vrsqrt.f32 %v1418_v52  ;;  %vm1427_vm1 = vmor %vm1425_vm15, %vm1426_vm14  ;;  %vm1435_vm4 = vweird.f32 %v1418_v52 }
0x1808   :  { %v1421_v55 = vmul.f32 %v4924_v50, %v1420_v54 }
0x180a   :  { %v1422_v56 = vmul.f32 0.5, %v1421_v55 }
0x180c   :  { %v1423_v57 = vsub.f32 1.5, %v1422_v56 }
0x180d   :  { %v4926_v58 = vpop.eup %4925 }
0x180e   :  { %v1424_v60 = vmul.f32 %v4924_v50, %v1423_v57  ;;  %v1430_v8 = vmul.f32 %v4926_v58, %v1418_v52  ;;  %vm1436_vm3 = vweird.f32 %v4926_v58 }
0x180f   :  { %vm1437_vm5 = vmor %vm1435_vm4, %vm1436_vm3 }
0x1810   :  { %v1428_v59 = vsel %vm1427_vm1, %v4924_v50, %v1424_v60  ;;  %v1431_v61 = vmul.f32 %v4926_v58, %v1430_v8 }
0x1811   :  { %v1439_v2 = vmul.f32 %v1428_v59, %v1405_v6 }
0x1812   :  { %v1432_v63 = vmul.f32 0.5, %v1431_v61 }
0x1813   :  { %v1444_v7 = vmul.f32 %v4759_v1, %v1439_v2 }
0x1814   :  { %v1433_v0 = vsub.f32 1.5, %v1432_v63 }
0x1815   :  { %v1449_v11 = vadd.f32 %v4760_v5, %v1444_v7 }
0x1816   :  { %v1434_v3 = vmul.f32 %v4926_v58, %v1433_v0 }
0x1817   :  { %v1451_v16 = vmul.f32 %v1449_v11, %v5841_v53 }
0x1818   :  { %v1438_v9 = vsel %vm1437_vm5, %v4926_v58, %v1434_v3 }
0x1819   :  { %v1440_v4 = vmul.f32 %v1438_v9, %v1406_v30 }
0x181b   :  { %v1445_v12 = vmul.f32 %v4759_v1, %v1440_v4 }
0x181d   :  { %v1450_v15 = vadd.f32 %v4760_v5, %v1445_v12 }
0x181f   :  { %v1452_v17 = vmul.f32 %v1450_v15, %v5844_v62  ;;  %v1491_v62 = vpop.f32.mrf.mxu2 }
0x1821   :  { %v1453_v18 = vpack.c.bf16 %v1452_v17, %v1451_v16 }
0x1823   :  { %4547 = vmatmul.msk.bf16.vlgmr.msrb.gmra.mxu1 %vm349_vm0, %v1453_v18 }
0x1824   :  { %2180 = vmatpush.bf16.msrb.mxu1 %v1479_v41 }
0x18a0   :  { %v1468_v19 = vpop.f32.mrf.mxu1 }
0x18a1   :  { %1473 = vst.msk [vmem:[#allocation2] sm:$0xff] %vm443_vm8, %v1468_v19 }
0x18a2   :  { %1475 = vst.msk [vmem:[#allocation2 + $0x8] sm:$0xff] %vm443_vm8, %v1468_v19 }
0x18a8   :  { %v1470_v20 = vpop.f32.mrf.mxu1 }
0x18a9   :  { %v1477_v21 = vld [vmem:[#allocation2 + $0x1] sm:$0xff]  ;;  %1474 = vst.msk [vmem:[#allocation2 + $0x10] sm:$0xff] %vm443_vm8, %v1470_v20 }
0x18aa   :  { %v1494_v22 = vadd.f32 %v1489_v14, %v1477_v21  ;;  %1476 = vst.msk [vmem:[#allocation2 + $0x18] sm:$0xff] %vm443_vm8, %v1470_v20  ;;  %v1570_v4 = vld [vmem:[#allocation2 + $0x2] sm:$0xff] }
0x18ac   :  { %4927 = vtanh.f32 %v1494_v22  ;;  %v4548_v28 = vmul.f32 -1.442695, %v1494_v22 }
0x18b1   :  { %v1478_v53 = vld [vmem:[#allocation2 + $0x11] sm:$0xff] }
0x18b2   :  { %v4928_v24 = vpop.eup %4927  ;;  %v1495_v25 = vadd.f32 %v1491_v62, %v1478_v53  ;;  %v1571_v15 = vld [vmem:[#allocation2 + $0x12] sm:$0xff] }
0x18b3   :  { %1540 = vrot.lane.b32.xlu1 %v4928_v24, %s5517_s29 }
0x18b4   :  { %4929 = vtanh.f32 %v1495_v25  ;;  %v4549_v29 = vmul.f32 -1.442695, %v1495_v25 }
0x18b5   :  { %4931 = vpow2.f32 %v4548_v28 }
0x18b6   :  { %4933 = vpow2.f32 %v4549_v29 }
0x18ba   :  { %v4930_v27 = vpop.eup %4929 }
0x18bb   :  { %1542 = vrot.lane.b32.xlu0 %v4930_v27, %s5517_s29  ;;  %v4932_v31 = vpop.eup %4931 }
0x18bc   :  { %v1502_v6 = vadd.f32 1.0, %v4932_v31  ;;  %v4934_v32 = vpop.eup %4933 }
0x18bd   :  { %v1503_v33 = vadd.f32 1.0, %v4934_v32 }
0x18be   :  { %4935 = vrcp.f32 %v1502_v6  ;;  %v1515_v41 = vand.u32 2147483648, %v1502_v6  ;;  %vm1509_vm7 = vweird.f32 %v1502_v6  ;;  %v1513_v42 = vand.u32 2147483647, %v1502_v6 }
0x18bf   :  { %4937 = vrcp.f32 %v1503_v33  ;;  %v1530_v49 = vand.u32 2147483648, %v1503_v33  ;;  %vm1524_vm12 = vweird.f32 %v1503_v33  ;;  %v1528_v51 = vand.u32 2147483647, %v1503_v33 }
0x18c0   :  { %v1516_v44 = vor.u32 1.1754944e-38, %v1515_v41  ;;  %vm1514_vm10 = vcmp.eq.f32.partialorder %v1513_v42, 8.507059e+37 }
0x18c1   :  { %v1531_v52 = vor.u32 1.1754944e-38, %v1530_v49  ;;  %vm1529_vm14 = vcmp.eq.f32.partialorder %v1528_v51, 8.507059e+37 }
0x18c4   :  { %v4936_v34 = vpop.eup %4935 }
0x18c5   :  { %v1505_v10 = vmul.f32 %v4936_v34, %v1502_v6  ;;  %v4938_v35 = vpop.eup %4937  ;;  %vm1510_vm6 = vweird.f32 %v4936_v34 }
0x18c6   :  { %v1520_v37 = vmul.f32 %v4938_v35, %v1503_v33  ;;  %vm1511_vm9 = vmor %vm1509_vm7, %vm1510_vm6  ;;  %vm1525_vm11 = vweird.f32 %v4938_v35 }
0x18c7   :  { %v1506_v30 = vsub.f32 1.0, %v1505_v10  ;;  %vm1526_vm13 = vmor %vm1524_vm12, %vm1525_vm11 }
0x18c8   :  { %v1521_v40 = vsub.f32 1.0, %v1520_v37 }
0x18c9   :  { %v1507_v36 = vmul.f32 %v4936_v34, %v1506_v30 }
0x18ca   :  { %v1522_v38 = vmul.f32 %v4938_v35, %v1521_v40 }
0x18cb   :  { %v1508_v39 = vadd.f32 %v4936_v34, %v1507_v36 }
0x18cc   :  { %v1523_v48 = vadd.f32 %v4938_v35, %v1522_v38 }
0x18cd   :  { %v1512_v43 = vsel %vm1511_vm9, %v4936_v34, %v1508_v39 }
0x18ce   :  { %v1517_v46 = vsel %vm1514_vm10, %v1516_v44, %v1512_v43  ;;  %v1527_v50 = vsel %vm1526_vm13, %v4938_v35, %v1523_v48 }
0x18cf   :  { %v1532_v55 = vsel %vm1529_vm14, %v1531_v52, %v1527_v50  ;;  %v1536_v57 = vmul.f32 0.0, %v1517_v46 }
0x18d0   :  { %v1537_v59 = vmul.f32 0.0, %v1532_v55 }
0x1925   :  { %v1541_v45 = vpop.permute.xlu1 %1540 }
0x1926   :  { %v1546_v47 = vmul.f32 %v1541_v45, %v1517_v46 }
0x1928   :  { %1550 = vrot.lane.b32.xlu2 %v1546_v47, %s5503_s7 }
0x192d   :  { %v1543_v54 = vpop.permute.xlu0 %1542 }
0x192e   :  { %v1547_v56 = vmul.f32 %v1543_v54, %v1532_v55 }
0x1930   :  { %1552 = vrot.lane.b32.xlu0 %v1547_v56, %s5503_s7 }
0x1982   :  { %v1551_v58 = vpop.permute.xlu2 %1550 }
0x1983   :  { %v6048_v60 = vadd.f32 %v1551_v58, %v1536_v57 }
0x1985   :  { %4939 = vtanh.f32 %v6048_v60 }
0x198b   :  { %v4940_v8 = vpop.eup %4939 }
0x198c   :  { %1562 = vrot.lane.b32.xlu1 %v4940_v8, %s5518_s10 }
0x19a2   :  { %v1553_v61 = vpop.permute.xlu0 %1552 }
0x19a3   :  { %v6052_v63 = vadd.f32 %v1553_v61, %v1537_v59 }
0x19a5   :  { %4941 = vtanh.f32 %v6052_v63 }
0x19ab   :  { %v4942_v1 = vpop.eup %4941 }
0x19ac   :  { %1564 = vrot.lane.b32.xlu2 %v4942_v1, %s5518_s10 }
0x19fe   :  { %v1563_v2 = vpop.permute.xlu1 %1562 }
0x19ff   :  { %v1568_v3 = vmul.f32 %v1563_v2, %v1517_v46  ;;  %v1670_v2 = vld [vmem:[#allocation2 + $0x13] sm:$0xff] }
0x1a06   :  { %v1565_v0 = vpop.permute.xlu2 %1564 }
0x1a07   :  { %v1569_v5 = vmul.f32 %v1565_v0, %v1532_v55 }
0x1a09   :  { %v1572_v7 = vpack.c.bf16 %v1569_v5, %v1568_v3 }
0x1a0b   :  { %1574 = vrot.lane.b32.xlu0 %v1572_v7, %s5519_s1 }
0x1a7d   :  { %v1575_v9 = vpop.permute.xlu0 %1574 }
0x1a7e   :  { %4550 = vmatmul.msk.bf16.vlgmr.msrb.gmra.mxu3 %vm451_vm2, %v1575_v9 }
0x1b01   :  { %v1588_v11 = vpop.f32.mrf.mxu3 }
0x1b02   :  { %v1593_v12 = vadd.f32 %v1588_v11, %v1570_v4 }
0x1b04   :  { %4943 = vtanh.f32 %v1593_v12  ;;  %v4551_v22 = vmul.f32 -1.442695, %v1593_v12 }
0x1b09   :  { %v1590_v16 = vpop.f32.mrf.mxu3 }
0x1b0a   :  { %v4944_v17 = vpop.eup %4943  ;;  %v1594_v18 = vadd.f32 %v1590_v16, %v1571_v15 }
0x1b0b   :  { %1639 = vrot.lane.b32.xlu1 %v4944_v17, %s5517_s29 }
0x1b0c   :  { %4945 = vtanh.f32 %v1594_v18  ;;  %v4552_v14 = vmul.f32 -1.442695, %v1594_v18 }
0x1b0e   :  { %4947 = vpow2.f32 %v4552_v14 }
0x1b12   :  { %v4946_v19 = vpop.eup %4945 }
0x1b13   :  { %1641 = vrot.lane.b32.xlu2 %v4946_v19, %s5517_s29 }
0x1b14   :  { %v4948_v20 = vpop.eup %4947 }
0x1b15   :  { %v1602_v21 = vadd.f32 1.0, %v4948_v20 }
0x1b17   :  { %4949 = vrcp.f32 %v1602_v21  ;;  %v1629_v6 = vand.u32 2147483648, %v1602_v21  ;;  %vm1623_vm1 = vweird.f32 %v1602_v21  ;;  %v1627_v32 = vand.u32 2147483647, %v1602_v21 }
0x1b18   :  { %4951 = vpow2.f32 %v4551_v22 }
0x1b19   :  { %v1630_v10 = vor.u32 1.1754944e-38, %v1629_v6  ;;  %vm1628_vm4 = vcmp.eq.f32.partialorder %v1627_v32, 8.507059e+37 }
0x1b1d   :  { %v4950_v53 = vpop.eup %4949 }
0x1b1e   :  { %v4952_v62 = vpop.eup %4951  ;;  %v1619_v24 = vmul.f32 %v4950_v53, %v1602_v21  ;;  %vm1624_vm15 = vweird.f32 %v4950_v53 }
0x1b1f   :  { %v1601_v25 = vadd.f32 1.0, %v4952_v62  ;;  %vm1625_vm3 = vmor %vm1623_vm1, %vm1624_vm15 }
0x1b20   :  { %v1620_v27 = vsub.f32 1.0, %v1619_v24 }
0x1b21   :  { %4953 = vrcp.f32 %v1601_v25  ;;  %v1614_v41 = vand.u32 2147483648, %v1601_v25  ;;  %vm1608_vm6 = vweird.f32 %v1601_v25  ;;  %v1612_v42 = vand.u32 2147483647, %v1601_v25 }
0x1b22   :  { %v1621_v28 = vmul.f32 %v4950_v53, %v1620_v27 }
0x1b23   :  { %v1615_v38 = vor.u32 1.1754944e-38, %v1614_v41  ;;  %vm1613_vm9 = vcmp.eq.f32.partialorder %v1612_v42, 8.507059e+37 }
0x1b24   :  { %v1622_v29 = vadd.f32 %v4950_v53, %v1621_v28 }
0x1b26   :  { %v1626_v33 = vsel %vm1625_vm3, %v4950_v53, %v1622_v29 }
0x1b27   :  { %v4954_v31 = vpop.eup %4953  ;;  %v1631_v35 = vsel %vm1628_vm4, %v1630_v10, %v1626_v33 }
0x1b28   :  { %v1604_v34 = vmul.f32 %v4954_v31, %v1601_v25  ;;  %vm1609_vm5 = vweird.f32 %v4954_v31  ;;  %v1636_v47 = vmul.f32 %v1631_v35, %v6052_v63  ;;  %v1669_v63 = vld [vmem:[#allocation2 + $0x3] sm:$0xff] }
0x1b29   :  { %vm1610_vm7 = vmor %vm1608_vm6, %vm1609_vm5 }
0x1b2a   :  { %v1605_v37 = vsub.f32 1.0, %v1604_v34 }
0x1b2c   :  { %v1606_v39 = vmul.f32 %v4954_v31, %v1605_v37 }
0x1b2e   :  { %v1607_v40 = vadd.f32 %v4954_v31, %v1606_v39 }
0x1b30   :  { %v1611_v43 = vsel %vm1610_vm7, %v4954_v31, %v1607_v40 }
0x1b31   :  { %v1616_v45 = vsel %vm1613_vm9, %v1615_v38, %v1611_v43 }
0x1b32   :  { %v1635_v50 = vmul.f32 %v1616_v45, %v6048_v60 }
0x1b6d   :  { %v1642_v30 = vpop.permute.xlu2 %1641 }
0x1b6e   :  { %v1646_v36 = vmul.f32 %v1642_v30, %v1631_v35 }
0x1b70   :  { %1651 = vrot.lane.b32.xlu1 %v1646_v36, %s5503_s7 }
0x1b7d   :  { %v1640_v44 = vpop.permute.xlu1 %1639 }
0x1b7e   :  { %v1645_v46 = vmul.f32 %v1640_v44, %v1616_v45 }
0x1b80   :  { %1649 = vrot.lane.b32.xlu0 %v1645_v46, %s5503_s7 }
0x1be2   :  { %v1652_v48 = vpop.permute.xlu1 %1651 }
0x1be3   :  { %v6063_v49 = vadd.f32 %v1652_v48, %v1636_v47 }
0x1be5   :  { %4955 = vtanh.f32 %v6063_v49 }
0x1beb   :  { %v4956_v51 = vpop.eup %4955 }
0x1bec   :  { %1663 = vrot.lane.b32.xlu0 %v4956_v51, %s5518_s10 }
0x1bf2   :  { %v1650_v52 = vpop.permute.xlu0 %1649 }
0x1bf3   :  { %v6068_v54 = vadd.f32 %v1650_v52, %v1635_v50 }
0x1bf5   :  { %4957 = vtanh.f32 %v6068_v54 }
0x1bfb   :  { %v4958_v55 = vpop.eup %4957 }
0x1bfc   :  { %1661 = vrot.lane.b32.xlu2 %v4958_v55, %s5518_s10 }
0x1c56   :  { %v1662_v56 = vpop.permute.xlu2 %1661 }
0x1c57   :  { %v1667_v58 = vmul.f32 %v1662_v56, %v1616_v45  ;;  %v1769_v56 = vld [vmem:[#allocation2 + $0x14] sm:$0xff] }
0x1c5e   :  { %v1664_v57 = vpop.permute.xlu0 %1663 }
0x1c5f   :  { %v1668_v8 = vmul.f32 %v1664_v57, %v1631_v35 }
0x1c61   :  { %v1671_v59 = vpack.c.bf16 %v1668_v8, %v1667_v58 }
0x1c63   :  { %1673 = vrot.lane.b32.xlu1 %v1671_v59, %s5519_s1 }
0x1cd5   :  { %v1674_v61 = vpop.permute.xlu1 %1673 }
0x1cd6   :  { %4553 = vmatmul.msk.bf16.vlgmr.msrb.gmra.mxu0 %vm451_vm2, %v1674_v61 }
0x1d53   :  { %v1687_v60 = vpop.f32.mrf.mxu0 }
0x1d54   :  { %v1692_v1 = vadd.f32 %v1687_v60, %v1669_v63 }
0x1d56   :  { %4959 = vtanh.f32 %v1692_v1  ;;  %v4554_v9 = vmul.f32 -1.442695, %v1692_v1 }
0x1d5b   :  { %v1689_v0 = vpop.f32.mrf.mxu0 }
0x1d5c   :  { %v4960_v3 = vpop.eup %4959  ;;  %v1693_v5 = vadd.f32 %v1689_v0, %v1670_v2 }
0x1d5d   :  { %1738 = vrot.lane.b32.xlu2 %v4960_v3, %s5517_s29 }
0x1d5e   :  { %4961 = vtanh.f32 %v1693_v5  ;;  %v4555_v17 = vmul.f32 -1.442695, %v1693_v5 }
0x1d5f   :  { %4963 = vpow2.f32 %v4554_v9 }
0x1d64   :  { %v4962_v7 = vpop.eup %4961 }
0x1d65   :  { %1740 = vrot.lane.b32.xlu0 %v4962_v7, %s5517_s29  ;;  %v4964_v4 = vpop.eup %4963 }
0x1d66   :  { %v1700_v11 = vadd.f32 1.0, %v4964_v4 }
0x1d68   :  { %4965 = vrcp.f32 %v1700_v11  ;;  %v1713_v14 = vand.u32 2147483648, %v1700_v11  ;;  %vm1707_vm11 = vweird.f32 %v1700_v11  ;;  %v1711_v20 = vand.u32 2147483647, %v1700_v11 }
0x1d69   :  { %4967 = vpow2.f32 %v4555_v17 }
0x1d6a   :  { %v1714_v53 = vor.u32 1.1754944e-38, %v1713_v14  ;;  %vm1712_vm13 = vcmp.eq.f32.partialorder %v1711_v20, 8.507059e+37 }
0x1d6e   :  { %v4966_v12 = vpop.eup %4965 }
0x1d6f   :  { %v1703_v15 = vmul.f32 %v4966_v12, %v1700_v11  ;;  %vm1708_vm10 = vweird.f32 %v4966_v12  ;;  %v4968_v21 = vpop.eup %4967 }
0x1d70   :  { %vm1709_vm12 = vmor %vm1707_vm11, %vm1708_vm10  ;;  %v1701_v62 = vadd.f32 1.0, %v4968_v21 }
0x1d71   :  { %v1704_v16 = vsub.f32 1.0, %v1703_v15 }
0x1d72   :  { %4969 = vrcp.f32 %v1701_v62  ;;  %v1728_v33 = vand.u32 2147483648, %v1701_v62  ;;  %vm1722_vm15 = vweird.f32 %v1701_v62  ;;  %v1726_v34 = vand.u32 2147483647, %v1701_v62 }
0x1d73   :  { %v1705_v18 = vmul.f32 %v4966_v12, %v1704_v16 }
0x1d74   :  { %v1729_v30 = vor.u32 1.1754944e-38, %v1728_v33  ;;  %vm1727_vm3 = vcmp.eq.f32.partialorder %v1726_v34, 8.507059e+37 }
0x1d75   :  { %v1706_v19 = vadd.f32 %v4966_v12, %v1705_v18 }
0x1d77   :  { %v1710_v22 = vsel %vm1709_vm12, %v4966_v12, %v1706_v19 }
0x1d78   :  { %v1715_v25 = vsel %vm1712_vm13, %v1714_v53, %v1710_v22  ;;  %v4970_v28 = vpop.eup %4969 }
0x1d79   :  { %v1718_v29 = vmul.f32 %v4970_v28, %v1701_v62  ;;  %vm1723_vm14 = vweird.f32 %v4970_v28  ;;  %v1734_v39 = vmul.f32 %v1715_v25, %v6068_v54 }
0x1d7a   :  { %vm1724_vm1 = vmor %vm1722_vm15, %vm1723_vm14 }
0x1d7b   :  { %v1719_v31 = vsub.f32 1.0, %v1718_v29 }
0x1d7d   :  { %v1720_v6 = vmul.f32 %v4970_v28, %v1719_v31 }
0x1d7f   :  { %v1721_v32 = vadd.f32 %v4970_v28, %v1720_v6 }
0x1d81   :  { %v1725_v10 = vsel %vm1724_vm1, %v4970_v28, %v1721_v32 }
0x1d82   :  { %v1730_v36 = vsel %vm1727_vm3, %v1729_v30, %v1725_v10 }
0x1d83   :  { %v1735_v42 = vmul.f32 %v1730_v36, %v6063_v49  ;;  %v1768_v49 = vld [vmem:[#allocation2 + $0x4] sm:$0xff] }
0x1db7   :  { %v1739_v24 = vpop.permute.xlu2 %1738 }
0x1db8   :  { %v1744_v27 = vmul.f32 %v1739_v24, %v1715_v25 }
0x1dba   :  { %1748 = vrot.lane.b32.xlu1 %v1744_v27, %s5503_s7 }
0x1dd7   :  { %v1741_v35 = vpop.permute.xlu0 %1740 }
0x1dd8   :  { %v1745_v37 = vmul.f32 %v1741_v35, %v1730_v36 }
0x1dda   :  { %1750 = vrot.lane.b32.xlu2 %v1745_v37, %s5503_s7 }
0x1e2c   :  { %v1749_v40 = vpop.permute.xlu1 %1748 }
0x1e2d   :  { %v6079_v41 = vadd.f32 %v1749_v40, %v1734_v39 }
0x1e2f   :  { %4971 = vtanh.f32 %v6079_v41 }
0x1e34   :  { %v1751_v43 = vpop.permute.xlu2 %1750 }
0x1e35   :  { %v4972_v38 = vpop.eup %4971  ;;  %v6083_v44 = vadd.f32 %v1751_v43, %v1735_v42 }
0x1e36   :  { %1760 = vrot.lane.b32.xlu0 %v4972_v38, %s5518_s10  ;;  %v1867_v38 = vld [vmem:[#allocation2 + $0x5] sm:$0xff] }
0x1e37   :  { %4973 = vtanh.f32 %v6083_v44 }
0x1e3d   :  { %v4974_v45 = vpop.eup %4973 }
0x1e3e   :  { %1762 = vrot.lane.b32.xlu1 %v4974_v45, %s5518_s10 }
0x1ea8   :  { %v1761_v46 = vpop.permute.xlu0 %1760 }
0x1ea9   :  { %v1766_v48 = vmul.f32 %v1761_v46, %v1715_v25  ;;  %v1868_v46 = vld [vmem:[#allocation2 + $0x15] sm:$0xff] }
0x1eb0   :  { %v1763_v47 = vpop.permute.xlu1 %1762 }
0x1eb1   :  { %v1767_v51 = vmul.f32 %v1763_v47, %v1730_v36 }
0x1eb3   :  { %v1770_v50 = vpack.c.bf16 %v1767_v51, %v1766_v48 }
0x1eb5   :  { %1772 = vrot.lane.b32.xlu2 %v1770_v50, %s5519_s1 }
0x1f0f   :  { %v1773_v52 = vpop.permute.xlu2 %1772 }
0x1f10   :  { %4556 = vmatmul.msk.bf16.vlgmr.msra.gmra.mxu1 %vm451_vm2, %v1773_v52 }
0x1f8d   :  { %v1786_v54 = vpop.f32.mrf.mxu1 }
0x1f8e   :  { %v1791_v55 = vadd.f32 %v1786_v54, %v1768_v49 }
0x1f90   :  { %4975 = vtanh.f32 %v1791_v55  ;;  %v4557_v61 = vmul.f32 -1.442695, %v1791_v55 }
0x1f95   :  { %v1788_v57 = vpop.f32.mrf.mxu1 }
0x1f96   :  { %v4976_v58 = vpop.eup %4975  ;;  %v1792_v8 = vadd.f32 %v1788_v57, %v1769_v56 }
0x1f97   :  { %1837 = vrot.lane.b32.xlu0 %v4976_v58, %s5517_s29 }
0x1f98   :  { %4977 = vtanh.f32 %v1792_v8  ;;  %v4558_v63 = vmul.f32 -1.442695, %v1792_v8 }
0x1f99   :  { %4979 = vpow2.f32 %v4557_v61 }
0x1f9a   :  { %4981 = vpow2.f32 %v4558_v63 }
0x1f9e   :  { %v4978_v59 = vpop.eup %4977 }
0x1f9f   :  { %1839 = vrot.lane.b32.xlu1 %v4978_v59, %s5517_s29  ;;  %v4980_v60 = vpop.eup %4979 }
0x1fa0   :  { %v1799_v1 = vadd.f32 1.0, %v4980_v60  ;;  %v4982_v2 = vpop.eup %4981 }
0x1fa1   :  { %v1800_v0 = vadd.f32 1.0, %v4982_v2 }
0x1fa2   :  { %4983 = vrcp.f32 %v1799_v1  ;;  %v1812_v16 = vand.u32 2147483648, %v1799_v1  ;;  %vm1806_vm5 = vweird.f32 %v1799_v1  ;;  %v1810_v17 = vand.u32 2147483647, %v1799_v1 }
0x1fa3   :  { %4985 = vrcp.f32 %v1800_v0  ;;  %v1827_v62 = vand.u32 2147483648, %v1800_v0  ;;  %vm1821_vm10 = vweird.f32 %v1800_v0  ;;  %v1825_v24 = vand.u32 2147483647, %v1800_v0 }
0x1fa4   :  { %v1813_v14 = vor.u32 1.1754944e-38, %v1812_v16  ;;  %vm1811_vm7 = vcmp.eq.f32.partialorder %v1810_v17, 8.507059e+37 }
0x1fa5   :  { %v1828_v27 = vor.u32 1.1754944e-38, %v1827_v62  ;;  %vm1826_vm12 = vcmp.eq.f32.partialorder %v1825_v24, 8.507059e+37 }
0x1fa8   :  { %v4984_v3 = vpop.eup %4983 }
0x1fa9   :  { %v1802_v5 = vmul.f32 %v4984_v3, %v1799_v1  ;;  %v4986_v9 = vpop.eup %4985  ;;  %vm1807_vm4 = vweird.f32 %v4984_v3 }
0x1faa   :  { %v1817_v11 = vmul.f32 %v4986_v9, %v1800_v0  ;;  %vm1808_vm6 = vmor %vm1806_vm5, %vm1807_vm4  ;;  %vm1822_vm9 = vweird.f32 %v4986_v9 }
0x1fab   :  { %v1803_v7 = vsub.f32 1.0, %v1802_v5  ;;  %vm1823_vm11 = vmor %vm1821_vm10, %vm1822_vm9 }
0x1fac   :  { %v1818_v15 = vsub.f32 1.0, %v1817_v11 }
0x1fad   :  { %v1804_v4 = vmul.f32 %v4984_v3, %v1803_v7 }
0x1fae   :  { %v1819_v19 = vmul.f32 %v4986_v9, %v1818_v15 }
0x1faf   :  { %v1805_v12 = vadd.f32 %v4984_v3, %v1804_v4 }
0x1fb0   :  { %v1820_v53 = vadd.f32 %v4986_v9, %v1819_v19 }
0x1fb1   :  { %v1809_v18 = vsel %vm1808_vm6, %v4984_v3, %v1805_v12 }
0x1fb2   :  { %v1814_v21 = vsel %vm1811_vm7, %v1813_v14, %v1809_v18  ;;  %v1824_v25 = vsel %vm1823_vm11, %v4986_v9, %v1820_v53 }
0x1fb3   :  { %v1829_v29 = vsel %vm1826_vm12, %v1828_v27, %v1824_v25  ;;  %v1833_v6 = vmul.f32 %v1814_v21, %v6079_v41 }
0x1fb4   :  { %v1834_v10 = vmul.f32 %v1829_v29, %v6083_v44 }
0x2009   :  { %v1838_v20 = vpop.permute.xlu0 %1837 }
0x200a   :  { %v1843_v22 = vmul.f32 %v1838_v20, %v1814_v21 }
0x200c   :  { %1847 = vrot.lane.b32.xlu2 %v1843_v22, %s5503_s7 }
0x2011   :  { %v1840_v28 = vpop.permute.xlu1 %1839 }
0x2012   :  { %v1844_v31 = vmul.f32 %v1840_v28, %v1829_v29 }
0x2014   :  { %1849 = vrot.lane.b32.xlu0 %v1844_v31, %s5503_s7 }
0x2066   :  { %v1848_v32 = vpop.permute.xlu2 %1847 }
0x2067   :  { %v6095_v33 = vadd.f32 %v1848_v32, %v1833_v6 }
0x2069   :  { %4987 = vtanh.f32 %v6095_v33 }
0x206f   :  { %v4988_v34 = vpop.eup %4987 }
0x2070   :  { %1859 = vrot.lane.b32.xlu1 %v4988_v34, %s5518_s10 }
0x2086   :  { %v1850_v30 = vpop.permute.xlu0 %1849 }
0x2087   :  { %v6100_v35 = vadd.f32 %v1850_v30, %v1834_v10 }
0x2089   :  { %4989 = vtanh.f32 %v6100_v35 }
0x208f   :  { %v4990_v36 = vpop.eup %4989 }
0x2090   :  { %1861 = vrot.lane.b32.xlu2 %v4990_v36, %s5518_s10 }
0x20e2   :  { %v1860_v37 = vpop.permute.xlu1 %1859 }
0x20e3   :  { %v1865_v40 = vmul.f32 %v1860_v37, %v1814_v21  ;;  %v1967_v37 = vld [vmem:[#allocation2 + $0x16] sm:$0xff] }
0x20ea   :  { %v1862_v39 = vpop.permute.xlu2 %1861 }
0x20eb   :  { %v1866_v41 = vmul.f32 %v1862_v39, %v1829_v29 }
0x20ed   :  { %v1869_v42 = vpack.c.bf16 %v1866_v41, %v1865_v40 }
0x20ef   :  { %1871 = vrot.lane.b32.xlu0 %v1869_v42, %s5519_s1 }
0x2161   :  { %v1872_v43 = vpop.permute.xlu0 %1871 }
0x2162   :  { %4559 = vmatmul.msk.bf16.vlgmr.msra.gmra.mxu2 %vm451_vm2, %v1872_v43 }
0x21e5   :  { %v1885_v44 = vpop.f32.mrf.mxu2 }
0x21e6   :  { %v1890_v45 = vadd.f32 %v1885_v44, %v1867_v38 }
0x21e8   :  { %4991 = vtanh.f32 %v1890_v45  ;;  %v4560_v55 = vmul.f32 -1.442695, %v1890_v45 }
0x21ed   :  { %v1887_v47 = vpop.f32.mrf.mxu2 }
0x21ee   :  { %v4992_v48 = vpop.eup %4991  ;;  %v1891_v51 = vadd.f32 %v1887_v47, %v1868_v46 }
0x21ef   :  { %1936 = vrot.lane.b32.xlu1 %v4992_v48, %s5517_s29 }
0x21f0   :  { %4993 = vtanh.f32 %v1891_v51  ;;  %v4561_v52 = vmul.f32 -1.442695, %v1891_v51 }
0x21f2   :  { %4995 = vpow2.f32 %v4561_v52 }
0x21f6   :  { %v4994_v50 = vpop.eup %4993 }
0x21f7   :  { %1938 = vrot.lane.b32.xlu2 %v4994_v50, %s5517_s29 }
0x21f8   :  { %v4996_v49 = vpop.eup %4995 }
0x21f9   :  { %v1899_v54 = vadd.f32 1.0, %v4996_v49 }
0x21fb   :  { %4997 = vrcp.f32 %v1899_v54  ;;  %v1926_v1 = vand.u32 2147483648, %v1899_v54  ;;  %vm1920_vm14 = vweird.f32 %v1899_v54  ;;  %v1924_v2 = vand.u32 2147483647, %v1899_v54 }
0x21fc   :  { %4999 = vpow2.f32 %v4560_v55 }
0x21fd   :  { %v1927_v5 = vor.u32 1.1754944e-38, %v1926_v1  ;;  %vm1925_vm1 = vcmp.eq.f32.partialorder %v1924_v2, 8.507059e+37 }
0x2201   :  { %v4998_v56 = vpop.eup %4997 }
0x2202   :  { %v5000_v57 = vpop.eup %4999  ;;  %v1916_v58 = vmul.f32 %v4998_v56, %v1899_v54  ;;  %vm1921_vm13 = vweird.f32 %v4998_v56 }
0x2203   :  { %v1898_v8 = vadd.f32 1.0, %v5000_v57  ;;  %vm1922_vm15 = vmor %vm1920_vm14, %vm1921_vm13 }
0x2204   :  { %v1917_v59 = vsub.f32 1.0, %v1916_v58 }
0x2205   :  { %5001 = vrcp.f32 %v1898_v8  ;;  %v1911_v16 = vand.u32 2147483648, %v1898_v8  ;;  %vm1905_vm4 = vweird.f32 %v1898_v8  ;;  %v1909_v17 = vand.u32 2147483647, %v1898_v8 }
0x2206   :  { %v1918_v61 = vmul.f32 %v4998_v56, %v1917_v59 }
0x2207   :  { %v1912_v19 = vor.u32 1.1754944e-38, %v1911_v16  ;;  %vm1910_vm6 = vcmp.eq.f32.partialorder %v1909_v17, 8.507059e+37 }
0x2208   :  { %v1919_v63 = vadd.f32 %v4998_v56, %v1918_v61 }
0x220a   :  { %v1923_v0 = vsel %vm1922_vm15, %v4998_v56, %v1919_v63 }
0x220b   :  { %v5002_v60 = vpop.eup %5001  ;;  %v1928_v9 = vsel %vm1925_vm1, %v1927_v5, %v1923_v0 }
0x220c   :  { %v1901_v3 = vmul.f32 %v5002_v60, %v1898_v8  ;;  %vm1906_vm3 = vweird.f32 %v5002_v60  ;;  %v1933_v22 = vmul.f32 %v1928_v9, %v6100_v35  ;;  %v1966_v35 = vld [vmem:[#allocation2 + $0x6] sm:$0xff] }
0x220d   :  { %vm1907_vm5 = vmor %vm1905_vm4, %vm1906_vm3 }
0x220e   :  { %v1902_v11 = vsub.f32 1.0, %v1901_v3 }
0x2210   :  { %v1903_v12 = vmul.f32 %v5002_v60, %v1902_v11 }
0x2212   :  { %v1904_v15 = vadd.f32 %v5002_v60, %v1903_v12 }
0x2214   :  { %v1908_v18 = vsel %vm1907_vm5, %v5002_v60, %v1904_v15 }
0x2215   :  { %v1913_v20 = vsel %vm1910_vm6, %v1912_v19, %v1908_v18 }
0x2216   :  { %v1932_v25 = vmul.f32 %v1913_v20, %v6095_v33 }
0x2251   :  { %v1939_v7 = vpop.permute.xlu2 %1938 }
0x2252   :  { %v1943_v4 = vmul.f32 %v1939_v7, %v1928_v9 }
0x2254   :  { %1948 = vrot.lane.b32.xlu1 %v1943_v4, %s5503_s7 }
0x2261   :  { %v1937_v14 = vpop.permute.xlu1 %1936 }
0x2262   :  { %v1942_v21 = vmul.f32 %v1937_v14, %v1913_v20 }
0x2264   :  { %1946 = vrot.lane.b32.xlu0 %v1942_v21, %s5503_s7 }
0x22c6   :  { %v1949_v53 = vpop.permute.xlu1 %1948 }
0x22c7   :  { %v6111_v62 = vadd.f32 %v1949_v53, %v1933_v22 }
0x22c9   :  { %5003 = vtanh.f32 %v6111_v62 }
0x22cf   :  { %v5004_v24 = vpop.eup %5003 }
0x22d0   :  { %1960 = vrot.lane.b32.xlu0 %v5004_v24, %s5518_s10 }
0x22d6   :  { %v1947_v27 = vpop.permute.xlu0 %1946 }
0x22d7   :  { %v6116_v28 = vadd.f32 %v1947_v27, %v1932_v25 }
0x22d9   :  { %5005 = vtanh.f32 %v6116_v28 }
0x22df   :  { %v5006_v29 = vpop.eup %5005 }
0x22e0   :  { %1958 = vrot.lane.b32.xlu2 %v5006_v29, %s5518_s10 }
0x233a   :  { %v1959_v31 = vpop.permute.xlu2 %1958 }
0x233b   :  { %v1964_v32 = vmul.f32 %v1959_v31, %v1913_v20  ;;  %v2066_v31 = vld [vmem:[#allocation2 + $0x17] sm:$0xff] }
0x2342   :  { %v1961_v6 = vpop.permute.xlu0 %1960 }
0x2343   :  { %v1965_v34 = vmul.f32 %v1961_v6, %v1928_v9 }
0x2345   :  { %v1968_v10 = vpack.c.bf16 %v1965_v34, %v1964_v32 }
0x2347   :  { %1970 = vrot.lane.b32.xlu1 %v1968_v10, %s5519_s1 }
0x23b9   :  { %v1971_v30 = vpop.permute.xlu1 %1970 }
0x23ba   :  { %4562 = vmatmul.msk.bf16.vlgmr.msra.gmra.mxu3 %vm451_vm2, %v1971_v30 }
0x243d   :  { %v1984_v33 = vpop.f32.mrf.mxu3 }
0x243e   :  { %v1989_v36 = vadd.f32 %v1984_v33, %v1966_v35 }
0x2440   :  { %5007 = vtanh.f32 %v1989_v36  ;;  %v4563_v43 = vmul.f32 -1.442695, %v1989_v36 }
0x2445   :  { %v1986_v39 = vpop.f32.mrf.mxu3 }
0x2446   :  { %v5008_v40 = vpop.eup %5007  ;;  %v1990_v41 = vadd.f32 %v1986_v39, %v1967_v37 }
0x2447   :  { %2035 = vrot.lane.b32.xlu2 %v5008_v40, %s5517_s29 }
0x2448   :  { %5009 = vtanh.f32 %v1990_v41  ;;  %v4564_v48 = vmul.f32 -1.442695, %v1990_v41 }
0x2449   :  { %5011 = vpow2.f32 %v4563_v43 }
0x244e   :  { %v5010_v42 = vpop.eup %5009 }
0x244f   :  { %2037 = vrot.lane.b32.xlu0 %v5010_v42, %s5517_s29  ;;  %v5012_v38 = vpop.eup %5011 }
0x2450   :  { %v1997_v44 = vadd.f32 1.0, %v5012_v38 }
0x2452   :  { %5013 = vrcp.f32 %v1997_v44  ;;  %v2010_v52 = vand.u32 2147483648, %v1997_v44  ;;  %vm2004_vm9 = vweird.f32 %v1997_v44  ;;  %v2008_v49 = vand.u32 2147483647, %v1997_v44 }
0x2453   :  { %5015 = vpow2.f32 %v4564_v48 }
0x2454   :  { %v2011_v56 = vor.u32 1.1754944e-38, %v2010_v52  ;;  %vm2009_vm11 = vcmp.eq.f32.partialorder %v2008_v49, 8.507059e+37 }
0x2458   :  { %v5014_v45 = vpop.eup %5013 }
0x2459   :  { %v2000_v46 = vmul.f32 %v5014_v45, %v1997_v44  ;;  %vm2005_vm7 = vweird.f32 %v5014_v45  ;;  %v5016_v54 = vpop.eup %5015 }
0x245a   :  { %vm2006_vm10 = vmor %vm2004_vm9, %vm2005_vm7  ;;  %v1998_v57 = vadd.f32 1.0, %v5016_v54 }
0x245b   :  { %v2001_v47 = vsub.f32 1.0, %v2000_v46 }
0x245c   :  { %5017 = vrcp.f32 %v1998_v57  ;;  %v2025_v0 = vand.u32 2147483648, %v1998_v57  ;;  %vm2019_vm13 = vweird.f32 %v1998_v57  ;;  %v2023_v3 = vand.u32 2147483647, %v1998_v57 }
0x245d   :  { %v2002_v51 = vmul.f32 %v5014_v45, %v2001_v47 }
0x245e   :  { %v2026_v7 = vor.u32 1.1754944e-38, %v2025_v0  ;;  %vm2024_vm15 = vcmp.eq.f32.partialorder %v2023_v3, 8.507059e+37 }
0x245f   :  { %v2003_v50 = vadd.f32 %v5014_v45, %v2002_v51 }
0x2461   :  { %v2007_v55 = vsel %vm2006_vm10, %v5014_v45, %v2003_v50 }
0x2462   :  { %v2012_v8 = vsel %vm2009_vm11, %v2011_v56, %v2007_v55  ;;  %v5018_v61 = vpop.eup %5017 }
0x2463   :  { %v2015_v63 = vmul.f32 %v5018_v61, %v1998_v57  ;;  %vm2020_vm12 = vweird.f32 %v5018_v61  ;;  %v2031_v12 = vmul.f32 %v2012_v8, %v6116_v28 }
0x2464   :  { %vm2021_vm14 = vmor %vm2019_vm13, %vm2020_vm12 }
0x2465   :  { %v2016_v60 = vsub.f32 1.0, %v2015_v63 }
0x2467   :  { %v2017_v1 = vmul.f32 %v5018_v61, %v2016_v60 }
0x2469   :  { %v2018_v2 = vadd.f32 %v5018_v61, %v2017_v1 }
0x246b   :  { %v2022_v5 = vsel %vm2021_vm14, %v5018_v61, %v2018_v2 }
0x246c   :  { %v2027_v4 = vsel %vm2024_vm15, %v2026_v7, %v2022_v5 }
0x246d   :  { %v2032_v17 = vmul.f32 %v2027_v4, %v6111_v62  ;;  %v2065_v62 = vld [vmem:[#allocation2 + $0x7] sm:$0xff] }
0x24a1   :  { %v2036_v58 = vpop.permute.xlu2 %2035 }
0x24a2   :  { %v2041_v59 = vmul.f32 %v2036_v58, %v2012_v8 }
0x24a4   :  { %2045 = vrot.lane.b32.xlu1 %v2041_v59, %s5503_s7 }
0x24c1   :  { %v2038_v9 = vpop.permute.xlu0 %2037 }
0x24c2   :  { %v2042_v11 = vmul.f32 %v2038_v9, %v2027_v4 }
0x24c4   :  { %2047 = vrot.lane.b32.xlu2 %v2042_v11, %s5503_s7 }
0x2516   :  { %v2046_v15 = vpop.permute.xlu1 %2045 }
0x2517   :  { %v6127_v16 = vadd.f32 %v2046_v15, %v2031_v12 }
0x2519   :  { %5019 = vtanh.f32 %v6127_v16 }
0x251e   :  { %v2048_v18 = vpop.permute.xlu2 %2047 }
0x251f   :  { %v5020_v19 = vpop.eup %5019  ;;  %v6131_v14 = vadd.f32 %v2048_v18, %v2032_v17 }
0x2520   :  { %2057 = vrot.lane.b32.xlu0 %v5020_v19, %s5518_s10  ;;  %v2164_v19 = vld [vmem:[#allocation2 + $0x8] sm:$0xff] }
0x2521   :  { %5021 = vtanh.f32 %v6131_v14 }
0x2527   :  { %v5022_v20 = vpop.eup %5021 }
0x2528   :  { %2059 = vrot.lane.b32.xlu1 %v5022_v20, %s5518_s10 }
0x2592   :  { %v2058_v21 = vpop.permute.xlu0 %2057 }
0x2593   :  { %v2063_v53 = vmul.f32 %v2058_v21, %v2012_v8  ;;  %v2165_v21 = vld [vmem:[#allocation2 + $0x18] sm:$0xff] }
0x259a   :  { %v2060_v22 = vpop.permute.xlu1 %2059 }
0x259b   :  { %v2064_v24 = vmul.f32 %v2060_v22, %v2027_v4 }
0x259d   :  { %v2067_v25 = vpack.c.bf16 %v2064_v24, %v2063_v53 }
0x259f   :  { %2069 = vrot.lane.b32.xlu2 %v2067_v25, %s5519_s1 }
0x25f9   :  { %v2070_v27 = vpop.permute.xlu2 %2069 }
0x25fa   :  { %4565 = vmatmul.msk.bf16.vlgmr.msra.gmra.mxu0 %vm451_vm2, %v2070_v27 }
0x2677   :  { %v2083_v28 = vpop.f32.mrf.mxu0 }
0x2678   :  { %v2088_v29 = vadd.f32 %v2083_v28, %v2065_v62 }
0x267a   :  { %5023 = vtanh.f32 %v2088_v29  ;;  %v4566_v30 = vmul.f32 -1.442695, %v2088_v29 }
0x267f   :  { %v2085_v6 = vpop.f32.mrf.mxu0 }
0x2680   :  { %v5024_v32 = vpop.eup %5023  ;;  %v2089_v34 = vadd.f32 %v2085_v6, %v2066_v31 }
0x2681   :  { %2134 = vrot.lane.b32.xlu0 %v5024_v32, %s5517_s29 }
0x2682   :  { %5025 = vtanh.f32 %v2089_v34  ;;  %v4567_v35 = vmul.f32 -1.442695, %v2089_v34 }
0x2683   :  { %5027 = vpow2.f32 %v4566_v30 }
0x2684   :  { %5029 = vpow2.f32 %v4567_v35 }
0x2688   :  { %v5026_v10 = vpop.eup %5025 }
0x2689   :  { %2136 = vrot.lane.b32.xlu1 %v5026_v10, %s5517_s29  ;;  %v5028_v33 = vpop.eup %5027 }
0x268a   :  { %v2096_v36 = vadd.f32 1.0, %v5028_v33  ;;  %v5030_v37 = vpop.eup %5029 }
0x268b   :  { %v2097_v39 = vadd.f32 1.0, %v5030_v37 }
0x268c   :  { %5031 = vrcp.f32 %v2096_v36  ;;  %v2109_v47 = vand.u32 2147483648, %v2096_v36  ;;  %vm2103_vm3 = vweird.f32 %v2096_v36  ;;  %v2107_v48 = vand.u32 2147483647, %v2096_v36 }
0x268d   :  { %5033 = vrcp.f32 %v2097_v39  ;;  %v2124_v57 = vand.u32 2147483648, %v2097_v39  ;;  %vm2118_vm7 = vweird.f32 %v2097_v39  ;;  %v2122_v58 = vand.u32 2147483647, %v2097_v39 }
0x268e   :  { %v2110_v52 = vor.u32 1.1754944e-38, %v2109_v47  ;;  %vm2108_vm5 = vcmp.eq.f32.partialorder %v2107_v48, 8.507059e+37 }
0x268f   :  { %v2125_v59 = vor.u32 1.1754944e-38, %v2124_v57  ;;  %vm2123_vm10 = vcmp.eq.f32.partialorder %v2122_v58, 8.507059e+37 }
0x2692   :  { %v5032_v40 = vpop.eup %5031 }
0x2693   :  { %v2099_v41 = vmul.f32 %v5032_v40, %v2096_v36  ;;  %v5034_v43 = vpop.eup %5033  ;;  %vm2104_vm1 = vweird.f32 %v5032_v40 }
0x2694   :  { %v2114_v44 = vmul.f32 %v5034_v43, %v2097_v39  ;;  %vm2105_vm4 = vmor %vm2103_vm3, %vm2104_vm1  ;;  %vm2119_vm6 = vweird.f32 %v5034_v43 }
0x2695   :  { %v2100_v42 = vsub.f32 1.0, %v2099_v41  ;;  %vm2120_vm9 = vmor %vm2118_vm7, %vm2119_vm6 }
0x2696   :  { %v2115_v46 = vsub.f32 1.0, %v2114_v44 }
0x2697   :  { %v2101_v38 = vmul.f32 %v5032_v40, %v2100_v42 }
0x2698   :  { %v2116_v50 = vmul.f32 %v5034_v43, %v2115_v46 }
0x2699   :  { %v2102_v45 = vadd.f32 %v5032_v40, %v2101_v38 }
0x269a   :  { %v2117_v56 = vadd.f32 %v5034_v43, %v2116_v50 }
0x269b   :  { %v2106_v51 = vsel %vm2105_vm4, %v5032_v40, %v2102_v45 }
0x269c   :  { %v2111_v54 = vsel %vm2108_vm5, %v2110_v52, %v2106_v51  ;;  %v2121_v8 = vsel %vm2120_vm9, %v5034_v43, %v2117_v56 }
0x269d   :  { %v2126_v63 = vsel %vm2123_vm10, %v2125_v59, %v2121_v8  ;;  %v2130_v1 = vmul.f32 %v2111_v54, %v6127_v16 }
0x269e   :  { %v2131_v5 = vmul.f32 %v2126_v63, %v6131_v14 }
0x26f3   :  { %v2135_v49 = vpop.permute.xlu0 %2134 }
0x26f4   :  { %v2140_v55 = vmul.f32 %v2135_v49, %v2111_v54 }
0x26f6   :  { %2144 = vrot.lane.b32.xlu2 %v2140_v55, %s5503_s7 }
0x26fb   :  { %v2137_v61 = vpop.permute.xlu1 %2136 }
0x26fc   :  { %v2141_v60 = vmul.f32 %v2137_v61, %v2126_v63 }
0x26fe   :  { %2146 = vrot.lane.b32.xlu0 %v2141_v60, %s5503_s7  ;;  %v4545_v60 = vld [vmem:[%s6723_s4 + $0x10] sm:$0xff] }
0x2750   :  { %v2145_v2 = vpop.permute.xlu2 %2144 }
0x2751   :  { %v6143_v0 = vadd.f32 %v2145_v2, %v2130_v1  ;;  %v4546_v1 = vld [vmem:[%s6723_s4 + $0x18] sm:$0xff] }
0x2752   :  { %v2264_v2 = vpack.c.bf16 %v4546_v1, %v4545_v60  ;;  %v2472_v1 = vld [vmem:[%s6731_s8 + $0x8] sm:$0xff] }
0x2753   :  { %5035 = vtanh.f32 %v6143_v0 }
0x2754   :  { %2278 = vmatpush.bf16.msrb.mxu2 %v2264_v2 }
0x2759   :  { %v5036_v3 = vpop.eup %5035 }
0x275a   :  { %2156 = vrot.lane.b32.xlu1 %v5036_v3, %s5518_s10 }
0x2770   :  { %v2147_v7 = vpop.permute.xlu0 %2146 }
0x2771   :  { %v6148_v9 = vadd.f32 %v2147_v7, %v2131_v5 }
0x2773   :  { %5037 = vtanh.f32 %v6148_v9 }
0x2779   :  { %v5038_v4 = vpop.eup %5037 }
0x277a   :  { %2158 = vrot.lane.b32.xlu2 %v5038_v4, %s5518_s10 }
0x27cc   :  { %v2157_v11 = vpop.permute.xlu1 %2156 }
0x27cd   :  { %v2162_v15 = vmul.f32 %v2157_v11, %v2111_v54 }
0x27d4   :  { %v2159_v12 = vpop.permute.xlu2 %2158 }
0x27d5   :  { %v2163_v16 = vmul.f32 %v2159_v12, %v2126_v63 }
0x27d7   :  { %v2166_v17 = vpack.c.bf16 %v2163_v16, %v2162_v15 }
0x27d9   :  { %2168 = vrot.lane.b32.xlu0 %v2166_v17, %s5519_s1 }
0x284b   :  { %v2169_v18 = vpop.permute.xlu0 %2168 }
0x284c   :  { %4568 = vmatmul.msk.bf16.vlgmr.msrb.gmra.mxu1 %vm451_vm2, %v2169_v18 }
0x28c9   :  { %v2182_v14 = vpop.f32.mrf.mxu1 }
0x28ca   :  { %v2187_v20 = vadd.f32 %v2182_v14, %v2164_v19  ;;  %v6178_v14 = vld [vmem:[%s6729_s25 + $0x8] sm:$0xff] }
0x28cc   :  { %5039 = vtanh.f32 %v2187_v20  ;;  %v4569_v29 = vmul.f32 -1.442695, %v2187_v20 }
0x28d1   :  { %v2184_v22 = vpop.f32.mrf.mxu1 }
0x28d2   :  { %v5040_v53 = vpop.eup %5039  ;;  %v2188_v24 = vadd.f32 %v2184_v22, %v2165_v21  ;;  %v2492_v22 = vsel %vm349_vm0, %v6178_v14, 0.0 }
0x28d3   :  { %2233 = vrot.lane.b32.xlu1 %v5040_v53, %s5517_s29 }
0x28d4   :  { %5041 = vtanh.f32 %v2188_v24  ;;  %v4570_v27 = vmul.f32 -1.442695, %v2188_v24 }
0x28d6   :  { %5043 = vpow2.f32 %v4570_v27 }
0x28da   :  { %v5042_v25 = vpop.eup %5041 }
0x28db   :  { %2235 = vrot.lane.b32.xlu2 %v5042_v25, %s5517_s29  ;;  %s5441_s29 = scalar_lea.hbm %s5727_s14, 16 }
0x28dc   :  { %v5044_v62 = vpop.eup %5043  ;;  %p5443_p1 = scmp.lt.s32.totalorder %s5441_s29, %s5439_s13 }
0x28dd   :  { %v2196_v28 = vadd.f32 1.0, %v5044_v62 }
0x28de   :  { %p5444_p2 = por %p5443_p1, %p5442_p0 }
0x28df   :  { %5045 = vrcp.f32 %v2196_v28  ;;  %v2223_v36 = vand.u32 2147483648, %v2196_v28  ;;  %vm2217_vm12 = vweird.f32 %v2196_v28  ;;  %v2221_v37 = vand.u32 2147483647, %v2196_v28 }
0x28e0   :  { %5047 = vpow2.f32 %v4569_v29  ;;  %p5445_p3 = pnand %p5444_p2, %p5440_p13 }
0x28e1   :  { %v2224_v41 = vor.u32 1.1754944e-38, %v2223_v36  ;;  %vm2222_vm14 = vcmp.eq.f32.partialorder %v2221_v37, 8.507059e+37 }
0x28e5   :  { %v5046_v31 = vpop.eup %5045 }
0x28e6   :  { %v5048_v6 = vpop.eup %5047  ;;  %v2213_v32 = vmul.f32 %v5046_v31, %v2196_v28  ;;  %vm2218_vm11 = vweird.f32 %v5046_v31 }
0x28e7   :  { %v2195_v34 = vadd.f32 1.0, %v5048_v6  ;;  %vm2219_vm13 = vmor %vm2217_vm12, %vm2218_vm11 }
0x28e8   :  { %v2214_v10 = vsub.f32 1.0, %v2213_v32 }
0x28e9   :  { %5049 = vrcp.f32 %v2195_v34  ;;  %v2208_v47 = vand.u32 2147483648, %v2195_v34  ;;  %vm2202_vm1 = vweird.f32 %v2195_v34  ;;  %v2206_v48 = vand.u32 2147483647, %v2195_v34 }
0x28ea   :  { %v2215_v30 = vmul.f32 %v5046_v31, %v2214_v10 }
0x28eb   :  { %v2209_v50 = vor.u32 1.1754944e-38, %v2208_v47  ;;  %vm2207_vm4 = vcmp.eq.f32.partialorder %v2206_v48, 8.507059e+37  ;;  %v4576_v48 = vld [vmem:[%s6724_s24 + $0x30] sm:$0xff] }
0x28ec   :  { %v2216_v35 = vadd.f32 %v5046_v31, %v2215_v30 }
0x28ee   :  { %v2220_v39 = vsel %vm2219_vm13, %v5046_v31, %v2216_v35 }
0x28ef   :  { %v5050_v33 = vpop.eup %5049  ;;  %v2225_v43 = vsel %vm2222_vm14, %v2224_v41, %v2220_v39  ;;  %v2477_v41 = vld [vmem:[%s6730_s3 + $0x10] sm:$0xff] }
0x28f0   :  { %v2198_v40 = vmul.f32 %v5050_v33, %v2195_v34  ;;  %vm2203_vm15 = vweird.f32 %v5050_v33  ;;  %v2230_v55 = vmul.f32 %v2225_v43, %v6148_v9 }
0x28f1   :  { %vm2204_vm3 = vmor %vm2202_vm1, %vm2203_vm15 }
0x28f2   :  { %v2199_v44 = vsub.f32 1.0, %v2198_v40 }
0x28f4   :  { %v2200_v45 = vmul.f32 %v5050_v33, %v2199_v44  ;;  %v2475_v44 = vld [vmem:[%s6730_s3] sm:$0xff] }
0x28f6   :  { %v2201_v46 = vadd.f32 %v5050_v33, %v2200_v45  ;;  %v2476_v45 = vld [vmem:[%s6730_s3 + $0x8] sm:$0xff] }
0x28f8   :  { %v2205_v51 = vsel %vm2204_vm3, %v5050_v33, %v2201_v46  ;;  %v2564_v46 = vpack.c.bf16 %v2476_v45, %v2475_v44 }
0x28f9   :  { %v2210_v49 = vsel %vm2207_vm4, %v2209_v50, %v2205_v51  ;;  %v4577_v51 = vld [vmem:[%s6724_s24 + $0x38] sm:$0xff]  ;;  %v2473_v50 = vld [vmem:[%s6731_s8 + $0x10] sm:$0xff]  ;;  %vm2643_vm4 = vcmask 64512  }
0x28fa   :  { %v2229_v8 = vmul.f32 %v2210_v49, %v6143_v0  ;;  %v6166_v0 = vld [vmem:[%s6729_s25] sm:$0xff] }
0x28fb   :  { %v2489_v11 = vsel %vm349_vm0, %v6166_v0, 0.0  ;;  %v6221_v47 = vpack.c.bf16 %v6178_v14, %v6166_v0 }
0x2935   :  { %v2236_v42 = vpop.permute.xlu2 %2235 }
0x2936   :  { %v2240_v38 = vmul.f32 %v2236_v42, %v2225_v43  ;;  %v2478_v42 = vld [vmem:[%s6730_s3 + $0x18] sm:$0xff] }
0x2938   :  { %2245 = vrot.lane.b32.xlu1 %v2240_v38, %s5503_s7 }
0x2945   :  { %v2234_v52 = vpop.permute.xlu1 %2233 }
0x2946   :  { %v2239_v54 = vmul.f32 %v2234_v52, %v2210_v49 }
0x2948   :  { %2243 = vrot.lane.b32.xlu0 %v2239_v54, %s5503_s7  ;;  %v2474_v54 = vld [vmem:[%s6731_s8 + $0x18] sm:$0xff]  ;;  %s5520_s7 = smov 112  }
0x29aa   :  { %v2246_v56 = vpop.permute.xlu1 %2245 }
0x29ab   :  { %v2250_v57 = vadd.f32 %v2246_v56, %v2230_v55 }
0x29ad   :  { %5051 = vtanh.f32 %v2250_v57  ;;  %v2545_v57 = vpack.c.bf16 %v2474_v54, %v2473_v50 }
0x29af   :  { %2555 = vmatpush.bf16.msra.mxu1 %v2545_v57 }
0x29b3   :  { %v5052_v58 = vpop.eup %5051 }
0x29b4   :  { %2257 = vrot.lane.b32.xlu0 %v5052_v58, %s5518_s10 }
0x29ba   :  { %v2244_v59 = vpop.permute.xlu0 %2243 }
0x29bb   :  { %v2249_v61 = vadd.f32 %v2244_v59, %v2229_v8  ;;  %v4574_v8 = vld [vmem:[%s6724_s24 + $0x20] sm:$0xff]  ;;  %v4575_v59 = vld [vmem:[%s6724_s24 + $0x28] sm:$0xff] }
0x29bc   :  { %v2362_v60 = vpack.c.bf16 %v4575_v59, %v4574_v8 }
0x29bd   :  { %5053 = vtanh.f32 %v2249_v61  ;;  %v2471_v61 = vld [vmem:[%s6731_s8] sm:$0xff] }
0x29be   :  { %v2544_v2 = vpack.c.bf16 %v2472_v1, %v2471_v61 }
0x29c0   :  { %2556 = vmatpush.bf16.msra.mxu1 %v2544_v2  ;;  %v4585_v2 = vld [vmem:[%s6727_s22 + $0x70] sm:$0xff] }
0x29c3   :  { %v5054_v63 = vpop.eup %5053 }
0x29c4   :  { %2255 = vrot.lane.b32.xlu2 %v5054_v63, %s5518_s10 }
0x2a1e   :  { %v2256_v3 = vpop.permute.xlu2 %2255 }
0x2a1f   :  { %v2261_v7 = vmul.f32 %v2256_v3, %v2210_v49  ;;  %v2363_v49 = vpack.c.bf16 %v4577_v51, %v4576_v48 }
0x2a21   :  { %2376 = vmatpush.bf16.msrb.mxu3 %v2363_v49 }
0x2a25   :  { %2377 = vmatpush.bf16.msrb.mxu3 %v2362_v60 }
0x2a26   :  { %v2258_v5 = vpop.permute.xlu0 %2257 }
0x2a27   :  { %v2262_v9 = vmul.f32 %v2258_v5, %v2225_v43  ;;  %v2565_v43 = vpack.c.bf16 %v2478_v42, %v2477_v41  ;;  %v4763_v42 = vld [vmem:[%s6725_s5 + $0x1] ss:$0 sm:$0xff] }
0x2a29   :  { %v2263_v4 = vpack.c.bf16 %v2262_v9, %v2261_v7  ;;  %2575 = vmatpush.bf16.msra.mxu2 %v2565_v43 }
0x2a2b   :  { %2266 = vrot.lane.b32.xlu1 %v2263_v4, %s5519_s1 }
0x2a2d   :  { %2576 = vmatpush.bf16.msra.mxu2 %v2564_v46  ;;  %v4762_v46 = vld [vmem:[#allocation8] ss:$0 sm:$0xff] }
0x2a55   :  { %2490 = vadd.xlane.f32.xlu1 %v2489_v11 }
0x2a9d   :  { %v2267_v12 = vpop.permute.xlu1 %2266 }
0x2a9e   :  { %4571 = vmatmul.msk.bf16.vlgmr.msrb.gmra.mxu2 %vm451_vm2, %v2267_v12 }
0x2aae   :  { %4590 = vmatmul.msk.bf16.vlgmr.msra.gmra.mxu2 %vm349_vm0, %v6221_v47 }
0x2ac8   :  { %v2491_v17 = vpop.xlane.xlu1 %2490 }
0x2ac9   :  { %v2495_v19 = vmul.f32 %v2491_v17, %v5825_v13 }
0x2acb   :  { %v6186_v53 = vsub.f32 %v6166_v0, %v2495_v19 }
0x2acd   :  { %v2499_v24 = vmul.f32 %v6186_v53, %v6186_v53 }
0x2acf   :  { %v2501_v25 = vsel %vm349_vm0, %v2499_v24, 0.0 }
0x2b21   :  { %v2280_v15 = vpop.f32.mrf.mxu2 }
0x2b22   :  { %v6172_v16 = vadd.f32 %v2280_v15, %v6011_v23 }
0x2b24   :  { %v2307_v18 = vsel %vm349_vm0, %v6172_v16, 0.0 }
0x2b25   :  { %2308 = vadd.xlane.f32.xlu2 %v2307_v18 }
0x2b29   :  { %v2282_v20 = vpop.f32.mrf.mxu2 }
0x2b2a   :  { %v6181_v21 = vadd.f32 %v2282_v20, %v6016_v26 }
0x2b2c   :  { %v2310_v23 = vsel %vm349_vm0, %v6181_v21, 0.0 }
0x2b2d   :  { %2311 = vadd.xlane.f32.xlu0 %v2310_v23  ;;  %2493 = vadd.xlane.f32.xlu2 %v2492_v22 }
0x2b35   :  { %2502 = vadd.xlane.f32.xlu2 %v2501_v25 }
0x2b98   :  { %v2309_v27 = vpop.xlane.xlu2 %2308 }
0x2b99   :  { %v2313_v26 = vmul.f32 %v2309_v27, %v5825_v13 }
0x2b9b   :  { %v6195_v62 = vsub.f32 %v6172_v16, %v2313_v26 }
0x2b9d   :  { %v2317_v28 = vmul.f32 %v6195_v62, %v6195_v62 }
0x2b9f   :  { %v2319_v29 = vsel %vm349_vm0, %v2317_v28, 0.0 }
0x2ba0   :  { %v2312_v31 = vpop.xlane.xlu0 %2311  ;;  %2320 = vadd.xlane.f32.xlu0 %v2319_v29  ;;  %v2494_v6 = vpop.xlane.xlu2 %2493 }
0x2ba1   :  { %v2314_v32 = vmul.f32 %v2312_v31, %v5825_v13  ;;  %v2496_v34 = vmul.f32 %v2494_v6, %v5825_v13 }
0x2ba3   :  { %v6203_v10 = vsub.f32 %v6181_v21, %v2314_v32  ;;  %v6206_v30 = vsub.f32 %v6178_v14, %v2496_v34 }
0x2ba5   :  { %v2318_v35 = vmul.f32 %v6203_v10, %v6203_v10  ;;  %v2500_v33 = vmul.f32 %v6206_v30, %v6206_v30 }
0x2ba7   :  { %v2322_v36 = vsel %vm349_vm0, %v2318_v35, 0.0  ;;  %v2504_v37 = vsel %vm349_vm0, %v2500_v33, 0.0 }
0x2ba8   :  { %2323 = vadd.xlane.f32.xlu1 %v2322_v36  ;;  %2505 = vadd.xlane.f32.xlu0 %v2504_v37  ;;  %v2503_v39 = vpop.xlane.xlu2 %2502 }
0x2ba9   :  { %v2507_v40 = vmul.f32 %v2503_v39, %v5825_v13  ;;  %v4761_v39 = vld [vmem:[#allocation6] ss:$0 sm:$0xff] }
0x2bab   :  { %v2509_v38 = vadd.f32 1e-06, %v2507_v40 }
0x2bad   :  { %5055 = vrsqrt.f32 %v2509_v38  ;;  %vm2517_vm5 = vweird.f32 %v2509_v38 }
0x2bb3   :  { %v5056_v55 = vpop.eup %5055 }
0x2bb4   :  { %v2512_v63 = vmul.f32 %v5056_v55, %v2509_v38  ;;  %vm2518_vm6 = vweird.f32 %v5056_v55 }
0x2bb5   :  { %vm6236_vm7 = vmor %vm2517_vm5, %vm2518_vm6  ;;  %vm2673_vm5 = vcmask 1043456  }
0x2bb6   :  { %v2513_v3 = vmul.f32 %v5056_v55, %v2512_v63 }
0x2bb8   :  { %v2514_v17 = vmul.f32 0.5, %v2513_v3  ;;  %v4586_v3 = vld [vmem:[%s6727_s22 + $0x78] sm:$0xff] }
0x2bba   :  { %v2515_v20 = vsub.f32 1.5, %v2514_v17 }
0x2bbc   :  { %v2516_v27 = vmul.f32 %v5056_v55, %v2515_v20 }
0x2bbe   :  { %v2520_v34 = vsel %vm6236_vm7, %v5056_v55, %v2516_v27 }
0x2bbf   :  { %v2531_v40 = vmul.f32 %v2520_v34, %v6186_v53 }
0x2bc1   :  { %v2536_v48 = vmul.f32 %v4761_v39, %v2531_v40 }
0x2c13   :  { %v2321_v52 = vpop.xlane.xlu0 %2320 }
0x2c14   :  { %v2325_v56 = vmul.f32 %v2321_v52, %v5825_v13  ;;  %v4764_v52 = vld [vmem:[%s6726_s0 + $0x1] ss:$0 sm:$0xff] }
0x2c16   :  { %v2327_v58 = vadd.f32 1e-06, %v2325_v56  ;;  %v2541_v56 = vadd.f32 %v4762_v46, %v2536_v48 }
0x2c18   :  { %5057 = vrsqrt.f32 %v2327_v58  ;;  %vm2335_vm10 = vweird.f32 %v2327_v58 }
0x2c1b   :  { %v2506_v5 = vpop.xlane.xlu0 %2505  ;;  %v2324_v7 = vpop.xlane.xlu1 %2323 }
0x2c1c   :  { %v2508_v9 = vmul.f32 %v2506_v5, %v5825_v13  ;;  %v2326_v4 = vmul.f32 %v2324_v7, %v5825_v13  ;;  %v2390_v5 = vpack.c.bf16 %v4586_v3, %v4585_v2 }
0x2c1e   :  { %v5058_v11 = vpop.eup %5057  ;;  %v2510_v12 = vadd.f32 1e-06, %v2508_v9  ;;  %v2328_v15 = vadd.f32 1e-06, %v2326_v4  ;;  %2401 = vmatpush.bf16.msrb.mxu0 %v2390_v5  ;;  %v4583_v9 = vld [vmem:[%s6727_s22 + $0x60] sm:$0xff]  ;;  %v4584_v4 = vld [vmem:[%s6727_s22 + $0x68] sm:$0xff] }
0x2c1f   :  { %v2330_v18 = vmul.f32 %v5058_v11, %v2327_v58  ;;  %vm2336_vm9 = vweird.f32 %v5058_v11 }
0x2c20   :  { %5059 = vrsqrt.f32 %v2510_v12  ;;  %vm2337_vm11 = vmor %vm2335_vm10, %vm2336_vm9  ;;  %vm2527_vm12 = vweird.f32 %v2510_v12  ;;  %vm2345_vm1 = vweird.f32 %v2328_v15 }
0x2c21   :  { %v2331_v19 = vmul.f32 %v5058_v11, %v2330_v18  ;;  %5061 = vrsqrt.f32 %v2328_v15  ;;  %v4579_v18 = vld [vmem:[%s6727_s22 + $0x40] sm:$0xff] }
0x2c23   :  { %v2332_v22 = vmul.f32 0.5, %v2331_v19  ;;  %v4580_v19 = vld [vmem:[%s6727_s22 + $0x48] sm:$0xff] }
0x2c25   :  { %v2333_v23 = vsub.f32 1.5, %v2332_v22  ;;  %v2387_v22 = vpack.c.bf16 %v4580_v19, %v4579_v18 }
0x2c26   :  { %v5060_v24 = vpop.eup %5059 }
0x2c27   :  { %v5062_v25 = vpop.eup %5061  ;;  %v2522_v26 = vmul.f32 %v5060_v24, %v2510_v12  ;;  %v2334_v29 = vmul.f32 %v5058_v11, %v2333_v23  ;;  %vm2528_vm13 = vweird.f32 %v5060_v24  ;;  %v4581_v12 = vld [vmem:[%s6727_s22 + $0x50] sm:$0xff] }
0x2c28   :  { %v2340_v31 = vmul.f32 %v5062_v25, %v2328_v15  ;;  %vm2529_vm14 = vmor %vm2527_vm12, %vm2528_vm13  ;;  %vm2346_vm15 = vweird.f32 %v5062_v25  ;;  %v4582_v15 = vld [vmem:[%s6727_s22 + $0x58] sm:$0xff] }
0x2c29   :  { %v2523_v6 = vmul.f32 %v5060_v24, %v2522_v26  ;;  %v2338_v33 = vsel %vm2337_vm11, %v5058_v11, %v2334_v29  ;;  %vm2347_vm3 = vmor %vm2345_vm1, %vm2346_vm15  ;;  %v2389_v11 = vpack.c.bf16 %v4584_v4, %v4583_v9  ;;  %v2388_v17 = vpack.c.bf16 %v4582_v15, %v4581_v12  ;;  %v4765_v26 = vld [vmem:[%s6728_s21 + $0x1] ss:$0 sm:$0xff] }
0x2c2a   :  { %v2341_v32 = vmul.f32 %v5062_v25, %v2340_v31  ;;  %v2349_v43 = vmul.f32 %v2338_v33, %v6195_v62 }
0x2c2b   :  { %v2524_v35 = vmul.f32 0.5, %v2523_v6  ;;  %2402 = vmatpush.bf16.msrb.mxu0 %v2389_v11 }
0x2c2c   :  { %v2342_v36 = vmul.f32 0.5, %v2341_v32  ;;  %v2354_v49 = vmul.f32 %v4763_v42, %v2349_v43  ;;  %v2482_v43 = vld [vmem:[%s6734_s2 + $0x18] sm:$0xff] }
0x2c2d   :  { %v2525_v37 = vsub.f32 1.5, %v2524_v35 }
0x2c2e   :  { %v2343_v41 = vsub.f32 1.5, %v2342_v36  ;;  %v2359_v62 = vadd.f32 %v4764_v52, %v2354_v49  ;;  %v333_v49 = vld [vmem:[%s6735_s17] sm:$0xff] }
0x2c2f   :  { %v2526_v38 = vmul.f32 %v5060_v24, %v2525_v37  ;;  %2403 = vmatpush.bf16.msrb.mxu0 %v2388_v17 }
0x2c30   :  { %v2344_v44 = vmul.f32 %v5062_v25, %v2343_v41 }
0x2c31   :  { %v2530_v45 = vsel %vm2529_vm14, %v5060_v24, %v2526_v38 }
0x2c32   :  { %v2532_v51 = vmul.f32 %v2530_v45, %v6206_v30  ;;  %v2348_v50 = vsel %vm2347_vm3, %v5062_v25, %v2344_v44  ;;  %v2578_v30 = vpop.f32.mrf.mxu2  ;;  %v2479_v44 = vld [vmem:[%s6734_s2] sm:$0xff]  ;;  %v2480_v45 = vld [vmem:[%s6734_s2 + $0x8] sm:$0xff] }
0x2c33   :  { %v2350_v53 = vmul.f32 %v2348_v50, %v6203_v10  ;;  %v2603_v61 = vpack.c.bf16 %v2578_v30, %v2578_v30  ;;  %2404 = vmatpush.bf16.msrb.mxu0 %v2387_v22 }
0x2c34   :  { %v2537_v54 = vmul.f32 %v4761_v39, %v2532_v51 }
0x2c35   :  { %v2355_v55 = vmul.f32 %v4763_v42, %v2350_v53  ;;  %v2736_v63 = vunpack.c.l.b16 %v2603_v61  ;;  %v2609_v20 = vsel %vm451_vm2, %v2603_v61, 0  ;;  %v2481_v42 = vld [vmem:[%s6734_s2 + $0x10] sm:$0xff] }
0x2c36   :  { %v2542_v57 = vadd.f32 %v4762_v46, %v2537_v54  ;;  %v2584_v38 = vpack.c.bf16 %v2482_v43, %v2481_v42  ;;  %v2583_v46 = vpack.c.bf16 %v2480_v45, %v2479_v44  ;;  %v2483_v43 = vld [vmem:[%s6736_s28] sm:$0xff] }
0x2c37   :  { %v2360_v58 = vadd.f32 %v4764_v52, %v2355_v55  ;;  %v2737_v10 = vpack.c.b16 %v2736_v63, %v2736_v63  ;;  %2618 = vmatpush.bf16.xpose.msra.mxu0 %v2609_v20 }
0x2c38   :  { %v2543_v8 = vpack.c.bf16 %v2542_v57, %v2541_v56  ;;  %2591 = vmatpush.bf16.msra.mxu3 %v2584_v38  ;;  %v2484_v38 = vld [vmem:[%s6736_s28 + $0x8] sm:$0xff] }
0x2c39   :  { %v2361_v59 = vpack.c.bf16 %v2360_v58, %v2359_v62  ;;  %2738 = vrot.lane.b32.xlu0 %v2737_v10, %s5520_s7  ;;  %v334_v58 = vld [vmem:[%s6735_s17 + $0x8] sm:$0xff]  ;;  %v2710_v44 = vpack.c.bf16 %v2484_v38, %v2483_v43 }
0x2c3a   :  { %4589 = vmatmul.msk.bf16.vlgmr.msra.gmra.mxu1 %vm349_vm0, %v2543_v8  ;;  %v2580_v60 = vpop.f32.mrf.mxu2 }
0x2c3b   :  { %4587 = vmatmul.msk.bf16.vlgmr.msrb.gmra.mxu3 %vm349_vm0, %v2361_v59  ;;  %v6251_v1 = vpack.c.bf16 %v2580_v60, %v2580_v60 }
0x2c3c   :  { %2592 = vmatpush.bf16.msra.mxu3 %v2583_v46 }
0x2c3d   :  { %v2628_v7 = vsel %vm451_vm2, %v6251_v1, 0  ;;  %v2765_v57 = vunpack.c.l.b16 %v6251_v1 }
0x2c3e   :  { %2637 = vmatpush.bf16.xpose.msrb.mxu1 %v2628_v7 }
0x2c3f   :  { %v2766_v62 = vpack.c.b16 %v2765_v57, %v2765_v57 }
0x2c4b   :  { %4591 = vmatmul.msk.bf16.vlgmr.msra.gmra.mxu3 %vm349_vm0, %v6221_v47 }
0x2cab   :  { %v2739_v40 = vpop.permute.xlu0 %2738 }
0x2cac   :  { %v2744_v41 = vsel %vm451_vm2, %v2739_v40, 0 }
0x2cad   :  { %2753 = vmatpush.bf16.xpose.msra.mxu1 %v2744_v41 }
0x2cb7   :  { %v2558_v23 = vpop.f32.mrf.mxu1 }
0x2cb8   :  { %v2599_v37 = vmul.f32 0.25, %v2558_v23 }
0x2cba   :  { %v2601_v39 = vpack.c.bf16 %v2599_v37, %v2599_v37 }
0x2cbc   :  { %v2731_v7 = vunpack.c.l.b16 %v2601_v39 }
0x2cbe   :  { %v2379_v24 = vpop.f32.mrf.mxu3  ;;  %v2732_v9 = vpack.c.b16 %v2731_v7, %v2731_v7 }
0x2cbf   :  { %v2560_v25 = vpop.f32.mrf.mxu1  ;;  %v2380_v31 = vadd.f32 %v4765_v26, %v2379_v24 }
0x2cc0   :  { %v2600_v27 = vmul.f32 0.25, %v2560_v25 }
0x2cc1   :  { %v2384_v35 = vmax.f32 %v2380_v31, 0.0 }
0x2cc2   :  { %v2602_v28 = vpack.c.bf16 %v2600_v27, %v2600_v27 }
0x2cc4   :  { %v2760_v29 = vunpack.c.l.b16 %v2602_v28  ;;  %4593 = vmatmul.msk.bf16.vlgmr.msrb.gmra.mxu1 %vm451_vm2, %v2602_v28 }
0x2cc6   :  { %v2381_v6 = vpop.f32.mrf.mxu3  ;;  %v2761_v32 = vpack.c.b16 %v2760_v29, %v2760_v29 }
0x2cc7   :  { %v2382_v34 = vadd.f32 %v4765_v26, %v2381_v6 }
0x2cc8   :  { %2762 = vrot.lane.b32.xlu0 %v2761_v32, %s5520_s7 }
0x2cc9   :  { %v2385_v33 = vmax.f32 %v2382_v34, 0.0 }
0x2ccb   :  { %v2386_v36 = vpack.c.bf16 %v2385_v33, %v2384_v35 }
0x2ccd   :  { %4588 = vmatmul.msk.bf16.vlgmr.msrb.gmra.mxu0 %vm443_vm8, %v2386_v36 }
0x2cce   :  { %v2594_v59 = vpop.f32.mrf.mxu3  ;;  %2721 = vmatpush.bf16.msrb.mxu0 %v2710_v44 }
0x2ccf   :  { %v2668_v30 = vpack.c.bf16 %v2594_v59, %v2594_v59 }
0x2cd1   :  { %v2675_v61 = vsel %vm2673_vm5, %v2668_v30, 0  ;;  %v2813_v45 = vunpack.c.l.b16 %v2668_v30  ;;  %v4766_v30 = vld [vmem:[#allocation3 + $0x1] ss:$0 sm:$0xff] }
0x2cd2   :  { %2684 = vmatpush.bf16.msrb.mxu2 %v2675_v61 }
0x2cd3   :  { %v2814_v46 = vpack.c.b16 %v2813_v45, %v2813_v45 }
0x2cd6   :  { %v2596_v18 = vpop.f32.mrf.mxu3 }
0x2cd7   :  { %v2669_v19 = vpack.c.bf16 %v2596_v18, %v2596_v18 }
0x2cd9   :  { %v2694_v20 = vsel %vm2673_vm5, %v2669_v19, 0 }
0x2cda   :  { %2703 = vmatpush.bf16.msrb.mxu3 %v2694_v20 }
0x2cdd   :  { %4592 = vmatmul.msk.bf16.vlgmr.msra.gmra.mxu0 %vm451_vm2, %v2601_v39 }
0x2d3a   :  { %v2763_v26 = vpop.permute.xlu0 %2762 }
0x2d41   :  { %v2639_v48 = vpop.f32.mrf.mxu1 }
0x2d42   :  { %v2640_v47 = vadd.f32 %v2639_v48, %v334_v58 }
0x2d44   :  { %v2647_v8 = vsel %vm2643_vm4, %v2640_v47, -inf }
0x2d49   :  { %v2641_v51 = vpop.f32.mrf.mxu1 }
0x2d4a   :  { %v6276_v50 = vpop.f32.mrf.mxu0 }
0x2d52   :  { %v6278_v52 = vpop.f32.mrf.mxu0 }
0x2d5a   :  { %v2620_v53 = vpop.f32.mrf.mxu0 }
0x2d5b   :  { %v2621_v54 = vadd.f32 %v2620_v53, %v333_v49 }
0x2d5d   :  { %v2644_v55 = vsel %vm2643_vm4, %v2621_v54, -inf }
0x2d5e   :  { %2645 = vmax.xlane.f32.xlu1 %v2644_v55 }
0x2d62   :  { %v2622_v56 = vpop.f32.mrf.mxu0 }
0x2d77   :  { %2767 = vrot.lane.b32.xlu1 %v2766_v62, %s5520_s7 }
0x2da1   :  { %2648 = vmax.xlane.f32.xlu1 %v2647_v8 }
0x2dd1   :  { %v2646_v63 = vpop.xlane.xlu1 %2645 }
0x2dd2   :  { %v2650_v10 = vsub.f32 %v2621_v54, %v2646_v63  ;;  %v2407_v63 = vadd.f32 %v4766_v30, %v6276_v50 }
0x2dd4   :  { %v2652_v60 = vmul.f32 1.442695, %v2650_v10 }
0x2dd6   :  { %5063 = vpow2.f32 %v2652_v60  ;;  %v2411_v60 = vadd.f32 %v2407_v63, %v6172_v16 }
0x2ddc   :  { %v5064_v2 = vpop.eup %5063 }
0x2ddd   :  { %v2656_v1 = vsel %vm2643_vm4, %v5064_v2, 0.0 }
0x2dde   :  { %2657 = vadd.xlane.f32.xlu2 %v2656_v1  ;;  %v2415_v1 = vsel %vm349_vm0, %v2411_v60, 0.0 }
0x2de9   :  { %v2768_v3 = vpop.permute.xlu1 %2767 }
0x2dea   :  { %v2773_v5 = vsel %vm451_vm2, %v2768_v3, 0 }
0x2deb   :  { %2782 = vmatpush.bf16.xpose.msra.mxu2 %v2773_v5 }
0x2df6   :  { %2733 = vrot.lane.b32.xlu2 %v2732_v9, %s5520_s7 }
0x2e14   :  { %v2649_v4 = vpop.xlane.xlu1 %2648 }
0x2e15   :  { %v2651_v11 = vsub.f32 %v2640_v47, %v2649_v4  ;;  %v2837_v47 = vunpack.c.l.b16 %v2669_v19 }
0x2e17   :  { %v2654_v12 = vmul.f32 1.442695, %v2651_v11  ;;  %v2838_v59 = vpack.c.b16 %v2837_v47, %v2837_v47 }
0x2e19   :  { %5065 = vpow2.f32 %v2654_v12 }
0x2e1f   :  { %v5066_v15 = vpop.eup %5065 }
0x2e20   :  { %v2659_v17 = vsel %vm2643_vm4, %v5066_v15, 0.0 }
0x2e21   :  { %2660 = vadd.xlane.f32.xlu0 %v2659_v17 }
0x2e51   :  { %v2658_v22 = vpop.xlane.xlu2 %2657 }
0x2e52   :  { %5067 = vrcp.f32 %v2658_v22 }
0x2e58   :  { %v5068_v23 = vpop.eup %5067 }
0x2e59   :  { %v2664_v24 = vmul.f32 %v5068_v23, %v5064_v2  ;;  %v2734_v25 = vpop.permute.xlu2 %2733  ;;  %v2409_v2 = vadd.f32 %v4766_v30, %v6278_v52  ;;  %v2889_v30 = vld [vmem:[%s6738_s19] sm:$0xff] }
0x2e5a   :  { %4597 = vmatmul.msk.bf16.vlgmr.msra.gmra.mxu1 %vm451_vm2, %v2734_v25  ;;  %v2485_v25 = vld [vmem:[%s6736_s28 + $0x10] sm:$0xff] }
0x2e5b   :  { %v2666_v27 = vpack.c.bf16 %v2664_v24, %v2664_v24  ;;  %v2412_v5 = vadd.f32 %v2409_v2, %v6181_v21 }
0x2e5d   :  { %4594 = vmatmul.msk.bf16.vlgmr.msrb.gmra.mxu2 %vm2643_vm4, %v2666_v27  ;;  %v2418_v9 = vsel %vm349_vm0, %v2412_v5, 0.0  ;;  %v2486_v27 = vld [vmem:[%s6736_s28 + $0x18] sm:$0xff] }
0x2e6d   :  { %4598 = vmatmul.msk.bf16.vlgmr.msra.gmra.mxu2 %vm451_vm2, %v2763_v26  ;;  %v2861_v26 = vpack.c.bf16 %v2486_v27, %v2485_v25  ;;  %v4767_v27 = vld [vmem:[%s6739_s15] ss:$0 sm:$0xff] }
0x2e6f   :  { %2872 = vmatpush.bf16.msrb.mxu1 %v2861_v26 }
0x2e94   :  { %v2661_v28 = vpop.xlane.xlu0 %2660 }
0x2e95   :  { %5069 = vrcp.f32 %v2661_v28 }
0x2e9b   :  { %v5070_v29 = vpop.eup %5069 }
0x2e9c   :  { %v2665_v31 = vmul.f32 %v5070_v29, %v5066_v15 }
0x2e9e   :  { %v2667_v6 = vpack.c.bf16 %v2665_v31, %v2665_v31 }
0x2ea0   :  { %4595 = vmatmul.msk.bf16.vlgmr.msrb.gmra.mxu3 %vm2643_vm4, %v2667_v6 }
0x2ed7   :  { %v2755_v32 = vpop.f32.mrf.mxu1 }
0x2ed8   :  { %v2756_v34 = vadd.f32 %v2755_v32, %v333_v49 }
0x2eda   :  { %v2788_v35 = vsel %vm2643_vm4, %v2756_v34, -inf }
0x2edb   :  { %2789 = vmax.xlane.f32.xlu2 %v2788_v35 }
0x2edf   :  { %v2757_v33 = vpop.f32.mrf.mxu1 }
0x2ee0   :  { %v2686_v36 = vpop.f32.mrf.mxu2 }
0x2ee8   :  { %v2688_v37 = vpop.f32.mrf.mxu2 }
0x2ef0   :  { %v2784_v39 = vpop.f32.mrf.mxu2 }
0x2ef1   :  { %v2785_v40 = vadd.f32 %v2784_v39, %v334_v58 }
0x2ef3   :  { %v2791_v41 = vsel %vm2643_vm4, %v2785_v40, -inf }
0x2ef4   :  { %2792 = vmax.xlane.f32.xlu1 %v2791_v41 }
0x2ef8   :  { %v2786_v42 = vpop.f32.mrf.mxu2 }
0x2f0d   :  { %2815 = vrot.lane.b32.xlu1 %v2814_v46, %s5520_s7 }
0x2f23   :  { %v2705_v48 = vpop.f32.mrf.mxu3 }
0x2f24   :  { %v2709_v51 = vpack.c.bf16 %v2705_v48, %v2686_v36 }
0x2f26   :  { %4596 = vmatmul.msk.bf16.vlgmr.msrb.gmra.mxu0 %vm451_vm2, %v2709_v51 }
0x2f2b   :  { %v2707_v49 = vpop.f32.mrf.mxu3 }
0x2f2c   :  { %v2887_v49 = vld [vmem:[%s6737_s11 + $0x10] sm:$0xff] }
0x2f4e   :  { %v2790_v53 = vpop.xlane.xlu2 %2789 }
0x2f4f   :  { %v2794_v54 = vsub.f32 %v2756_v34, %v2790_v53  ;;  %v2888_v53 = vld [vmem:[%s6737_s11 + $0x18] sm:$0xff] }
0x2f51   :  { %v2796_v55 = vmul.f32 1.442695, %v2794_v54  ;;  %v2891_v54 = vld [vmem:[%s6738_s19 + $0x10] sm:$0xff] }
0x2f53   :  { %5071 = vpow2.f32 %v2796_v55  ;;  %v2975_v55 = vpack.c.bf16 %v2888_v53, %v2887_v49 }
0x2f59   :  { %v5072_v56 = vpop.eup %5071 }
0x2f5a   :  { %v2800_v57 = vsel %vm2643_vm4, %v5072_v56, 0.0 }
0x2f5b   :  { %2801 = vadd.xlane.f32.xlu0 %v2800_v57 }
0x2f67   :  { %v2793_v62 = vpop.xlane.xlu1 %2792 }
0x2f68   :  { %v2795_v58 = vsub.f32 %v2785_v40, %v2793_v62 }
0x2f6a   :  { %v2798_v8 = vmul.f32 1.442695, %v2795_v58 }
0x2f6c   :  { %5073 = vpow2.f32 %v2798_v8  ;;  %v2885_v8 = vld [vmem:[%s6737_s11] sm:$0xff] }
0x2f6f   :  { %2839 = vrot.lane.b32.xlu0 %v2838_v59, %s5520_s7  ;;  %v2886_v59 = vld [vmem:[%s6737_s11 + $0x8] sm:$0xff] }
0x2f70   :  { %v2974_v63 = vpack.c.bf16 %v2886_v59, %v2885_v8 }
0x2f72   :  { %v5074_v61 = vpop.eup %5073 }
0x2f73   :  { %v2803_v10 = vsel %vm2643_vm4, %v5074_v61, 0.0 }
0x2f74   :  { %2804 = vadd.xlane.f32.xlu2 %v2803_v10  ;;  %v2890_v10 = vld [vmem:[%s6738_s19 + $0x8] sm:$0xff] }
0x2f75   :  { %v2993_v2 = vpack.c.bf16 %v2890_v10, %v2889_v30  ;;  %v4769_v30 = vld [vmem:[#allocation9] ss:$0 sm:$0xff] }
0x2f7c   :  { %2416 = vadd.xlane.f32.xlu2 %v2415_v1 }
0x2f7f   :  { %v2816_v3 = vpop.permute.xlu1 %2815 }
0x2f80   :  { %v2821_v7 = vsel %vm2673_vm5, %v2816_v3, 0 }
0x2f81   :  { %2830 = vmatpush.bf16.msra.mxu3 %v2821_v7 }
0x2f84   :  { %2419 = vadd.xlane.f32.xlu2 %v2418_v9 }
0x2f85   :  { %2985 = vmatpush.bf16.msrb.mxu3 %v2975_v55 }
0x2f89   :  { %2986 = vmatpush.bf16.msrb.mxu3 %v2974_v63 }
0x2fa3   :  { %v2723_v29 = vpop.f32.mrf.mxu0 }
0x2fa4   :  { %v2728_v36 = vadd.f32 %v2723_v29, %v6166_v0 }
0x2fab   :  { %v2725_v6 = vpop.f32.mrf.mxu0 }
0x2fac   :  { %v2729_v43 = vadd.f32 %v2725_v6, %v6178_v14 }
0x2fce   :  { %v2802_v50 = vpop.xlane.xlu0 %2801 }
0x2fcf   :  { %5075 = vrcp.f32 %v2802_v50 }
0x2fd5   :  { %v5076_v4 = vpop.eup %5075 }
0x2fd6   :  { %v2808_v11 = vmul.f32 %v5076_v4, %v5072_v56  ;;  %v2892_v56 = vld [vmem:[%s6738_s19 + $0x18] sm:$0xff] }
0x2fd7   :  { %v2994_v62 = vpack.c.bf16 %v2892_v56, %v2891_v54 }
0x2fd8   :  { %v2810_v12 = vpack.c.bf16 %v2808_v11, %v2808_v11 }
0x2fda   :  { %4599 = vmatmul.msk.bf16.vlgmr.msra.gmra.mxu3 %vm2643_vm4, %v2810_v12 }
0x2fe1   :  { %v2840_v16 = vpop.permute.xlu0 %2839 }
0x2fe2   :  { %v2845_v52 = vsel %vm2673_vm5, %v2840_v16, 0 }
0x2fe3   :  { %2854 = vmatpush.bf16.msra.mxu0 %v2845_v52 }
0x2fe7   :  { %v2805_v21 = vpop.xlane.xlu2 %2804  ;;  %3001 = vmatpush.bf16.msrb.mxu0 %v2994_v62 }
0x2fe8   :  { %5077 = vrcp.f32 %v2805_v21 }
0x2feb   :  { %3002 = vmatpush.bf16.msrb.mxu0 %v2993_v2  ;;  %v4770_v2 = vld [vmem:[#allocation11] ss:$0 sm:$0xff] }
0x2fee   :  { %v5078_v15 = vpop.eup %5077 }
0x2fef   :  { %v2809_v17 = vmul.f32 %v5078_v15, %v5074_v61  ;;  %v2417_v18 = vpop.xlane.xlu2 %2416 }
0x2ff0   :  { %v2421_v19 = vmul.f32 %v2417_v18, %v5825_v13 }
0x2ff1   :  { %v2811_v20 = vpack.c.bf16 %v2809_v17, %v2809_v17 }
0x2ff2   :  { %v6315_v22 = vsub.f32 %v2411_v60, %v2421_v19 }
0x2ff3   :  { %4600 = vmatmul.msk.bf16.vlgmr.msra.gmra.mxu0 %vm2643_vm4, %v2811_v20 }
0x2ff4   :  { %v2425_v23 = vmul.f32 %v6315_v22, %v6315_v22 }
0x2ff6   :  { %v2427_v24 = vsel %vm349_vm0, %v2425_v23, 0.0 }
0x2ff7   :  { %2428 = vadd.xlane.f32.xlu1 %v2427_v24  ;;  %v2420_v33 = vpop.xlane.xlu2 %2419 }
0x2ff8   :  { %v2422_v37 = vmul.f32 %v2420_v33, %v5825_v13 }
0x2ffa   :  { %v6328_v41 = vsub.f32 %v2412_v5, %v2422_v37  ;;  %v2884_v37 = vld [vmem:[%s6741_s9 + $0x18] sm:$0xff] }
0x2ffc   :  { %v2426_v0 = vmul.f32 %v6328_v41, %v6328_v41 }
0x2ffe   :  { %v2430_v46 = vsel %vm349_vm0, %v2426_v0, 0.0  ;;  %v2881_v0 = vld [vmem:[%s6741_s9] sm:$0xff] }
0x305d   :  { %v2832_v28 = vpop.f32.mrf.mxu3 }
0x3065   :  { %v2834_v31 = vpop.f32.mrf.mxu3 }
0x3066   :  { %v4768_v31 = vld [vmem:[%s6740_s27] ss:$0 sm:$0xff] }
0x306a   :  { %v2429_v48 = vpop.xlane.xlu1 %2428 }
0x306b   :  { %v2433_v51 = vmul.f32 %v2429_v48, %v5825_v13 }
0x306d   :  { %v2435_v14 = vadd.f32 1e-06, %v2433_v51 }
0x306f   :  { %5079 = vrsqrt.f32 %v2435_v14  ;;  %vm2443_vm7 = vweird.f32 %v2435_v14 }
0x3070   :  { %v2856_v32 = vpop.f32.mrf.mxu0 }
0x3071   :  { %v2860_v34 = vpack.c.bf16 %v2856_v32, %v2832_v28 }
0x3073   :  { %4601 = vmatmul.msk.bf16.vlgmr.msrb.gmra.mxu1 %vm451_vm2, %v2860_v34 }
0x3075   :  { %v5080_v58 = vpop.eup %5079 }
0x3076   :  { %v2438_v60 = vmul.f32 %v5080_v58, %v2435_v14  ;;  %vm2444_vm6 = vweird.f32 %v5080_v58 }
0x3077   :  { %vm2445_vm9 = vmor %vm2443_vm7, %vm2444_vm6 }
0x3078   :  { %v2858_v35 = vpop.f32.mrf.mxu0  ;;  %v2439_v5 = vmul.f32 %v5080_v58, %v2438_v60 }
0x307a   :  { %v2440_v16 = vmul.f32 0.5, %v2439_v5 }
0x307c   :  { %v2441_v15 = vsub.f32 1.5, %v2440_v16 }
0x307e   :  { %v2442_v18 = vmul.f32 %v5080_v58, %v2441_v15 }
0x3080   :  { %v2446_v23 = vsel %vm2445_vm9, %v5080_v58, %v2442_v18 }
0x3081   :  { %v2457_v26 = vmul.f32 %v2446_v23, %v6315_v22  ;;  %v2883_v22 = vld [vmem:[%s6741_s9 + $0x10] sm:$0xff] }
0x3083   :  { %v2462_v6 = vmul.f32 %v4767_v27, %v2457_v26 }
0x3085   :  { %v2467_v35 = vadd.f32 %v4768_v31, %v2462_v6 }
0x30f0   :  { %v2874_v39 = vpop.f32.mrf.mxu1 }
0x30f1   :  { %v6326_v40 = vadd.f32 %v2874_v39, %v2728_v36  ;;  %v2955_v39 = vpack.c.bf16 %v2884_v37, %v2883_v22 }
0x30f3   :  { %v2899_v42 = vsel %vm349_vm0, %v6326_v40, 0.0  ;;  %2965 = vmatpush.bf16.msrb.mxu2 %v2955_v39  ;;  %v335_v39 = vld [vmem:[%s6742_s6] sm:$0xff] }
0x30f4   :  { %2900 = vadd.xlane.f32.xlu2 %v2899_v42 }
0x30f8   :  { %v2876_v38 = vpop.f32.mrf.mxu1 }
0x30f9   :  { %v6335_v44 = vadd.f32 %v2876_v38, %v2729_v43 }
0x30fb   :  { %v2902_v45 = vsel %vm349_vm0, %v6335_v44, 0.0 }
0x30fc   :  { %2903 = vadd.xlane.f32.xlu0 %v2902_v45  ;;  %2431 = vadd.xlane.f32.xlu2 %v2430_v46 }
0x3167   :  { %v2901_v57 = vpop.xlane.xlu2 %2900 }
0x3168   :  { %v2905_v47 = vmul.f32 %v2901_v57, %v5825_v13 }
0x316a   :  { %v6350_v61 = vsub.f32 %v6326_v40, %v2905_v47 }
0x316c   :  { %v2909_v1 = vmul.f32 %v6350_v61, %v6350_v61 }
0x316e   :  { %v2911_v3 = vsel %vm349_vm0, %v2909_v1, 0.0 }
0x316f   :  { %v2904_v7 = vpop.xlane.xlu0 %2903  ;;  %2912 = vadd.xlane.f32.xlu2 %v2911_v3  ;;  %v2432_v9 = vpop.xlane.xlu2 %2431 }
0x3170   :  { %v2906_v50 = vmul.f32 %v2904_v7, %v5825_v13  ;;  %v2434_v4 = vmul.f32 %v2432_v9, %v5825_v13 }
0x3172   :  { %v6359_v11 = vsub.f32 %v6335_v44, %v2906_v50  ;;  %v2436_v12 = vadd.f32 1e-06, %v2434_v4 }
0x3174   :  { %5081 = vrsqrt.f32 %v2436_v12  ;;  %v2910_v52 = vmul.f32 %v6359_v11, %v6359_v11  ;;  %vm2453_vm11 = vweird.f32 %v2436_v12 }
0x3176   :  { %v2914_v21 = vsel %vm349_vm0, %v2910_v52, 0.0 }
0x3177   :  { %2915 = vadd.xlane.f32.xlu2 %v2914_v21 }
0x317a   :  { %v5082_v17 = vpop.eup %5081 }
0x317b   :  { %v2448_v19 = vmul.f32 %v5082_v17, %v2436_v12  ;;  %vm2454_vm10 = vweird.f32 %v5082_v17 }
0x317c   :  { %vm2455_vm12 = vmor %vm2453_vm11, %vm2454_vm10 }
0x317d   :  { %v2449_v20 = vmul.f32 %v5082_v17, %v2448_v19 }
0x317f   :  { %v2450_v24 = vmul.f32 0.5, %v2449_v20 }
0x3181   :  { %v2451_v25 = vsub.f32 1.5, %v2450_v24 }
0x3183   :  { %v2452_v28 = vmul.f32 %v5082_v17, %v2451_v25 }
0x3185   :  { %v2456_v29 = vsel %vm2455_vm12, %v5082_v17, %v2452_v28 }
0x3186   :  { %v2458_v32 = vmul.f32 %v2456_v29, %v6328_v41  ;;  %v2882_v41 = vld [vmem:[%s6741_s9 + $0x8] sm:$0xff] }
0x3187   :  { %v2954_v45 = vpack.c.bf16 %v2882_v41, %v2881_v0 }
0x3188   :  { %v2463_v34 = vmul.f32 %v4767_v27, %v2458_v32 }
0x3189   :  { %2966 = vmatpush.bf16.msrb.mxu2 %v2954_v45 }
0x318a   :  { %v2468_v33 = vadd.f32 %v4768_v31, %v2463_v34 }
0x318c   :  { %v6368_v36 = vpack.c.bf16 %v2468_v33, %v2467_v35 }
0x318e   :  { %4603 = vmatmul.msk.bf16.vlgmr.msrb.gmra.mxu3 %vm349_vm0, %v6368_v36  ;;  %4604 = vmatmul.msk.bf16.vlgmr.msrb.gmra.mxu0 %vm349_vm0, %v6368_v36 }
0x31e2   :  { %v2913_v42 = vpop.xlane.xlu2 %2912 }
0x31e3   :  { %v2917_v43 = vmul.f32 %v2913_v42, %v5825_v13 }
0x31e5   :  { %v2919_v38 = vadd.f32 1e-06, %v2917_v43 }
0x31e7   :  { %5083 = vrsqrt.f32 %v2919_v38  ;;  %vm2927_vm14 = vweird.f32 %v2919_v38 }
0x31ea   :  { %v2916_v46 = vpop.xlane.xlu2 %2915 }
0x31eb   :  { %v2918_v48 = vmul.f32 %v2916_v46, %v5825_v13 }
0x31ed   :  { %v5084_v51 = vpop.eup %5083  ;;  %v2920_v14 = vadd.f32 1e-06, %v2918_v48 }
0x31ee   :  { %v2922_v49 = vmul.f32 %v5084_v51, %v2919_v38  ;;  %vm2928_vm13 = vweird.f32 %v5084_v51 }
0x31ef   :  { %5085 = vrsqrt.f32 %v2920_v14  ;;  %vm2929_vm15 = vmor %vm2927_vm14, %vm2928_vm13  ;;  %vm2937_vm3 = vweird.f32 %v2920_v14 }
0x31f0   :  { %v2923_v53 = vmul.f32 %v5084_v51, %v2922_v49 }
0x31f2   :  { %v2924_v54 = vmul.f32 0.5, %v2923_v53 }
0x31f4   :  { %v2925_v55 = vsub.f32 1.5, %v2924_v54 }
0x31f5   :  { %v5086_v56 = vpop.eup %5085 }
0x31f6   :  { %v2926_v57 = vmul.f32 %v5084_v51, %v2925_v55  ;;  %v2932_v62 = vmul.f32 %v5086_v56, %v2920_v14  ;;  %vm2938_vm1 = vweird.f32 %v5086_v56 }
0x31f7   :  { %vm2939_vm6 = vmor %vm2937_vm3, %vm2938_vm1 }
0x31f8   :  { %v2933_v58 = vmul.f32 %v5086_v56, %v2932_v62  ;;  %v2930_v47 = vsel %vm2929_vm15, %v5084_v51, %v2926_v57 }
0x31f9   :  { %v2941_v63 = vmul.f32 %v2930_v47, %v6350_v61 }
0x31fa   :  { %v2934_v8 = vmul.f32 0.5, %v2933_v58  ;;  %v336_v58 = vld [vmem:[%s6742_s6 + $0x8] sm:$0xff] }
0x31fb   :  { %v2946_v1 = vmul.f32 %v4769_v30, %v2941_v63 }
0x31fc   :  { %v2935_v59 = vsub.f32 1.5, %v2934_v8 }
0x31fd   :  { %v2951_v7 = vadd.f32 %v4770_v2, %v2946_v1 }
0x31fe   :  { %v2936_v10 = vmul.f32 %v5086_v56, %v2935_v59 }
0x3200   :  { %v2940_v60 = vsel %vm2939_vm6, %v5086_v56, %v2936_v10 }
0x3201   :  { %v2942_v3 = vmul.f32 %v2940_v60, %v6359_v11 }
0x3203   :  { %v2947_v5 = vmul.f32 %v4769_v30, %v2942_v3 }
0x3205   :  { %v2952_v9 = vadd.f32 %v4770_v2, %v2947_v5 }
0x3207   :  { %v2953_v50 = vpack.c.bf16 %v2952_v9, %v2951_v7 }
0x3209   :  { %4602 = vmatmul.msk.bf16.vlgmr.msrb.gmra.mxu2 %vm349_vm0, %v2953_v50 }
0x320b   :  { %v3004_v4 = vpop.f32.mrf.mxu0 }
0x320c   :  { %v6383_v12 = vpack.c.bf16 %v3004_v4, %v3004_v4 }
0x320e   :  { %v3083_v61 = vsel %vm2673_vm5, %v6383_v12, 0 }
0x320f   :  { %3092 = vmatpush.bf16.msra.mxu3 %v3083_v61 }
0x3211   :  { %v2988_v16 = vpop.f32.mrf.mxu3 }
0x3212   :  { %v3013_v52 = vpack.c.bf16 %v2988_v16, %v2988_v16 }
0x3213   :  { %v3006_v21 = vpop.f32.mrf.mxu0 }
0x3214   :  { %v3019_v15 = vsel %vm451_vm2, %v3013_v52, 0  ;;  %v3144_v17 = vunpack.c.l.b16 %v3013_v52  ;;  %v6388_v11 = vpack.c.bf16 %v3006_v21, %v3006_v21 }
0x3215   :  { %3028 = vmatpush.bf16.xpose.msra.mxu1 %v3019_v15 }
0x3216   :  { %v3145_v18 = vpack.c.b16 %v3144_v17, %v3144_v17  ;;  %v3102_v19 = vsel %vm2673_vm5, %v6388_v11, 0  ;;  %v3245_v15 = vunpack.c.l.b16 %v6388_v11 }
0x3217   :  { %3111 = vmatpush.bf16.msra.mxu0 %v3102_v19 }
0x3218   :  { %3146 = vrot.lane.b32.xlu0 %v3145_v18, %s5520_s7  ;;  %v3246_v17 = vpack.c.b16 %v3245_v15, %v3245_v15 }
0x3219   :  { %v2990_v20 = vpop.f32.mrf.mxu3 }
0x321a   :  { %v3014_v23 = vpack.c.bf16 %v2990_v20, %v2990_v20 }
0x321c   :  { %v3038_v24 = vsel %vm451_vm2, %v3014_v23, 0  ;;  %v3173_v57 = vunpack.c.l.b16 %v3014_v23 }
0x321d   :  { %3047 = vmatpush.bf16.xpose.msra.mxu2 %v3038_v24 }
0x321e   :  { %v3174_v62 = vpack.c.b16 %v3173_v57, %v3173_v57 }
0x328a   :  { %v3147_v25 = vpop.permute.xlu0 %3146 }
0x328b   :  { %v3152_v27 = vsel %vm451_vm2, %v3147_v25, 0 }
0x328c   :  { %v2968_v26 = vpop.f32.mrf.mxu2  ;;  %3161 = vmatpush.bf16.xpose.msrb.mxu2 %v3152_v27  ;;  %v3221_v27 = vunpack.c.l.b16 %v6383_v12 }
0x328d   :  { %v3009_v28 = vmul.f32 0.25, %v2968_v26 }
0x328e   :  { %v3222_v26 = vpack.c.b16 %v3221_v27, %v3221_v27  ;;  %v3291_v27 = vld [vmem:[%s6744_s18] sm:$0xff] }
0x328f   :  { %v3011_v29 = vpack.c.bf16 %v3009_v28, %v3009_v28  ;;  %v2893_v28 = vld [vmem:[%s6743_s20] sm:$0xff] }
0x3291   :  { %v3139_v31 = vunpack.c.l.b16 %v3011_v29  ;;  %4605 = vmatmul.msk.bf16.vlgmr.msra.gmra.mxu1 %vm451_vm2, %v3011_v29  ;;  %v2894_v29 = vld [vmem:[%s6743_s20 + $0x8] sm:$0xff] }
0x3293   :  { %v3140_v6 = vpack.c.b16 %v3139_v31, %v3139_v31  ;;  %v3118_v31 = vpack.c.bf16 %v2894_v29, %v2893_v28 }
0x3294   :  { %v2970_v32 = vpop.f32.mrf.mxu2 }
0x3295   :  { %v3010_v34 = vmul.f32 0.25, %v2970_v32  ;;  %3141 = vrot.lane.b32.xlu1 %v3140_v6, %s5520_s7  ;;  %3129 = vmatpush.bf16.msrb.mxu1 %v3118_v31 }
0x3297   :  { %v3012_v35 = vpack.c.bf16 %v3010_v34, %v3010_v34 }
0x3299   :  { %v3168_v33 = vunpack.c.l.b16 %v3012_v35  ;;  %4606 = vmatmul.msk.bf16.vlgmr.msra.gmra.mxu2 %vm451_vm2, %v3012_v35 }
0x329b   :  { %v3169_v22 = vpack.c.b16 %v3168_v33, %v3168_v33 }
0x329d   :  { %3170 = vrot.lane.b32.xlu0 %v3169_v22, %s5520_s7 }
0x3307   :  { %v3142_v37 = vpop.permute.xlu1 %3141 }
0x3308   :  { %4610 = vmatmul.msk.bf16.vlgmr.msrb.gmra.mxu2 %vm451_vm2, %v3142_v37 }
0x330e   :  { %v3030_v42 = vpop.f32.mrf.mxu1 }
0x330f   :  { %v3031_v43 = vadd.f32 %v3030_v42, %v335_v39  ;;  %v3171_v1 = vpop.permute.xlu0 %3170 }
0x3311   :  { %v3053_v0 = vsel %vm2643_vm4, %v3031_v43, -inf }
0x3312   :  { %3054 = vmax.xlane.f32.xlu2 %v3053_v0 }
0x3316   :  { %v3032_v41 = vpop.f32.mrf.mxu1 }
0x331c   :  { %v3049_v38 = vpop.f32.mrf.mxu2 }
0x331d   :  { %v3050_v47 = vadd.f32 %v3049_v38, %v336_v58 }
0x331f   :  { %v3056_v8 = vsel %vm2643_vm4, %v3050_v47, -inf }
0x3324   :  { %v3051_v45 = vpop.f32.mrf.mxu2 }
0x3385   :  { %v3055_v46 = vpop.xlane.xlu2 %3054 }
0x3386   :  { %v3059_v48 = vsub.f32 %v3031_v43, %v3055_v46 }
0x3388   :  { %v3061_v51 = vmul.f32 1.442695, %v3059_v48 }
0x338a   :  { %5087 = vpow2.f32 %v3061_v51 }
0x338b   :  { %v3163_v14 = vpop.f32.mrf.mxu2 }
0x338c   :  { %v3164_v49 = vadd.f32 %v3163_v14, %v335_v39 }
0x338e   :  { %v3196_v53 = vsel %vm2643_vm4, %v3164_v49, -inf }
0x338f   :  { %3197 = vmax.xlane.f32.xlu1 %v3196_v53 }
0x3390   :  { %v5088_v54 = vpop.eup %5087 }
0x3391   :  { %v3065_v55 = vsel %vm2643_vm4, %v5088_v54, 0.0 }
0x3392   :  { %3066 = vadd.xlane.f32.xlu2 %v3065_v55 }
0x3393   :  { %v3165_v56 = vpop.f32.mrf.mxu2 }
0x33aa   :  { %3175 = vrot.lane.b32.xlu2 %v3174_v62, %s5520_s7  ;;  %v2895_v62 = vld [vmem:[%s6743_s20 + $0x10] sm:$0xff] }
0x33d3   :  { %3057 = vmax.xlane.f32.xlu2 %v3056_v8 }
0x3402   :  { %v3198_v3 = vpop.xlane.xlu1 %3197 }
0x3403   :  { %v3202_v9 = vsub.f32 %v3164_v49, %v3198_v3 }
0x3405   :  { %v3067_v59 = vpop.xlane.xlu2 %3066  ;;  %v3204_v4 = vmul.f32 1.442695, %v3202_v9 }
0x3406   :  { %5089 = vrcp.f32 %v3067_v59 }
0x340c   :  { %v5090_v30 = vpop.eup %5089 }
0x340d   :  { %v3073_v63 = vmul.f32 %v5090_v30, %v5088_v54  ;;  %v3176_v10 = vpop.permute.xlu2 %3175 }
0x340e   :  { %v3181_v60 = vsel %vm451_vm2, %v3176_v10, 0 }
0x340f   :  { %v3075_v2 = vpack.c.bf16 %v3073_v63, %v3073_v63  ;;  %3190 = vmatpush.bf16.xpose.msrb.mxu3 %v3181_v60 }
0x3411   :  { %4607 = vmatmul.msk.bf16.vlgmr.msra.gmra.mxu3 %vm2643_vm4, %v3075_v2 }
0x3421   :  { %4611 = vmatmul.msk.bf16.vlgmr.msrb.gmra.mxu3 %vm451_vm2, %v3171_v1 }
0x3446   :  { %v3058_v5 = vpop.xlane.xlu2 %3057 }
0x3447   :  { %v3060_v7 = vsub.f32 %v3050_v47, %v3058_v5 }
0x3449   :  { %v3063_v50 = vmul.f32 1.442695, %v3060_v7 }
0x344b   :  { %5091 = vpow2.f32 %v3063_v50 }
0x344c   :  { %5093 = vpow2.f32 %v3204_v4 }
0x3451   :  { %v5092_v61 = vpop.eup %5091 }
0x3452   :  { %v3068_v16 = vsel %vm2643_vm4, %v5092_v61, 0.0  ;;  %v5094_v52 = vpop.eup %5093 }
0x3453   :  { %3069 = vadd.xlane.f32.xlu0 %v3068_v16  ;;  %v3208_v21 = vsel %vm2643_vm4, %v5094_v52, 0.0 }
0x345b   :  { %3209 = vadd.xlane.f32.xlu0 %v3208_v21 }
0x346f   :  { %3247 = vrot.lane.b32.xlu0 %v3246_v17, %s5520_s7 }
0x3494   :  { %v3094_v18 = vpop.f32.mrf.mxu3 }
0x349c   :  { %v3096_v19 = vpop.f32.mrf.mxu3 }
0x349d   :  { %v3293_v19 = vld [vmem:[%s6744_s18 + $0x10] sm:$0xff] }
0x34a4   :  { %v3192_v20 = vpop.f32.mrf.mxu3 }
0x34a5   :  { %v3193_v23 = vadd.f32 %v3192_v20, %v336_v58  ;;  %v2896_v58 = vld [vmem:[%s6743_s20 + $0x18] sm:$0xff] }
0x34a6   :  { %v3269_v47 = vpack.c.bf16 %v2896_v58, %v2895_v62  ;;  %v3294_v20 = vld [vmem:[%s6744_s18 + $0x18] sm:$0xff] }
0x34a7   :  { %v3199_v24 = vsel %vm2643_vm4, %v3193_v23, -inf  ;;  %v3303_v62 = vld [vmem:[%s6745_s23 + $0x38] sm:$0xff] }
0x34a8   :  { %3200 = vmax.xlane.f32.xlu2 %v3199_v24  ;;  %3280 = vmatpush.bf16.msra.mxu2 %v3269_v47  ;;  %v3300_v47 = vld [vmem:[%s6745_s23 + $0x20] sm:$0xff] }
0x34ac   :  { %v3194_v25 = vpop.f32.mrf.mxu3 }
0x34c0   :  { %3223 = vrot.lane.b32.xlu2 %v3222_v26, %s5520_s7  ;;  %v3292_v26 = vld [vmem:[%s6744_s18 + $0x8] sm:$0xff] }
0x34c1   :  { %v3360_v29 = vpack.c.bf16 %v3292_v26, %v3291_v27  ;;  %v4626_v27 = vld [vmem:[%s6734_s2 + $0x28] sm:$0xff] }
0x34c6   :  { %v3070_v11 = vpop.xlane.xlu0 %3069 }
0x34c7   :  { %5095 = vrcp.f32 %v3070_v11 }
0x34cd   :  { %v5096_v6 = vpop.eup %5095 }
0x34ce   :  { %v3074_v32 = vmul.f32 %v5096_v6, %v5092_v61  ;;  %v3210_v35 = vpop.xlane.xlu0 %3209 }
0x34cf   :  { %5097 = vrcp.f32 %v3210_v35 }
0x34d0   :  { %v3076_v34 = vpack.c.bf16 %v3074_v32, %v3074_v32 }
0x34d2   :  { %4608 = vmatmul.msk.bf16.vlgmr.msra.gmra.mxu0 %vm2643_vm4, %v3076_v34 }
0x34d5   :  { %v5098_v42 = vpop.eup %5097 }
0x34d6   :  { %v3216_v43 = vmul.f32 %v5098_v42, %v5094_v52 }
0x34d8   :  { %v3218_v45 = vpack.c.bf16 %v3216_v43, %v3216_v43 }
0x34e1   :  { %v3248_v33 = vpop.permute.xlu0 %3247 }
0x34e2   :  { %v3253_v22 = vsel %vm2673_vm5, %v3248_v33, 0 }
0x34e3   :  { %3262 = vmatpush.bf16.msra.mxu1 %v3253_v22 }
0x351b   :  { %v3201_v12 = vpop.xlane.xlu2 %3200 }
0x351c   :  { %v3203_v37 = vsub.f32 %v3193_v23, %v3201_v12  ;;  %v3361_v23 = vpack.c.bf16 %v3294_v20, %v3293_v19  ;;  %v4621_v20 = vld [vmem:[%s6730_s3 + $0x20] sm:$0xff] }
0x351e   :  { %v3206_v39 = vmul.f32 1.442695, %v3203_v37  ;;  %3374 = vmatpush.bf16.msra.mxu3 %v3361_v23  ;;  %v4622_v23 = vld [vmem:[%s6730_s3 + $0x28] sm:$0xff] }
0x3520   :  { %5099 = vpow2.f32 %v3206_v39 }
0x3522   :  { %3375 = vmatpush.bf16.msra.mxu3 %v3360_v29 }
0x3523   :  { %v3224_v0 = vpop.permute.xlu2 %3223 }
0x3524   :  { %v3229_v41 = vsel %vm2673_vm5, %v3224_v0, 0 }
0x3525   :  { %3238 = vmatpush.bf16.msrb.mxu0 %v3229_v41 }
0x3526   :  { %v5100_v38 = vpop.eup %5099 }
0x3527   :  { %v3211_v46 = vsel %vm2643_vm4, %v5100_v38, 0.0 }
0x3528   :  { %3212 = vadd.xlane.f32.xlu1 %v3211_v46  ;;  %4612 = vmatmul.msk.bf16.vlgmr.msrb.gmra.mxu0 %vm2643_vm4, %v3218_v45 }
0x354f   :  { %v3113_v48 = vpop.f32.mrf.mxu0 }
0x3550   :  { %v3117_v51 = vpack.c.bf16 %v3113_v48, %v3094_v18 }
0x3552   :  { %4609 = vmatmul.msk.bf16.vlgmr.msrb.gmra.mxu1 %vm451_vm2, %v3117_v51  ;;  %v4772_v51 = vld [vmem:[#allocation14] ss:$0 sm:$0xff] }
0x3557   :  { %v3115_v14 = vpop.f32.mrf.mxu0 }
0x359b   :  { %v3213_v49 = vpop.xlane.xlu1 %3212 }
0x359c   :  { %5101 = vrcp.f32 %v3213_v49 }
0x35a2   :  { %v5102_v53 = vpop.eup %5101 }
0x35a3   :  { %v3217_v54 = vmul.f32 %v5102_v53, %v5100_v38  ;;  %v4771_v38 = vld [vmem:[#allocation12] ss:$0 sm:$0xff] }
0x35a5   :  { %v3219_v55 = vpack.c.bf16 %v3217_v54, %v3217_v54  ;;  %v3240_v56 = vpop.f32.mrf.mxu0 }
0x35a7   :  { %4613 = vmatmul.msk.bf16.vlgmr.msra.gmra.mxu1 %vm2643_vm4, %v3219_v55 }
0x35ad   :  { %v3242_v57 = vpop.f32.mrf.mxu0 }
0x35ae   :  { %v3302_v57 = vld [vmem:[%s6745_s23 + $0x30] sm:$0xff] }
0x35af   :  { %v3388_v58 = vpack.c.bf16 %v3303_v62, %v3302_v57 }
0x35b1   :  { %3399 = vmatpush.bf16.msra.mxu0 %v3388_v58 }
0x35cf   :  { %v3131_v8 = vpop.f32.mrf.mxu1 }
0x35d0   :  { %v3136_v60 = vadd.f32 %v3131_v8, %v6326_v40  ;;  %v3301_v8 = vld [vmem:[%s6745_s23 + $0x28] sm:$0xff] }
0x35d7   :  { %v3133_v59 = vpop.f32.mrf.mxu1 }
0x35d8   :  { %v3137_v5 = vadd.f32 %v3133_v59, %v6335_v44  ;;  %v3387_v59 = vpack.c.bf16 %v3301_v8, %v3300_v47 }
0x35da   :  { %3400 = vmatpush.bf16.msra.mxu0 %v3387_v59 }
0x3624   :  { %v3264_v30 = vpop.f32.mrf.mxu1 }
0x3625   :  { %v3268_v63 = vpack.c.bf16 %v3264_v30, %v3240_v56  ;;  %v3298_v30 = vld [vmem:[%s6745_s23 + $0x10] sm:$0xff] }
0x3627   :  { %4614 = vmatmul.msk.bf16.vlgmr.msra.gmra.mxu2 %vm451_vm2, %v3268_v63  ;;  %v3299_v63 = vld [vmem:[%s6745_s23 + $0x18] sm:$0xff] }
0x362c   :  { %v3266_v10 = vpop.f32.mrf.mxu1 }
0x362d   :  { %v3386_v10 = vpack.c.bf16 %v3299_v63, %v3298_v30 }
0x362f   :  { %3401 = vmatpush.bf16.msra.mxu0 %v3386_v10 }
0x36aa   :  { %v3282_v2 = vpop.f32.mrf.mxu2 }
0x36ab   :  { %v6430_v1 = vadd.f32 %v3282_v2, %v3136_v60  ;;  %v3296_v60 = vld [vmem:[%s6745_s23] sm:$0xff]  ;;  %v3297_v2 = vld [vmem:[%s6745_s23 + $0x8] sm:$0xff] }
0x36ad   :  { %v3305_v3 = vsel %vm349_vm0, %v6430_v1, 0.0 }
0x36ae   :  { %3306 = vadd.xlane.f32.xlu1 %v3305_v3  ;;  %v3385_v3 = vpack.c.bf16 %v3297_v2, %v3296_v60 }
0x36b0   :  { %3402 = vmatpush.bf16.msra.mxu0 %v3385_v3 }
0x36b2   :  { %v3284_v7 = vpop.f32.mrf.mxu2 }
0x36b3   :  { %v6435_v9 = vadd.f32 %v3284_v7, %v3137_v5  ;;  %v4773_v7 = vld [vmem:[#allocation15] ss:$0 sm:$0xff] }
0x36b5   :  { %v3308_v50 = vsel %vm349_vm0, %v6435_v9, 0.0 }
0x36b6   :  { %3309 = vadd.xlane.f32.xlu1 %v3308_v50 }
0x3721   :  { %v3307_v4 = vpop.xlane.xlu1 %3306 }
0x3722   :  { %v3311_v40 = vmul.f32 %v3307_v4, %v5825_v13 }
0x3724   :  { %v3313_v61 = vsub.f32 %v6430_v1, %v3311_v40 }
0x3726   :  { %v3315_v16 = vmul.f32 %v3313_v61, %v3313_v61 }
0x3728   :  { %v3317_v52 = vsel %vm349_vm0, %v3315_v16, 0.0 }
0x3729   :  { %3318 = vadd.xlane.f32.xlu1 %v3317_v52  ;;  %v3310_v44 = vpop.xlane.xlu1 %3309 }
0x372a   :  { %v3312_v21 = vmul.f32 %v3310_v44, %v5825_v13  ;;  %v4623_v44 = vld [vmem:[%s6730_s3 + $0x30] sm:$0xff] }
0x372c   :  { %v3314_v15 = vsub.f32 %v6435_v9, %v3312_v21  ;;  %v4624_v21 = vld [vmem:[%s6730_s3 + $0x38] sm:$0xff] }
0x372e   :  { %v3316_v17 = vmul.f32 %v3314_v15, %v3314_v15 }
0x3730   :  { %v3320_v18 = vsel %vm349_vm0, %v3316_v17, 0.0  ;;  %v3511_v17 = vpack.c.bf16 %v4624_v21, %v4623_v44 }
0x3731   :  { %3321 = vadd.xlane.f32.xlu0 %v3320_v18  ;;  %v4628_v18 = vld [vmem:[%s6734_s2 + $0x38] sm:$0xff] }
0x3732   :  { %3521 = vmatpush.bf16.msrb.mxu2 %v3511_v17 }
0x379c   :  { %v3319_v24 = vpop.xlane.xlu1 %3318 }
0x379d   :  { %v3323_v25 = vmul.f32 %v3319_v24, %v5825_v13  ;;  %v4625_v24 = vld [vmem:[%s6734_s2 + $0x20] sm:$0xff] }
0x379e   :  { %v3529_v26 = vpack.c.bf16 %v4626_v27, %v4625_v24 }
0x379f   :  { %v3325_v28 = vadd.f32 1e-06, %v3323_v25  ;;  %v3510_v25 = vpack.c.bf16 %v4622_v23, %v4621_v20 }
0x37a1   :  { %5103 = vrsqrt.f32 %v3325_v28  ;;  %vm3333_vm9 = vweird.f32 %v3325_v28  ;;  %3522 = vmatpush.bf16.msrb.mxu2 %v3510_v25 }
0x37a4   :  { %v3322_v31 = vpop.xlane.xlu0 %3321 }
0x37a5   :  { %v3324_v11 = vmul.f32 %v3322_v31, %v5825_v13 }
0x37a7   :  { %v5104_v6 = vpop.eup %5103  ;;  %v3326_v32 = vadd.f32 1e-06, %v3324_v11 }
0x37a8   :  { %v3328_v34 = vmul.f32 %v5104_v6, %v3325_v28  ;;  %vm3334_vm7 = vweird.f32 %v5104_v6  ;;  %v4774_v28 = vld [vmem:[#allocation17] ss:$0 sm:$0xff] }
0x37a9   :  { %5105 = vrsqrt.f32 %v3326_v32  ;;  %vm3335_vm10 = vmor %vm3333_vm9, %vm3334_vm7  ;;  %vm3343_vm12 = vweird.f32 %v3326_v32 }
0x37aa   :  { %v3329_v35 = vmul.f32 %v5104_v6, %v3328_v34 }
0x37ac   :  { %v3330_v33 = vmul.f32 0.5, %v3329_v35 }
0x37ae   :  { %v3331_v22 = vsub.f32 1.5, %v3330_v33 }
0x37af   :  { %v5106_v12 = vpop.eup %5105 }
0x37b0   :  { %v3332_v37 = vmul.f32 %v5104_v6, %v3331_v22  ;;  %v3338_v39 = vmul.f32 %v5106_v12, %v3326_v32  ;;  %vm3344_vm11 = vweird.f32 %v5106_v12 }
0x37b1   :  { %vm3345_vm13 = vmor %vm3343_vm12, %vm3344_vm11 }
0x37b2   :  { %v3339_v42 = vmul.f32 %v5106_v12, %v3338_v39  ;;  %v3336_v43 = vsel %vm3335_vm10, %v5104_v6, %v3332_v37 }
0x37b3   :  { %v3347_v45 = vmul.f32 %v3336_v43, %v3313_v61  ;;  %v4618_v43 = vld [vmem:[%s6731_s8 + $0x28] sm:$0xff] }
0x37b4   :  { %v3340_v0 = vmul.f32 0.5, %v3339_v42 }
0x37b5   :  { %v3352_v14 = vmul.f32 %v4771_v38, %v3347_v45 }
0x37b6   :  { %v3341_v41 = vsub.f32 1.5, %v3340_v0 }
0x37b7   :  { %v3357_v54 = vadd.f32 %v4772_v51, %v3352_v14 }
0x37b8   :  { %v3342_v46 = vmul.f32 %v5106_v12, %v3341_v41 }
0x37ba   :  { %v3346_v48 = vsel %vm3345_vm13, %v5106_v12, %v3342_v46  ;;  %v4620_v12 = vld [vmem:[%s6731_s8 + $0x38] sm:$0xff] }
0x37bb   :  { %v3348_v49 = vmul.f32 %v3346_v48, %v3314_v15  ;;  %v4627_v15 = vld [vmem:[%s6734_s2 + $0x30] sm:$0xff] }
0x37bc   :  { %v3530_v19 = vpack.c.bf16 %v4628_v18, %v4627_v15 }
0x37bd   :  { %v3353_v53 = vmul.f32 %v4771_v38, %v3348_v49 }
0x37be   :  { %3537 = vmatpush.bf16.msrb.mxu3 %v3530_v19 }
0x37bf   :  { %v3358_v55 = vadd.f32 %v4772_v51, %v3353_v53 }
0x37c1   :  { %v3359_v56 = vpack.c.bf16 %v3358_v55, %v3357_v54 }
0x37c2   :  { %3538 = vmatpush.bf16.msrb.mxu3 %v3529_v26 }
0x37c3   :  { %4615 = vmatmul.msk.bf16.vlgmr.msra.gmra.mxu3 %vm349_vm0, %v3359_v56 }
0x3846   :  { %v3377_v5 = vpop.f32.mrf.mxu3 }
0x3847   :  { %v3378_v50 = vadd.f32 %v4773_v7, %v3377_v5 }
0x3849   :  { %v3382_v61 = vmax.f32 %v3378_v50, 0.0 }
0x384e   :  { %v3379_v4 = vpop.f32.mrf.mxu3 }
0x384f   :  { %v3380_v40 = vadd.f32 %v4773_v7, %v3379_v4 }
0x3851   :  { %v3383_v16 = vmax.f32 %v3380_v40, 0.0 }
0x3853   :  { %v3384_v52 = vpack.c.bf16 %v3383_v16, %v3382_v61 }
0x3855   :  { %4616 = vmatmul.msk.bf16.vlgmr.msra.gmra.mxu0 %vm443_vm8, %v3384_v52 }
0x38d2   :  { %v3404_v29 = vpop.f32.mrf.mxu0 }
0x38d3   :  { %v3405_v31 = vadd.f32 %v4774_v28, %v3404_v29 }
0x38d5   :  { %v6470_v11 = vadd.f32 %v3405_v31, %v6430_v1  ;;  %v4619_v1 = vld [vmem:[%s6731_s8 + $0x30] sm:$0xff] }
0x38d6   :  { %v3491_v37 = vpack.c.bf16 %v4620_v12, %v4619_v1 }
0x38d7   :  { %v3435_v6 = vsel %vm349_vm0, %v6470_v11, 0.0 }
0x38d8   :  { %3436 = vadd.xlane.f32.xlu2 %v3435_v6  ;;  %3501 = vmatpush.bf16.msrb.mxu1 %v3491_v37 }
0x38da   :  { %v3406_v32 = vpop.f32.mrf.mxu0 }
0x38db   :  { %v3407_v34 = vadd.f32 %v4774_v28, %v3406_v32  ;;  %v4775_v28 = vld [vmem:[#allocation6 + $0x1] ss:$0 sm:$0xff]  ;;  %v4776_v32 = vld [vmem:[#allocation8 + $0x1] ss:$0 sm:$0xff] }
0x38dd   :  { %v6475_v35 = vadd.f32 %v3407_v34, %v6435_v9  ;;  %v4617_v9 = vld [vmem:[%s6731_s8 + $0x20] sm:$0xff] }
0x38de   :  { %v3490_v41 = vpack.c.bf16 %v4618_v43, %v4617_v9 }
0x38df   :  { %v3509_v33 = vpack.c.bf16 %v6475_v35, %v6470_v11  ;;  %v3438_v22 = vsel %vm349_vm0, %v6475_v35, 0.0 }
0x38e0   :  { %3439 = vadd.xlane.f32.xlu1 %v3438_v22  ;;  %3502 = vmatpush.bf16.msrb.mxu1 %v3490_v41 }
0x38e1   :  { %4634 = vmatmul.msk.bf16.vlgmr.msrb.gmra.mxu2 %vm349_vm0, %v3509_v33  ;;  %4635 = vmatmul.msk.bf16.vlgmr.msrb.gmra.mxu3 %vm349_vm0, %v3509_v33 }
0x394b   :  { %v3437_v39 = vpop.xlane.xlu2 %3436 }
0x394c   :  { %v3441_v42 = vmul.f32 %v3437_v39, %v5825_v13 }
0x394e   :  { %v3443_v0 = vsub.f32 %v6470_v11, %v3441_v42 }
0x3950   :  { %v3445_v38 = vmul.f32 %v3443_v0, %v3443_v0 }
0x3952   :  { %v3447_v45 = vsel %vm349_vm0, %v3445_v38, 0.0 }
0x3953   :  { %v3440_v46 = vpop.xlane.xlu1 %3439  ;;  %3448 = vadd.xlane.f32.xlu1 %v3447_v45 }
0x3954   :  { %v3442_v48 = vmul.f32 %v3440_v46, %v5825_v13 }
0x3956   :  { %v3444_v51 = vsub.f32 %v6475_v35, %v3442_v48 }
0x3958   :  { %v3446_v14 = vmul.f32 %v3444_v51, %v3444_v51 }
0x395a   :  { %v3450_v49 = vsel %vm349_vm0, %v3446_v14, 0.0  ;;  %v5157_v14 = vld [vmem:[%s6735_s17] sm:$0xff] }
0x395b   :  { %3451 = vadd.xlane.f32.xlu1 %v3450_v49 }
0x3964   :  { %v3524_v53 = vpop.f32.mrf.mxu2  ;;  %v3540_v54 = vpop.f32.mrf.mxu3 }
0x3965   :  { %v3549_v55 = vpack.c.bf16 %v3524_v53, %v3524_v53  ;;  %v6493_v56 = vpack.c.bf16 %v3540_v54, %v3540_v54 }
0x3967   :  { %v3555_v57 = vsel %vm451_vm2, %v3549_v55, 0  ;;  %v3680_v62 = vunpack.c.l.b16 %v3549_v55  ;;  %v3619_v58 = vsel %vm2673_vm5, %v6493_v56, 0 }
0x3968   :  { %3564 = vmatpush.bf16.xpose.msrb.mxu0 %v3555_v57  ;;  %3628 = vmatpush.bf16.msra.mxu2 %v3619_v58  ;;  %v5158_v57 = vld [vmem:[%s6735_s17 + $0x8] sm:$0xff] }
0x3969   :  { %v3681_v47 = vpack.c.b16 %v3680_v62, %v3680_v62 }
0x396b   :  { %3682 = vrot.lane.b32.xlu0 %v3681_v47, %s5520_s7 }
0x396c   :  { %v3526_v8 = vpop.f32.mrf.mxu2  ;;  %v3542_v59 = vpop.f32.mrf.mxu3 }
0x396d   :  { %v3550_v30 = vpack.c.bf16 %v3526_v8, %v3526_v8  ;;  %v6499_v63 = vpack.c.bf16 %v3542_v59, %v3542_v59 }
0x396f   :  { %v3574_v10 = vsel %vm451_vm2, %v3550_v30, 0  ;;  %v3709_v60 = vunpack.c.l.b16 %v3550_v30  ;;  %v3638_v2 = vsel %vm2673_vm5, %v6499_v63, 0 }
0x3970   :  { %3583 = vmatpush.bf16.xpose.msra.mxu1 %v3574_v10  ;;  %3647 = vmatpush.bf16.msra.mxu3 %v3638_v2 }
0x3971   :  { %v3710_v3 = vpack.c.b16 %v3709_v60, %v3709_v60 }
0x3973   :  { %3711 = vrot.lane.b32.xlu2 %v3710_v3, %s5520_s7 }
0x39c6   :  { %v3449_v5 = vpop.xlane.xlu1 %3448 }
0x39c7   :  { %v3453_v7 = vmul.f32 %v3449_v5, %v5825_v13 }
0x39c9   :  { %v3455_v50 = vadd.f32 1e-06, %v3453_v7 }
0x39cb   :  { %5107 = vrsqrt.f32 %v3455_v50  ;;  %vm3463_vm15 = vweird.f32 %v3455_v50 }
0x39cd   :  { %v3712_v4 = vpop.permute.xlu2 %3711 }
0x39ce   :  { %v3717_v40 = vsel %vm451_vm2, %v3712_v4, 0  ;;  %v3452_v61 = vpop.xlane.xlu1 %3451 }
0x39cf   :  { %v3454_v16 = vmul.f32 %v3452_v61, %v5825_v13  ;;  %3726 = vmatpush.bf16.xpose.msrb.mxu2 %v3717_v40 }
0x39d1   :  { %v5108_v52 = vpop.eup %5107  ;;  %v3456_v44 = vadd.f32 1e-06, %v3454_v16 }
0x39d2   :  { %v3458_v21 = vmul.f32 %v5108_v52, %v3455_v50  ;;  %vm3464_vm14 = vweird.f32 %v5108_v52 }
0x39d3   :  { %5109 = vrsqrt.f32 %v3456_v44  ;;  %vm3465_vm1 = vmor %vm3463_vm15, %vm3464_vm14  ;;  %vm3473_vm6 = vweird.f32 %v3456_v44 }
0x39d4   :  { %v3459_v15 = vmul.f32 %v5108_v52, %v3458_v21 }
0x39d6   :  { %v3460_v17 = vmul.f32 0.5, %v3459_v15 }
0x39d8   :  { %v3461_v18 = vsub.f32 1.5, %v3460_v17 }
0x39d9   :  { %v5110_v19 = vpop.eup %5109 }
0x39da   :  { %v3462_v20 = vmul.f32 %v5108_v52, %v3461_v18  ;;  %v3468_v23 = vmul.f32 %v5110_v19, %v3456_v44  ;;  %vm3474_vm3 = vweird.f32 %v5110_v19 }
0x39db   :  { %vm3475_vm7 = vmor %vm3473_vm6, %vm3474_vm3 }
0x39dc   :  { %v3469_v24 = vmul.f32 %v5110_v19, %v3468_v23  ;;  %v3466_v25 = vsel %vm3465_vm1, %v5108_v52, %v3462_v20  ;;  %v4629_v23 = vld [vmem:[%s6736_s28 + $0x20] sm:$0xff] }
0x39dd   :  { %v3477_v29 = vmul.f32 %v3466_v25, %v3443_v0  ;;  %v3683_v37 = vpop.permute.xlu0 %3682 }
0x39de   :  { %v3470_v27 = vmul.f32 0.5, %v3469_v24  ;;  %v3688_v42 = vsel %vm451_vm2, %v3683_v37, 0  ;;  %v4630_v24 = vld [vmem:[%s6736_s28 + $0x28] sm:$0xff] }
0x39df   :  { %v3482_v34 = vmul.f32 %v4775_v28, %v3477_v29  ;;  %v3654_v25 = vpack.c.bf16 %v4630_v24, %v4629_v23  ;;  %v4646_v24 = vld [vmem:[%s6741_s9 + $0x20] sm:$0xff] }
0x39e0   :  { %v3471_v26 = vsub.f32 1.5, %v3470_v27 }
0x39e1   :  { %v3487_v1 = vadd.f32 %v4776_v32, %v3482_v34  ;;  %3665 = vmatpush.bf16.msra.mxu0 %v3654_v25  ;;  %v4647_v25 = vld [vmem:[%s6741_s9 + $0x28] sm:$0xff] }
0x39e2   :  { %v3472_v31 = vmul.f32 %v5110_v19, %v3471_v26 }
0x39e4   :  { %v3476_v6 = vsel %vm3475_vm7, %v5110_v19, %v3472_v31 }
0x39e5   :  { %v3478_v33 = vmul.f32 %v3476_v6, %v3444_v51 }
0x39e7   :  { %v3483_v22 = vmul.f32 %v4775_v28, %v3478_v33 }
0x39e9   :  { %v3488_v12 = vadd.f32 %v4776_v32, %v3483_v22 }
0x39eb   :  { %v3489_v39 = vpack.c.bf16 %v3488_v12, %v3487_v1 }
0x39ed   :  { %4633 = vmatmul.msk.bf16.vlgmr.msrb.gmra.mxu1 %vm349_vm0, %v3489_v39  ;;  %v3757_v39 = vunpack.c.l.b16 %v6493_v56 }
0x39ee   :  { %3697 = vmatpush.bf16.xpose.msrb.mxu1 %v3688_v42 }
0x39ef   :  { %v3758_v42 = vpack.c.b16 %v3757_v39, %v3757_v39 }
0x3a6a   :  { %v3504_v9 = vpop.f32.mrf.mxu1 }
0x3a6b   :  { %v3545_v43 = vmul.f32 0.25, %v3504_v9 }
0x3a6d   :  { %v3547_v0 = vpack.c.bf16 %v3545_v43, %v3545_v43 }
0x3a6f   :  { %4636 = vmatmul.msk.bf16.vlgmr.msrb.gmra.mxu0 %vm451_vm2, %v3547_v0  ;;  %v3675_v4 = vunpack.c.l.b16 %v3547_v0 }
0x3a71   :  { %v3676_v40 = vpack.c.b16 %v3675_v4, %v3675_v4 }
0x3a72   :  { %v3506_v41 = vpop.f32.mrf.mxu1 }
0x3a73   :  { %v3546_v38 = vmul.f32 0.25, %v3506_v41 }
0x3a75   :  { %v3548_v45 = vpack.c.bf16 %v3546_v38, %v3546_v38 }
0x3a77   :  { %v3704_v46 = vunpack.c.l.b16 %v3548_v45  ;;  %4637 = vmatmul.msk.bf16.vlgmr.msra.gmra.mxu1 %vm451_vm2, %v3548_v45 }
0x3a79   :  { %v3705_v48 = vpack.c.b16 %v3704_v46, %v3704_v46 }
0x3a7b   :  { %3706 = vrot.lane.b32.xlu0 %v3705_v48, %s5520_s7 }
0x3aec   :  { %v3566_v51 = vpop.f32.mrf.mxu0 }
0x3aed   :  { %v3567_v49 = vadd.f32 %v5157_v14, %v3566_v51  ;;  %v3707_v61 = vpop.permute.xlu0 %3706 }
0x3aef   :  { %v3589_v53 = vsel %vm2643_vm4, %v3567_v49, -inf }
0x3af0   :  { %3590 = vmax.xlane.f32.xlu1 %v3589_v53  ;;  %v3781_v53 = vunpack.c.l.b16 %v6499_v63 }
0x3af4   :  { %v3568_v54 = vpop.f32.mrf.mxu0  ;;  %v3585_v55 = vpop.f32.mrf.mxu1 }
0x3af5   :  { %v3586_v62 = vadd.f32 %v5158_v57, %v3585_v55  ;;  %v3782_v54 = vpack.c.b16 %v3781_v53, %v3781_v53  ;;  %v4652_v55 = vld [vmem:[%s6737_s11 + $0x30] sm:$0xff] }
0x3af7   :  { %v3592_v58 = vsel %vm2643_vm4, %v3586_v62, -inf }
0x3af8   :  { %3593 = vmax.xlane.f32.xlu2 %v3592_v58  ;;  %v4650_v58 = vld [vmem:[%s6737_s11 + $0x20] sm:$0xff] }
0x3afc   :  { %v3587_v47 = vpop.f32.mrf.mxu1 }
0x3afd   :  { %v4651_v47 = vld [vmem:[%s6737_s11 + $0x28] sm:$0xff] }
0x3b63   :  { %v3591_v8 = vpop.xlane.xlu1 %3590 }
0x3b64   :  { %v3595_v59 = vsub.f32 %v3567_v49, %v3591_v8  ;;  %v3923_v8 = vpack.c.bf16 %v4651_v47, %v4650_v58 }
0x3b66   :  { %v3597_v30 = vmul.f32 1.442695, %v3595_v59 }
0x3b68   :  { %5111 = vpow2.f32 %v3597_v30 }
0x3b6b   :  { %v3594_v10 = vpop.xlane.xlu2 %3593 }
0x3b6c   :  { %v3596_v60 = vsub.f32 %v3586_v62, %v3594_v10 }
0x3b6e   :  { %v5112_v2 = vpop.eup %5111  ;;  %v3599_v3 = vmul.f32 1.442695, %v3596_v60 }
0x3b6f   :  { %v3601_v5 = vsel %vm2643_vm4, %v5112_v2, 0.0 }
0x3b70   :  { %5113 = vpow2.f32 %v3599_v3  ;;  %3602 = vadd.xlane.f32.xlu1 %v3601_v5  ;;  %v4657_v3 = vld [vmem:[%s6738_s19 + $0x38] sm:$0xff] }
0x3b76   :  { %v5114_v7 = vpop.eup %5113 }
0x3b77   :  { %v3604_v50 = vsel %vm2643_vm4, %v5114_v7, 0.0 }
0x3b78   :  { %3605 = vadd.xlane.f32.xlu0 %v3604_v50 }
0x3b89   :  { %3677 = vrot.lane.b32.xlu1 %v3676_v40, %s5520_s7  ;;  %v4654_v40 = vld [vmem:[%s6738_s19 + $0x20] sm:$0xff] }
0x3be3   :  { %v3603_v16 = vpop.xlane.xlu1 %3602 }
0x3be4   :  { %5115 = vrcp.f32 %v3603_v16 }
0x3bea   :  { %v5116_v52 = vpop.eup %5115 }
0x3beb   :  { %v3609_v44 = vmul.f32 %v5116_v52, %v5112_v2  ;;  %v3606_v21 = vpop.xlane.xlu0 %3605  ;;  %v4656_v2 = vld [vmem:[%s6738_s19 + $0x30] sm:$0xff] }
0x3bec   :  { %5117 = vrcp.f32 %v3606_v21  ;;  %v3940_v50 = vpack.c.bf16 %v4657_v3, %v4656_v2  ;;  %v4631_v21 = vld [vmem:[%s6736_s28 + $0x30] sm:$0xff] }
0x3bed   :  { %v3611_v15 = vpack.c.bf16 %v3609_v44, %v3609_v44 }
0x3bef   :  { %4638 = vmatmul.msk.bf16.vlgmr.msra.gmra.mxu2 %vm2643_vm4, %v3611_v15  ;;  %v4632_v15 = vld [vmem:[%s6736_s28 + $0x38] sm:$0xff] }
0x3bf2   :  { %v5118_v17 = vpop.eup %5117 }
0x3bf3   :  { %v3610_v18 = vmul.f32 %v5118_v17, %v5114_v7  ;;  %v3805_v17 = vpack.c.bf16 %v4632_v15, %v4631_v21 }
0x3bf5   :  { %v3612_v19 = vpack.c.bf16 %v3610_v18, %v3610_v18  ;;  %3816 = vmatpush.bf16.msra.mxu1 %v3805_v17 }
0x3bf7   :  { %4639 = vmatmul.msk.bf16.vlgmr.msra.gmra.mxu3 %vm2643_vm4, %v3612_v19  ;;  %v4648_v19 = vld [vmem:[%s6741_s9 + $0x30] sm:$0xff] }
0x3bfb   :  { %v3678_v20 = vpop.permute.xlu1 %3677 }
0x3bfc   :  { %4641 = vmatmul.msk.bf16.vlgmr.msrb.gmra.mxu1 %vm451_vm2, %v3678_v20  ;;  %v4649_v20 = vld [vmem:[%s6741_s9 + $0x38] sm:$0xff] }
0x3bfd   :  { %v3905_v23 = vpack.c.bf16 %v4649_v20, %v4648_v19 }
0x3bff   :  { %4642 = vmatmul.msk.bf16.vlgmr.msrb.gmra.mxu2 %vm451_vm2, %v3707_v61  ;;  %v4655_v61 = vld [vmem:[%s6738_s19 + $0x28] sm:$0xff] }
0x3c00   :  { %v3939_v44 = vpack.c.bf16 %v4655_v61, %v4654_v40  ;;  %3915 = vmatpush.bf16.msra.mxu2 %v3905_v23 }
0x3c72   :  { %v3630_v27 = vpop.f32.mrf.mxu2 }
0x3c79   :  { %v3699_v26 = vpop.f32.mrf.mxu1 }
0x3c7a   :  { %v3700_v28 = vadd.f32 %v5157_v14, %v3699_v26  ;;  %v3632_v29 = vpop.f32.mrf.mxu2  ;;  %v3649_v31 = vpop.f32.mrf.mxu3 }
0x3c7b   :  { %v3653_v6 = vpack.c.bf16 %v3649_v31, %v3630_v27  ;;  %v3904_v27 = vpack.c.bf16 %v4647_v25, %v4646_v24  ;;  %v4778_v24 = vld [vmem:[#allocation11 + $0x1] ss:$0 sm:$0xff] }
0x3c7c   :  { %v3732_v32 = vsel %vm2643_vm4, %v3700_v28, -inf }
0x3c7d   :  { %3733 = vmax.xlane.f32.xlu1 %v3732_v32  ;;  %4640 = vmatmul.msk.bf16.vlgmr.msra.gmra.mxu0 %vm451_vm2, %v3653_v6 }
0x3c7e   :  { %3916 = vmatpush.bf16.msra.mxu2 %v3904_v27 }
0x3c81   :  { %v3701_v34 = vpop.f32.mrf.mxu1 }
0x3c82   :  { %v3651_v33 = vpop.f32.mrf.mxu3  ;;  %v3728_v22 = vpop.f32.mrf.mxu2 }
0x3c83   :  { %v3729_v1 = vadd.f32 %v5158_v57, %v3728_v22  ;;  %v4653_v57 = vld [vmem:[%s6737_s11 + $0x38] sm:$0xff] }
0x3c84   :  { %v3924_v62 = vpack.c.bf16 %v4653_v57, %v4652_v55 }
0x3c85   :  { %v3735_v12 = vsel %vm2643_vm4, %v3729_v1, -inf }
0x3c86   :  { %3736 = vmax.xlane.f32.xlu2 %v3735_v12 }
0x3c8a   :  { %v3730_v37 = vpop.f32.mrf.mxu2 }
0x3c9e   :  { %3759 = vrot.lane.b32.xlu2 %v3758_v42, %s5520_s7 }
0x3cf0   :  { %v3734_v9 = vpop.xlane.xlu1 %3733 }
0x3cf1   :  { %v3738_v43 = vsub.f32 %v3700_v28, %v3734_v9 }
0x3cf3   :  { %v3740_v0 = vmul.f32 1.442695, %v3738_v43 }
0x3cf5   :  { %5119 = vpow2.f32 %v3740_v0 }
0x3cf9   :  { %v3737_v41 = vpop.xlane.xlu2 %3736 }
0x3cfa   :  { %v3739_v38 = vsub.f32 %v3729_v1, %v3737_v41  ;;  %v3667_v18 = vpop.f32.mrf.mxu0 }
0x3cfb   :  { %v5120_v45 = vpop.eup %5119  ;;  %v3672_v41 = vadd.f32 %v3667_v18, %v6470_v11  ;;  %v4777_v18 = vld [vmem:[#allocation9 + $0x1] ss:$0 sm:$0xff] }
0x3cfc   :  { %v3742_v46 = vmul.f32 1.442695, %v3739_v38  ;;  %v3744_v48 = vsel %vm2643_vm4, %v5120_v45, 0.0 }
0x3cfd   :  { %3745 = vadd.xlane.f32.xlu0 %v3744_v48 }
0x3cfe   :  { %5121 = vpow2.f32 %v3742_v46 }
0x3d01   :  { %v3760_v56 = vpop.permute.xlu2 %3759 }
0x3d02   :  { %v3765_v51 = vsel %vm2673_vm5, %v3760_v56, 0  ;;  %v3669_v26 = vpop.f32.mrf.mxu0 }
0x3d03   :  { %3774 = vmatpush.bf16.msrb.mxu3 %v3765_v51  ;;  %v3673_v48 = vadd.f32 %v3669_v26, %v6475_v35 }
0x3d04   :  { %v5122_v14 = vpop.eup %5121 }
0x3d05   :  { %v3747_v49 = vsel %vm2643_vm4, %v5122_v14, 0.0 }
0x3d06   :  { %3748 = vadd.xlane.f32.xlu1 %v3747_v49 }
0x3d07   :  { %3931 = vmatpush.bf16.msra.mxu3 %v3924_v62 }
0x3d0b   :  { %3932 = vmatpush.bf16.msra.mxu3 %v3923_v8 }
0x3d11   :  { %3783 = vrot.lane.b32.xlu0 %v3782_v54, %s5520_s7 }
0x3d70   :  { %v3746_v59 = vpop.xlane.xlu0 %3745 }
0x3d71   :  { %5123 = vrcp.f32 %v3746_v59 }
0x3d77   :  { %v5124_v30 = vpop.eup %5123 }
0x3d78   :  { %v3752_v10 = vmul.f32 %v5124_v30, %v5120_v45 }
0x3d79   :  { %v3749_v63 = vpop.xlane.xlu1 %3748 }
0x3d7a   :  { %v3754_v60 = vpack.c.bf16 %v3752_v10, %v3752_v10  ;;  %5125 = vrcp.f32 %v3749_v63 }
0x3d7c   :  { %4643 = vmatmul.msk.bf16.vlgmr.msrb.gmra.mxu3 %vm2643_vm4, %v3754_v60 }
0x3d80   :  { %v5126_v5 = vpop.eup %5125 }
0x3d81   :  { %v3753_v7 = vmul.f32 %v5126_v5, %v5122_v14 }
0x3d83   :  { %v3784_v4 = vpop.permute.xlu0 %3783  ;;  %v3755_v52 = vpack.c.bf16 %v3753_v7, %v3753_v7 }
0x3d84   :  { %v3789_v16 = vsel %vm2673_vm5, %v3784_v4, 0 }
0x3d85   :  { %3798 = vmatpush.bf16.msrb.mxu0 %v3789_v16 }
0x3d88   :  { %4644 = vmatmul.msk.bf16.vlgmr.msrb.gmra.mxu0 %vm2643_vm4, %v3755_v52 }
0x3d89   :  { %3947 = vmatpush.bf16.msra.mxu0 %v3940_v50 }
0x3d8c   :  { %4663 = vmatmul.msk.bf16.vlgmr.msra.gmra.mxu3 %vm349_vm0, %v6368_v36 }
0x3d8d   :  { %3948 = vmatpush.bf16.msra.mxu0 %v3939_v44 }
0x3d98   :  { %4664 = vmatmul.msk.bf16.vlgmr.msra.gmra.mxu0 %vm349_vm0, %v6368_v36 }
0x3dff   :  { %v3776_v28 = vpop.f32.mrf.mxu3 }
0x3e05   :  { %v3800_v29 = vpop.f32.mrf.mxu0 }
0x3e06   :  { %v3804_v31 = vpack.c.bf16 %v3800_v29, %v3776_v28 }
0x3e07   :  { %v3778_v6 = vpop.f32.mrf.mxu3 }
0x3e08   :  { %4645 = vmatmul.msk.bf16.vlgmr.msra.gmra.mxu1 %vm451_vm2, %v3804_v31 }
0x3e0d   :  { %v3802_v36 = vpop.f32.mrf.mxu0 }
0x3e0f   :  { %v3934_v32 = vpop.f32.mrf.mxu3 }
0x3e10   :  { %v3959_v34 = vpack.c.bf16 %v3934_v32, %v3934_v32 }
0x3e12   :  { %v3965_v33 = vsel %vm451_vm2, %v3959_v34, 0  ;;  %v4090_v8 = vunpack.c.l.b16 %v3959_v34 }
0x3e13   :  { %3974 = vmatpush.bf16.xpose.msrb.mxu1 %v3965_v33 }
0x3e14   :  { %v4091_v59 = vpack.c.b16 %v4090_v8, %v4090_v8  ;;  %v5160_v8 = vld [vmem:[%s6742_s6 + $0x8] sm:$0xff] }
0x3e15   :  { %v3950_v22 = vpop.f32.mrf.mxu0 }
0x3e16   :  { %v6559_v1 = vpack.c.bf16 %v3950_v22, %v3950_v22 }
0x3e17   :  { %v3936_v12 = vpop.f32.mrf.mxu3 }
0x3e18   :  { %v4029_v37 = vsel %vm2673_vm5, %v6559_v1, 0  ;;  %v6563_v39 = vpack.c.bf16 %v3936_v12, %v3936_v12 }
0x3e19   :  { %4038 = vmatpush.bf16.msrb.mxu3 %v4029_v37 }
0x3e1a   :  { %v3984_v42 = vsel %vm451_vm2, %v6563_v39, 0 }
0x3e1b   :  { %3993 = vmatpush.bf16.xpose.msrb.mxu2 %v3984_v42 }
0x3e1d   :  { %v3952_v9 = vpop.f32.mrf.mxu0 }
0x3e1e   :  { %v6567_v43 = vpack.c.bf16 %v3952_v9, %v3952_v9 }
0x3e20   :  { %v4048_v0 = vsel %vm2673_vm5, %v6567_v43, 0 }
0x3e21   :  { %4057 = vmatpush.bf16.msrb.mxu0 %v4048_v0 }
0x3e85   :  { %v3818_v38 = vpop.f32.mrf.mxu1 }
0x3e86   :  { %v6572_v45 = vadd.f32 %v3818_v38, %v3672_v41  ;;  %v5159_v41 = vld [vmem:[%s6742_s6] sm:$0xff] }
0x3e88   :  { %v3849_v46 = vsel %vm349_vm0, %v6572_v45, 0.0 }
0x3e89   :  { %3850 = vadd.xlane.f32.xlu1 %v3849_v46 }
0x3e8d   :  { %v3820_v56 = vpop.f32.mrf.mxu1 }
0x3e8e   :  { %v6577_v51 = vadd.f32 %v3820_v56, %v3673_v48 }
0x3e90   :  { %v3852_v14 = vsel %vm349_vm0, %v6577_v51, 0.0 }
0x3e91   :  { %3853 = vadd.xlane.f32.xlu1 %v3852_v14 }
0x3efc   :  { %v3851_v49 = vpop.xlane.xlu1 %3850 }
0x3efd   :  { %v3855_v53 = vmul.f32 %v3851_v49, %v5825_v13 }
0x3eff   :  { %v3857_v11 = vsub.f32 %v6572_v45, %v3855_v53 }
0x3f01   :  { %v3859_v54 = vmul.f32 %v3857_v11, %v3857_v11 }
0x3f03   :  { %v3861_v55 = vsel %vm349_vm0, %v3859_v54, 0.0 }
0x3f04   :  { %3862 = vadd.xlane.f32.xlu1 %v3861_v55  ;;  %v3854_v57 = vpop.xlane.xlu1 %3853 }
0x3f05   :  { %v3856_v62 = vmul.f32 %v3854_v57, %v5825_v13 }
0x3f07   :  { %v3858_v35 = vsub.f32 %v6577_v51, %v3856_v62 }
0x3f09   :  { %v3860_v58 = vmul.f32 %v3858_v35, %v3858_v35 }
0x3f0b   :  { %v3864_v47 = vsel %vm349_vm0, %v3860_v58, 0.0  ;;  %v4119_v58 = vunpack.c.l.b16 %v6563_v39 }
0x3f0c   :  { %3865 = vadd.xlane.f32.xlu0 %v3864_v47 }
0x3f0d   :  { %v4120_v47 = vpack.c.b16 %v4119_v58, %v4119_v58 }
0x3f1d   :  { %4092 = vrot.lane.b32.xlu1 %v4091_v59, %s5520_s7 }
0x3f77   :  { %v3863_v30 = vpop.xlane.xlu1 %3862 }
0x3f78   :  { %v3867_v10 = vmul.f32 %v3863_v30, %v5825_v13 }
0x3f7a   :  { %v3869_v63 = vadd.f32 1e-06, %v3867_v10 }
0x3f7c   :  { %5127 = vrsqrt.f32 %v3869_v63  ;;  %vm3877_vm10 = vweird.f32 %v3869_v63 }
0x3f7f   :  { %v3866_v60 = vpop.xlane.xlu0 %3865 }
0x3f80   :  { %v3868_v2 = vmul.f32 %v3866_v60, %v5825_v13 }
0x3f82   :  { %v5128_v3 = vpop.eup %5127  ;;  %v3870_v5 = vadd.f32 1e-06, %v3868_v2 }
0x3f83   :  { %v3872_v7 = vmul.f32 %v5128_v3, %v3869_v63  ;;  %vm3878_vm9 = vweird.f32 %v5128_v3 }
0x3f84   :  { %5129 = vrsqrt.f32 %v3870_v5  ;;  %vm3879_vm11 = vmor %vm3877_vm10, %vm3878_vm9  ;;  %vm3887_vm13 = vweird.f32 %v3870_v5 }
0x3f85   :  { %v3873_v50 = vmul.f32 %v5128_v3, %v3872_v7 }
0x3f87   :  { %v3874_v4 = vmul.f32 0.5, %v3873_v50 }
0x3f89   :  { %v3875_v40 = vsub.f32 1.5, %v3874_v4 }
0x3f8a   :  { %v5130_v61 = vpop.eup %5129 }
0x3f8b   :  { %v3876_v16 = vmul.f32 %v5128_v3, %v3875_v40  ;;  %v3882_v52 = vmul.f32 %v5130_v61, %v3870_v5  ;;  %vm3888_vm12 = vweird.f32 %v5130_v61 }
0x3f8c   :  { %vm3889_vm14 = vmor %vm3887_vm13, %vm3888_vm12 }
0x3f8d   :  { %v3883_v44 = vmul.f32 %v5130_v61, %v3882_v52  ;;  %v3880_v21 = vsel %vm3879_vm11, %v5128_v3, %v3876_v16 }
0x3f8e   :  { %v3891_v19 = vmul.f32 %v3880_v21, %v3857_v11 }
0x3f8f   :  { %v3884_v15 = vmul.f32 0.5, %v3883_v44  ;;  %v4093_v31 = vpop.permute.xlu1 %4092 }
0x3f90   :  { %v3896_v25 = vmul.f32 %v4777_v18, %v3891_v19  ;;  %v4098_v36 = vsel %vm451_vm2, %v4093_v31, 0 }
0x3f91   :  { %v3885_v17 = vsub.f32 1.5, %v3884_v15 }
0x3f92   :  { %v3901_v28 = vadd.f32 %v4778_v24, %v3896_v25 }
0x3f93   :  { %v3886_v20 = vmul.f32 %v5130_v61, %v3885_v17 }
0x3f95   :  { %v3890_v23 = vsel %vm3889_vm14, %v5130_v61, %v3886_v20  ;;  %v4191_v61 = vunpack.c.l.b16 %v6567_v43  ;;  %v4658_v20 = vld [vmem:[%s6743_s20 + $0x20] sm:$0xff] }
0x3f96   :  { %v3892_v27 = vmul.f32 %v3890_v23, %v3858_v35  ;;  %v4659_v23 = vld [vmem:[%s6743_s20 + $0x28] sm:$0xff] }
0x3f97   :  { %v4192_v16 = vpack.c.b16 %v4191_v61, %v4191_v61 }
0x3f98   :  { %v3897_v26 = vmul.f32 %v4777_v18, %v3892_v27  ;;  %v4167_v18 = vunpack.c.l.b16 %v6559_v1 }
0x3f9a   :  { %v3902_v29 = vadd.f32 %v4778_v24, %v3897_v26  ;;  %v4168_v19 = vpack.c.b16 %v4167_v18, %v4167_v18  ;;  %v4064_v24 = vpack.c.bf16 %v4659_v23, %v4658_v20 }
0x3f9c   :  { %v3903_v6 = vpack.c.bf16 %v3902_v29, %v3901_v28  ;;  %4075 = vmatpush.bf16.msra.mxu1 %v4064_v24 }
0x3f9e   :  { %4662 = vmatmul.msk.bf16.vlgmr.msra.gmra.mxu2 %vm349_vm0, %v3903_v6 }
0x3f9f   :  { %4107 = vmatpush.bf16.xpose.msra.mxu2 %v4098_v36 }
0x4021   :  { %v3918_v32 = vpop.f32.mrf.mxu2 }
0x4022   :  { %v3955_v34 = vmul.f32 0.25, %v3918_v32 }
0x4024   :  { %v3957_v33 = vpack.c.bf16 %v3955_v34, %v3955_v34 }
0x4026   :  { %4665 = vmatmul.msk.bf16.vlgmr.msrb.gmra.mxu1 %vm451_vm2, %v3957_v33  ;;  %v4085_v14 = vunpack.c.l.b16 %v3957_v33 }
0x4028   :  { %v4086_v53 = vpack.c.b16 %v4085_v14, %v4085_v14 }
0x4029   :  { %v3920_v22 = vpop.f32.mrf.mxu2 }
0x402a   :  { %v3956_v12 = vmul.f32 0.25, %v3920_v22 }
0x402c   :  { %v3958_v37 = vpack.c.bf16 %v3956_v12, %v3956_v12 }
0x402e   :  { %v4114_v42 = vunpack.c.l.b16 %v3958_v37  ;;  %4666 = vmatmul.msk.bf16.vlgmr.msrb.gmra.mxu2 %vm451_vm2, %v3958_v37 }
0x4030   :  { %v4115_v9 = vpack.c.b16 %v4114_v42, %v4114_v42 }
0x4032   :  { %4116 = vrot.lane.b32.xlu0 %v4115_v9, %s5520_s7 }
0x40a3   :  { %v3976_v0 = vpop.f32.mrf.mxu1 }
0x40a4   :  { %v3977_v38 = vadd.f32 %v5159_v41, %v3976_v0  ;;  %v4117_v40 = vpop.permute.xlu0 %4116 }
0x40a6   :  { %v3999_v46 = vsel %vm2643_vm4, %v3977_v38, -inf }
0x40a7   :  { %4000 = vmax.xlane.f32.xlu2 %v3999_v46 }
0x40ab   :  { %v3978_v48 = vpop.f32.mrf.mxu1 }
0x40b1   :  { %v3995_v56 = vpop.f32.mrf.mxu2 }
0x40b2   :  { %v3996_v59 = vadd.f32 %v5160_v8, %v3995_v56 }
0x40b4   :  { %v4002_v30 = vsel %vm2643_vm4, %v3996_v59, -inf }
0x40b9   :  { %v3997_v49 = vpop.f32.mrf.mxu2 }
0x40bf   :  { %4087 = vrot.lane.b32.xlu2 %v4086_v53, %s5520_s7 }
0x411a   :  { %v4001_v11 = vpop.xlane.xlu2 %4000 }
0x411b   :  { %v4005_v54 = vsub.f32 %v3977_v38, %v4001_v11 }
0x411d   :  { %v4007_v55 = vmul.f32 1.442695, %v4005_v54 }
0x411f   :  { %5131 = vpow2.f32 %v4007_v55 }
0x4122   :  { %v4088_v57 = vpop.permute.xlu2 %4087 }
0x4123   :  { %4670 = vmatmul.msk.bf16.vlgmr.msra.gmra.mxu2 %vm451_vm2, %v4088_v57 }
0x4125   :  { %v5132_v62 = vpop.eup %5131 }
0x4126   :  { %v4011_v35 = vsel %vm2643_vm4, %v5132_v62, 0.0 }
0x4127   :  { %4012 = vadd.xlane.f32.xlu1 %v4011_v35 }
0x4140   :  { %4121 = vrot.lane.b32.xlu1 %v4120_v47, %s5520_s7 }
0x416a   :  { %4003 = vmax.xlane.f32.xlu1 %v4002_v30  ;;  %v4660_v30 = vld [vmem:[%s6743_s20 + $0x30] sm:$0xff] }
0x419a   :  { %v4013_v10 = vpop.xlane.xlu1 %4012 }
0x419b   :  { %5133 = vrcp.f32 %v4013_v10  ;;  %v4661_v10 = vld [vmem:[%s6743_s20 + $0x38] sm:$0xff] }
0x41a1   :  { %v5134_v63 = vpop.eup %5133 }
0x41a2   :  { %v4019_v60 = vmul.f32 %v5134_v63, %v5132_v62  ;;  %v4215_v63 = vpack.c.bf16 %v4661_v10, %v4660_v30  ;;  %v4683_v10 = vld [vmem:[%s6745_s23 + $0x60] sm:$0xff] }
0x41a4   :  { %v4021_v2 = vpack.c.bf16 %v4019_v60, %v4019_v60  ;;  %4226 = vmatpush.bf16.msrb.mxu2 %v4215_v63  ;;  %v4684_v63 = vld [vmem:[%s6745_s23 + $0x68] sm:$0xff] }
0x41a6   :  { %4667 = vmatmul.msk.bf16.vlgmr.msrb.gmra.mxu3 %vm2643_vm4, %v4021_v2  ;;  %v4109_v3 = vpop.f32.mrf.mxu2 }
0x41a7   :  { %v4110_v5 = vadd.f32 %v5159_v41, %v4109_v3 }
0x41a9   :  { %v4142_v7 = vsel %vm2643_vm4, %v4110_v5, -inf }
0x41aa   :  { %4143 = vmax.xlane.f32.xlu2 %v4142_v7 }
0x41ae   :  { %v4111_v39 = vpop.f32.mrf.mxu2 }
0x41b2   :  { %v4122_v50 = vpop.permute.xlu1 %4121 }
0x41b3   :  { %v4127_v4 = vsel %vm451_vm2, %v4122_v50, 0 }
0x41b4   :  { %4136 = vmatpush.bf16.xpose.msra.mxu3 %v4127_v4 }
0x41bb   :  { %4671 = vmatmul.msk.bf16.vlgmr.msra.gmra.mxu3 %vm451_vm2, %v4117_v40 }
0x41c2   :  { %4193 = vrot.lane.b32.xlu2 %v4192_v16, %s5520_s7 }
0x41dd   :  { %v4004_v52 = vpop.xlane.xlu1 %4003 }
0x41de   :  { %v4006_v44 = vsub.f32 %v3996_v59, %v4004_v52 }
0x41e0   :  { %v4009_v21 = vmul.f32 1.442695, %v4006_v44 }
0x41e2   :  { %5135 = vpow2.f32 %v4009_v21 }
0x41e8   :  { %v5136_v15 = vpop.eup %5135 }
0x41e9   :  { %v4014_v17 = vsel %vm2643_vm4, %v5136_v15, 0.0 }
0x41ea   :  { %4015 = vadd.xlane.f32.xlu0 %v4014_v17 }
0x41fe   :  { %4169 = vrot.lane.b32.xlu0 %v4168_v19, %s5520_s7 }
0x421d   :  { %v4144_v43 = vpop.xlane.xlu2 %4143 }
0x421e   :  { %v4148_v29 = vsub.f32 %v4110_v5, %v4144_v43  ;;  %v4677_v43 = vld [vmem:[%s6744_s18 + $0x30] sm:$0xff] }
0x4220   :  { %v4150_v31 = vmul.f32 1.442695, %v4148_v29  ;;  %v4675_v29 = vld [vmem:[%s6744_s18 + $0x20] sm:$0xff] }
0x4222   :  { %5137 = vpow2.f32 %v4150_v31  ;;  %v4676_v31 = vld [vmem:[%s6744_s18 + $0x28] sm:$0xff] }
0x4225   :  { %v4194_v25 = vpop.permute.xlu2 %4193 }
0x4226   :  { %v4199_v27 = vsel %vm2673_vm5, %v4194_v25, 0  ;;  %v4678_v25 = vld [vmem:[%s6744_s18 + $0x38] sm:$0xff] }
0x4227   :  { %4208 = vmatpush.bf16.msrb.mxu1 %v4199_v27  ;;  %v4313_v27 = vpack.c.bf16 %v4678_v25, %v4677_v43 }
0x4228   :  { %v5138_v32 = vpop.eup %5137 }
0x4229   :  { %v4040_v26 = vpop.f32.mrf.mxu3  ;;  %v4154_v33 = vsel %vm2643_vm4, %v5138_v32, 0.0  ;;  %4326 = vmatpush.bf16.msrb.mxu3 %v4313_v27 }
0x4231   :  { %v4042_v28 = vpop.f32.mrf.mxu3 }
0x423e   :  { %v4138_v6 = vpop.f32.mrf.mxu3 }
0x423f   :  { %v4139_v36 = vadd.f32 %v5160_v8, %v4138_v6 }
0x4241   :  { %v4145_v1 = vsel %vm2643_vm4, %v4139_v36, -inf }
0x4242   :  { %4146 = vmax.xlane.f32.xlu1 %v4145_v1 }
0x4246   :  { %v4140_v34 = vpop.f32.mrf.mxu3 }
0x424a   :  { %4155 = vadd.xlane.f32.xlu1 %v4154_v33 }
0x425d   :  { %v4016_v22 = vpop.xlane.xlu0 %4015 }
0x425e   :  { %5139 = vrcp.f32 %v4016_v22 }
0x4264   :  { %v5140_v12 = vpop.eup %5139 }
0x4265   :  { %v4020_v37 = vmul.f32 %v5140_v12, %v5136_v15 }
0x4267   :  { %v4022_v42 = vpack.c.bf16 %v4020_v37, %v4020_v37 }
0x4269   :  { %4668 = vmatmul.msk.bf16.vlgmr.msrb.gmra.mxu0 %vm2643_vm4, %v4022_v42 }
0x4270   :  { %v4170_v9 = vpop.permute.xlu0 %4169 }
0x4271   :  { %v4175_v0 = vsel %vm2673_vm5, %v4170_v9, 0 }
0x4272   :  { %4184 = vmatpush.bf16.msra.mxu0 %v4175_v0 }
0x42b5   :  { %v4147_v41 = vpop.xlane.xlu1 %4146 }
0x42b6   :  { %v4149_v38 = vsub.f32 %v4139_v36, %v4147_v41  ;;  %v4312_v36 = vpack.c.bf16 %v4676_v31, %v4675_v29 }
0x42b8   :  { %v4152_v46 = vmul.f32 1.442695, %v4149_v38  ;;  %4327 = vmatpush.bf16.msrb.mxu3 %v4312_v36 }
0x42ba   :  { %5141 = vpow2.f32 %v4152_v46 }
0x42bd   :  { %v4156_v48 = vpop.xlane.xlu1 %4155 }
0x42be   :  { %5143 = vrcp.f32 %v4156_v48 }
0x42c0   :  { %v5142_v56 = vpop.eup %5141 }
0x42c1   :  { %v4157_v14 = vsel %vm2643_vm4, %v5142_v56, 0.0 }
0x42c2   :  { %4158 = vadd.xlane.f32.xlu1 %v4157_v14  ;;  %v4779_v14 = vld [vmem:[#allocation12 + $0x1] ss:$0 sm:$0xff] }
0x42c4   :  { %v5144_v49 = vpop.eup %5143 }
0x42c5   :  { %v4162_v53 = vmul.f32 %v5144_v49, %v5138_v32 }
0x42c7   :  { %v4164_v11 = vpack.c.bf16 %v4162_v53, %v4162_v53 }
0x42c9   :  { %4672 = vmatmul.msk.bf16.vlgmr.msra.gmra.mxu0 %vm2643_vm4, %v4164_v11 }
0x42e6   :  { %v4059_v54 = vpop.f32.mrf.mxu0 }
0x42e7   :  { %v4063_v55 = vpack.c.bf16 %v4059_v54, %v4040_v26  ;;  %v4780_v54 = vld [vmem:[#allocation14 + $0x1] ss:$0 sm:$0xff] }
0x42e9   :  { %4669 = vmatmul.msk.bf16.vlgmr.msra.gmra.mxu1 %vm451_vm2, %v4063_v55 }
0x42ee   :  { %v4061_v57 = vpop.f32.mrf.mxu0 }
0x4335   :  { %v4159_v62 = vpop.xlane.xlu1 %4158 }
0x4336   :  { %5145 = vrcp.f32 %v4159_v62 }
0x433c   :  { %v5146_v35 = vpop.eup %5145 }
0x433d   :  { %v4163_v58 = vmul.f32 %v5146_v35, %v5142_v56 }
0x433f   :  { %v4165_v47 = vpack.c.bf16 %v4163_v58, %v4163_v58 }
0x4341   :  { %4673 = vmatmul.msk.bf16.vlgmr.msrb.gmra.mxu1 %vm2643_vm4, %v4165_v47 }
0x4346   :  { %v4186_v8 = vpop.f32.mrf.mxu0 }
0x434e   :  { %v4188_v59 = vpop.f32.mrf.mxu0 }
0x434f   :  { %v4686_v59 = vld [vmem:[%s6745_s23 + $0x78] sm:$0xff] }
0x4366   :  { %v4077_v60 = vpop.f32.mrf.mxu1 }
0x4367   :  { %v4082_v39 = vadd.f32 %v4077_v60, %v6572_v45  ;;  %v4339_v60 = vpack.c.bf16 %v4684_v63, %v4683_v10  ;;  %v4784_v10 = vld [vmem:[#allocation20] ss:$0 sm:$0xff] }
0x436e   :  { %v4079_v2 = vpop.f32.mrf.mxu1 }
0x436f   :  { %v4083_v61 = vadd.f32 %v4079_v2, %v6577_v51  ;;  %v4681_v2 = vld [vmem:[%s6745_s23 + $0x50] sm:$0xff] }
0x43be   :  { %v4210_v3 = vpop.f32.mrf.mxu1 }
0x43bf   :  { %v4214_v5 = vpack.c.bf16 %v4210_v3, %v4186_v8  ;;  %v4685_v8 = vld [vmem:[%s6745_s23 + $0x70] sm:$0xff]  ;;  %v4682_v3 = vld [vmem:[%s6745_s23 + $0x58] sm:$0xff] }
0x43c0   :  { %v4340_v30 = vpack.c.bf16 %v4686_v59, %v4685_v8  ;;  %v4783_v8 = vld [vmem:[#allocation18] ss:$0 sm:$0xff] }
0x43c1   :  { %4674 = vmatmul.msk.bf16.vlgmr.msrb.gmra.mxu2 %vm451_vm2, %v4214_v5  ;;  %v4338_v5 = vpack.c.bf16 %v4682_v3, %v4681_v2 }
0x43c2   :  { %4351 = vmatpush.bf16.msrb.mxu0 %v4340_v30 }
0x43c6   :  { %v4212_v7 = vpop.f32.mrf.mxu1  ;;  %4352 = vmatpush.bf16.msrb.mxu0 %v4339_v60 }
0x43c7   :  { %v4679_v7 = vld [vmem:[%s6745_s23 + $0x40] sm:$0xff] }
0x43ca   :  { %4353 = vmatpush.bf16.msrb.mxu0 %v4338_v5 }
0x4444   :  { %v4228_v50 = vpop.f32.mrf.mxu2 }
0x4445   :  { %v6628_v4 = vadd.f32 %v4228_v50, %v4082_v39  ;;  %v4680_v39 = vld [vmem:[%s6745_s23 + $0x48] sm:$0xff] }
0x4446   :  { %v4337_v50 = vpack.c.bf16 %v4680_v39, %v4679_v7 }
0x4447   :  { %v4257_v40 = vsel %vm349_vm0, %v6628_v4, 0.0 }
0x4448   :  { %4258 = vadd.xlane.f32.xlu1 %v4257_v40  ;;  %4354 = vmatpush.bf16.msrb.mxu0 %v4337_v50 }
0x444c   :  { %v4230_v16 = vpop.f32.mrf.mxu2 }
0x444d   :  { %v6633_v52 = vadd.f32 %v4230_v16, %v4083_v61  ;;  %v4781_v61 = vld [vmem:[#allocation15 + $0x1] ss:$0 sm:$0xff] }
0x444f   :  { %v4260_v44 = vsel %vm349_vm0, %v6633_v52, 0.0 }
0x4450   :  { %4261 = vadd.xlane.f32.xlu1 %v4260_v44 }
0x44bb   :  { %v4259_v21 = vpop.xlane.xlu1 %4258 }
0x44bc   :  { %v4263_v45 = vmul.f32 %v4259_v21, %v5825_v13 }
0x44be   :  { %v4265_v15 = vsub.f32 %v6628_v4, %v4263_v45 }
0x44c0   :  { %v4267_v17 = vmul.f32 %v4265_v15, %v4265_v15 }
0x44c2   :  { %v4269_v18 = vsel %vm349_vm0, %v4267_v17, 0.0 }
0x44c3   :  { %4270 = vadd.xlane.f32.xlu0 %v4269_v18  ;;  %v4262_v51 = vpop.xlane.xlu1 %4261  ;;  %v4782_v18 = vld [vmem:[#allocation17 + $0x1] ss:$0 sm:$0xff] }
0x44c4   :  { %v4264_v19 = vmul.f32 %v4262_v51, %v5825_v13 }
0x44c6   :  { %v4266_v20 = vsub.f32 %v6633_v52, %v4264_v19 }
0x44c8   :  { %v4268_v23 = vmul.f32 %v4266_v20, %v4266_v20 }
0x44ca   :  { %v4272_v24 = vsel %vm349_vm0, %v4268_v23, 0.0 }
0x44cb   :  { %4273 = vadd.xlane.f32.xlu1 %v4272_v24 }
0x4536   :  { %v4271_v26 = vpop.xlane.xlu0 %4270 }
0x4537   :  { %v4275_v28 = vmul.f32 %v4271_v26, %v5825_v13 }
0x4539   :  { %v4277_v6 = vadd.f32 1e-06, %v4275_v28 }
0x453b   :  { %5147 = vrsqrt.f32 %v4277_v6  ;;  %vm4285_vm4 = vweird.f32 %v4277_v6 }
0x453e   :  { %v4274_v1 = vpop.xlane.xlu1 %4273 }
0x453f   :  { %v4276_v32 = vmul.f32 %v4274_v1, %v5825_v13 }
0x4541   :  { %v5148_v34 = vpop.eup %5147  ;;  %v4278_v33 = vadd.f32 1e-06, %v4276_v32 }
0x4542   :  { %v4280_v22 = vmul.f32 %v5148_v34, %v4277_v6  ;;  %vm4286_vm2 = vweird.f32 %v5148_v34 }
0x4543   :  { %5149 = vrsqrt.f32 %v4278_v33  ;;  %vm4287_vm5 = vmor %vm4285_vm4, %vm4286_vm2  ;;  %vm4295_vm1 = vweird.f32 %v4278_v33 }
0x4544   :  { %v4281_v12 = vmul.f32 %v5148_v34, %v4280_v22 }
0x4546   :  { %v4282_v37 = vmul.f32 0.5, %v4281_v12 }
0x4548   :  { %v4283_v42 = vsub.f32 1.5, %v4282_v37 }
0x4549   :  { %v5150_v9 = vpop.eup %5149 }
0x454a   :  { %v4284_v0 = vmul.f32 %v5148_v34, %v4283_v42  ;;  %v4290_v41 = vmul.f32 %v5150_v9, %v4278_v33  ;;  %vm4296_vm15 = vweird.f32 %v5150_v9  ;;  %v4422_v33 = vld [vmem:[%s5722_s12 + $0x18] sm:$0xff]  ;;  %v4419_v42 = vld [vmem:[%s5722_s12] sm:$0xff] }
0x454b   :  { %vm4297_vm3 = vmor %vm4295_vm1, %vm4296_vm15 }
0x454c   :  { %v4291_v38 = vmul.f32 %v5150_v9, %v4290_v41  ;;  %v4288_v46 = vsel %vm4287_vm5, %v5148_v34, %v4284_v0  ;;  %v4421_v34 = vld [vmem:[%s5722_s12 + $0x10] sm:$0xff] }
0x454d   :  { %v4299_v49 = vmul.f32 %v4288_v46, %v4265_v15  ;;  %v4425_v22 = vpack.c.bf16 %v4422_v33, %v4421_v34 }
0x454e   :  { %v4292_v48 = vmul.f32 0.5, %v4291_v38 }
0x454f   :  { %v4304_v55 = vmul.f32 %v4779_v14, %v4299_v49  ;;  %4435 = vmatpush.bf16.msra.mxu1 %v4425_v22 }
0x4550   :  { %v4293_v56 = vsub.f32 1.5, %v4292_v48 }
0x4551   :  { %v4309_v35 = vadd.f32 %v4780_v54, %v4304_v55 }
0x4552   :  { %v4294_v53 = vmul.f32 %v5150_v9, %v4293_v56 }
0x4554   :  { %v4298_v11 = vsel %vm4297_vm3, %v5150_v9, %v4294_v53  ;;  %v4420_v9 = vld [vmem:[%s5722_s12 + $0x8] sm:$0xff]  ;;  %s5521_s12 = smov [#allocation21]  }
0x4555   :  { %v4300_v57 = vmul.f32 %v4298_v11, %v4266_v20  ;;  %v4424_v41 = vpack.c.bf16 %v4420_v9, %v4419_v42  ;;  %s4451_s16 = sshll.u32 %s5521_s12, 4  ;;  %s4452_s16 = int_to_ptr.vmem [resolvable:$true] %s4451_s16 }
0x4557   :  { %v4305_v62 = vmul.f32 %v4779_v14, %v4300_v57  ;;  %4436 = vmatpush.bf16.msra.mxu1 %v4424_v41 }
0x4559   :  { %v4310_v58 = vadd.f32 %v4780_v54, %v4305_v62 }
0x455b   :  { %v4311_v47 = vpack.c.bf16 %v4310_v58, %v4309_v35 }
0x455d   :  { %4687 = vmatmul.msk.bf16.vlgmr.msrb.gmra.mxu3 %vm349_vm0, %v4311_v47 }
0x45e0   :  { %v4329_v40 = vpop.f32.mrf.mxu3 }
0x45e1   :  { %v4330_v16 = vadd.f32 %v4781_v61, %v4329_v40 }
0x45e3   :  { %v4334_v45 = vmax.f32 %v4330_v16, 0.0 }
0x45e8   :  { %v4331_v44 = vpop.f32.mrf.mxu3 }
0x45e9   :  { %v4332_v21 = vadd.f32 %v4781_v61, %v4331_v44 }
0x45eb   :  { %v4335_v15 = vmax.f32 %v4332_v21, 0.0 }
0x45ed   :  { %v4336_v17 = vpack.c.bf16 %v4335_v15, %v4334_v45 }
0x45ef   :  { %4688 = vmatmul.msk.bf16.vlgmr.msrb.gmra.mxu0 %vm443_vm8, %v4336_v17 }
0x466c   :  { %v4356_v51 = vpop.f32.mrf.mxu0 }
0x466d   :  { %v4357_v19 = vadd.f32 %v4782_v18, %v4356_v51 }
0x466f   :  { %v4361_v20 = vadd.f32 %v4357_v19, %v6628_v4 }
0x4671   :  { %v4365_v23 = vsel %vm349_vm0, %v4361_v20, 0.0 }
0x4672   :  { %4366 = vadd.xlane.f32.xlu2 %v4365_v23 }
0x4674   :  { %v4358_v24 = vpop.f32.mrf.mxu0 }
0x4675   :  { %v4359_v43 = vadd.f32 %v4782_v18, %v4358_v24 }
0x4677   :  { %v4362_v25 = vadd.f32 %v4359_v43, %v6633_v52 }
0x4679   :  { %v4368_v27 = vsel %vm349_vm0, %v4362_v25, 0.0 }
0x467a   :  { %4369 = vadd.xlane.f32.xlu1 %v4368_v27 }
0x46e5   :  { %v4367_v26 = vpop.xlane.xlu2 %4366 }
0x46e6   :  { %v4371_v28 = vmul.f32 %v4367_v26, %v5825_v13 }
0x46e8   :  { %v4373_v29 = vsub.f32 %v4361_v20, %v4371_v28 }
0x46ea   :  { %v4375_v31 = vmul.f32 %v4373_v29, %v4373_v29 }
0x46ec   :  { %v4377_v4 = vsel %vm349_vm0, %v4375_v31, 0.0 }
0x46ed   :  { %v4370_v6 = vpop.xlane.xlu1 %4369  ;;  %4378 = vadd.xlane.f32.xlu1 %v4377_v4 }
0x46ee   :  { %v4372_v36 = vmul.f32 %v4370_v6, %v5825_v13 }
0x46f0   :  { %v4374_v1 = vsub.f32 %v4362_v25, %v4372_v36 }
0x46f2   :  { %v4376_v32 = vmul.f32 %v4374_v1, %v4374_v1 }
0x46f4   :  { %v4380_v52 = vsel %vm349_vm0, %v4376_v32, 0.0 }
0x46f5   :  { %4381 = vadd.xlane.f32.xlu1 %v4380_v52 }
0x4760   :  { %v4379_v12 = vpop.xlane.xlu1 %4378 }
0x4761   :  { %v4383_v37 = vmul.f32 %v4379_v12, %v5825_v13 }
0x4763   :  { %v4385_v0 = vadd.f32 1e-06, %v4383_v37 }
0x4765   :  { %5151 = vrsqrt.f32 %v4385_v0  ;;  %vm4393_vm6 = vweird.f32 %v4385_v0 }
0x4768   :  { %v4382_v38 = vpop.xlane.xlu1 %4381 }
0x4769   :  { %v4384_v46 = vmul.f32 %v4382_v38, %v5825_v13 }
0x476b   :  { %v5152_v48 = vpop.eup %5151  ;;  %v4386_v56 = vadd.f32 1e-06, %v4384_v46 }
0x476c   :  { %v4388_v14 = vmul.f32 %v5152_v48, %v4385_v0  ;;  %vm4394_vm8 = vweird.f32 %v5152_v48 }
0x476d   :  { %5153 = vrsqrt.f32 %v4386_v56  ;;  %vm4395_vm7 = vmor %vm4393_vm6, %vm4394_vm8  ;;  %vm4403_vm10 = vweird.f32 %v4386_v56 }
0x476e   :  { %v4389_v49 = vmul.f32 %v5152_v48, %v4388_v14 }
0x4770   :  { %v4390_v53 = vmul.f32 0.5, %v4389_v49 }
0x4772   :  { %v4391_v11 = vsub.f32 1.5, %v4390_v53 }
0x4773   :  { %v5154_v54 = vpop.eup %5153 }
0x4774   :  { %v4392_v55 = vmul.f32 %v5152_v48, %v4391_v11  ;;  %v4398_v57 = vmul.f32 %v5154_v54, %v4386_v56  ;;  %vm4404_vm9 = vweird.f32 %v5154_v54 }
0x4775   :  { %vm4405_vm11 = vmor %vm4403_vm10, %vm4404_vm9 }
0x4776   :  { %v4399_v62 = vmul.f32 %v5154_v54, %v4398_v57  ;;  %v4396_v35 = vsel %vm4395_vm7, %v5152_v48, %v4392_v55 }
0x4777   :  { %v4407_v13 = vmul.f32 %v4396_v35, %v4373_v29 }
0x4778   :  { %v4400_v58 = vmul.f32 0.5, %v4399_v62 }
0x4779   :  { %v4412_v63 = vmul.f32 %v4783_v8, %v4407_v13 }
0x477a   :  { %v4401_v47 = vsub.f32 1.5, %v4400_v58 }
0x477b   :  { %v4417_v3 = vadd.f32 %v4784_v10, %v4412_v63 }
0x477c   :  { %v4402_v59 = vmul.f32 %v5154_v54, %v4401_v47 }
0x477e   :  { %v4406_v30 = vsel %vm4405_vm11, %v5154_v54, %v4402_v59 }
0x477f   :  { %v4408_v60 = vmul.f32 %v4406_v30, %v4374_v1 }
0x4781   :  { %v4413_v2 = vmul.f32 %v4783_v8, %v4408_v60 }
0x4783   :  { %v4418_v5 = vadd.f32 %v4784_v10, %v4413_v2 }
0x4785   :  { %v4423_v7 = vpack.c.bf16 %v4418_v5, %v4417_v3 }
0x4787   :  { %4689 = vmatmul.msk.bf16.vlgmr.msra.gmra.mxu1 %vm349_vm0, %v4423_v7 }
0x4804   :  { %v4438_v39 = vpop.f32.mrf.mxu1 }
0x4805   :  { %v4443_v50 = vmul.f32 0.17677669, %v4438_v39 }
0x4807   :  { %4445 = vst.msk [vmem:[#allocation21] sm:$0xff] %vm349_vm0, %v4443_v50 }
0x480c   :  { %v4440_v40 = vpop.f32.mrf.mxu1 }
0x480d   :  { %v4444_v61 = vmul.f32 0.17677669, %v4440_v40 }
0x480f   :  { %4446 = vst.msk [vmem:[#allocation21 + $0x8] sm:$0xff] %vm349_vm0, %v4444_v61 }
0x4810   :  { %5448 = shalt.err (!%p5445_p3)
}
0x4811   :  { %s5522_s10 = smov 128   ;;  %s5523_s1 = smov 8  }
0x4812   :  { %4459 = dma.vmem_to_hbm [thread:$0]  %s4452_s16, 256, %s4454_s26, [#allocation5], %s5522_s10, %s5522_s10, %s5523_s1  }
0x4813   :  { %5461 = dma.done.wait [#allocation5], 256  }
0x4814   :  { %5462 = vsyncadd [#allocation5], 4294967040 }
0x4815   :  { %4464 = vsyncpa [#allocation4], 1 }
0x4816   :  { %4465 = vsyncpa [#allocation7], 1 }
0x4817   :  { %4466 = vsyncpa [#allocation10], 1 }
0x4818   :  { %4467 = vsyncpa [#allocation13], 1 }
0x4819   :  { %4468 = vsyncpa [#allocation16], 1 }
0x481a   :  { %4469 = vsyncpa [#allocation19], 1 }
0x481b   :  { %4470 = vsyncpa [#allocation5], 1 }

</bundles_post_ra>
